<compile_context>
chip_gen: v6e
topology: v6e:2x2x1
jax: 0.10.0
libtpu: 0.0.40
codegen_flags: <defaults>
</compile_context>

<pallas_src>
import numpy as np
import jax
import jax.numpy as jnp
from jax.experimental import pallas as pl
from jax.experimental.pallas import tpu as pltpu

K_NEIGHBORS = 3  # CFA self.K (inference uses only K, not K+J)


def _round_up(x, m):
    return ((x + m - 1) // m) * m


def _tile_and_pad(dim, max_tile, align, max_waste_frac=0.125):
    """Pick (tile, padded_dim): tile is a multiple of `align`, <= max_tile, divides padded_dim.

    Prefers the largest tile whose padding waste is <= max_waste_frac * dim; otherwise the
    minimum-waste tile.  Never falls back to a full-dimension block (the previous version
    OOM'd at canonical CFA shapes N = M = 56**2 = 3136 with D ~ 1792)."""
    if dim <= max_tile:
        t = _round_up(dim, align)
        return t, t
    fallback = None
    for t in range(max_tile, align - 1, -align):
        pad = _round_up(dim, t)
        waste = pad - dim
        if fallback is None or waste < fallback[0]:
            fallback = (waste, t, pad)
        if waste <= dim * max_waste_frac:
            return t, pad
    return fallback[1], fallback[2]


# ----------------------------------------------------------------------------
# Pallas kernel: Descriptor (1x1 conv) + memory-bank distance + streaming top-3
# ----------------------------------------------------------------------------
def _cfa_score_kernel(feat_ref, w_ref, c_ref, csq_ref, out_ref,
                      phi2_ref, fsq_ref, r1_ref, r2_ref, r3_ref):
    """Grid = (batch, N-tile, M-tile); M-tile is the innermost reduction axis.

    feat_ref : (Cfp, TN)  backbone features + ones row (channels-major, bf16)
    w_ref    : (D, Cfp)   Descriptor 1x1-conv weight with bias column folded in (bf16)
    c_ref    : (TM, D)    memory-bank centroid tile (bf16, centroid-major)
    csq_ref  : (TM, 1)    precomputed ||C||^2 for this centroid tile (f32, +inf for padding)
    out_ref  : (1, TN)    per-patch anomaly score (lane-dense, f32)
    scratch  : phi2 (D,TN) bf16 = -2*phi, fsq (1,TN) f32 = ||phi||^2,
               r1/r2/r3 (8,TN) f32 = per-sublane-slot running sorted top-3 partial distances
    """
    m_idx = pl.program_id(2)

    # ---- once per (batch, N-tile): Descriptor conv, cache -2*phi, reset running top-3 ----
    @pl.when(m_idx == 0)
    def _():
        phi = jnp.dot(w_ref[...], feat_ref[...],
                      preferred_element_type=jnp.float32)                  # (D, TN) f32
        fsq_ref[...] = jnp.sum(phi * phi, axis=0, keepdims=True)           # (1, TN)
        phi2_ref[...] = (-2.0 * phi).astype(jnp.bfloat16)                  # fold -2 (exact)
        inf8 = jnp.full(r1_ref.shape, jnp.inf, dtype=jnp.float32)
        r1_ref[...] = inf8
        r2_ref[...] = inf8
        r3_ref[...] = inf8

    # ---- partial squared distance for this centroid tile (||phi||^2 and sqrt deferred) ----
    # d[m, n] = ||C_m||^2 - 2 <phi_n, C_m>
    d = csq_ref[...] + jnp.dot(c_ref[...], phi2_ref[...],
                               preferred_element_type=jnp.float32)         # (TM, TN)

    # ---- single-pass streaming top-3: insert aligned 8-row sublane chunks into the 8
    #      per-sublane-slot sorted triples (5 VPU min/max ops per element, no rewrites) ----
    r1, r2, r3 = r1_ref[...], r2_ref[...], r3_ref[...]
    tm = d.shape[0]
    for j in range(tm // 8):
        t = d[j * 8:(j + 1) * 8, :]          # (8, TN) slab, aligned to the vreg tile
        c1 = jnp.maximum(r1, t)
        r1 = jnp.minimum(r1, t)
        c2 = jnp.maximum(r2, c1)
        r2 = jnp.minimum(r2, c1)
        r3 = jnp.minimum(r3, c2)
    r1_ref[...] = r1
    r2_ref[...] = r2
    r3_ref[...] = r3

    # ---- last M-tile: merge the 24 candidates, true distances on 3 values, softmin ----
    @pl.when(m_idx == pl.num_programs(2) - 1)
    def _():
        cand = jnp.concatenate([r1_ref[...], r2_ref[...], r3_ref[...]], axis=0)  # (24, TN)
        rows = jax.lax.broadcasted_iota(jnp.int32, cand.shape, 0)

        def pop_min(dd):
            # smallest value per token; mask only its FIRST occurrence (torch.topk semantics)
            v = jnp.min(dd, axis=0, keepdims=True)
            first = jnp.min(jnp.where(dd == v, rows, cand.shape[0]), axis=0, keepdims=True)
            return v, jnp.where(rows == first, jnp.float32(jnp.inf), dd)

        t1, cand_ = pop_min(cand)
        t2, cand_ = pop_min(cand_)
        t3, _ = pop_min(cand_)

        fsq = fsq_ref[...]
        m1 = jnp.sqrt(jnp.maximum(fsq + t1, 0.0))
        m2 = jnp.sqrt(jnp.maximum(fsq + t2, 0.0))
        m3 = jnp.sqrt(jnp.maximum(fsq + t3, 0.0))
        # F.softmin(top3, -1)[..., 0] * top3[..., 0]; m1 <= m2 <= m3 -> numerically stable
        denom = 1.0 + jnp.exp(m1 - m2) + jnp.exp(m1 - m3)
        out_ref[...] = m1 * pl.reciprocal(denom, approx=True)               # (1, TN)


def cfa_patch_scores(feat_t, w_aug, c_t, csq, *, max_tn=1024, max_tm=512):
    """feat_t (B, Cfp, N) bf16 (ones row appended; bias folded into w_aug),
    w_aug (D, Cfp) bf16, c_t (M, D) bf16 centroid-major, csq (M, 1) f32 = ||C||^2
    -> (B, 1, N) f32 patch anomaly scores (lane-dense)."""
    B, Cfp, N = feat_t.shape
    M, D = c_t.shape

    tn, n_pad = _tile_and_pad(N, max_tn, 128)     # tokens live on the lane axis
    tm, m_pad = _tile_and_pad(M, max_tm, 8)       # centroids live on the sublane axis
    if n_pad != N:        # padded tokens produce finite garbage scores; cropped below
        feat_t = jnp.pad(feat_t, ((0, 0), (0, 0), (0, n_pad - N)))
    if m_pad != M:        # padded centroids get ||C||^2 = +inf -> never among the top-3
        c_t = jnp.pad(c_t, ((0, m_pad - M), (0, 0)))
        csq = jnp.pad(csq, ((0, m_pad - M), (0, 0)), constant_values=jnp.inf)

    grid_spec = pltpu.PrefetchScalarGridSpec(
        num_scalar_prefetch=0,
        grid=(B, n_pad // tn, m_pad // tm),
        in_specs=[
            pl.BlockSpec((None, Cfp, tn), lambda b, n, m: (b, 0, n)),   # features (B squeezed)
            pl.BlockSpec((D, Cfp), lambda b, n, m: (0, 0)),             # Descriptor weight+bias
            pl.BlockSpec((tm, D), lambda b, n, m: (m, 0)),              # memory-bank tile
            pl.BlockSpec((tm, 1), lambda b, n, m: (m, 0)),              # precomputed ||C||^2
        ],
        out_specs=pl.BlockSpec((None, 1, tn), lambda b, n, m: (b, 0, n)),
        scratch_shapes=[
            pltpu.VMEM((D, tn), jnp.bfloat16),   # cached -2*phi for this N-tile
            pltpu.VMEM((1, tn), jnp.float32),    # ||phi||^2
            pltpu.VMEM((8, tn), jnp.float32),    # running 1st nearest (per sublane slot)
            pltpu.VMEM((8, tn), jnp.float32),    # running 2nd nearest
            pltpu.VMEM((8, tn), jnp.float32),    # running 3rd nearest
        ],
    )
    out = pl.pallas_call(
        _cfa_score_kernel,
        out_shape=jax.ShapeDtypeStruct((B, 1, n_pad), jnp.float32),
        grid_spec=grid_spec,
        compiler_params=pltpu.CompilerParams(
            # B and N-tile parallel, M-tile is the sequential reduction axis.
            # TODO(synk): on v7x mark the N-tile axis pltpu.CORE_PARALLEL (2 TCs/chip) and on
            # v6e raise max_tn/vmem_limit further; kept generation-agnostic here for safety.
            dimension_semantics=("parallel", "parallel", "arbitrary"),
            vmem_limit_bytes=48 * 1024 * 1024,
        ),
    )(feat_t, w_aug, c_t, csq)
    return out[:, :, :N]


# ----------------------------------------------------------------------------
# Plain-JAX glue (feature extractor stand-in + heatmap post-processing)
# ----------------------------------------------------------------------------
def feature_extractor_stub(x):
    # TODO(synk): real CFA uses a pretrained CNN backbone (CustomFeatureExtractor);
    # stand-in here is a deterministic 2x2 average pool so the feature map is H/2 x W/2.
    B, C, H, W = x.shape
    return x.reshape(B, C, H // 2, 2, W // 2, 2).mean(axis=(3, 5))


def _prep_kernel_inputs(p, w_desc, b_desc, c_bank):
    """One-time per-forward preprocessing (grid-invariant work kept out of the kernel)."""
    B, Cf, h, w = p.shape
    D, M = c_bank.shape
    N = h * w
    feat = p.reshape(B, Cf, N).astype(jnp.bfloat16)                    # channels-major tokens
    ones = jnp.ones((B, 1, N), jnp.bfloat16)
    feat_aug = jnp.concatenate([feat, ones], axis=1)                   # fold bias via ones row
    w_aug = jnp.concatenate([w_desc, b_desc.reshape(D, 1)], axis=1).astype(jnp.bfloat16)
    cfp = _round_up(Cf + 1, 8)                                         # sublane-align contraction
    if cfp != Cf + 1:
        feat_aug = jnp.pad(feat_aug, ((0, 0), (0, cfp - (Cf + 1)), (0, 0)))
        w_aug = jnp.pad(w_aug, ((0, 0), (0, cfp - (Cf + 1))))
    c_t = jnp.transpose(c_bank).astype(jnp.bfloat16)                   # (M, D) centroid-major
    csq = jnp.sum(c_bank.astype(jnp.float32) ** 2, axis=0).reshape(M, 1)
    return feat_aug, w_aug, c_t, csq


def gaussian_blur_3x3(x, sigma=4.0):
    # torchvision GaussianBlur(kernel_size=3, sigma=4): reflect pad + 3x3 Gaussian conv
    coords = jnp.arange(3, dtype=jnp.float32) - 1.0
    k1 = jnp.exp(-0.5 * (coords / sigma) ** 2)
    k1 = k1 / jnp.sum(k1)
    k2 = jnp.outer(k1, k1)
    xp = jnp.pad(x, ((0, 0), (1, 1), (1, 1)), mode="reflect")
    out = jax.lax.conv_general_dilated(
        xp[:, None, :, :], k2[None, None, :, :],
        window_strides=(1, 1), padding="VALID",
        dimension_numbers=("NCHW", "OIHW", "NCHW"))
    return out[:, 0]


def rescale(x):
    return (x - x.min()) / (x.max() - x.min())


def cfa_forward(x, w_desc, b_desc, c_bank):
    # TODO(synk): training-mode soft_boundary loss branch not implemented; this is the eval path.
    p = feature_extractor_stub(x)                                      # (B, Cf, h, w)  NCHW
    B, Cf, h, w = p.shape
    feat_aug, w_aug, c_t, csq = _prep_kernel_inputs(p, w_desc, b_desc, c_bank)

    dist = cfa_patch_scores(feat_aug, w_aug, c_t, csq)                 # (B, 1, h*w)

    scores = dist.reshape(B, 1, h, w)                                  # 'b (h w) c -> b c h w'
    heatmaps = jnp.mean(scores, axis=1)                                # (B, h, w)
    heatmaps = jax.image.resize(                                       # bilinear, align_corners=False
        heatmaps, (B, x.shape[2], x.shape[3]), method="bilinear")
    heatmaps = gaussian_blur_3x3(heatmaps, sigma=4.0)
    _ = rescale(heatmaps)                                              # dead code in torch too
    img_scores = scores.reshape(B, -1).max(axis=1)
    return heatmaps[:, None, :, :], img_scores                         # (B,1,H,W), (B,)


# ----------------------------------------------------------------------------
# Pure-JAX reference for the Pallas hot path (same bf16 quantization choices)
# ----------------------------------------------------------------------------
def _patch_scores_ref(feat_t, w_aug, c_t, csq):
    phi = jnp.einsum("dc,bcn->bdn", w_aug, feat_t,
                     preferred_element_type=jnp.float32)                   # (B, D, N)
    fsq = jnp.sum(phi * phi, axis=1)                                       # (B, N)
    phi2 = (-2.0 * phi).astype(jnp.bfloat16)
    g = jnp.einsum("md,bdn->bmn", c_t, phi2,
                   preferred_element_type=jnp.float32)                     # (B, M, N)
    d = csq.reshape(1, -1, 1) + g                                          # (B, M, N)
    top3 = -jax.lax.top_k(-jnp.swapaxes(d, 1, 2), K_NEIGHBORS)[0]          # (B, N, 3) ascending
    dist = jnp.sqrt(jnp.maximum(fsq[..., None] + top3, 0.0))
    sm = jax.nn.softmax(-dist, axis=-1)                                    # softmin
    return sm[..., 0] * dist[..., 0]                                       # (B, N)


if __name__ == "__main__":
    key = jax.random.PRNGKey(0)
    kx, kw, kb, kc = jax.random.split(key, 4)

    # Small shapes that exercise padding and multi-tile streaming:
    # feature map 40x40 -> N = M = 1600 -> N padded to 1792 (TN=896), M padded to 1792 (TM=448)
    B, Cin, H, W = 2, 32, 80, 80
    x = jax.random.normal(kx, (B, Cin, H, W), dtype=jnp.float32)       # NCHW, like PyTorch

    Cf = Cin
    D = Cf                         # gamma_d = 1 -> Descriptor keeps the channel count
    scale = H // 2                 # feature-map side from the stub extractor
    M = scale * scale              # gamma_c = 1 -> scale**2 memory-bank centroids
    w_desc = 0.1 * jax.random.normal(kw, (D, Cf), dtype=jnp.float32)   # 1x1-conv weight (squeezed)
    b_desc = 0.01 * jax.random.normal(kb, (D,), dtype=jnp.float32)
    c_bank = jax.random.normal(kc, (D, M), dtype=jnp.float32)          # stored transposed, as in CFA

    heatmaps, img_scores = jax.jit(cfa_forward)(x, w_desc, b_desc, c_bank)
    jax.block_until_ready((heatmaps, img_scores))
    assert heatmaps.shape == (B, 1, H, W)
    assert img_scores.shape == (B,)

    # Validate the Pallas hot path against the pure-JAX reference.
    p = feature_extractor_stub(x)
    feat_aug, w_aug, c_t, csq = _prep_kernel_inputs(p, w_desc, b_desc, c_bank)
    got = cfa_patch_scores(feat_aug, w_aug, c_t, csq)[:, 0, :]
    want = _patch_scores_ref(feat_aug, w_aug, c_t, csq)
    np.testing.assert_allclose(np.asarray(got), np.asarray(want), rtol=2e-2, atol=2e-3)

    print("KERNEL_OK")
</pallas_src>

<mosaic_0001>
module attributes {stable_mosaic.version = 11 : i64} {
  func.func @_cfa_score_kernel(%arg0: i32, %arg1: i32, %arg2: i32, %arg3: memref<1x40x896xbf16, #tpu.memory_space<vmem>>, %arg4: memref<32x40xbf16, #tpu.memory_space<vmem>>, %arg5: memref<448x32xbf16, #tpu.memory_space<vmem>>, %arg6: memref<448x1xf32, #tpu.memory_space<vmem>>, %arg7: memref<1x1x896xf32, #tpu.memory_space<vmem>>, %arg8: memref<32x896xbf16, #tpu.memory_space<vmem>>, %arg9: memref<1x896xf32, #tpu.memory_space<vmem>>, %arg10: memref<8x896xf32, #tpu.memory_space<vmem>>, %arg11: memref<8x896xf32, #tpu.memory_space<vmem>>, %arg12: memref<8x896xf32, #tpu.memory_space<vmem>>) attributes {dimension_semantics = [#tpu.dimension_semantics<parallel>, #tpu.dimension_semantics<parallel>, #tpu.dimension_semantics<arbitrary>], iteration_bounds = array<i64: 2, 2, 4>, scalar_prefetch = 0 : i64, scratch_operands = 5 : i64, tpu.core_type = #tpu.core_type<tc>, window_params = [{transform_indices = @transform_0, window_bounds = array<i64: 1, 40, 896>}, {pipeline_mode = #tpu.pipeline_mode<synchronous>, transform_indices = @transform_1, window_bounds = array<i64: 32, 40>}, {transform_indices = @transform_2, window_bounds = array<i64: 448, 32>}, {transform_indices = @transform_3, window_bounds = array<i64: 448, 1>}, {transform_indices = @transform_4, window_bounds = array<i64: 1, 1, 896>}]} {
    %c0_i32 = arith.constant 0 : i32
    %0 = arith.cmpi eq, %arg2, %c0_i32 : i32
    %1 = arith.extui %0 : i1 to i32
    %c0_i32_0 = arith.constant 0 : i32
    %2 = arith.cmpi ne, %1, %c0_i32_0 : i32
    scf.if %2 {
      %c0_19 = arith.constant 0 : index
      %c0_20 = arith.constant 0 : index
      %354 = vector.load %arg4[%c0_19, %c0_20] : memref<32x40xbf16, #tpu.memory_space<vmem>>, vector<32x40xbf16>
      %c0_21 = arith.constant 0 : index
      %c0_22 = arith.constant 0 : index
      %c0_23 = arith.constant 0 : index
      %355 = vector.load %arg3[%c0_21, %c0_22, %c0_23] : memref<1x40x896xbf16, #tpu.memory_space<vmem>>, vector<1x40x896xbf16>
      %356 = vector.shape_cast %355 : vector<1x40x896xbf16> to vector<40x896xbf16>
      %cst_24 = arith.constant dense<0.000000e+00> : vector<32x896xf32>
      %357 = tpu.matmul %354, %356, %cst_24 {dimension_numbers = #tpu.dot_dimension_numbers<[1], [0], [0], [1], [0, 0, 1, 1], [], []>} : vector<32x40xbf16>, vector<40x896xbf16>, vector<32x896xf32> -> vector<32x896xf32>
      %358 = arith.mulf %357, %357 : vector<32x896xf32>
      %cst_25 = arith.constant dense<0.000000e+00> : vector<896xf32>
      %359 = vector.multi_reduction <add>, %358, %cst_25 [0] : vector<32x896xf32> to vector<896xf32>
      %360 = vector.shape_cast %359 : vector<896xf32> to vector<1x896xf32>
      %c0_26 = arith.constant 0 : index
      %c0_27 = arith.constant 0 : index
      %361 = vector.load %arg9[%c0_26, %c0_27] : memref<1x896xf32, #tpu.memory_space<vmem>>, vector<1x896xf32>
      tpu.vector_store %arg9[%c0_26, %c0_27], %360 {strides = array<i32>} : memref<1x896xf32, #tpu.memory_space<vmem>>, vector<1x896xf32>,
      %cst_28 = arith.constant -2.000000e+00 : f32
      %362 = vector.broadcast %cst_28 : f32 to vector<32x896xf32>
      %363 = arith.mulf %362, %357 : vector<32x896xf32>
      %364 = arith.truncf %363 : vector<32x896xf32> to vector<32x896xbf16>
      %c0_29 = arith.constant 0 : index
      %c0_30 = arith.constant 0 : index
      %365 = vector.load %arg8[%c0_29, %c0_30] : memref<32x896xbf16, #tpu.memory_space<vmem>>, vector<32x896xbf16>
      tpu.vector_store %arg8[%c0_29, %c0_30], %364 {strides = array<i32>} : memref<32x896xbf16, #tpu.memory_space<vmem>>, vector<32x896xbf16>,
      %cst_31 = arith.constant 0x7F800000 : f32
      %366 = vector.broadcast %cst_31 : f32 to vector<8x896xf32>
      %c0_32 = arith.constant 0 : index
      %c0_33 = arith.constant 0 : index
      %367 = vector.load %arg10[%c0_32, %c0_33] : memref<8x896xf32, #tpu.memory_space<vmem>>, vector<8x896xf32>
      tpu.vector_store %arg10[%c0_32, %c0_33], %366 {strides = array<i32>} : memref<8x896xf32, #tpu.memory_space<vmem>>, vector<8x896xf32>,
      %c0_34 = arith.constant 0 : index
      %c0_35 = arith.constant 0 : index
      %368 = vector.load %arg11[%c0_34, %c0_35] : memref<8x896xf32, #tpu.memory_space<vmem>>, vector<8x896xf32>
      tpu.vector_store %arg11[%c0_34, %c0_35], %366 {strides = array<i32>} : memref<8x896xf32, #tpu.memory_space<vmem>>, vector<8x896xf32>,
      %c0_36 = arith.constant 0 : index
      %c0_37 = arith.constant 0 : index
      %369 = vector.load %arg12[%c0_36, %c0_37] : memref<8x896xf32, #tpu.memory_space<vmem>>, vector<8x896xf32>
      tpu.vector_store %arg12[%c0_36, %c0_37], %366 {strides = array<i32>} : memref<8x896xf32, #tpu.memory_space<vmem>>, vector<8x896xf32>,
    } else {
    }
    %c0 = arith.constant 0 : index
    %c0_1 = arith.constant 0 : index
    %3 = vector.load %arg6[%c0, %c0_1] : memref<448x1xf32, #tpu.memory_space<vmem>>, vector<448x1xf32>
    %c0_2 = arith.constant 0 : index
    %c0_3 = arith.constant 0 : index
    %4 = vector.load %arg5[%c0_2, %c0_3] : memref<448x32xbf16, #tpu.memory_space<vmem>>, vector<448x32xbf16>
    %c0_4 = arith.constant 0 : index
    %c0_5 = arith.constant 0 : index
    %5 = vector.load %arg8[%c0_4, %c0_5] : memref<32x896xbf16, #tpu.memory_space<vmem>>, vector<32x896xbf16>
    %cst = arith.constant dense<0.000000e+00> : vector<448x896xf32>
    %6 = tpu.matmul %4, %5, %cst {dimension_numbers = #tpu.dot_dimension_numbers<[1], [0], [0], [1], [0, 0, 1, 1], [], []>} : vector<448x32xbf16>, vector<32x896xbf16>, vector<448x896xf32> -> vector<448x896xf32>
    %7 = vector.broadcast %3 : vector<448x1xf32> to vector<448x896xf32>
    %8 = arith.addf %7, %6 : vector<448x896xf32>
    %c0_6 = arith.constant 0 : index
    %c0_7 = arith.constant 0 : index
    %9 = vector.load %arg10[%c0_6, %c0_7] : memref<8x896xf32, #tpu.memory_space<vmem>>, vector<8x896xf32>
    %c0_8 = arith.constant 0 : index
    %c0_9 = arith.constant 0 : index
    %10 = vector.load %arg11[%c0_8, %c0_9] : memref<8x896xf32, #tpu.memory_space<vmem>>, vector<8x896xf32>
    %c0_10 = arith.constant 0 : index
    %c0_11 = arith.constant 0 : index
    %11 = vector.load %arg12[%c0_10, %c0_11] : memref<8x896xf32, #tpu.memory_space<vmem>>, vector<8x896xf32>
    %12 = vector.extract_strided_slice %8 {offsets = [0, 0], sizes = [8, 896], strides = [1, 1]} : vector<448x896xf32> to vector<8x896xf32>
    %13 = arith.maximumf %9, %12 : vector<8x896xf32>
    %14 = arith.minimumf %9, %12 : vector<8x896xf32>
    %15 = arith.maximumf %10, %13 : vector<8x896xf32>
    %16 = arith.minimumf %10, %13 : vector<8x896xf32>
    %17 = arith.minimumf %11, %15 : vector<8x896xf32>
    %18 = vector.extract_strided_slice %8 {offsets = [8, 0], sizes = [8, 896], strides = [1, 1]} : vector<448x896xf32> to vector<8x896xf32>
    %19 = arith.maximumf %14, %18 : vector<8x896xf32>
    %20 = arith.minimumf %14, %18 : vector<8x896xf32>
    %21 = arith.maximumf %16, %19 : vector<8x896xf32>
    %22 = arith.minimumf %16, %19 : vector<8x896xf32>
    %23 = arith.minimumf %17, %21 : vector<8x896xf32>
    %24 = vector.extract_strided_slice %8 {offsets = [16, 0], sizes = [8, 896], strides = [1, 1]} : vector<448x896xf32> to vector<8x896xf32>
    %25 = arith.maximumf %20, %24 : vector<8x896xf32>
    %26 = arith.minimumf %20, %24 : vector<8x896xf32>
    %27 = arith.maximumf %22, %25 : vector<8x896xf32>
    %28 = arith.minimumf %22, %25 : vector<8x896xf32>
    %29 = arith.minimumf %23, %27 : vector<8x896xf32>
    %30 = vector.extract_strided_slice %8 {offsets = [24, 0], sizes = [8, 896], strides = [1, 1]} : vector<448x896xf32> to vector<8x896xf32>
    %31 = arith.maximumf %26, %30 : vector<8x896xf32>
    %32 = arith.minimumf %26, %30 : vector<8x896xf32>
    %33 = arith.maximumf %28, %31 : vector<8x896xf32>
    %34 = arith.minimumf %28, %31 : vector<8x896xf32>
    %35 = arith.minimumf %29, %33 : vector<8x896xf32>
    %36 = vector.extract_strided_slice %8 {offsets = [32, 0], sizes = [8, 896], strides = [1, 1]} : vector<448x896xf32> to vector<8x896xf32>
    %37 = arith.maximumf %32, %36 : vector<8x896xf32>
    %38 = arith.minimumf %32, %36 : vector<8x896xf32>
    %39 = arith.maximumf %34, %37 : vector<8x896xf32>
    %40 = arith.minimumf %34, %37 : vector<8x896xf32>
    %41 = arith.minimumf %35, %39 : vector<8x896xf32>
    %42 = vector.extract_strided_slice %8 {offsets = [40, 0], sizes = [8, 896], strides = [1, 1]} : vector<448x896xf32> to vector<8x896xf32>
    %43 = arith.maximumf %38, %42 : vector<8x896xf32>
    %44 = arith.minimumf %38, %42 : vector<8x896xf32>
    %45 = arith.maximumf %40, %43 : vector<8x896xf32>
    %46 = arith.minimumf %40, %43 : vector<8x896xf32>
    %47 = arith.minimumf %41, %45 : vector<8x896xf32>
    %48 = vector.extract_strided_slice %8 {offsets = [48, 0], sizes = [8, 896], strides = [1, 1]} : vector<448x896xf32> to vector<8x896xf32>
    %49 = arith.maximumf %44, %48 : vector<8x896xf32>
    %50 = arith.minimumf %44, %48 : vector<8x896xf32>
    %51 = arith.maximumf %46, %49 : vector<8x896xf32>
    %52 = arith.minimumf %46, %49 : vector<8x896xf32>
    %53 = arith.minimumf %47, %51 : vector<8x896xf32>
    %54 = vector.extract_strided_slice %8 {offsets = [56, 0], sizes = [8, 896], strides = [1, 1]} : vector<448x896xf32> to vector<8x896xf32>
    %55 = arith.maximumf %50, %54 : vector<8x896xf32>
    %56 = arith.minimumf %50, %54 : vector<8x896xf32>
    %57 = arith.maximumf %52, %55 : vector<8x896xf32>
    %58 = arith.minimumf %52, %55 : vector<8x896xf32>
    %59 = arith.minimumf %53, %57 : vector<8x896xf32>
    %60 = vector.extract_strided_slice %8 {offsets = [64, 0], sizes = [8, 896], strides = [1, 1]} : vector<448x896xf32> to vector<8x896xf32>
    %61 = arith.maximumf %56, %60 : vector<8x896xf32>
    %62 = arith.minimumf %56, %60 : vector<8x896xf32>
    %63 = arith.maximumf %58, %61 : vector<8x896xf32>
    %64 = arith.minimumf %58, %61 : vector<8x896xf32>
    %65 = arith.minimumf %59, %63 : vector<8x896xf32>
    %66 = vector.extract_strided_slice %8 {offsets = [72, 0], sizes = [8, 896], strides = [1, 1]} : vector<448x896xf32> to vector<8x896xf32>
    %67 = arith.maximumf %62, %66 : vector<8x896xf32>
    %68 = arith.minimumf %62, %66 : vector<8x896xf32>
    %69 = arith.maximumf %64, %67 : vector<8x896xf32>
    %70 = arith.minimumf %64, %67 : vector<8x896xf32>
    %71 = arith.minimumf %65, %69 : vector<8x896xf32>
    %72 = vector.extract_strided_slice %8 {offsets = [80, 0], sizes = [8, 896], strides = [1, 1]} : vector<448x896xf32> to vector<8x896xf32>
    %73 = arith.maximumf %68, %72 : vector<8x896xf32>
    %74 = arith.minimumf %68, %72 : vector<8x896xf32>
    %75 = arith.maximumf %70, %73 : vector<8x896xf32>
    %76 = arith.minimumf %70, %73 : vector<8x896xf32>
    %77 = arith.minimumf %71, %75 : vector<8x896xf32>
    %78 = vector.extract_strided_slice %8 {offsets = [88, 0], sizes = [8, 896], strides = [1, 1]} : vector<448x896xf32> to vector<8x896xf32>
    %79 = arith.maximumf %74, %78 : vector<8x896xf32>
    %80 = arith.minimumf %74, %78 : vector<8x896xf32>
    %81 = arith.maximumf %76, %79 : vector<8x896xf32>
    %82 = arith.minimumf %76, %79 : vector<8x896xf32>
    %83 = arith.minimumf %77, %81 : vector<8x896xf32>
    %84 = vector.extract_strided_slice %8 {offsets = [96, 0], sizes = [8, 896], strides = [1, 1]} : vector<448x896xf32> to vector<8x896xf32>
    %85 = arith.maximumf %80, %84 : vector<8x896xf32>
    %86 = arith.minimumf %80, %84 : vector<8x896xf32>
    %87 = arith.maximumf %82, %85 : vector<8x896xf32>
    %88 = arith.minimumf %82, %85 : vector<8x896xf32>
    %89 = arith.minimumf %83, %87 : vector<8x896xf32>
    %90 = vector.extract_strided_slice %8 {offsets = [104, 0], sizes = [8, 896], strides = [1, 1]} : vector<448x896xf32> to vector<8x896xf32>
    %91 = arith.maximumf %86, %90 : vector<8x896xf32>
    %92 = arith.minimumf %86, %90 : vector<8x896xf32>
    %93 = arith.maximumf %88, %91 : vector<8x896xf32>
    %94 = arith.minimumf %88, %91 : vector<8x896xf32>
    %95 = arith.minimumf %89, %93 : vector<8x896xf32>
    %96 = vector.extract_strided_slice %8 {offsets = [112, 0], sizes = [8, 896], strides = [1, 1]} : vector<448x896xf32> to vector<8x896xf32>
    %97 = arith.maximumf %92, %96 : vector<8x896xf32>
    %98 = arith.minimumf %92, %96 : vector<8x896xf32>
    %99 = arith.maximumf %94, %97 : vector<8x896xf32>
    %100 = arith.minimumf %94, %97 : vector<8x896xf32>
    %101 = arith.minimumf %95, %99 : vector<8x896xf32>
    %102 = vector.extract_strided_slice %8 {offsets = [120, 0], sizes = [8, 896], strides = [1, 1]} : vector<448x896xf32> to vector<8x896xf32>
    %103 = arith.maximumf %98, %102 : vector<8x896xf32>
    %104 = arith.minimumf %98, %102 : vector<8x896xf32>
    %105 = arith.maximumf %100, %103 : vector<8x896xf32>
    %106 = arith.minimumf %100, %103 : vector<8x896xf32>
    %107 = arith.minimumf %101, %105 : vector<8x896xf32>
    %108 = vector.extract_strided_slice %8 {offsets = [128, 0], sizes = [8, 896], strides = [1, 1]} : vector<448x896xf32> to vector<8x896xf32>
    %109 = arith.maximumf %104, %108 : vector<8x896xf32>
    %110 = arith.minimumf %104, %108 : vector<8x896xf32>
    %111 = arith.maximumf %106, %109 : vector<8x896xf32>
    %112 = arith.minimumf %106, %109 : vector<8x896xf32>
    %113 = arith.minimumf %107, %111 : vector<8x896xf32>
    %114 = vector.extract_strided_slice %8 {offsets = [136, 0], sizes = [8, 896], strides = [1, 1]} : vector<448x896xf32> to vector<8x896xf32>
    %115 = arith.maximumf %110, %114 : vector<8x896xf32>
    %116 = arith.minimumf %110, %114 : vector<8x896xf32>
    %117 = arith.maximumf %112, %115 : vector<8x896xf32>
    %118 = arith.minimumf %112, %115 : vector<8x896xf32>
    %119 = arith.minimumf %113, %117 : vector<8x896xf32>
    %120 = vector.extract_strided_slice %8 {offsets = [144, 0], sizes = [8, 896], strides = [1, 1]} : vector<448x896xf32> to vector<8x896xf32>
    %121 = arith.maximumf %116, %120 : vector<8x896xf32>
    %122 = arith.minimumf %116, %120 : vector<8x896xf32>
    %123 = arith.maximumf %118, %121 : vector<8x896xf32>
    %124 = arith.minimumf %118, %121 : vector<8x896xf32>
    %125 = arith.minimumf %119, %123 : vector<8x896xf32>
    %126 = vector.extract_strided_slice %8 {offsets = [152, 0], sizes = [8, 896], strides = [1, 1]} : vector<448x896xf32> to vector<8x896xf32>
    %127 = arith.maximumf %122, %126 : vector<8x896xf32>
    %128 = arith.minimumf %122, %126 : vector<8x896xf32>
    %129 = arith.maximumf %124, %127 : vector<8x896xf32>
    %130 = arith.minimumf %124, %127 : vector<8x896xf32>
    %131 = arith.minimumf %125, %129 : vector<8x896xf32>
    %132 = vector.extract_strided_slice %8 {offsets = [160, 0], sizes = [8, 896], strides = [1, 1]} : vector<448x896xf32> to vector<8x896xf32>
    %133 = arith.maximumf %128, %132 : vector<8x896xf32>
    %134 = arith.minimumf %128, %132 : vector<8x896xf32>
    %135 = arith.maximumf %130, %133 : vector<8x896xf32>
    %136 = arith.minimumf %130, %133 : vector<8x896xf32>
    %137 = arith.minimumf %131, %135 : vector<8x896xf32>
    %138 = vector.extract_strided_slice %8 {offsets = [168, 0], sizes = [8, 896], strides = [1, 1]} : vector<448x896xf32> to vector<8x896xf32>
    %139 = arith.maximumf %134, %138 : vector<8x896xf32>
    %140 = arith.minimumf %134, %138 : vector<8x896xf32>
    %141 = arith.maximumf %136, %139 : vector<8x896xf32>
    %142 = arith.minimumf %136, %139 : vector<8x896xf32>
    %143 = arith.minimumf %137, %141 : vector<8x896xf32>
    %144 = vector.extract_strided_slice %8 {offsets = [176, 0], sizes = [8, 896], strides = [1, 1]} : vector<448x896xf32> to vector<8x896xf32>
    %145 = arith.maximumf %140, %144 : vector<8x896xf32>
    %146 = arith.minimumf %140, %144 : vector<8x896xf32>
    %147 = arith.maximumf %142, %145 : vector<8x896xf32>
    %148 = arith.minimumf %142, %145 : vector<8x896xf32>
    %149 = arith.minimumf %143, %147 : vector<8x896xf32>
    %150 = vector.extract_strided_slice %8 {offsets = [184, 0], sizes = [8, 896], strides = [1, 1]} : vector<448x896xf32> to vector<8x896xf32>
    %151 = arith.maximumf %146, %150 : vector<8x896xf32>
    %152 = arith.minimumf %146, %150 : vector<8x896xf32>
    %153 = arith.maximumf %148, %151 : vector<8x896xf32>
    %154 = arith.minimumf %148, %151 : vector<8x896xf32>
    %155 = arith.minimumf %149, %153 : vector<8x896xf32>
    %156 = vector.extract_strided_slice %8 {offsets = [192, 0], sizes = [8, 896], strides = [1, 1]} : vector<448x896xf32> to vector<8x896xf32>
    %157 = arith.maximumf %152, %156 : vector<8x896xf32>
    %158 = arith.minimumf %152, %156 : vector<8x896xf32>
    %159 = arith.maximumf %154, %157 : vector<8x896xf32>
    %160 = arith.minimumf %154, %157 : vector<8x896xf32>
    %161 = arith.minimumf %155, %159 : vector<8x896xf32>
    %162 = vector.extract_strided_slice %8 {offsets = [200, 0], sizes = [8, 896], strides = [1, 1]} : vector<448x896xf32> to vector<8x896xf32>
    %163 = arith.maximumf %158, %162 : vector<8x896xf32>
    %164 = arith.minimumf %158, %162 : vector<8x896xf32>
    %165 = arith.maximumf %160, %163 : vector<8x896xf32>
    %166 = arith.minimumf %160, %163 : vector<8x896xf32>
    %167 = arith.minimumf %161, %165 : vector<8x896xf32>
    %168 = vector.extract_strided_slice %8 {offsets = [208, 0], sizes = [8, 896], strides = [1, 1]} : vector<448x896xf32> to vector<8x896xf32>
    %169 = arith.maximumf %164, %168 : vector<8x896xf32>
    %170 = arith.minimumf %164, %168 : vector<8x896xf32>
    %171 = arith.maximumf %166, %169 : vector<8x896xf32>
    %172 = arith.minimumf %166, %169 : vector<8x896xf32>
    %173 = arith.minimumf %167, %171 : vector<8x896xf32>
    %174 = vector.extract_strided_slice %8 {offsets = [216, 0], sizes = [8, 896], strides = [1, 1]} : vector<448x896xf32> to vector<8x896xf32>
    %175 = arith.maximumf %170, %174 : vector<8x896xf32>
    %176 = arith.minimumf %170, %174 : vector<8x896xf32>
    %177 = arith.maximumf %172, %175 : vector<8x896xf32>
    %178 = arith.minimumf %172, %175 : vector<8x896xf32>
    %179 = arith.minimumf %173, %177 : vector<8x896xf32>
    %180 = vector.extract_strided_slice %8 {offsets = [224, 0], sizes = [8, 896], strides = [1, 1]} : vector<448x896xf32> to vector<8x896xf32>
    %181 = arith.maximumf %176, %180 : vector<8x896xf32>
    %182 = arith.minimumf %176, %180 : vector<8x896xf32>
    %183 = arith.maximumf %178, %181 : vector<8x896xf32>
    %184 = arith.minimumf %178, %181 : vector<8x896xf32>
    %185 = arith.minimumf %179, %183 : vector<8x896xf32>
    %186 = vector.extract_strided_slice %8 {offsets = [232, 0], sizes = [8, 896], strides = [1, 1]} : vector<448x896xf32> to vector<8x896xf32>
    %187 = arith.maximumf %182, %186 : vector<8x896xf32>
    %188 = arith.minimumf %182, %186 : vector<8x896xf32>
    %189 = arith.maximumf %184, %187 : vector<8x896xf32>
    %190 = arith.minimumf %184, %187 : vector<8x896xf32>
    %191 = arith.minimumf %185, %189 : vector<8x896xf32>
    %192 = vector.extract_strided_slice %8 {offsets = [240, 0], sizes = [8, 896], strides = [1, 1]} : vector<448x896xf32> to vector<8x896xf32>
    %193 = arith.maximumf %188, %192 : vector<8x896xf32>
    %194 = arith.minimumf %188, %192 : vector<8x896xf32>
    %195 = arith.maximumf %190, %193 : vector<8x896xf32>
    %196 = arith.minimumf %190, %193 : vector<8x896xf32>
    %197 = arith.minimumf %191, %195 : vector<8x896xf32>
    %198 = vector.extract_strided_slice %8 {offsets = [248, 0], sizes = [8, 896], strides = [1, 1]} : vector<448x896xf32> to vector<8x896xf32>
    %199 = arith.maximumf %194, %198 : vector<8x896xf32>
    %200 = arith.minimumf %194, %198 : vector<8x896xf32>
    %201 = arith.maximumf %196, %199 : vector<8x896xf32>
    %202 = arith.minimumf %196, %199 : vector<8x896xf32>
    %203 = arith.minimumf %197, %201 : vector<8x896xf32>
    %204 = vector.extract_strided_slice %8 {offsets = [256, 0], sizes = [8, 896], strides = [1, 1]} : vector<448x896xf32> to vector<8x896xf32>
    %205 = arith.maximumf %200, %204 : vector<8x896xf32>
    %206 = arith.minimumf %200, %204 : vector<8x896xf32>
    %207 = arith.maximumf %202, %205 : vector<8x896xf32>
    %208 = arith.minimumf %202, %205 : vector<8x896xf32>
    %209 = arith.minimumf %203, %207 : vector<8x896xf32>
    %210 = vector.extract_strided_slice %8 {offsets = [264, 0], sizes = [8, 896], strides = [1, 1]} : vector<448x896xf32> to vector<8x896xf32>
    %211 = arith.maximumf %206, %210 : vector<8x896xf32>
    %212 = arith.minimumf %206, %210 : vector<8x896xf32>
    %213 = arith.maximumf %208, %211 : vector<8x896xf32>
    %214 = arith.minimumf %208, %211 : vector<8x896xf32>
    %215 = arith.minimumf %209, %213 : vector<8x896xf32>
    %216 = vector.extract_strided_slice %8 {offsets = [272, 0], sizes = [8, 896], strides = [1, 1]} : vector<448x896xf32> to vector<8x896xf32>
    %217 = arith.maximumf %212, %216 : vector<8x896xf32>
    %218 = arith.minimumf %212, %216 : vector<8x896xf32>
    %219 = arith.maximumf %214, %217 : vector<8x896xf32>
    %220 = arith.minimumf %214, %217 : vector<8x896xf32>
    %221 = arith.minimumf %215, %219 : vector<8x896xf32>
    %222 = vector.extract_strided_slice %8 {offsets = [280, 0], sizes = [8, 896], strides = [1, 1]} : vector<448x896xf32> to vector<8x896xf32>
    %223 = arith.maximumf %218, %222 : vector<8x896xf32>
    %224 = arith.minimumf %218, %222 : vector<8x896xf32>
    %225 = arith.maximumf %220, %223 : vector<8x896xf32>
    %226 = arith.minimumf %220, %223 : vector<8x896xf32>
    %227 = arith.minimumf %221, %225 : vector<8x896xf32>
    %228 = vector.extract_strided_slice %8 {offsets = [288, 0], sizes = [8, 896], strides = [1, 1]} : vector<448x896xf32> to vector<8x896xf32>
    %229 = arith.maximumf %224, %228 : vector<8x896xf32>
    %230 = arith.minimumf %224, %228 : vector<8x896xf32>
    %231 = arith.maximumf %226, %229 : vector<8x896xf32>
    %232 = arith.minimumf %226, %229 : vector<8x896xf32>
    %233 = arith.minimumf %227, %231 : vector<8x896xf32>
    %234 = vector.extract_strided_slice %8 {offsets = [296, 0], sizes = [8, 896], strides = [1, 1]} : vector<448x896xf32> to vector<8x896xf32>
    %235 = arith.maximumf %230, %234 : vector<8x896xf32>
    %236 = arith.minimumf %230, %234 : vector<8x896xf32>
    %237 = arith.maximumf %232, %235 : vector<8x896xf32>
    %238 = arith.minimumf %232, %235 : vector<8x896xf32>
    %239 = arith.minimumf %233, %237 : vector<8x896xf32>
    %240 = vector.extract_strided_slice %8 {offsets = [304, 0], sizes = [8, 896], strides = [1, 1]} : vector<448x896xf32> to vector<8x896xf32>
    %241 = arith.maximumf %236, %240 : vector<8x896xf32>
    %242 = arith.minimumf %236, %240 : vector<8x896xf32>
    %243 = arith.maximumf %238, %241 : vector<8x896xf32>
    %244 = arith.minimumf %238, %241 : vector<8x896xf32>
    %245 = arith.minimumf %239, %243 : vector<8x896xf32>
    %246 = vector.extract_strided_slice %8 {offsets = [312, 0], sizes = [8, 896], strides = [1, 1]} : vector<448x896xf32> to vector<8x896xf32>
    %247 = arith.maximumf %242, %246 : vector<8x896xf32>
    %248 = arith.minimumf %242, %246 : vector<8x896xf32>
    %249 = arith.maximumf %244, %247 : vector<8x896xf32>
    %250 = arith.minimumf %244, %247 : vector<8x896xf32>
    %251 = arith.minimumf %245, %249 : vector<8x896xf32>
    %252 = vector.extract_strided_slice %8 {offsets = [320, 0], sizes = [8, 896], strides = [1, 1]} : vector<448x896xf32> to vector<8x896xf32>
    %253 = arith.maximumf %248, %252 : vector<8x896xf32>
    %254 = arith.minimumf %248, %252 : vector<8x896xf32>
    %255 = arith.maximumf %250, %253 : vector<8x896xf32>
    %256 = arith.minimumf %250, %253 : vector<8x896xf32>
    %257 = arith.minimumf %251, %255 : vector<8x896xf32>
    %258 = vector.extract_strided_slice %8 {offsets = [328, 0], sizes = [8, 896], strides = [1, 1]} : vector<448x896xf32> to vector<8x896xf32>
    %259 = arith.maximumf %254, %258 : vector<8x896xf32>
    %260 = arith.minimumf %254, %258 : vector<8x896xf32>
    %261 = arith.maximumf %256, %259 : vector<8x896xf32>
    %262 = arith.minimumf %256, %259 : vector<8x896xf32>
    %263 = arith.minimumf %257, %261 : vector<8x896xf32>
    %264 = vector.extract_strided_slice %8 {offsets = [336, 0], sizes = [8, 896], strides = [1, 1]} : vector<448x896xf32> to vector<8x896xf32>
    %265 = arith.maximumf %260, %264 : vector<8x896xf32>
    %266 = arith.minimumf %260, %264 : vector<8x896xf32>
    %267 = arith.maximumf %262, %265 : vector<8x896xf32>
    %268 = arith.minimumf %262, %265 : vector<8x896xf32>
    %269 = arith.minimumf %263, %267 : vector<8x896xf32>
    %270 = vector.extract_strided_slice %8 {offsets = [344, 0], sizes = [8, 896], strides = [1, 1]} : vector<448x896xf32> to vector<8x896xf32>
    %271 = arith.maximumf %266, %270 : vector<8x896xf32>
    %272 = arith.minimumf %266, %270 : vector<8x896xf32>
    %273 = arith.maximumf %268, %271 : vector<8x896xf32>
    %274 = arith.minimumf %268, %271 : vector<8x896xf32>
    %275 = arith.minimumf %269, %273 : vector<8x896xf32>
    %276 = vector.extract_strided_slice %8 {offsets = [352, 0], sizes = [8, 896], strides = [1, 1]} : vector<448x896xf32> to vector<8x896xf32>
    %277 = arith.maximumf %272, %276 : vector<8x896xf32>
    %278 = arith.minimumf %272, %276 : vector<8x896xf32>
    %279 = arith.maximumf %274, %277 : vector<8x896xf32>
    %280 = arith.minimumf %274, %277 : vector<8x896xf32>
    %281 = arith.minimumf %275, %279 : vector<8x896xf32>
    %282 = vector.extract_strided_slice %8 {offsets = [360, 0], sizes = [8, 896], strides = [1, 1]} : vector<448x896xf32> to vector<8x896xf32>
    %283 = arith.maximumf %278, %282 : vector<8x896xf32>
    %284 = arith.minimumf %278, %282 : vector<8x896xf32>
    %285 = arith.maximumf %280, %283 : vector<8x896xf32>
    %286 = arith.minimumf %280, %283 : vector<8x896xf32>
    %287 = arith.minimumf %281, %285 : vector<8x896xf32>
    %288 = vector.extract_strided_slice %8 {offsets = [368, 0], sizes = [8, 896], strides = [1, 1]} : vector<448x896xf32> to vector<8x896xf32>
    %289 = arith.maximumf %284, %288 : vector<8x896xf32>
    %290 = arith.minimumf %284, %288 : vector<8x896xf32>
    %291 = arith.maximumf %286, %289 : vector<8x896xf32>
    %292 = arith.minimumf %286, %289 : vector<8x896xf32>
    %293 = arith.minimumf %287, %291 : vector<8x896xf32>
    %294 = vector.extract_strided_slice %8 {offsets = [376, 0], sizes = [8, 896], strides = [1, 1]} : vector<448x896xf32> to vector<8x896xf32>
    %295 = arith.maximumf %290, %294 : vector<8x896xf32>
    %296 = arith.minimumf %290, %294 : vector<8x896xf32>
    %297 = arith.maximumf %292, %295 : vector<8x896xf32>
    %298 = arith.minimumf %292, %295 : vector<8x896xf32>
    %299 = arith.minimumf %293, %297 : vector<8x896xf32>
    %300 = vector.extract_strided_slice %8 {offsets = [384, 0], sizes = [8, 896], strides = [1, 1]} : vector<448x896xf32> to vector<8x896xf32>
    %301 = arith.maximumf %296, %300 : vector<8x896xf32>
    %302 = arith.minimumf %296, %300 : vector<8x896xf32>
    %303 = arith.maximumf %298, %301 : vector<8x896xf32>
    %304 = arith.minimumf %298, %301 : vector<8x896xf32>
    %305 = arith.minimumf %299, %303 : vector<8x896xf32>
    %306 = vector.extract_strided_slice %8 {offsets = [392, 0], sizes = [8, 896], strides = [1, 1]} : vector<448x896xf32> to vector<8x896xf32>
    %307 = arith.maximumf %302, %306 : vector<8x896xf32>
    %308 = arith.minimumf %302, %306 : vector<8x896xf32>
    %309 = arith.maximumf %304, %307 : vector<8x896xf32>
    %310 = arith.minimumf %304, %307 : vector<8x896xf32>
    %311 = arith.minimumf %305, %309 : vector<8x896xf32>
    %312 = vector.extract_strided_slice %8 {offsets = [400, 0], sizes = [8, 896], strides = [1, 1]} : vector<448x896xf32> to vector<8x896xf32>
    %313 = arith.maximumf %308, %312 : vector<8x896xf32>
    %314 = arith.minimumf %308, %312 : vector<8x896xf32>
    %315 = arith.maximumf %310, %313 : vector<8x896xf32>
    %316 = arith.minimumf %310, %313 : vector<8x896xf32>
    %317 = arith.minimumf %311, %315 : vector<8x896xf32>
    %318 = vector.extract_strided_slice %8 {offsets = [408, 0], sizes = [8, 896], strides = [1, 1]} : vector<448x896xf32> to vector<8x896xf32>
    %319 = arith.maximumf %314, %318 : vector<8x896xf32>
    %320 = arith.minimumf %314, %318 : vector<8x896xf32>
    %321 = arith.maximumf %316, %319 : vector<8x896xf32>
    %322 = arith.minimumf %316, %319 : vector<8x896xf32>
    %323 = arith.minimumf %317, %321 : vector<8x896xf32>
    %324 = vector.extract_strided_slice %8 {offsets = [416, 0], sizes = [8, 896], strides = [1, 1]} : vector<448x896xf32> to vector<8x896xf32>
    %325 = arith.maximumf %320, %324 : vector<8x896xf32>
    %326 = arith.minimumf %320, %324 : vector<8x896xf32>
    %327 = arith.maximumf %322, %325 : vector<8x896xf32>
    %328 = arith.minimumf %322, %325 : vector<8x896xf32>
    %329 = arith.minimumf %323, %327 : vector<8x896xf32>
    %330 = vector.extract_strided_slice %8 {offsets = [424, 0], sizes = [8, 896], strides = [1, 1]} : vector<448x896xf32> to vector<8x896xf32>
    %331 = arith.maximumf %326, %330 : vector<8x896xf32>
    %332 = arith.minimumf %326, %330 : vector<8x896xf32>
    %333 = arith.maximumf %328, %331 : vector<8x896xf32>
    %334 = arith.minimumf %328, %331 : vector<8x896xf32>
    %335 = arith.minimumf %329, %333 : vector<8x896xf32>
    %336 = vector.extract_strided_slice %8 {offsets = [432, 0], sizes = [8, 896], strides = [1, 1]} : vector<448x896xf32> to vector<8x896xf32>
    %337 = arith.maximumf %332, %336 : vector<8x896xf32>
    %338 = arith.minimumf %332, %336 : vector<8x896xf32>
    %339 = arith.maximumf %334, %337 : vector<8x896xf32>
    %340 = arith.minimumf %334, %337 : vector<8x896xf32>
    %341 = arith.minimumf %335, %339 : vector<8x896xf32>
    %342 = vector.extract_strided_slice %8 {offsets = [440, 0], sizes = [8, 896], strides = [1, 1]} : vector<448x896xf32> to vector<8x896xf32>
    %343 = arith.maximumf %338, %342 : vector<8x896xf32>
    %344 = arith.minimumf %338, %342 : vector<8x896xf32>
    %345 = arith.maximumf %340, %343 : vector<8x896xf32>
    %346 = arith.minimumf %340, %343 : vector<8x896xf32>
    %347 = arith.minimumf %341, %345 : vector<8x896xf32>
    %c0_12 = arith.constant 0 : index
    %c0_13 = arith.constant 0 : index
    %348 = vector.load %arg10[%c0_12, %c0_13] : memref<8x896xf32, #tpu.memory_space<vmem>>, vector<8x896xf32>
    tpu.vector_store %arg10[%c0_12, %c0_13], %344 {strides = array<i32>} : memref<8x896xf32, #tpu.memory_space<vmem>>, vector<8x896xf32>,
    %c0_14 = arith.constant 0 : index
    %c0_15 = arith.constant 0 : index
    %349 = vector.load %arg11[%c0_14, %c0_15] : memref<8x896xf32, #tpu.memory_space<vmem>>, vector<8x896xf32>
    tpu.vector_store %arg11[%c0_14, %c0_15], %346 {strides = array<i32>} : memref<8x896xf32, #tpu.memory_space<vmem>>, vector<8x896xf32>,
    %c0_16 = arith.constant 0 : index
    %c0_17 = arith.constant 0 : index
    %350 = vector.load %arg12[%c0_16, %c0_17] : memref<8x896xf32, #tpu.memory_space<vmem>>, vector<8x896xf32>
    tpu.vector_store %arg12[%c0_16, %c0_17], %347 {strides = array<i32>} : memref<8x896xf32, #tpu.memory_space<vmem>>, vector<8x896xf32>,
    %c3_i32 = arith.constant 3 : i32
    %351 = arith.cmpi eq, %arg2, %c3_i32 : i32
    %352 = arith.extui %351 : i1 to i32
    %c0_i32_18 = arith.constant 0 : i32
    %353 = arith.cmpi ne, %352, %c0_i32_18 : i32
    scf.if %353 {
      %c0_19 = arith.constant 0 : index
      %c0_20 = arith.constant 0 : index
      %354 = vector.load %arg10[%c0_19, %c0_20] : memref<8x896xf32, #tpu.memory_space<vmem>>, vector<8x896xf32>
      %c0_21 = arith.constant 0 : index
      %c0_22 = arith.constant 0 : index
      %355 = vector.load %arg11[%c0_21, %c0_22] : memref<8x896xf32, #tpu.memory_space<vmem>>, vector<8x896xf32>
      %c0_23 = arith.constant 0 : index
      %c0_24 = arith.constant 0 : index
      %356 = vector.load %arg12[%c0_23, %c0_24] : memref<8x896xf32, #tpu.memory_space<vmem>>, vector<8x896xf32>
      %357 = tpu.concatenate %354, %355, %356 in 0 : vector<8x896xf32>, vector<8x896xf32>, vector<8x896xf32> -> vector<24x896xf32>
      %358 = tpu.iota {dimensions = array<i32: 0>} : vector<24x896xi32>
      %cst_25 = arith.constant dense<0x7F800000> : vector<896xf32>
      %359 = vector.multi_reduction <minimumf>, %357, %cst_25 [0] : vector<24x896xf32> to vector<896xf32>
      %360 = vector.shape_cast %359 : vector<896xf32> to vector<1x896xf32>
      %361 = vector.broadcast %360 : vector<1x896xf32> to vector<24x896xf32>
      %362 = arith.cmpf oeq, %357, %361 : vector<24x896xf32>
      %c24_i32 = arith.constant 24 : i32
      %363 = vector.broadcast %c24_i32 : i32 to vector<24x896xi32>
      %364 = arith.select %362, %358, %363 : vector<24x896xi1>, vector<24x896xi32>
      %cst_26 = arith.constant dense<2147483647> : vector<896xi32>
      %365 = vector.multi_reduction <minsi>, %364, %cst_26 [0] : vector<24x896xi32> to vector<896xi32>
      %366 = vector.shape_cast %365 : vector<896xi32> to vector<1x896xi32>
      %367 = vector.broadcast %366 : vector<1x896xi32> to vector<24x896xi32>
      %368 = arith.cmpi eq, %358, %367 : vector<24x896xi32>
      %cst_27 = arith.constant 0x7F800000 : f32
      %369 = vector.broadcast %cst_27 : f32 to vector<24x896xf32>
      %370 = arith.select %368, %369, %357 : vector<24x896xi1>, vector<24x896xf32>
      %cst_28 = arith.constant dense<0x7F800000> : vector<896xf32>
      %371 = vector.multi_reduction <minimumf>, %370, %cst_28 [0] : vector<24x896xf32> to vector<896xf32>
      %372 = vector.shape_cast %371 : vector<896xf32> to vector<1x896xf32>
      %373 = vector.broadcast %372 : vector<1x896xf32> to vector<24x896xf32>
      %374 = arith.cmpf oeq, %370, %373 : vector<24x896xf32>
      %c24_i32_29 = arith.constant 24 : i32
      %375 = vector.broadcast %c24_i32_29 : i32 to vector<24x896xi32>
      %376 = arith.select %374, %358, %375 : vector<24x896xi1>, vector<24x896xi32>
      %cst_30 = arith.constant dense<2147483647> : vector<896xi32>
      %377 = vector.multi_reduction <minsi>, %376, %cst_30 [0] : vector<24x896xi32> to vector<896xi32>
      %378 = vector.shape_cast %377 : vector<896xi32> to vector<1x896xi32>
      %379 = vector.broadcast %378 : vector<1x896xi32> to vector<24x896xi32>
      %380 = arith.cmpi eq, %358, %379 : vector<24x896xi32>
      %cst_31 = arith.constant 0x7F800000 : f32
      %381 = vector.broadcast %cst_31 : f32 to vector<24x896xf32>
      %382 = arith.select %380, %381, %370 : vector<24x896xi1>, vector<24x896xf32>
      %cst_32 = arith.constant dense<0x7F800000> : vector<896xf32>
      %383 = vector.multi_reduction <minimumf>, %382, %cst_32 [0] : vector<24x896xf32> to vector<896xf32>
      %384 = vector.shape_cast %383 : vector<896xf32> to vector<1x896xf32>
      %c0_33 = arith.constant 0 : index
      %c0_34 = arith.constant 0 : index
      %385 = vector.load %arg9[%c0_33, %c0_34] : memref<1x896xf32, #tpu.memory_space<vmem>>, vector<1x896xf32>
      %386 = arith.addf %385, %360 : vector<1x896xf32>
      %cst_35 = arith.constant 0.000000e+00 : f32
      %387 = vector.broadcast %cst_35 : f32 to vector<1x896xf32>
      %388 = arith.maximumf %386, %387 : vector<1x896xf32>
      %389 = math.sqrt %388 : vector<1x896xf32>
      %390 = arith.addf %385, %372 : vector<1x896xf32>
      %cst_36 = arith.constant 0.000000e+00 : f32
      %391 = vector.broadcast %cst_36 : f32 to vector<1x896xf32>
      %392 = arith.maximumf %390, %391 : vector<1x896xf32>
      %393 = math.sqrt %392 : vector<1x896xf32>
      %394 = arith.addf %385, %384 : vector<1x896xf32>
      %cst_37 = arith.constant 0.000000e+00 : f32
      %395 = vector.broadcast %cst_37 : f32 to vector<1x896xf32>
      %396 = arith.maximumf %394, %395 : vector<1x896xf32>
      %397 = math.sqrt %396 : vector<1x896xf32>
      %398 = arith.subf %389, %393 : vector<1x896xf32>
      %399 = math.exp %398 : vector<1x896xf32>
      %cst_38 = arith.constant 1.000000e+00 : f32
      %400 = vector.broadcast %cst_38 : f32 to vector<1x896xf32>
      %401 = arith.addf %400, %399 : vector<1x896xf32>
      %402 = arith.subf %389, %397 : vector<1x896xf32>
      %403 = math.exp %402 : vector<1x896xf32>
      %404 = arith.addf %401, %403 : vector<1x896xf32>
      %405 = tpu.reciprocal %404 {approx = true} : vector<1x896xf32> -> vector<1x896xf32>
      %406 = arith.mulf %389, %405 : vector<1x896xf32>
      %c0_39 = arith.constant 0 : index
      %c0_40 = arith.constant 0 : index
      %c0_41 = arith.constant 0 : index
      %407 = vector.load %arg7[%c0_39, %c0_40, %c0_41] : memref<1x1x896xf32, #tpu.memory_space<vmem>>, vector<1x1x896xf32>
      %408 = vector.shape_cast %407 : vector<1x1x896xf32> to vector<1x896xf32>
      %409 = vector.shape_cast %406 : vector<1x896xf32> to vector<1x1x896xf32>
      tpu.vector_store %arg7[%c0_39, %c0_40, %c0_41], %409 {strides = array<i32>} : memref<1x1x896xf32, #tpu.memory_space<vmem>>, vector<1x1x896xf32>,
    } else {
    }
    return
  }
  func.func @transform_0(%arg0: i32, %arg1: i32, %arg2: i32) -> (i32, i32, i32) {
    %c0_i32 = arith.constant 0 : i32
    %c0_i32_0 = arith.constant 0 : i32
    return %arg0, %c0_i32, %arg1 : i32, i32, i32
  }
  func.func @transform_1(%arg0: i32, %arg1: i32, %arg2: i32) -> (i32, i32) {
    %c0_i32 = arith.constant 0 : i32
    %c0_i32_0 = arith.constant 0 : i32
    %c0_i32_1 = arith.constant 0 : i32
    return %c0_i32, %c0_i32_0 : i32, i32
  }
  func.func @transform_2(%arg0: i32, %arg1: i32, %arg2: i32) -> (i32, i32) {
    %c0_i32 = arith.constant 0 : i32
    %c0_i32_0 = arith.constant 0 : i32
    return %arg2, %c0_i32 : i32, i32
  }
  func.func @transform_3(%arg0: i32, %arg1: i32, %arg2: i32) -> (i32, i32) {
    %c0_i32 = arith.constant 0 : i32
    %c0_i32_0 = arith.constant 0 : i32
    return %arg2, %c0_i32 : i32, i32
  }
  func.func @transform_4(%arg0: i32, %arg1: i32, %arg2: i32) -> (i32, i32, i32) {
    %c0_i32 = arith.constant 0 : i32
    %c0_i32_0 = arith.constant 0 : i32
    return %arg0, %c0_i32, %arg1 : i32, i32, i32
  }
}

</mosaic_0001>

<bundles_post_ra>
// kernel: cfa_forward.1
= control target key start
LH: loop header
LB: loop body
LE: loop exit
PB: predicated region body
PF: predicated region fallthrough
CT: control target
= control target key end

     0   :  { %s9794_s0 = inlined_call_operand.vmem [shape: bf16[2,40,1792], index: 0, kind: input, shape index: {}]   ;;  %s9795_s1 = inlined_call_operand.vmem [shape: bf16[32,40], index: 1, kind: input, shape index: {}]   ;;  %s9796_s2 = inlined_call_operand.vmem [shape: bf16[1792,32], index: 2, kind: input, shape index: {}]   ;;  %s9797_s3 = inlined_call_operand.vmem [shape: f32[1792,1], index: 3, kind: input, shape index: {}]   ;;  %s9798_s4 = inlined_call_operand.vmem [shape: f32[2,1,1792], index: 4, kind: output, shape index: {}]  }
   0x1   :  { %10020 = sst [smem:[#allocation113_spill]] %s9794_s0 }
   0x2   :  { %s6848_s15 = smov 0   ;;  %s6850_s16 = smov 0  }
   0x3   :  { %s6852_s17 = smov 0   ;;  %s6854_s18 = smov 0  }
   0x4   :  { %s6856_s19 = smov 0   ;;  %s6858_s20 = smov 0  }
   0x5   :  { %s6860_s21 = smov 0   ;;  %s6862_s22 = smov 0  }
   0x6   :  { %s6864_s23 = smov 0  }
   0x7 LB: > { %s26_s24 = sadd.s32 1, %s6804_s20  ;;  %s29_s25 = sadd.s32 1, %s6808_s21  ;;  %s6816_s23 = sphi %s6864_s23, %s14_s23   ;;  %s6812_s22 = sphi %s6862_s22, %s10450_s22   ;;  %s6808_s21 = sphi %s6860_s21, %s10449_s21   ;;  %s6804_s20 = sphi %s6858_s20, %s10448_s20   ;;  %s6800_s19 = sphi %s6856_s19, %s10447_s19   ;;  %s6796_s18 = sphi %s6854_s18, %s10446_s18   ;;  %s6792_s17 = sphi %s6852_s17, %s10445_s17   ;;  %s6788_s16 = sphi %s6850_s16, %s10444_s16   ;;  %s6784_s15 = sphi %s6848_s15, %s10443_s15  }
   0x8   : > { %p27_p0 = scmp.ge.s32.totalorder %s26_s24, 4  ;;  %p49_p1 = scmp.ne.s32.totalorder %s6788_s16, %s6784_s15 }
   0x9   : > { %p50_p2 = scmp.eq.s32.totalorder %s6816_s23, 0  ;;  %s33_s26 = sadd.s32 1, %s6812_s22 }
   0xa   : > { %s10452_s24 = smov (%p27_p0, %s26_s24), 0  ;;  %s10454_s25 = smov (!%p27_p0, %s29_s25), %s6808_s21 }
   0xb   : > { %p31_p3 = scmp.ge.s32.totalorder %s10454_s25, 2  ;;  %p51_p4 = por %p50_p2, %p49_p1 }
   0xc   : > { %s42_s30 = sadd.s32 1, %s6788_s16  ;;  %p6191_p7 = scmp.ge.s32.totalorder %s6816_s23, 16 }
   0xd   : > { %s10456_s25 = smov (%p31_p3, %s10454_s25), 0  ;;  %s10458_s26 = smov (!%p31_p3, %s33_s26), %s6812_s22 }
   0xe   : > { %p35_p5 = scmp.ge.s32.totalorder %s10458_s26, 2  ;;  %s38_s27 = ssub.s32 %s6808_s21, %s10456_s25 }
  0x10   : > { %s10460_s26 = smov (%p35_p5, %s10458_s26), 0 }
  0x11   : > { %s37_s28 = ssub.s32 %s6812_s22, %s10460_s26  ;;  %179 = sbr.rel (%p6191_p7) target bundleno = 42 (0x2a), region = 20 }
  0x12   : > { %s39_s29 = sor.u32 %s38_s27, %s37_s28 }
  0x13   : > { %p40_p6 = scmp.eq.s32.totalorder %s39_s29, 0 }
  0x15   : > { %s6913_s5 = scalar_select %p40_p6, %s6788_s16, %s42_s30  }
  0x16   : > { %182 = sbr.rel (!%p51_p4) target bundleno = 42 (0x2a), region = 24  ;;  %s184_s6 = sand.u32 (%p51_p4), 1, %s6788_s16  }
  0x17   : > { %s187_s7 = smul.u32 (%p51_p4), 7, %s6808_s21  ;;  %s10021_s0 = sld [smem:[#allocation113_spill]] (%p51_p4) }
  0x18   : > { %s6540_s8 = smul.u32 (%p51_p4), 140, %s184_s6 }
  0x19   : > { %s6541_s9 = smul.u32 (%p51_p4), 70, %s6812_s22 }
  0x1a   : > { %s6927_s27 = scalar_lea.vmem (%p51_p4), [#allocation7], %s6540_s8 }
  0x1b   : > { %s189_s10 = sadd.s32 %s6541_s9, %s187_s7 }
  0x1c   : > { %s6192_s11 = sshll.u32 %s189_s10, 2 }
  0x1d   : > { %s6922_s14 = scalar_lea.vmem %s10021_s0, %s6192_s11 }
  0x1e   : > { %v206_v0 = vld [vmem:[%s6922_s14] sm:$0xff]  ;;  %v208_v1 = vld [vmem:[%s6922_s14 + $0x8] sm:$0xff]  ;;  %v210_v2 = vld [vmem:[%s6922_s14 + $0x10] sm:$0xff] }
  0x1f   : > { %207 = vst [vmem:[%s6927_s27] sm:$0xff] %v206_v0  ;;  %209 = vst [vmem:[%s6927_s27 + $0x8] sm:$0xff] %v208_v1  ;;  %v212_v3 = vld [vmem:[%s6922_s14 + $0x38] sm:$0xff]  ;;  %v214_v4 = vld [vmem:[%s6922_s14 + $0x40] sm:$0xff] }
  0x20   : > { %211 = vst [vmem:[%s6927_s27 + $0x10] sm:$0xff] %v210_v2  ;;  %v216_v5 = vld [vmem:[%s6922_s14 + $0x48] sm:$0xff]  ;;  %213 = vst [vmem:[%s6927_s27 + $0x1c] sm:$0xff] %v212_v3  ;;  %v218_v6 = vld [vmem:[%s6922_s14 + $0x70] sm:$0xff] }
  0x21   : > { %215 = vst [vmem:[%s6927_s27 + $0x24] sm:$0xff] %v214_v4  ;;  %217 = vst [vmem:[%s6927_s27 + $0x2c] sm:$0xff] %v216_v5  ;;  %v220_v7 = vld [vmem:[%s6922_s14 + $0x78] sm:$0xff]  ;;  %v222_v8 = vld [vmem:[%s6922_s14 + $0x80] sm:$0xff] }
  0x22   : > { %219 = vst [vmem:[%s6927_s27 + $0x38] sm:$0xff] %v218_v6  ;;  %221 = vst [vmem:[%s6927_s27 + $0x40] sm:$0xff] %v220_v7  ;;  %v224_v9 = vld [vmem:[%s6922_s14 + $0xa8] sm:$0xff]  ;;  %v226_v10 = vld [vmem:[%s6922_s14 + $0xb0] sm:$0xff] }
  0x23   : > { %223 = vst [vmem:[%s6927_s27 + $0x48] sm:$0xff] %v222_v8  ;;  %v228_v11 = vld [vmem:[%s6922_s14 + $0xb8] sm:$0xff]  ;;  %225 = vst [vmem:[%s6927_s27 + $0x54] sm:$0xff] %v224_v9  ;;  %v230_v12 = vld [vmem:[%s6922_s14 + $0xe0] sm:$0xff] }
  0x24   : > { %227 = vst [vmem:[%s6927_s27 + $0x5c] sm:$0xff] %v226_v10  ;;  %229 = vst [vmem:[%s6927_s27 + $0x64] sm:$0xff] %v228_v11  ;;  %v232_v13 = vld [vmem:[%s6922_s14 + $0xe8] sm:$0xff]  ;;  %v234_v14 = vld [vmem:[%s6922_s14 + $0xf0] sm:$0xff] }
  0x25   : > { %231 = vst [vmem:[%s6927_s27 + $0x70] sm:$0xff] %v230_v12  ;;  %233 = vst [vmem:[%s6927_s27 + $0x78] sm:$0xff] %v232_v13  ;;  %v6193_v15 = vld [vmem:[%s6922_s14 + $0x18] sm:$0xf]  ;;  %v6195_v16 = vld [vmem:[%s6922_s14 + $0x50] sm:$0xf] }
  0x26   : > { %235 = vst [vmem:[%s6927_s27 + $0x80] sm:$0xff] %v234_v14  ;;  %v6197_v17 = vld [vmem:[%s6922_s14 + $0x88] sm:$0xf]  ;;  %6194 = vst [vmem:[%s6927_s27 + $0x18] sm:$0xf] %v6193_v15 }
  0x27   : > { %6196 = vst [vmem:[%s6927_s27 + $0x34] sm:$0xf] %v6195_v16  ;;  %6198 = vst [vmem:[%s6927_s27 + $0x50] sm:$0xf] %v6197_v17  ;;  %v6199_v18 = vld [vmem:[%s6922_s14 + $0xc0] sm:$0xf] }
  0x28   : > { %v6201_v19 = vld [vmem:[%s6922_s14 + $0xf8] sm:$0xf]  ;;  %6200 = vst [vmem:[%s6927_s27 + $0x6c] sm:$0xf] %v6199_v18 }
  0x29   : > { %6202 = vst [vmem:[%s6927_s27 + $0x88] sm:$0xf] %v6201_v19 }
  0x2a PF: > { %p6203_p8 = scmp.ge.s32.totalorder %s6816_s23, 1  ;;  %p276_p9 = scmp.lt.s32.totalorder %s6816_s23, 17 }
  0x2c   : > { %p277_p10 = pnand %p6203_p8, %p276_p9 }
  0x2e   : > { %280 = sbr.rel (%p277_p10) target bundleno = 1353 (0x549), region = 58 }
  0x33   : > { %s283_s28 = sand.u32 1, %s6784_s15   ;;  %s322_s29 = smul.u32 56, %s6792_s17 }
  0x34   : > { %s6542_s30 = smul.u32 140, %s283_s28  ;;  %p335_p11 = scmp.lt.s32.totalorder %s6800_s19, 1 }
  0x35   : > { %p323_p12 = scmp.lt.s32.totalorder %s322_s29, 223  ;;  %s334_s6 = smul.u32 7, %s6796_s18 }
  0x36   : > { %s10464_s19 = smov (!%p335_p11, %s6800_s19), 1  ;;  %s6989_s0 = scalar_lea.vmem [#allocation7], %s6542_s30 }
  0x37   : > { %s10462_s29 = smov (!%p323_p12, %s322_s29), 223  ;;  %p337_p13 = scmp.lt.s32.totalorder %s334_s6, 13 }
  0x38   : > { %s6204_s7 = sshll.u32 %s10462_s29, 2  ;;  %s6205_s8 = sshll.u32 %s10462_s29, 3 }
  0x39   : > { %s6976_s11 = scalar_lea.vmem %s9796_s2, %s6204_s7  ;;  %s6981_s14 = scalar_lea.vmem %s9797_s3, %s6205_s8 }
  0x3a   : > { %s6543_s15 = smul.u32 14, %s10464_s19  ;;  %s10466_s6 = smov (!%p337_p13, %s334_s6), 13 }
  0x3b   : > { %p6206_p0 = scmp.ne.s32.totalorder %s6792_s17, 0 }
  0x3c   : > { %s6983_s27 = sadd.s32 %s6543_s15, %s10466_s6 }
  0x3d   : > { %s341_s29 = scalar_lea.vmem %s9798_s4, %s6983_s27  ;;  %347 = sbr.rel (%p6206_p0) target bundleno = 331 (0x14b), region = 66 }
  0x42   : > { %v368_v20 = vld [vmem:[%s6989_s0 + $0x70] sm:$0xff]  ;;  %vm479_vm0 = vcmask 1043456   ;;  %v369_v21 = vld [vmem:[%s6989_s0 + $0x78] sm:$0xff]  ;;  %v6818_v27 = vmov 0   ;;  %v6627_v28 = vld [vmem:[%s6989_s0 + $0x44] ss:$28 sps:$4 sm:$0xff]  }
  0x43   : > { %v6224_v22 = vcombine.high %v368_v20, %v368_v20  ;;  %v6226_v23 = vcombine.high %v369_v21, %v369_v21  ;;  %v6223_v24 = vcombine.low %v368_v20, %v368_v20  ;;  %v6225_v25 = vcombine.low %v369_v21, %v369_v21  ;;  %v6625_v26 = vld [vmem:[%s6989_s0 + $0x3c] ss:$28 sps:$4 sm:$0xff]   ;;  %533 = vmatprep.mubr.bf16.mxu0 %v6818_v27  ;;  %v6631_v33 = vld [vmem:[%s6989_s0 + $0x4] ss:$28 sps:$4 sm:$0xff]   ;;  %v6633_v34 = vld [vmem:[%s6989_s0 + $0xc] ss:$28 sps:$4 sm:$0xff]  }
  0x44   : > { %586 = vmatprep.mubr.bf16.mxu1 %v6818_v27  ;;  %v6629_v31 = vld [vmem:[%s6989_s0 + $0x38] ss:$28 sps:$4 sm:$0xff]   ;;  %v6630_v32 = vld [vmem:[%s6989_s0 + $0x40] ss:$28 sps:$4 sm:$0xff]   ;;  %v6636_v37 = vld [vmem:[%s6989_s0 + $0x8] ss:$28 sps:$4 sm:$0xff]  }
  0x45   : > { %6230 = vmatprep.subr.msk.bf16.mxu0 %vm479_vm0, %v6224_v22  ;;  %6233 = vmatprep.subr.msk.bf16.mxu1 %vm479_vm0, %v6226_v23  ;;  %v481_v29 = vsel %vm479_vm0, %v6223_v24, 0  ;;  %v487_v30 = vsel %vm479_vm0, %v6225_v25, 0  ;;  %v6635_v35 = vld [vmem:[%s6989_s0] ss:$28 sps:$4 sm:$0xff]   ;;  %v6640_v40 = vld [vmem:[%s6989_s0 + $0x88] ss:$0 sps:$4 sm:$0xff]  }
  0x46   : > { %512 = vmatpush1.bf16.msra.mxu0 %v481_v29  ;;  %565 = vmatpush1.bf16.msra.mxu1 %v487_v30  ;;  %v370_v36 = vld [vmem:[%s6989_s0 + $0x80] sm:$0xff]  ;;  %vm472_vm1 = vcmask 326656   ;;  %v499_v43 = vsel %vm479_vm0, %v6640_v40, 0  ;;  %v6643_v44 = vld [vmem:[%s6989_s0 + $0x4c] ss:$28 sps:$4 sm:$0xff]   ;;  %v6819_v51 = vmov inf  }
  0x47   : > { %513 = vmatprep.subr.bf16.mxu0 %v6625_v26  ;;  %566 = vmatprep.subr.bf16.mxu1 %v6627_v28  ;;  %v6228_v38 = vcombine.high %v370_v36, %v370_v36  ;;  %v6227_v39 = vcombine.low %v370_v36, %v370_v36  ;;  %v6637_v41 = vld [vmem:[%s9795_s1] sm:$0xff]   ;;  %v6645_v45 = vld [vmem:[%s6989_s0 + $0x50] ss:$28 sps:$4 sm:$0xff]   ;;  %993 = vst [vmem:[#allocation4 + $0x30] sm:$0xff] %v6819_v51  ;;  %994 = vst [vmem:[#allocation4] sm:$0xff] %v6819_v51 }
  0x48   : > { %v6641_v46 = vld [vmem:[%s6989_s0 + $0x48] ss:$28 sps:$4 sm:$0xff]   ;;  %v6648_v47 = vld [vmem:[%s6989_s0 + $0x14] ss:$28 sps:$4 sm:$0xff]   ;;  %995 = vst [vmem:[#allocation4 + $0x18] sm:$0xff] %v6819_v51  ;;  %996 = vst [vmem:[#allocation4 + $0x10] sm:$0xff] %v6819_v51 }
  0x49   : > { %v493_v42 = vsel %vm479_vm0, %v6227_v39, 0  ;;  %v6649_v48 = vld [vmem:[%s6989_s0 + $0x18] ss:$28 sps:$4 sm:$0xff]   ;;  %v6644_v49 = vld [vmem:[%s9795_s1 + $0x8] sm:$0xff]   ;;  %997 = vst [vmem:[#allocation4 + $0x8] sm:$0xff] %v6819_v51  ;;  %998 = vst [vmem:[#allocation4 + $0x20] sm:$0xff] %v6819_v51 }
  0x4a   : > { %514 = vmatpush1.bf16.msra.mxu0 %v6629_v31  ;;  %567 = vmatpush1.bf16.msra.mxu1 %v6630_v32  ;;  %v6646_v50 = vld [vmem:[%s6989_s0 + $0x10] ss:$28 sps:$4 sm:$0xff]   ;;  %999 = vst [vmem:[#allocation4 + $0x28] sm:$0xff] %v6819_v51  ;;  %1000 = vst [vmem:[#allocation5] sm:$0xff] %v6819_v51 }
  0x4b   : > { %515 = vmatprep.subr.bf16.mxu0 %v6631_v33  ;;  %568 = vmatprep.subr.bf16.mxu1 %v6633_v34  ;;  %1001 = vst [vmem:[#allocation5 + $0x8] sm:$0xff] %v6819_v51  ;;  %1002 = vst [vmem:[#allocation5 + $0x20] sm:$0xff] %v6819_v51 }
  0x4c   : > { %1003 = vst [vmem:[#allocation5 + $0x18] sm:$0xff] %v6819_v51  ;;  %1004 = vst [vmem:[#allocation5 + $0x28] sm:$0xff] %v6819_v51 }
  0x4d   : > { %1005 = vst [vmem:[#allocation5 + $0x30] sm:$0xff] %v6819_v51  ;;  %1006 = vst [vmem:[#allocation5 + $0x10] sm:$0xff] %v6819_v51 }
  0x4e   : > { %516 = vmatpush1.bf16.msra.mxu0 %v6635_v35  ;;  %569 = vmatpush1.bf16.msra.mxu1 %v6636_v37  ;;  %1007 = vst [vmem:[#allocation6] sm:$0xff] %v6819_v51  ;;  %1008 = vst [vmem:[#allocation6 + $0x8] sm:$0xff] %v6819_v51 }
  0x4f   : > { %6236 = vmatprep.subr.msk.bf16.mxu0 %vm479_vm0, %v6228_v38  ;;  %6539 = vmatprep.subr.msk.bf16.mxu1 %vm479_vm0, %v6640_v40  ;;  %1009 = vst [vmem:[#allocation6 + $0x28] sm:$0xff] %v6819_v51  ;;  %1010 = vst [vmem:[#allocation6 + $0x20] sm:$0xff] %v6819_v51 }
  0x50   : > { %1011 = vst [vmem:[#allocation6 + $0x18] sm:$0xff] %v6819_v51  ;;  %1012 = vst [vmem:[#allocation6 + $0x10] sm:$0xff] %v6819_v51 }
  0x51   : > { %6231 = vmatmul.mubr.msk.bf16.vlgmr.msra.gmra.mxu0 %vm472_vm1, %v6637_v41  ;;  %6234 = vmatmul.mubr.msk.bf16.vlgmr.msra.gmra.mxu1 %vm472_vm1, %v6637_v41  ;;  %1013 = vst [vmem:[#allocation6 + $0x30] sm:$0xff] %v6819_v51 }
  0x52   : > { %618 = vmatpush1.bf16.msra.mxu0 %v493_v42  ;;  %6466 = vmatpush3.bf16.msra.mxu1 %v499_v43 }
  0x53   : > { %619 = vmatprep.subr.bf16.mxu0 %v6643_v44  ;;  %543 = vmatprep.mubr.bf16.mxu0 %v6818_v27 }
  0x54   : > { %596 = vmatprep.mubr.bf16.mxu1 %v6818_v27  ;;  %6467 = vmatprep.subr.bf16.mxu1 %v6645_v45 }
  0x56   : > { %620 = vmatpush1.bf16.msra.mxu0 %v6641_v46  ;;  %6468 = vmatpush3.bf16.msra.mxu1 %v6645_v45 }
  0x57   : > { %621 = vmatprep.subr.bf16.mxu0 %v6648_v47  ;;  %6469 = vmatprep.subr.bf16.mxu1 %v6649_v48 }
  0x59   : > { %6232 = vmatmul.mubr.msk.bf16.gmra.mxu0 %vm472_vm1, %v6644_v49  ;;  %6235 = vmatmul.mubr.msk.bf16.gmra.mxu1 %vm472_vm1, %v6644_v49 }
  0x5a   : > { %622 = vmatpush1.bf16.msra.mxu0 %v6646_v50  ;;  %6470 = vmatpush3.bf16.msra.mxu1 %v6649_v48 }
  0x5b   : > { %639 = vmatprep.mubr.bf16.mxu0 %v6818_v27  ;;  %6471 = vmatprep.mubr.msk.bf16.mxu1 %vm472_vm1, %v6637_v41 }
  0x61   : > { %6237 = vmatmul.mubr.msk.bf16.vlgmr.msra.gmra.mxu0 %vm472_vm1, %v6637_v41  ;;  %6472 = vmatmul.mubr.msk.bf16.vlgmr.msra.gmra.mxu1 %vm472_vm1, %v6644_v49 }
  0x62   : > { %649 = vmatprep.mubr.bf16.mxu0 %v6818_v27 }
  0x69   : > { %6238 = vmatmul.mubr.msk.bf16.gmra.mxu0 %vm472_vm1, %v6644_v49 }
 0x111   : > { %v535_v52 = vpop.f32.mrf.mxu0  ;;  %v588_v53 = vpop.f32.mrf.mxu1 }
 0x112   : > { %v863_v54 = vmul.f32 -2.0, %v588_v53  ;;  %v861_v57 = vmul.f32 -2.0, %v535_v52  ;;  %v711_v60 = vmul.f32 %v588_v53, %v588_v53  ;;  %v709_v63 = vmul.f32 %v535_v52, %v535_v52 }
 0x113   : > { %v537_v55 = vpop.f32.mrf.mxu0  ;;  %v590_v56 = vpop.f32.mrf.mxu1 }
 0x114   : > { %v862_v58 = vmul.f32 -2.0, %v537_v55  ;;  %v864_v59 = vmul.f32 -2.0, %v590_v56  ;;  %v710_v3 = vmul.f32 %v537_v55, %v537_v55  ;;  %v712_v4 = vmul.f32 %v590_v56, %v590_v56 }
 0x115   : > { %v539_v61 = vpop.f32.mrf.mxu0  ;;  %v592_v62 = vpop.f32.mrf.mxu1 }
 0x116   : > { %v6414_v0 = vpack.c.bf16 %v862_v58, %v861_v57  ;;  %v6415_v1 = vpack.c.bf16 %v864_v59, %v863_v54  ;;  %v716_v2 = vmul.f32 %v539_v61, %v539_v61  ;;  %v718_v5 = vmul.f32 %v592_v62, %v592_v62 }
 0x117   : > { %v870_v6 = vmul.f32 -2.0, %v592_v62  ;;  %v541_v7 = vpop.f32.mrf.mxu0  ;;  %v594_v8 = vpop.f32.mrf.mxu1  ;;  %v868_v9 = vmul.f32 -2.0, %v539_v61 }
 0x118   : > { %977 = vst [vmem:[#allocation2] sm:$0xff] %v6414_v0  ;;  %978 = vst [vmem:[#allocation2 + $0x8] sm:$0xff] %v6415_v1  ;;  %v717_v10 = vmul.f32 %v541_v7, %v541_v7  ;;  %v869_v11 = vmul.f32 -2.0, %v541_v7  ;;  %v719_v12 = vmul.f32 %v594_v8, %v594_v8  ;;  %v755_v13 = vadd.f32 %v718_v5, %v711_v60 }
 0x119   : > { %v871_v14 = vmul.f32 -2.0, %v594_v8  ;;  %v545_v15 = vpop.f32.mrf.mxu0  ;;  %v598_v16 = vpop.f32.mrf.mxu1  ;;  %v737_v17 = vadd.f32 %v716_v2, %v709_v63 }
 0x11a   : > { %v746_v18 = vadd.f32 %v717_v10, %v710_v3  ;;  %v6418_v19 = vpack.c.bf16 %v869_v11, %v868_v9  ;;  %v723_v20 = vmul.f32 %v545_v15, %v545_v15  ;;  %v764_v21 = vadd.f32 %v719_v12, %v712_v4 }
 0x11b   : > { %v6419_v22 = vpack.c.bf16 %v871_v14, %v870_v6  ;;  %v725_v23 = vmul.f32 %v598_v16, %v598_v16  ;;  %v877_v24 = vmul.f32 -2.0, %v598_v16  ;;  %v547_v25 = vpop.f32.mrf.mxu0  ;;  %v600_v26 = vpop.f32.mrf.mxu1  ;;  %v875_v27 = vmul.f32 -2.0, %v545_v15 }
 0x11c   : > { %981 = vst [vmem:[#allocation2 + $0x1c] sm:$0xff] %v6418_v19  ;;  %v724_v28 = vmul.f32 %v547_v25, %v547_v25  ;;  %v876_v29 = vmul.f32 -2.0, %v547_v25  ;;  %v726_v30 = vmul.f32 %v600_v26, %v600_v26  ;;  %v738_v31 = vadd.f32 %v737_v17, %v723_v20 }
 0x11d   : > { %982 = vst [vmem:[#allocation2 + $0x24] sm:$0xff] %v6419_v22  ;;  %v756_v32 = vadd.f32 %v755_v13, %v725_v23  ;;  %v878_v33 = vmul.f32 -2.0, %v600_v26  ;;  %v549_v34 = vpop.f32.mrf.mxu0  ;;  %v602_v35 = vpop.f32.mrf.mxu1 }
 0x11e   : > { %v747_v36 = vadd.f32 %v746_v18, %v724_v28  ;;  %v6422_v37 = vpack.c.bf16 %v876_v29, %v875_v27  ;;  %v765_v38 = vadd.f32 %v764_v21, %v726_v30  ;;  %v730_v39 = vmul.f32 %v549_v34, %v549_v34 }
 0x11f   : > { %v6423_v40 = vpack.c.bf16 %v878_v33, %v877_v24  ;;  %v882_v41 = vmul.f32 -2.0, %v549_v34  ;;  %v732_v42 = vmul.f32 %v602_v35, %v602_v35  ;;  %v884_v43 = vmul.f32 -2.0, %v602_v35  ;;  %v551_v44 = vpop.f32.mrf.mxu0  ;;  %v604_v45 = vpop.f32.mrf.mxu1 }
 0x120   : > { %985 = vst [vmem:[#allocation2 + $0x38] sm:$0xff] %v6422_v37  ;;  %v739_v46 = vadd.f32 %v738_v31, %v730_v39  ;;  %v731_v47 = vmul.f32 %v551_v44, %v551_v44  ;;  %v883_v48 = vmul.f32 -2.0, %v551_v44  ;;  %v733_v49 = vmul.f32 %v604_v45, %v604_v45 }
 0x121   : > { %986 = vst [vmem:[#allocation2 + $0x40] sm:$0xff] %v6423_v40  ;;  %v757_v50 = vadd.f32 %v756_v32, %v732_v42  ;;  %v885_v51 = vmul.f32 -2.0, %v604_v45  ;;  %v641_v52 = vpop.f32.mrf.mxu0  ;;  %v6473_v53 = vpop.f32.mrf.mxu1 }
 0x122   : > { %v748_v54 = vadd.f32 %v747_v36, %v731_v47  ;;  %v6426_v55 = vpack.c.bf16 %v883_v48, %v882_v41  ;;  %v766_v56 = vadd.f32 %v765_v38, %v733_v49  ;;  %v740_v60 = vrot.slane %v739_v46, 4 }
 0x123   : > { %v6427_v57 = vpack.c.bf16 %v885_v51, %v884_v43  ;;  %v643_v58 = vpop.f32.mrf.mxu0  ;;  %v694_v59 = vpop.f32.mrf.mxu1  ;;  %v758_v61 = vrot.slane %v757_v50, 4  ;;  %v865_v0 = vmul.f32 -2.0, %v641_v52  ;;  %v881_v1 = vmul.f32 -2.0, %v6473_v53 }
 0x124   : > { %v749_v62 = vrot.slane %v748_v54, 4  ;;  %989 = vst [vmem:[#allocation2 + $0x54] sm:$0xff] %v6426_v55  ;;  %v767_v63 = vrot.slane %v766_v56, 4  ;;  %v866_v2 = vmul.f32 -2.0, %v643_v58  ;;  %v867_v7 = vmul.f32 -2.0, %v694_v59 }
 0x125   : > { %990 = vst [vmem:[#allocation2 + $0x5c] sm:$0xff] %v6427_v57  ;;  %v645_v3 = vpop.f32.mrf.mxu0  ;;  %v6474_v4 = vpop.f32.mrf.mxu1  ;;  %v6425_v5 = vpack.c.bf16 %v881_v1, %v881_v1  ;;  %v741_v9 = vadd.f32 %v740_v60, %v739_v46  ;;  %v759_v11 = vadd.f32 %v758_v61, %v757_v50  ;;  %v713_v16 = vmul.f32 %v641_v52, %v641_v52 }
 0x126   : > { %v6416_v6 = vpack.c.bf16 %v866_v2, %v865_v0  ;;  %v750_v10 = vadd.f32 %v749_v62, %v748_v54  ;;  %v768_v12 = vadd.f32 %v767_v63, %v766_v56  ;;  %v6417_v13 = vpack.c.bf16 %v867_v7, %v867_v7 }
 0x127   : > { %v647_v8 = vpop.f32.mrf.mxu0  ;;  %988 = vst [vmem:[#allocation2 + $0x50] sm:$0xf] %v6425_v5  ;;  %v697_v14 = vpop.f32.mrf.mxu1  ;;  %v729_v17 = vmul.f32 %v6473_v53, %v6473_v53  ;;  %v715_v18 = vmul.f32 %v694_v59, %v694_v59  ;;  %v720_v19 = vmul.f32 %v645_v3, %v645_v3  ;;  %v714_v20 = vmul.f32 %v643_v58, %v643_v58 }
 0x128   : > { %979 = vst [vmem:[#allocation2 + $0x10] sm:$0xff] %v6416_v6  ;;  %980 = vst [vmem:[#allocation2 + $0x18] sm:$0xf] %v6417_v13  ;;  %v872_v21 = vmul.f32 -2.0, %v645_v3  ;;  %v888_v22 = vmul.f32 -2.0, %v6474_v4  ;;  %v873_v23 = vmul.f32 -2.0, %v647_v8  ;;  %v721_v27 = vmul.f32 %v647_v8, %v647_v8 }
 0x129   : > { %v651_v15 = vpop.f32.mrf.mxu0  ;;  %v742_v25 = vrot.slane %v741_v9, 2  ;;  %v751_v26 = vrot.slane %v750_v10, 2  ;;  %v722_v28 = vmul.f32 %v697_v14, %v697_v14  ;;  %v760_v29 = vrot.slane %v759_v11, 2 }
 0x12a   : > { %v769_v30 = vrot.slane %v768_v12, 2  ;;  %v6429_v31 = vpack.c.bf16 %v888_v22, %v888_v22  ;;  %v6420_v32 = vpack.c.bf16 %v873_v23, %v872_v21  ;;  %v773_v34 = vadd.f32 %v720_v19, %v713_v16 }
 0x12b   : > { %v653_v24 = vpop.f32.mrf.mxu0  ;;  %v736_v35 = vmul.f32 %v6474_v4, %v6474_v4  ;;  %v791_v36 = vadd.f32 %v722_v28, %v715_v18  ;;  %v874_v37 = vmul.f32 -2.0, %v697_v14  ;;  %v727_v38 = vmul.f32 %v651_v15, %v651_v15 }
 0x12c   : > { %992 = vst [vmem:[#allocation2 + $0x6c] sm:$0xf] %v6429_v31  ;;  %983 = vst [vmem:[#allocation2 + $0x2c] sm:$0xff] %v6420_v32  ;;  %v879_v39 = vmul.f32 -2.0, %v651_v15  ;;  %v728_v40 = vmul.f32 %v653_v24, %v653_v24  ;;  %v880_v41 = vmul.f32 -2.0, %v653_v24  ;;  %v752_v42 = vadd.f32 %v751_v26, %v750_v10 }
 0x12d   : > { %v655_v33 = vpop.f32.mrf.mxu0  ;;  %v782_v43 = vadd.f32 %v721_v27, %v714_v20  ;;  %v792_v44 = vadd.f32 %v791_v36, %v729_v17  ;;  %v6421_v45 = vpack.c.bf16 %v874_v37, %v874_v37  ;;  %v770_v47 = vadd.f32 %v769_v30, %v768_v12 }
 0x12e   : > { %v774_v48 = vadd.f32 %v773_v34, %v727_v38  ;;  %v6424_v49 = vpack.c.bf16 %v880_v41, %v879_v39  ;;  %v734_v50 = vmul.f32 %v655_v33, %v655_v33  ;;  %v743_v51 = vadd.f32 %v742_v25, %v741_v9 }
 0x12f   : > { %v657_v46 = vpop.f32.mrf.mxu0  ;;  %v761_v52 = vadd.f32 %v760_v29, %v759_v11  ;;  %v793_v53 = vadd.f32 %v792_v44, %v736_v35  ;;  %984 = vst [vmem:[#allocation2 + $0x34] sm:$0xf] %v6421_v45  ;;  %v783_v54 = vadd.f32 %v782_v43, %v728_v40  ;;  %v886_v56 = vmul.f32 -2.0, %v655_v33 }
 0x130   : > { %987 = vst [vmem:[#allocation2 + $0x48] sm:$0xff] %v6424_v49  ;;  %v775_v55 = vadd.f32 %v774_v48, %v734_v50  ;;  %v735_v57 = vmul.f32 %v657_v46, %v657_v46  ;;  %v887_v58 = vmul.f32 -2.0, %v657_v46  ;;  %v753_v59 = vrot.slane %v752_v42, 1 }
 0x131   : > { %v6820_v60 = vmov 1966171168   ;;  %v813_v62 = vlaneseq  ;;  %v794_v63 = vrot.slane %v793_v53, 4  ;;  %v771_v0 = vrot.slane %v770_v47, 1 }
 0x132   : > { %v811_v61 = vunpack.c.l.s4 %v6820_v60  ;;  %v776_v1 = vrot.slane %v775_v55, 4  ;;  %v784_v2 = vadd.f32 %v783_v54, %v735_v57  ;;  %v6428_v3 = vpack.c.bf16 %v887_v58, %v886_v56 }
 0x133   : > { %v744_v4 = vrot.slane %v743_v51, 1  ;;  %v795_v5 = vadd.f32 %v794_v63, %v793_v53  ;;  %v762_v6 = vrot.slane %v761_v52, 1  ;;  %v754_v9 = vadd.f32 %v753_v59, %v752_v42 }
 0x134   : > { %v777_v7 = vadd.f32 %v776_v1, %v775_v55  ;;  %v785_v8 = vrot.slane %v784_v2, 4  ;;  %991 = vst [vmem:[#allocation2 + $0x64] sm:$0xff] %v6428_v3  ;;  %v812_v10 = vunpack.c.0.s8 %v811_v61  ;;  %v814_v11 = vshrl.u32 %v813_v62, 7 }
 0x135   : > { %v796_v12 = vrot.slane %v795_v5, 2  ;;  %v772_v13 = vadd.f32 %v771_v0, %v770_v47  ;;  %v745_v16 = vadd.f32 %v744_v4, %v743_v51  ;;  %v763_v18 = vadd.f32 %v762_v6, %v761_v52 }
 0x136   : > { %v778_v14 = vrot.slane %v777_v7, 2  ;;  %v786_v15 = vadd.f32 %v785_v8, %v784_v2  ;;  %v815_v22 = vsub.s32 %v812_v10, %v814_v11  ;;  %vm858_vm2 = vcmp.lt.s32.totalorder %v813_v62, 896 }
 0x137   : > { %v797_v17 = vadd.f32 %v796_v12, %v795_v5  ;;  %v807_v21 = vcombine.low %v745_v16, %v754_v9  ;;  %v808_v23 = vcombine.low %v763_v18, %v772_v13 }
 0x138   : > { %v779_v19 = vadd.f32 %v778_v14, %v777_v7  ;;  %v787_v20 = vrot.slane %v786_v15, 2 }
 0x139   : > { %v798_v24 = vrot.slane %v797_v17, 1  ;;  %v816_v28 = vrot.slane %v807_v21, %v815_v22  ;;  %v823_v29 = vrot.slane %v808_v23, %v815_v22 }
 0x13a   : > { %v780_v25 = vrot.slane %v779_v19, 1  ;;  %v788_v26 = vadd.f32 %v787_v20, %v786_v15 }
 0x13b   : > { %v799_v30 = vadd.f32 %v798_v24, %v797_v17  ;;  %v838_v34 = vcombine.low %v816_v28, %v823_v29 }
 0x13c   : > { %v789_v27 = vrot.slane %v788_v26, 1  ;;  %v781_v31 = vadd.f32 %v780_v25, %v779_v19 }
 0x13d   : > { %v837_v35 = vrot.slane %v799_v30, %v815_v22  ;;  %v846_v38 = vrot.slane %v838_v34, %v815_v22 }
 0x13e   : > { %v790_v32 = vadd.f32 %v789_v27, %v788_v26 }
 0x140   : > { %v809_v33 = vcombine.low %v781_v31, %v790_v32 }
 0x142   : > { %v830_v36 = vrot.slane %v809_v33, %v815_v22 }
 0x144   : > { %v839_v37 = vcombine.low %v830_v36, %v837_v35 }
 0x146   : > { %v853_v39 = vrot.slane %v839_v37, %v815_v22 }
 0x148   : > { %v854_v40 = vcombine.low %v846_v38, %v853_v39 }
 0x14a   : > { %860 = vst.msk [vmem:[#allocation3] sm:$0x7f] %vm858_vm2, %v854_v40 }
 0x14b PF: > { %v1016_v41 = vld [vmem:[%s6981_s14 + $0x10] sm:$0xff]  ;;  %v1014_v42 = vld [vmem:[%s6981_s14] sm:$0xff]  ;;  %v9803_v43 = vmov 0   ;;  %v6652_v44 = vld [vmem:[#allocation2 + $0x3c] ss:$28 sps:$4 sm:$0xff]   ;;  %vm1354_vm3 = vcmask 261120  }
 0x14c   : > { %6651 = vset.pattern.permute.xlu1 %v9803_v43  ;;  %6650 = vset.pattern.permute.xlu0 %v9803_v43  ;;  %v6654_v45 = vld [vmem:[#allocation2 + $0x38] ss:$28 sps:$4 sm:$0xff]   ;;  %v1015_v47 = vld [vmem:[%s6981_s14 + $0x8] sm:$0xff]  ;;  %v6655_v48 = vld [vmem:[#allocation2 + $0x4] ss:$28 sps:$4 sm:$0xff]   ;;  %p6411_p1 = scmp.ne.s32.totalorder %s6792_s17, 3 }
 0x14d   : > { %2647 = vperm.xlu1 %6651, %v1016_v41   ;;  %2637 = vperm.xlu0 %6650, %v1014_v42   ;;  %v1017_v46 = vld [vmem:[%s6981_s14 + $0x18] sm:$0xff]  ;;  %v1019_v50 = vld [vmem:[%s6981_s14 + $0x28] sm:$0xff]  ;;  %v1018_v51 = vld [vmem:[%s6981_s14 + $0x20] sm:$0xff] }
 0x14e   : > { %1451 = vmatprep.subr.bf16.mxu0 %v6652_v44  ;;  %6535 = vmatprep.subr.bf16.mxu1 %v6652_v44  ;;  %v6657_v49 = vld [vmem:[#allocation2] ss:$28 sps:$4 sm:$0xff]   ;;  %v7046_v53 = vld [vmem:[%s6976_s11 + $0xa8] sm:$0xff]   ;;  %v1020_v59 = vld [vmem:[%s6981_s14 + $0x30] sm:$0xff] }
 0x14f   : > { %1452 = vmatpush1.bf16.msra.mxu0 %v6654_v45  ;;  %6537 = vmatpush1.bf16.msra.mxu1 %v6654_v45  ;;  %v7041_v52 = vld [vmem:[%s6976_s11] sm:$0xff]   ;;  %v6665_v57 = vld [vmem:[#allocation2 + $0x4c] ss:$28 sps:$4 sm:$0xff]   ;;  %v1021_v58 = vld [vmem:[%s6981_s14 + $0x38] sm:$0xff] }
 0x150   : > { %1453 = vmatprep.subr.bf16.mxu0 %v6655_v48  ;;  %6536 = vmatprep.subr.bf16.mxu1 %v6655_v48  ;;  %v6662_v54 = vld [vmem:[#allocation2 + $0x44] ss:$28 sps:$4 sm:$0xff]   ;;  %v1023_v60 = vld [vmem:[%s6981_s14 + $0x48] sm:$0xff]  ;;  %v6667_v63 = vld [vmem:[%s6976_s11 + $0xb0] sm:$0xff]  }
 0x151   : > { %2652 = vperm.xlu1 %6651, %v1017_v46   ;;  %2642 = vperm.xlu0 %6650, %v1015_v47   ;;  %v6660_v55 = vld [vmem:[#allocation2 + $0x40] ss:$28 sps:$4 sm:$0xff]   ;;  %v6663_v56 = vld [vmem:[#allocation2 + $0x48] ss:$28 sps:$4 sm:$0xff]   ;;  %v1024_v1 = vld [vmem:[%s6981_s14 + $0x50] sm:$0xff] }
 0x152   : > { %1471 = vmatprep.mubr.bf16.mxu0 %v9803_v43  ;;  %1681 = vmatprep.mubr.bf16.mxu1 %v9803_v43  ;;  %v1022_v61 = vld [vmem:[%s6981_s14 + $0x40] sm:$0xff]  ;;  %v7058_v62 = vld [vmem:[%s6976_s11 + $0x8] sm:$0xff]   ;;  %v1025_v0 = vld [vmem:[%s6981_s14 + $0x58] sm:$0xff] }
 0x153   : > { %1454 = vmatpush1.bf16.msra.mxu0 %v6657_v49  ;;  %6538 = vmatpush1.bf16.msra.mxu1 %v6657_v49  ;;  %v6672_v2 = vld [vmem:[#allocation2 + $0x8] ss:$28 sps:$4 sm:$0xff]   ;;  %v7072_v6 = vld [vmem:[%s6976_s11 + $0x10] sm:$0xff]   ;;  %v6669_v7 = vld [vmem:[%s6976_s11 + $0xb8] sm:$0xff]  }
 0x154   : > { %1764 = vmatprep.subr.bf16.mxu1 %v6662_v54  ;;  %2077 = vmatprep.subr.bf16.mxu0 %v6665_v57  ;;  %v1027_v3 = vld [vmem:[%s6981_s14 + $0x68] sm:$0xff]  ;;  %v1026_v4 = vld [vmem:[%s6981_s14 + $0x60] sm:$0xff]  ;;  %v1029_v8 = vld [vmem:[%s6981_s14 + $0x78] sm:$0xff] }
 0x155   : > { %2662 = vperm.xlu1 %6651, %v1019_v50   ;;  %2657 = vperm.xlu0 %6650, %v1018_v51   ;;  %v6674_v5 = vld [vmem:[#allocation2 + $0xc] ss:$28 sps:$4 sm:$0xff]   ;;  %v1028_v9 = vld [vmem:[%s6981_s14 + $0x70] sm:$0xff]  ;;  %v1030_v11 = vld [vmem:[%s6981_s14 + $0x80] sm:$0xff] }
 0x156   : > { %6299 = vmatmul.mubr.msk.bf16.vlgmr.msra.gmra.mxu0 %vm1354_vm3, %v7041_v52  ;;  %6320 = vmatmul.mubr.msk.bf16.vlgmr.msra.gmra.mxu1 %vm1354_vm3, %v7046_v53  ;;  %v1031_v10 = vld [vmem:[%s6981_s14 + $0x88] sm:$0xff]  ;;  %v7085_v12 = vld [vmem:[%s6976_s11 + $0x18] sm:$0xff]   ;;  %v6671_v13 = vld [vmem:[%s6976_s11 + $0xc0] sm:$0xff]  }
 0x157   : > { %1765 = vmatpush1.bf16.msra.mxu1 %v6660_v55  ;;  %2078 = vmatpush1.bf16.msra.mxu0 %v6663_v56  ;;  %v7088_v14 = vld [vmem:[#allocation2 + $0x50] ss:$28 sps:$4 sm:$0xff]   ;;  %v1033_v15 = vld [vmem:[%s6981_s14 + $0x98] sm:$0xff]  ;;  %v1034_v18 = vld [vmem:[%s6981_s14 + $0xa0] sm:$0xff] }
 0x158   : > { %1481 = vmatprep.mubr.bf16.mxu0 %v9803_v43  ;;  %1691 = vmatprep.mubr.bf16.mxu1 %v9803_v43  ;;  %v1032_v16 = vld [vmem:[%s6981_s14 + $0x90] sm:$0xff]  ;;  %v1035_v17 = vld [vmem:[%s6981_s14 + $0xa8] sm:$0xff]  ;;  %v7101_v19 = vld [vmem:[%s6976_s11 + $0x20] sm:$0xff]  }
 0x159   : > { %2672 = vperm.xlu1 %6651, %v1021_v58   ;;  %2667 = vperm.xlu0 %6650, %v1020_v59   ;;  %v6676_v20 = vld [vmem:[%s6976_s11 + $0xc8] sm:$0xff]   ;;  %v1037_v21 = vld [vmem:[%s6981_s14 + $0xb8] sm:$0xff]  ;;  %v1036_v22 = vld [vmem:[%s6981_s14 + $0xb0] sm:$0xff] }
 0x15a   : > { %1766 = vmatprep.subr.bf16.mxu1 %v6674_v5  ;;  %v6687_v23 = vld [vmem:[#allocation2 + $0x10] ss:$28 sps:$4 sm:$0xff]   ;;  %v1038_v26 = vld [vmem:[%s6981_s14 + $0xc0] sm:$0xff]  ;;  %v1041_v29 = vld [vmem:[%s6981_s14 + $0xd8] sm:$0xff] }
 0x15b   : > { %1767 = vmatpush1.bf16.msra.mxu1 %v6672_v2  ;;  %v6689_v24 = vld [vmem:[#allocation2 + $0x14] ss:$28 sps:$4 sm:$0xff]   ;;  %v1039_v25 = vld [vmem:[%s6981_s14 + $0xc8] sm:$0xff]  ;;  %v1042_v32 = vld [vmem:[%s6981_s14 + $0xe0] sm:$0xff] }
 0x15c   : > { %6475 = vmatprep.subr.bf16.mxu1 %v7088_v14  ;;  %2079 = vmatprep.subr.bf16.mxu0 %v6689_v24  ;;  %v7114_v27 = vld [vmem:[%s6976_s11 + $0x28] sm:$0xff]   ;;  %v6678_v28 = vld [vmem:[%s6976_s11 + $0xd0] sm:$0xff]   ;;  %v6680_v34 = vld [vmem:[%s6976_s11 + $0xd8] sm:$0xff]  }
 0x15d   : > { %2682 = vperm.xlu1 %6651, %v1023_v60   ;;  %2677 = vperm.xlu0 %6650, %v1022_v61   ;;  %v1040_v30 = vld [vmem:[%s6981_s14 + $0xd0] sm:$0xff]  ;;  %v1043_v31 = vld [vmem:[%s6981_s14 + $0xe8] sm:$0xff]  ;;  %v1045_v35 = vld [vmem:[%s6981_s14 + $0xf8] sm:$0xff] }
 0x15e   : > { %6300 = vmatmul.mubr.msk.bf16.gmra.mxu0 %vm1354_vm3, %v7058_v62  ;;  %6321 = vmatmul.mubr.msk.bf16.gmra.mxu1 %vm1354_vm3, %v6667_v63  ;;  %v7127_v33 = vld [vmem:[%s6976_s11 + $0x30] sm:$0xff]   ;;  %v1047_v37 = vld [vmem:[%s6981_s14 + $0x108] sm:$0xff]  ;;  %v1046_v38 = vld [vmem:[%s6981_s14 + $0x100] sm:$0xff] }
 0x15f   : > { %1491 = vmatprep.mubr.bf16.mxu0 %v9803_v43  ;;  %1701 = vmatprep.mubr.bf16.mxu1 %v9803_v43  ;;  %v1044_v36 = vld [vmem:[%s6981_s14 + $0xf0] sm:$0xff]  ;;  %v7140_v39 = vld [vmem:[%s6976_s11 + $0x38] sm:$0xff]   ;;  %v1051_v44 = vld [vmem:[%s6981_s14 + $0x128] sm:$0xff] }
 0x160   : > { %2080 = vmatpush1.bf16.msra.mxu0 %v6687_v23  ;;  %v6699_v40 = vld [vmem:[#allocation2 + $0x18] ss:$28 sps:$4 sm:$0xff]   ;;  %v1050_v45 = vld [vmem:[%s6981_s14 + $0x120] sm:$0xff]  ;;  %v1055_v49 = vld [vmem:[%s6981_s14 + $0x148] sm:$0xff] }
 0x161   : > { %2692 = vperm.xlu1 %6651, %v1025_v0   ;;  %2687 = vperm.xlu0 %6650, %v1024_v1   ;;  %v1049_v41 = vld [vmem:[%s6981_s14 + $0x118] sm:$0xff]  ;;  %v1048_v42 = vld [vmem:[%s6981_s14 + $0x110] sm:$0xff]  ;;  %v7154_v46 = vld [vmem:[%s6976_s11 + $0x40] sm:$0xff]  }
 0x162   : > { %v1053_v47 = vld [vmem:[%s6981_s14 + $0x138] sm:$0xff]  ;;  %v1052_v48 = vld [vmem:[%s6981_s14 + $0x130] sm:$0xff]  ;;  %v1054_v50 = vld [vmem:[%s6981_s14 + $0x140] sm:$0xff] }
 0x163   : > { %v7167_v51 = vld [vmem:[%s6976_s11 + $0x48] sm:$0xff]   ;;  %v1057_v54 = vld [vmem:[%s6981_s14 + $0x158] sm:$0xff]  ;;  %v1056_v55 = vld [vmem:[%s6981_s14 + $0x150] sm:$0xff] }
 0x164   : > { %v1058_v56 = vld [vmem:[%s6981_s14 + $0x160] sm:$0xff]  ;;  %v7179_v57 = vld [vmem:[%s6976_s11 + $0x50] sm:$0xff]   ;;  %v1059_v58 = vld [vmem:[%s6981_s14 + $0x168] sm:$0xff] }
 0x165   : > { %2702 = vperm.xlu1 %6651, %v1027_v3   ;;  %2697 = vperm.xlu0 %6650, %v1026_v4   ;;  %v1060_v59 = vld [vmem:[%s6981_s14 + $0x170] sm:$0xff]  ;;  %v1061_v60 = vld [vmem:[%s6981_s14 + $0x178] sm:$0xff]  ;;  %v1062_v63 = vld [vmem:[%s6981_s14 + $0x180] sm:$0xff] }
 0x166   : > { %6301 = vmatmul.mubr.msk.bf16.gmra.mxu0 %vm1354_vm3, %v7072_v6  ;;  %6322 = vmatmul.mubr.msk.bf16.gmra.mxu1 %vm1354_vm3, %v6669_v7  ;;  %v7191_v61 = vld [vmem:[%s6976_s11 + $0x58] sm:$0xff]   ;;  %v1063_v0 = vld [vmem:[%s6981_s14 + $0x188] sm:$0xff]  ;;  %v1064_v1 = vld [vmem:[%s6981_s14 + $0x190] sm:$0xff] }
 0x167   : > { %1501 = vmatprep.mubr.bf16.mxu0 %v9803_v43  ;;  %1711 = vmatprep.mubr.bf16.mxu1 %v9803_v43  ;;  %v1065_v2 = vld [vmem:[%s6981_s14 + $0x198] sm:$0xff]  ;;  %v7204_v3 = vld [vmem:[%s6976_s11 + $0x60] sm:$0xff]   ;;  %v1067_v5 = vld [vmem:[%s6981_s14 + $0x1a8] sm:$0xff] }
 0x168   : > { %v1066_v4 = vld [vmem:[%s6981_s14 + $0x1a0] sm:$0xff]  ;;  %v1068_v7 = vld [vmem:[%s6981_s14 + $0x1b0] sm:$0xff] }
 0x169   : > { %2712 = vperm.xlu1 %6651, %v1029_v8   ;;  %2707 = vperm.xlu0 %6650, %v1028_v9   ;;  %v1069_v8 = vld [vmem:[%s6981_s14 + $0x1b8] sm:$0xff]  ;;  %v6691_v9 = vld [vmem:[%s6976_s11 + $0x68] sm:$0xff]  }
 0x16d   : > { %2722 = vperm.xlu1 %6651, %v1031_v10   ;;  %2717 = vperm.xlu0 %6650, %v1030_v11   ;;  %v6692_v10 = vld [vmem:[%s6976_s11 + $0x70] sm:$0xff]  }
 0x16e   : > { %6302 = vmatmul.mubr.msk.bf16.gmra.mxu0 %vm1354_vm3, %v7085_v12  ;;  %6323 = vmatmul.mubr.msk.bf16.gmra.mxu1 %vm1354_vm3, %v6671_v13 }
 0x16f   : > { %1511 = vmatprep.mubr.bf16.mxu0 %v9803_v43  ;;  %1721 = vmatprep.mubr.bf16.mxu1 %v9803_v43 }
 0x171   : > { %2732 = vperm.xlu1 %6651, %v1033_v15   ;;  %2727 = vperm.xlu0 %6650, %v1032_v16  }
 0x175   : > { %2742 = vperm.xlu1 %6651, %v1035_v17   ;;  %2737 = vperm.xlu0 %6650, %v1034_v18  }
 0x176   : > { %6303 = vmatmul.mubr.msk.bf16.gmra.mxu0 %vm1354_vm3, %v7101_v19  ;;  %6324 = vmatmul.mubr.msk.bf16.gmra.mxu1 %vm1354_vm3, %v6676_v20  ;;  %v6694_v20 = vld [vmem:[%s6976_s11 + $0x80] sm:$0xff]  }
 0x177   : > { %1521 = vmatprep.mubr.bf16.mxu0 %v9803_v43  ;;  %1731 = vmatprep.mubr.bf16.mxu1 %v9803_v43 }
 0x179   : > { %2752 = vperm.xlu1 %6651, %v1037_v21   ;;  %2747 = vperm.xlu0 %6650, %v1036_v22  }
 0x17d   : > { %2762 = vperm.xlu1 %6651, %v1039_v25   ;;  %2757 = vperm.xlu0 %6650, %v1038_v26   ;;  %v6695_v25 = vld [vmem:[%s6976_s11 + $0x88] sm:$0xff]  }
 0x17e   : > { %6304 = vmatmul.mubr.msk.bf16.gmra.mxu0 %vm1354_vm3, %v7114_v27  ;;  %6325 = vmatmul.mubr.msk.bf16.gmra.mxu1 %vm1354_vm3, %v6678_v28 }
 0x17f   : > { %1531 = vmatprep.mubr.bf16.mxu0 %v9803_v43  ;;  %1741 = vmatprep.mubr.bf16.mxu1 %v9803_v43 }
 0x181   : > { %2772 = vperm.xlu1 %6651, %v1041_v29   ;;  %2767 = vperm.xlu0 %6650, %v1040_v30  }
 0x185   : > { %2782 = vperm.xlu1 %6651, %v1043_v31   ;;  %2777 = vperm.xlu0 %6650, %v1042_v32   ;;  %v7275_v31 = vld [vmem:[%s6976_s11 + $0x90] sm:$0xff]  }
 0x186   : > { %6305 = vmatmul.mubr.msk.bf16.gmra.mxu0 %vm1354_vm3, %v7127_v33  ;;  %6326 = vmatmul.mubr.msk.bf16.gmra.mxu1 %vm1354_vm3, %v6680_v34 }
 0x187   : > { %1541 = vmatprep.mubr.bf16.mxu0 %v9803_v43  ;;  %1784 = vmatprep.mubr.bf16.mxu1 %v9803_v43 }
 0x189   : > { %2792 = vperm.xlu1 %6651, %v1045_v35   ;;  %2787 = vperm.xlu0 %6650, %v1044_v36  }
 0x18d   : > { %2802 = vperm.xlu1 %6651, %v1047_v37   ;;  %2797 = vperm.xlu0 %6650, %v1046_v38   ;;  %v7292_v37 = vld [vmem:[%s6976_s11 + $0x98] sm:$0xff]  }
 0x18e   : > { %6306 = vmatmul.mubr.msk.bf16.gmra.mxu0 %vm1354_vm3, %v7140_v39  ;;  %6327 = vmatmul.mubr.msk.bf16.vlgmr.msra.gmra.mxu1 %vm1354_vm3, %v7041_v52 }
 0x18f   : > { %6476 = vmatpush3.bf16.msra.mxu1 %v7088_v14  ;;  %1551 = vmatprep.mubr.bf16.mxu0 %v9803_v43  ;;  %v6693_v14 = vld [vmem:[%s6976_s11 + $0x78] sm:$0xff]  }
 0x190   : > { %1794 = vmatprep.mubr.bf16.mxu1 %v9803_v43  ;;  %6477 = vmatprep.subr.bf16.mxu1 %v6699_v40 }
 0x191   : > { %2812 = vperm.xlu1 %6651, %v1049_v41   ;;  %2807 = vperm.xlu0 %6650, %v1048_v42  }
 0x193   : > { %6478 = vmatpush3.bf16.msra.mxu1 %v6699_v40 }
 0x195   : > { %2822 = vperm.xlu1 %6651, %v1051_v44   ;;  %2817 = vperm.xlu0 %6650, %v1050_v45   ;;  %v7309_v44 = vld [vmem:[%s6976_s11 + $0xa0] sm:$0xff]  }
 0x196   : > { %6307 = vmatmul.mubr.msk.bf16.gmra.mxu0 %vm1354_vm3, %v7154_v46  ;;  %6328 = vmatmul.mubr.msk.bf16.gmra.mxu1 %vm1354_vm3, %v7058_v62 }
 0x197   : > { %1561 = vmatprep.mubr.bf16.mxu0 %v9803_v43  ;;  %1804 = vmatprep.mubr.bf16.mxu1 %v9803_v43 }
 0x199   : > { %2832 = vperm.xlu1 %6651, %v1053_v47   ;;  %2827 = vperm.xlu0 %6650, %v1052_v48  }
 0x19d   : > { %2842 = vperm.xlu1 %6651, %v1055_v49   ;;  %2837 = vperm.xlu0 %6650, %v1054_v50  }
 0x19e   : > { %6308 = vmatmul.mubr.msk.bf16.gmra.mxu0 %vm1354_vm3, %v7167_v51  ;;  %6329 = vmatmul.mubr.msk.bf16.gmra.mxu1 %vm1354_vm3, %v7072_v6 }
 0x19f   : > { %1571 = vmatprep.mubr.bf16.mxu0 %v9803_v43  ;;  %1814 = vmatprep.mubr.bf16.mxu1 %v9803_v43 }
 0x1a1   : > { %2852 = vperm.xlu1 %6651, %v1057_v54   ;;  %2847 = vperm.xlu0 %6650, %v1056_v55  }
 0x1a5   : > { %2857 = vperm.xlu0 %6650, %v1058_v56   ;;  %2862 = vperm.xlu1 %6651, %v1059_v58  }
 0x1a6   : > { %6309 = vmatmul.mubr.msk.bf16.gmra.mxu0 %vm1354_vm3, %v7179_v57  ;;  %6330 = vmatmul.mubr.msk.bf16.gmra.mxu1 %vm1354_vm3, %v7085_v12 }
 0x1a7   : > { %1581 = vmatprep.mubr.bf16.mxu0 %v9803_v43  ;;  %1824 = vmatprep.mubr.bf16.mxu1 %v9803_v43 }
 0x1a9   : > { %2867 = vperm.xlu0 %6650, %v1060_v59   ;;  %2872 = vperm.xlu1 %6651, %v1061_v60  }
 0x1ad   : > { %2877 = vperm.xlu0 %6650, %v1062_v63   ;;  %2882 = vperm.xlu1 %6651, %v1063_v0   ;;  %v3307_v0 = vld [vmem:[#allocation4 + $0x30] sm:$0xff] }
 0x1ae   : > { %6310 = vmatmul.mubr.msk.bf16.gmra.mxu0 %vm1354_vm3, %v7191_v61  ;;  %6331 = vmatmul.mubr.msk.bf16.gmra.mxu1 %vm1354_vm3, %v7101_v19 }
 0x1af   : > { %1591 = vmatprep.mubr.bf16.mxu0 %v9803_v43  ;;  %1834 = vmatprep.mubr.bf16.mxu1 %v9803_v43 }
 0x1b1   : > { %2887 = vperm.xlu0 %6650, %v1064_v1   ;;  %2892 = vperm.xlu1 %6651, %v1065_v2  }
 0x1b5   : > { %2897 = vperm.xlu0 %6650, %v1066_v4   ;;  %2902 = vperm.xlu1 %6651, %v1067_v5   ;;  %v3314_v4 = vld [vmem:[#allocation5] sm:$0xff] }
 0x1b6   : > { %6311 = vmatmul.mubr.msk.bf16.gmra.mxu0 %vm1354_vm3, %v7204_v3  ;;  %6332 = vmatmul.mubr.msk.bf16.gmra.mxu1 %vm1354_vm3, %v7114_v27 }
 0x1b7   : > { %1601 = vmatprep.mubr.bf16.mxu0 %v9803_v43  ;;  %1844 = vmatprep.mubr.bf16.mxu1 %v9803_v43 }
 0x1b9   : > { %2907 = vperm.xlu0 %6650, %v1068_v7   ;;  %2912 = vperm.xlu1 %6651, %v1069_v8   ;;  %v3308_v7 = vld [vmem:[#allocation4] sm:$0xff] }
 0x1be   : > { %6312 = vmatmul.mubr.msk.bf16.gmra.mxu0 %vm1354_vm3, %v6691_v9  ;;  %6333 = vmatmul.mubr.msk.bf16.gmra.mxu1 %vm1354_vm3, %v7127_v33 }
 0x1bf   : > { %1611 = vmatprep.mubr.bf16.mxu0 %v9803_v43  ;;  %1854 = vmatprep.mubr.bf16.mxu1 %v9803_v43 }
 0x1c6   : > { %6313 = vmatmul.mubr.msk.bf16.gmra.mxu0 %vm1354_vm3, %v6692_v10  ;;  %6334 = vmatmul.mubr.msk.bf16.gmra.mxu1 %vm1354_vm3, %v7140_v39 }
 0x1c7   : > { %1621 = vmatprep.mubr.bf16.mxu0 %v9803_v43  ;;  %1864 = vmatprep.mubr.bf16.mxu1 %v9803_v43 }
 0x1c8   : > { %v7228_v11 = vpop.permute.xlu1 %2647  ;;  %v7230_v13 = vpop.permute.xlu0 %2637 }
 0x1c9   : > { %10022 = vst [vmem:[#allocation8_spill] sm:$0xff] %v7228_v11  ;;  %10023 = vst [vmem:[#allocation9_spill] sm:$0xff] %v7230_v13 }
 0x1cc   : > { %v7233_v15 = vpop.permute.xlu1 %2652  ;;  %v7235_v16 = vpop.permute.xlu0 %2642 }
 0x1cd   : > { %10024 = vst [vmem:[#allocation10_spill] sm:$0xff] %v7233_v15  ;;  %10025 = vst [vmem:[#allocation11_spill] sm:$0xff] %v7235_v16 }
 0x1ce   : > { %6314 = vmatmul.mubr.msk.bf16.gmra.mxu0 %vm1354_vm3, %v6693_v14  ;;  %6335 = vmatmul.mubr.msk.bf16.gmra.mxu1 %vm1354_vm3, %v7154_v46 }
 0x1cf   : > { %1631 = vmatprep.mubr.bf16.mxu0 %v9803_v43  ;;  %1874 = vmatprep.mubr.bf16.mxu1 %v9803_v43 }
 0x1d0   : > { %v7242_v17 = vpop.permute.xlu1 %2662  ;;  %v7244_v18 = vpop.permute.xlu0 %2657 }
 0x1d1   : > { %10026 = vst [vmem:[#allocation12_spill] sm:$0xff] %v7242_v17  ;;  %10027 = vst [vmem:[#allocation13_spill] sm:$0xff] %v7244_v18 }
 0x1d4   : > { %v7247_v21 = vpop.permute.xlu1 %2672  ;;  %v7249_v22 = vpop.permute.xlu0 %2667 }
 0x1d5   : > { %10028 = vst [vmem:[#allocation14_spill] sm:$0xff] %v7247_v21  ;;  %10029 = vst [vmem:[#allocation15_spill] sm:$0xff] %v7249_v22 }
 0x1d6   : > { %6315 = vmatmul.mubr.msk.bf16.gmra.mxu0 %vm1354_vm3, %v6694_v20  ;;  %6336 = vmatmul.mubr.msk.bf16.gmra.mxu1 %vm1354_vm3, %v7167_v51 }
 0x1d7   : > { %1641 = vmatprep.mubr.bf16.mxu0 %v9803_v43  ;;  %1884 = vmatprep.mubr.bf16.mxu1 %v9803_v43 }
 0x1d8   : > { %v7256_v23 = vpop.permute.xlu1 %2682  ;;  %v7258_v24 = vpop.permute.xlu0 %2677 }
 0x1d9   : > { %10030 = vst [vmem:[#allocation16_spill] sm:$0xff] %v7256_v23  ;;  %10031 = vst [vmem:[#allocation17_spill] sm:$0xff] %v7258_v24 }
 0x1dc   : > { %v7261_v26 = vpop.permute.xlu1 %2692  ;;  %v7263_v28 = vpop.permute.xlu0 %2687 }
 0x1dd   : > { %10032 = vst [vmem:[#allocation18_spill] sm:$0xff] %v7261_v26  ;;  %10033 = vst [vmem:[#allocation19_spill] sm:$0xff] %v7263_v28 }
 0x1de   : > { %6316 = vmatmul.mubr.msk.bf16.gmra.mxu0 %vm1354_vm3, %v6695_v25  ;;  %6337 = vmatmul.mubr.msk.bf16.gmra.mxu1 %vm1354_vm3, %v7179_v57 }
 0x1df   : > { %1651 = vmatprep.mubr.bf16.mxu0 %v9803_v43  ;;  %1894 = vmatprep.mubr.bf16.mxu1 %v9803_v43 }
 0x1e0   : > { %v7270_v29 = vpop.permute.xlu1 %2702  ;;  %v7272_v30 = vpop.permute.xlu0 %2697 }
 0x1e1   : > { %10034 = vst [vmem:[#allocation20_spill] sm:$0xff] %v7270_v29  ;;  %10035 = vst [vmem:[#allocation21_spill] sm:$0xff] %v7272_v30 }
 0x1e4   : > { %v7277_v32 = vpop.permute.xlu1 %2712  ;;  %v7279_v34 = vpop.permute.xlu0 %2707 }
 0x1e5   : > { %10036 = vst [vmem:[#allocation22_spill] sm:$0xff] %v7277_v32  ;;  %10037 = vst [vmem:[#allocation23_spill] sm:$0xff] %v7279_v34 }
 0x1e6   : > { %6317 = vmatmul.mubr.msk.bf16.gmra.mxu0 %vm1354_vm3, %v7275_v31  ;;  %6338 = vmatmul.mubr.msk.bf16.gmra.mxu1 %vm1354_vm3, %v7191_v61 }
 0x1e7   : > { %1661 = vmatprep.mubr.bf16.mxu0 %v9803_v43  ;;  %1904 = vmatprep.mubr.bf16.mxu1 %v9803_v43 }
 0x1e8   : > { %v7287_v35 = vpop.permute.xlu1 %2722  ;;  %v7289_v36 = vpop.permute.xlu0 %2717 }
 0x1e9   : > { %10038 = vst [vmem:[#allocation24_spill] sm:$0xff] %v7287_v35  ;;  %10039 = vst [vmem:[#allocation25_spill] sm:$0xff] %v7289_v36 }
 0x1ec   : > { %v7294_v38 = vpop.permute.xlu1 %2732  ;;  %v7296_v40 = vpop.permute.xlu0 %2727 }
 0x1ed   : > { %10040 = vst [vmem:[#allocation26_spill] sm:$0xff] %v7294_v38  ;;  %10041 = vst [vmem:[#allocation27_spill] sm:$0xff] %v7296_v40 }
 0x1ee   : > { %6318 = vmatmul.mubr.msk.bf16.gmra.mxu0 %vm1354_vm3, %v7292_v37  ;;  %6339 = vmatmul.mubr.msk.bf16.gmra.mxu1 %vm1354_vm3, %v7204_v3 }
 0x1ef   : > { %1671 = vmatprep.mubr.bf16.mxu0 %v9803_v43  ;;  %1914 = vmatprep.mubr.bf16.mxu1 %v9803_v43 }
 0x1f0   : > { %v7304_v41 = vpop.permute.xlu1 %2742  ;;  %v7306_v42 = vpop.permute.xlu0 %2737 }
 0x1f1   : > { %10042 = vst [vmem:[#allocation28_spill] sm:$0xff] %v7304_v41  ;;  %10043 = vst [vmem:[#allocation29_spill] sm:$0xff] %v7306_v42 }
 0x1f4   : > { %v7311_v45 = vpop.permute.xlu1 %2752  ;;  %v7313_v47 = vpop.permute.xlu0 %2747 }
 0x1f5   : > { %10044 = vst [vmem:[#allocation30_spill] sm:$0xff] %v7311_v45  ;;  %10045 = vst [vmem:[#allocation31_spill] sm:$0xff] %v7313_v47 }
 0x1f6   : > { %6319 = vmatmul.mubr.msk.bf16.gmra.mxu0 %vm1354_vm3, %v7309_v44  ;;  %6340 = vmatmul.mubr.msk.bf16.gmra.mxu1 %vm1354_vm3, %v6691_v9 }
 0x1f7   : > { %1924 = vmatprep.mubr.bf16.mxu1 %v9803_v43  ;;  %2097 = vmatprep.mubr.bf16.mxu0 %v9803_v43 }
 0x1f8   : > { %v7320_v48 = vpop.permute.xlu0 %2757  ;;  %v7322_v49 = vpop.permute.xlu1 %2762 }
 0x1f9   : > { %10046 = vst [vmem:[#allocation32_spill] sm:$0xff] %v7320_v48  ;;  %10047 = vst [vmem:[#allocation33_spill] sm:$0xff] %v7322_v49 }
 0x1fc   : > { %v7324_v50 = vpop.permute.xlu0 %2767  ;;  %v7329_v54 = vpop.permute.xlu1 %2772 }
 0x1fd   : > { %10048 = vst [vmem:[#allocation34_spill] sm:$0xff] %v7324_v50  ;;  %10049 = vst [vmem:[#allocation35_spill] sm:$0xff] %v7329_v54 }
 0x1fe   : > { %6341 = vmatmul.mubr.msk.bf16.gmra.mxu1 %vm1354_vm3, %v6692_v10  ;;  %6355 = vmatmul.mubr.msk.bf16.vlgmr.msra.gmra.mxu0 %vm1354_vm3, %v7041_v52 }
 0x1ff   : > { %1934 = vmatprep.mubr.bf16.mxu1 %v9803_v43  ;;  %2107 = vmatprep.mubr.bf16.mxu0 %v9803_v43 }
 0x200   : > { %v7333_v55 = vpop.permute.xlu0 %2777  ;;  %v7335_v56 = vpop.permute.xlu1 %2782 }
 0x201   : > { %10050 = vst [vmem:[#allocation36_spill] sm:$0xff] %v7333_v55  ;;  %10051 = vst [vmem:[#allocation37_spill] sm:$0xff] %v7335_v56 }
 0x204   : > { %v7342_v52 = vpop.permute.xlu0 %2787  ;;  %v7344_v58 = vpop.permute.xlu1 %2792 }
 0x205   : > { %10052 = vst [vmem:[#allocation38_spill] sm:$0xff] %v7342_v52  ;;  %10053 = vst [vmem:[#allocation39_spill] sm:$0xff] %v7344_v58  ;;  %v3322_v58 = vld [vmem:[#allocation6 + $0x8] sm:$0xff] }
 0x206   : > { %6342 = vmatmul.mubr.msk.bf16.gmra.mxu1 %vm1354_vm3, %v6693_v14  ;;  %6356 = vmatmul.mubr.msk.bf16.gmra.mxu0 %vm1354_vm3, %v7058_v62 }
 0x207   : > { %1944 = vmatprep.mubr.bf16.mxu1 %v9803_v43  ;;  %2117 = vmatprep.mubr.bf16.mxu0 %v9803_v43 }
 0x208   : > { %v7349_v59 = vpop.permute.xlu0 %2797  ;;  %v7353_v62 = vpop.permute.xlu1 %2802 }
 0x209   : > { %10054 = vst [vmem:[#allocation40_spill] sm:$0xff] %v7349_v59  ;;  %10055 = vst [vmem:[#allocation41_spill] sm:$0xff] %v7353_v62 }
 0x20c   : > { %v7355_v60 = vpop.permute.xlu0 %2807 }
 0x20d   : > { %10056 = vst [vmem:[#allocation42_spill] sm:$0xff] %v7355_v60 }
 0x20e   : > { %6343 = vmatmul.mubr.msk.bf16.gmra.mxu1 %vm1354_vm3, %v6694_v20  ;;  %6357 = vmatmul.mubr.msk.bf16.gmra.mxu0 %vm1354_vm3, %v7072_v6  ;;  %v7362_v6 = vpop.permute.xlu1 %2812  ;;  %v3315_v20 = vld [vmem:[#allocation5 + $0x8] sm:$0xff] }
 0x20f   : > { %1954 = vmatprep.mubr.bf16.mxu1 %v9803_v43  ;;  %2127 = vmatprep.mubr.bf16.mxu0 %v9803_v43  ;;  %10057 = vst [vmem:[#allocation43_spill] sm:$0xff] %v7362_v6 }
 0x210   : > { %v7372_v6 = vpop.permute.xlu0 %2817 }
 0x211   : > { %10058 = vst [vmem:[#allocation44_spill] sm:$0xff] %v7372_v6 }
 0x212   : > { %v7377_v54 = vpop.permute.xlu1 %2822 }
 0x213   : > { %10059 = vst [vmem:[#allocation45_spill] sm:$0xff] %v7377_v54 }
 0x216   : > { %v1473_v63 = vpop.f32.mrf.mxu0  ;;  %v7357_v1 = vpop.f32.mrf.mxu1  ;;  %6344 = vmatmul.mubr.msk.bf16.gmra.mxu1 %vm1354_vm3, %v6695_v25  ;;  %6358 = vmatmul.mubr.msk.bf16.gmra.mxu0 %vm1354_vm3, %v7085_v12 }
 0x217   : > { %v2915_v2 = vadd.f32 %v7230_v13, %v1473_v63  ;;  %1964 = vmatprep.mubr.bf16.mxu1 %v9803_v43  ;;  %2137 = vmatprep.mubr.bf16.mxu0 %v9803_v43  ;;  %v3321_v63 = vld [vmem:[#allocation6] sm:$0xff] }
 0x218   : > { %v1475_v5 = vpop.f32.mrf.mxu0  ;;  %v7367_v8 = vpop.f32.mrf.mxu1 }
 0x219   : > { %v3328_v9 = vmax.f32 %v3307_v0, %v2915_v2  ;;  %v2916_v10 = vadd.f32 %v7230_v13, %v1475_v5  ;;  %v3335_v14 = vmin.f32 %v3307_v0, %v2915_v2 }
 0x21a   : > { %v1477_v25 = vpop.f32.mrf.mxu0  ;;  %v7370_v12 = vpop.f32.mrf.mxu1 }
 0x21b   : > { %v3342_v60 = vmax.f32 %v3314_v4, %v3328_v9  ;;  %v3329_v62 = vmax.f32 %v3308_v7, %v2916_v10  ;;  %v3336_v59 = vmin.f32 %v3308_v7, %v2916_v10  ;;  %v3349_v43 = vmin.f32 %v3314_v4, %v3328_v9 }
 0x21c   : > { %v2922_v52 = vadd.f32 %v7235_v16, %v1477_v25  ;;  %v1479_v56 = vpop.f32.mrf.mxu0  ;;  %v7375_v55 = vpop.f32.mrf.mxu1 }
 0x21d   : > { %v3343_v0 = vmax.f32 %v3315_v20, %v3329_v62  ;;  %v3350_v2 = vmin.f32 %v3315_v20, %v3329_v62  ;;  %v2923_v5 = vadd.f32 %v7235_v16, %v1479_v56  ;;  %v3356_v50 = vmin.f32 %v3321_v63, %v3342_v60 }
 0x21e   : > { %v3363_v49 = vmax.f32 %v3335_v14, %v2922_v52  ;;  %v3370_v6 = vmin.f32 %v3335_v14, %v2922_v52  ;;  %v1483_v48 = vpop.f32.mrf.mxu0  ;;  %v7380_v45 = vpop.f32.mrf.mxu1  ;;  %6345 = vmatmul.mubr.msk.bf16.gmra.mxu1 %vm1354_vm3, %v7275_v31  ;;  %6359 = vmatmul.mubr.msk.bf16.gmra.mxu0 %vm1354_vm3, %v7101_v19  ;;  %v10060_v62 = vmov 0  }
 0x21f   : > { %v3357_v4 = vmin.f32 %v3322_v58, %v3343_v0  ;;  %v3364_v7 = vmax.f32 %v3336_v59, %v2923_v5  ;;  %v3371_v9 = vmin.f32 %v3336_v59, %v2923_v5  ;;  %v2929_v10 = vadd.f32 %v7228_v11, %v1483_v48  ;;  %1974 = vmatprep.mubr.bf16.mxu1 %v10060_v62  ;;  %v7391_v14 = vpop.permute.xlu0 %2827  ;;  %v7396_v5 = vpop.permute.xlu1 %2832 }
 0x220   : > { %v3377_v56 = vmax.f32 %v3349_v43, %v3363_v49  ;;  %v3384_v60 = vmin.f32 %v3349_v43, %v3363_v49  ;;  %v1485_v20 = vpop.f32.mrf.mxu0  ;;  %v7388_v52 = vpop.f32.mrf.mxu1  ;;  %2147 = vmatprep.mubr.bf16.mxu0 %v10060_v62  ;;  %10061 = vst [vmem:[#allocation46_spill] sm:$0xff] %v7391_v14  ;;  %10062 = vst [vmem:[#allocation47_spill] sm:$0xff] %v7396_v5 }
 0x221   : > { %v3378_v31 = vmax.f32 %v3350_v2, %v3364_v7  ;;  %v3385_v25 = vmin.f32 %v3350_v2, %v3364_v7  ;;  %v3398_v63 = vmax.f32 %v3370_v6, %v2929_v10  ;;  %v3405_v19 = vmin.f32 %v3370_v6, %v2929_v10 }
 0x222   : > { %v3391_v58 = vmin.f32 %v3356_v50, %v3377_v56  ;;  %v2930_v59 = vadd.f32 %v7228_v11, %v1485_v20  ;;  %v1487_v0 = vpop.f32.mrf.mxu0  ;;  %v7394_v48 = vpop.f32.mrf.mxu1 }
 0x223   : > { %v3392_v43 = vmin.f32 %v3357_v4, %v3378_v31  ;;  %v3412_v49 = vmax.f32 %v3384_v60, %v3398_v63  ;;  %v3419_v54 = vmin.f32 %v3384_v60, %v3398_v63  ;;  %v2936_v47 = vadd.f32 %v7233_v15, %v1487_v0  ;;  %v7408_v4 = vpop.permute.xlu0 %2837 }
 0x224   : > { %v3399_v41 = vmax.f32 %v3371_v9, %v2930_v59  ;;  %v3406_v42 = vmin.f32 %v3371_v9, %v2930_v59  ;;  %v1489_v14 = vpop.f32.mrf.mxu0  ;;  %v7399_v38 = vpop.f32.mrf.mxu1  ;;  %10063 = vst [vmem:[#allocation48_spill] sm:$0xff] %v7408_v4 }
 0x225   : > { %v3426_v2 = vmin.f32 %v3391_v58, %v3412_v49  ;;  %v3433_v6 = vmax.f32 %v3405_v19, %v2936_v47  ;;  %v3440_v50 = vmin.f32 %v3405_v19, %v2936_v47  ;;  %v2937_v7 = vadd.f32 %v7233_v15, %v1489_v14 }
 0x226   : > { %v3413_v10 = vmax.f32 %v3385_v25, %v3399_v41  ;;  %v3420_v56 = vmin.f32 %v3385_v25, %v3399_v41  ;;  %v1493_v20 = vpop.f32.mrf.mxu0  ;;  %v7402_v40 = vpop.f32.mrf.mxu1  ;;  %6346 = vmatmul.mubr.msk.bf16.gmra.mxu1 %vm1354_vm3, %v7292_v37  ;;  %6360 = vmatmul.mubr.msk.bf16.gmra.mxu0 %vm1354_vm3, %v7114_v27 }
 0x227   : > { %v3447_v9 = vmax.f32 %v3419_v54, %v3433_v6  ;;  %v3454_v60 = vmin.f32 %v3419_v54, %v3433_v6  ;;  %v3434_v31 = vmax.f32 %v3406_v42, %v2937_v7  ;;  %v3441_v63 = vmin.f32 %v3406_v42, %v2937_v7  ;;  %1984 = vmatprep.mubr.bf16.mxu1 %v10060_v62  ;;  %v7415_v37 = vpop.permute.xlu1 %2842 }
 0x228   : > { %v3427_v47 = vmin.f32 %v3392_v43, %v3413_v10  ;;  %v2943_v41 = vadd.f32 %v7244_v18, %v1493_v20  ;;  %v1495_v14 = vpop.f32.mrf.mxu0  ;;  %v7412_v25 = vpop.f32.mrf.mxu1  ;;  %2157 = vmatprep.mubr.bf16.mxu0 %v10060_v62  ;;  %10064 = vst [vmem:[#allocation49_spill] sm:$0xff] %v7415_v37 }
 0x229   : > { %v3461_v19 = vmin.f32 %v3426_v2, %v3447_v9  ;;  %v3448_v27 = vmax.f32 %v3420_v56, %v3434_v31  ;;  %v3455_v58 = vmin.f32 %v3420_v56, %v3434_v31  ;;  %v2944_v59 = vadd.f32 %v7244_v18, %v1495_v14  ;;  %v7423_v2 = vpop.permute.xlu0 %2847 }
 0x22a   : > { %v3468_v54 = vmax.f32 %v3440_v50, %v2943_v41  ;;  %v3475_v0 = vmin.f32 %v3440_v50, %v2943_v41  ;;  %v1497_v42 = vpop.f32.mrf.mxu0  ;;  %v7418_v49 = vpop.f32.mrf.mxu1  ;;  %10065 = vst [vmem:[#allocation50_spill] sm:$0xff] %v7423_v2 }
 0x22b   : > { %v3462_v43 = vmin.f32 %v3427_v47, %v3448_v27  ;;  %v3469_v6 = vmax.f32 %v3441_v63, %v2944_v59  ;;  %v3476_v7 = vmin.f32 %v3441_v63, %v2944_v59  ;;  %v2950_v10 = vadd.f32 %v7242_v17, %v1497_v42 }
 0x22c   : > { %v3482_v20 = vmax.f32 %v3454_v60, %v3468_v54  ;;  %v3489_v4 = vmin.f32 %v3454_v60, %v3468_v54  ;;  %v1499_v5 = vpop.f32.mrf.mxu0  ;;  %v7421_v15 = vpop.f32.mrf.mxu1 }
 0x22d   : > { %v3483_v56 = vmax.f32 %v3455_v58, %v3469_v6  ;;  %v3490_v9 = vmin.f32 %v3455_v58, %v3469_v6  ;;  %v3503_v31 = vmax.f32 %v3475_v0, %v2950_v10  ;;  %v3510_v14 = vmin.f32 %v3475_v0, %v2950_v10  ;;  %v7432_v60 = vpop.permute.xlu1 %2852 }
 0x22e   : > { %v3496_v50 = vmin.f32 %v3461_v19, %v3482_v20  ;;  %v2951_v41 = vadd.f32 %v7242_v17, %v1499_v5  ;;  %v1503_v37 = vpop.f32.mrf.mxu0  ;;  %v7426_v47 = vpop.f32.mrf.mxu1  ;;  %6347 = vmatmul.mubr.msk.bf16.gmra.mxu1 %vm1354_vm3, %v7309_v44  ;;  %6361 = vmatmul.mubr.msk.bf16.gmra.mxu0 %vm1354_vm3, %v7127_v33  ;;  %10066 = vst [vmem:[#allocation51_spill] sm:$0xff] %v7432_v60 }
 0x22f   : > { %v3497_v63 = vmin.f32 %v3462_v43, %v3483_v56  ;;  %v3517_v27 = vmax.f32 %v3489_v4, %v3503_v31  ;;  %v3524_v59 = vmin.f32 %v3489_v4, %v3503_v31  ;;  %v2957_v58 = vadd.f32 %v7249_v22, %v1503_v37  ;;  %1994 = vmatprep.mubr.bf16.mxu1 %v10060_v62 }
 0x230   : > { %v3504_v19 = vmax.f32 %v3476_v7, %v2951_v41  ;;  %v3511_v5 = vmin.f32 %v3476_v7, %v2951_v41  ;;  %v1505_v54 = vpop.f32.mrf.mxu0  ;;  %v7436_v0 = vpop.f32.mrf.mxu1  ;;  %2167 = vmatprep.mubr.bf16.mxu0 %v10060_v62  ;;  %v7444_v37 = vadd.f32 %v7423_v2, %v7357_v1  ;;  %v7457_v1 = vadd.f32 %v7423_v2, %v7367_v8 }
 0x231   : > { %v3531_v44 = vmin.f32 %v3496_v50, %v3517_v27  ;;  %v3538_v42 = vmax.f32 %v3510_v14, %v2957_v58  ;;  %v3545_v6 = vmin.f32 %v3510_v14, %v2957_v58  ;;  %v2958_v33 = vadd.f32 %v7249_v22, %v1505_v54  ;;  %v7446_v7 = vpop.permute.xlu0 %2857 }
 0x232   : > { %v3518_v10 = vmax.f32 %v3490_v9, %v3504_v19  ;;  %v3525_v43 = vmin.f32 %v3490_v9, %v3504_v19  ;;  %v1507_v20 = vpop.f32.mrf.mxu0  ;;  %v7440_v4 = vpop.f32.mrf.mxu1  ;;  %10067 = vst [vmem:[#allocation52_spill] sm:$0xff] %v7444_v37  ;;  %10068 = vst [vmem:[#allocation53_spill] sm:$0xff] %v7446_v7  ;;  %v7453_v9 = vadd.f32 %v7432_v60, %v7370_v12 }
 0x233   : > { %v3552_v56 = vmax.f32 %v3524_v59, %v3538_v42  ;;  %v3559_v31 = vmin.f32 %v3524_v59, %v3538_v42  ;;  %v3539_v41 = vmax.f32 %v3511_v5, %v2958_v33  ;;  %v3546_v17 = vmin.f32 %v3511_v5, %v2958_v33  ;;  %10070 = vst [vmem:[#allocation55_spill] sm:$0xff] %v7457_v1  ;;  %v7459_v19 = vpop.permute.xlu1 %2862 }
 0x234   : > { %v3532_v50 = vmin.f32 %v3497_v63, %v3518_v10  ;;  %v2964_v14 = vadd.f32 %v7247_v21, %v1507_v20  ;;  %v1509_v27 = vpop.f32.mrf.mxu0  ;;  %v7449_v58 = vpop.f32.mrf.mxu1  ;;  %10069 = vst [vmem:[#allocation54_spill] sm:$0xff] %v7453_v9  ;;  %10071 = vst [vmem:[#allocation56_spill] sm:$0xff] %v7459_v19  ;;  %v7470_v8 = vadd.f32 %v7446_v7, %v7380_v45 }
 0x235   : > { %v3566_v54 = vmin.f32 %v3531_v44, %v3552_v56  ;;  %v3553_v59 = vmax.f32 %v3525_v43, %v3539_v41  ;;  %v3560_v42 = vmin.f32 %v3525_v43, %v3539_v41  ;;  %v2965_v63 = vadd.f32 %v7247_v21, %v1509_v27 }
 0x236   : > { %v3573_v5 = vmax.f32 %v3545_v6, %v2964_v14  ;;  %v3580_v33 = vmin.f32 %v3545_v6, %v2964_v14  ;;  %v1513_v10 = vpop.f32.mrf.mxu0  ;;  %v7462_v20 = vpop.f32.mrf.mxu1  ;;  %6348 = vmatmul.mubr.msk.bf16.gmra.mxu1 %vm1354_vm3, %v7046_v53  ;;  %6362 = vmatmul.mubr.msk.bf16.gmra.mxu0 %vm1354_vm3, %v7140_v39  ;;  %10072 = vst [vmem:[#allocation57_spill] sm:$0xff] %v7470_v8 }
 0x237   : > { %v3567_v12 = vmin.f32 %v3532_v50, %v3553_v59  ;;  %v3574_v44 = vmax.f32 %v3546_v17, %v2965_v63  ;;  %v3581_v43 = vmin.f32 %v3546_v17, %v2965_v63  ;;  %v2971_v56 = vadd.f32 %v7258_v24, %v1513_v10  ;;  %2004 = vmatprep.mubr.bf16.mxu1 %v10060_v62  ;;  %v7485_v17 = vpop.permute.xlu0 %2867 }
 0x238   : > { %v3587_v6 = vmax.f32 %v3559_v31, %v3573_v5  ;;  %v3594_v41 = vmin.f32 %v3559_v31, %v3573_v5  ;;  %v1515_v14 = vpop.f32.mrf.mxu0  ;;  %v7474_v27 = vpop.f32.mrf.mxu1  ;;  %2177 = vmatprep.mubr.bf16.mxu0 %v10060_v62  ;;  %v7479_v53 = vadd.f32 %v7459_v19, %v7394_v48  ;;  %v7483_v39 = vadd.f32 %v7432_v60, %v7375_v55 }
 0x239   : > { %10075 = vst [vmem:[#allocation60_spill] sm:$0xff] %v7485_v17  ;;  %v3588_v45 = vmax.f32 %v3560_v42, %v3574_v44  ;;  %v3595_v50 = vmin.f32 %v3560_v42, %v3574_v44  ;;  %v3608_v59 = vmax.f32 %v3580_v33, %v2971_v56  ;;  %v3615_v63 = vmin.f32 %v3580_v33, %v2971_v56  ;;  %v7498_v60 = vpop.permute.xlu1 %2872 }
 0x23a   : > { %10073 = vst [vmem:[#allocation58_spill] sm:$0xff] %v7479_v53  ;;  %10074 = vst [vmem:[#allocation59_spill] sm:$0xff] %v7483_v39  ;;  %v7489_v31 = vadd.f32 %v7459_v19, %v7399_v38  ;;  %v3601_v5 = vmin.f32 %v3566_v54, %v3587_v6  ;;  %v2972_v10 = vadd.f32 %v7258_v24, %v1515_v14  ;;  %v1517_v2 = vpop.f32.mrf.mxu0  ;;  %v7492_v48 = vpop.f32.mrf.mxu1 }
 0x23b   : > { %v7496_v55 = vadd.f32 %v7446_v7, %v7388_v52  ;;  %10078 = vst [vmem:[#allocation63_spill] sm:$0xff] %v7498_v60  ;;  %v3602_v53 = vmin.f32 %v3567_v12, %v3588_v45  ;;  %v3622_v42 = vmax.f32 %v3594_v41, %v3608_v59  ;;  %v3629_v44 = vmin.f32 %v3594_v41, %v3608_v59  ;;  %v7511_v19 = vpop.permute.xlu0 %2877 }
 0x23c   : > { %10076 = vst [vmem:[#allocation61_spill] sm:$0xff] %v7489_v31  ;;  %v2978_v33 = vadd.f32 %v7256_v23, %v1517_v2  ;;  %v7503_v38 = vadd.f32 %v7485_v17, %v7412_v25  ;;  %v3609_v54 = vmax.f32 %v3581_v43, %v2972_v10  ;;  %v3616_v56 = vmin.f32 %v3581_v43, %v2972_v10  ;;  %v1519_v6 = vpop.f32.mrf.mxu0  ;;  %v7505_v14 = vpop.f32.mrf.mxu1 }
 0x23d   : > { %10077 = vst [vmem:[#allocation62_spill] sm:$0xff] %v7496_v55  ;;  %v7509_v52 = vadd.f32 %v7485_v17, %v7402_v40  ;;  %10081 = vst [vmem:[#allocation66_spill] sm:$0xff] %v7511_v19  ;;  %v3636_v12 = vmin.f32 %v3601_v5, %v3622_v42  ;;  %v2979_v2 = vadd.f32 %v7256_v23, %v1519_v6  ;;  %v7524_v40 = vpop.permute.xlu1 %2882 }
 0x23e   : > { %10079 = vst [vmem:[#allocation64_spill] sm:$0xff] %v7503_v38  ;;  %v3643_v41 = vmax.f32 %v3615_v63, %v2978_v33  ;;  %v3650_v45 = vmin.f32 %v3615_v63, %v2978_v33  ;;  %v7516_v25 = vadd.f32 %v7498_v60, %v7418_v49  ;;  %v3623_v59 = vmax.f32 %v3595_v50, %v3609_v54  ;;  %v1523_v10 = vpop.f32.mrf.mxu0  ;;  %v7518_v7 = vpop.f32.mrf.mxu1  ;;  %v6700_v38 = vld [vmem:[%s6976_s11 + $0xb0] sm:$0xff]  }
 0x23f   : > { %10080 = vst [vmem:[#allocation65_spill] sm:$0xff] %v7509_v52  ;;  %v3630_v43 = vmin.f32 %v3595_v50, %v3609_v54  ;;  %6349 = vmatmul.mubr.msk.bf16.gmra.mxu1 %vm1354_vm3, %v6700_v38  ;;  %6363 = vmatmul.mubr.msk.bf16.gmra.mxu0 %vm1354_vm3, %v7154_v46  ;;  %10083 = vst [vmem:[#allocation68_spill] sm:$0xff] %v7524_v40  ;;  %v3644_v42 = vmax.f32 %v3616_v56, %v2979_v2 }
 0x240   : > { %10082 = vst [vmem:[#allocation67_spill] sm:$0xff] %v7516_v25  ;;  %v3657_v63 = vmax.f32 %v3629_v44, %v3643_v41  ;;  %v3664_v5 = vmin.f32 %v3629_v44, %v3643_v41  ;;  %v3651_v33 = vmin.f32 %v3616_v56, %v2979_v2  ;;  %2014 = vmatprep.mubr.bf16.mxu1 %v10060_v62  ;;  %v1525_v46 = vpop.f32.mrf.mxu0  ;;  %v1735_v6 = vpop.f32.mrf.mxu1 }
 0x241   : > { %v7529_v49 = vadd.f32 %v7498_v60, %v7421_v15  ;;  %v7533_v50 = vadd.f32 %v7511_v19, %v7426_v47  ;;  %v3637_v38 = vmin.f32 %v3602_v53, %v3623_v59  ;;  %v2985_v54 = vadd.f32 %v7263_v28, %v1523_v10  ;;  %2187 = vmatprep.mubr.bf16.mxu0 %v10060_v62  ;;  %v7537_v44 = vpop.permute.xlu0 %2887 }
 0x242   : > { %10086 = vst [vmem:[#allocation71_spill] sm:$0xff] %v7537_v44  ;;  %v3671_v56 = vmin.f32 %v3636_v12, %v3657_v63  ;;  %v3658_v41 = vmax.f32 %v3630_v43, %v3644_v42  ;;  %v3665_v2 = vmin.f32 %v3630_v43, %v3644_v42  ;;  %v2986_v17 = vadd.f32 %v7263_v28, %v1525_v46  ;;  %v1527_v10 = vpop.f32.mrf.mxu0  ;;  %v1737_v60 = vpop.f32.mrf.mxu1 }
 0x243   : > { %10084 = vst [vmem:[#allocation69_spill] sm:$0xff] %v7529_v49  ;;  %10085 = vst [vmem:[#allocation70_spill] sm:$0xff] %v7533_v50  ;;  %v7542_v15 = vadd.f32 %v7511_v19, %v7436_v0  ;;  %v7546_v47 = vadd.f32 %v7524_v40, %v7440_v4  ;;  %v3678_v53 = vmax.f32 %v3650_v45, %v2985_v54  ;;  %v6701_v19 = vld [vmem:[%s6976_s11 + $0xb8] sm:$0xff]  }
 0x244   : > { %v3685_v59 = vmin.f32 %v3650_v45, %v2985_v54  ;;  %v3672_v49 = vmin.f32 %v3637_v38, %v3658_v41  ;;  %v3679_v50 = vmax.f32 %v3651_v33, %v2986_v17  ;;  %v3686_v31 = vmin.f32 %v3651_v33, %v2986_v17  ;;  %v1529_v42 = vpop.f32.mrf.mxu0  ;;  %v1739_v45 = vpop.f32.mrf.mxu1 }
 0x245   : > { %10087 = vst [vmem:[#allocation72_spill] sm:$0xff] %v7542_v15  ;;  %10088 = vst [vmem:[#allocation73_spill] sm:$0xff] %v7546_v47  ;;  %v2992_v12 = vadd.f32 %v7261_v26, %v1527_v10  ;;  %v7551_v43 = vadd.f32 %v7524_v40, %v7449_v58  ;;  %v7555_v0 = vadd.f32 %v7537_v44, %v7462_v20  ;;  %v7557_v54 = vpop.permute.xlu1 %2892 }
 0x246   : > { %v3692_v4 = vmax.f32 %v3664_v5, %v3678_v53  ;;  %v3699_v63 = vmin.f32 %v3664_v5, %v3678_v53  ;;  %10091 = vst [vmem:[#allocation76_spill] sm:$0xff] %v7557_v54  ;;  %v3693_v38 = vmax.f32 %v3665_v2, %v3679_v50  ;;  %v3700_v46 = vmin.f32 %v3665_v2, %v3679_v50  ;;  %v1533_v40 = vpop.f32.mrf.mxu0  ;;  %v1743_v20 = vpop.f32.mrf.mxu1 }
 0x247   : > { %10089 = vst [vmem:[#allocation74_spill] sm:$0xff] %v7551_v43  ;;  %10090 = vst [vmem:[#allocation75_spill] sm:$0xff] %v7555_v0  ;;  %v3713_v17 = vmax.f32 %v3685_v59, %v2992_v12  ;;  %v3720_v33 = vmin.f32 %v3685_v59, %v2992_v12  ;;  %v7561_v41 = vadd.f32 %v7537_v44, %v7474_v27  ;;  %6350 = vmatmul.mubr.msk.bf16.gmra.mxu1 %vm1354_vm3, %v6701_v19  ;;  %v7568_v5 = vpop.permute.xlu0 %2897 }
 0x248   : > { %v3706_v58 = vmin.f32 %v3671_v56, %v3692_v4  ;;  %v2993_v10 = vadd.f32 %v7261_v26, %v1529_v42  ;;  %6364 = vmatmul.mubr.msk.bf16.gmra.mxu0 %vm1354_vm3, %v7167_v51  ;;  %10093 = vst [vmem:[#allocation78_spill] sm:$0xff] %v7568_v5  ;;  %v3707_v50 = vmin.f32 %v3672_v49, %v3693_v38  ;;  %v1535_v51 = vpop.f32.mrf.mxu0  ;;  %v1745_v4 = vpop.f32.mrf.mxu1 }
 0x249   : > { %10092 = vst [vmem:[#allocation77_spill] sm:$0xff] %v7561_v41  ;;  %v3727_v2 = vmax.f32 %v3699_v63, %v3713_v17  ;;  %v3734_v53 = vmin.f32 %v3699_v63, %v3713_v17  ;;  %v2999_v59 = vadd.f32 %v7272_v30, %v1533_v40  ;;  %2024 = vmatprep.mubr.bf16.mxu1 %v10060_v62  ;;  %v7581_v63 = vpop.permute.xlu1 %2902 }
 0x24a   : > { %v7574_v27 = vadd.f32 %v7557_v54, %v7492_v48  ;;  %v7578_v56 = vadd.f32 %v7557_v54, %v7505_v14  ;;  %v3714_v19 = vmax.f32 %v3686_v31, %v2993_v10  ;;  %v3721_v12 = vmin.f32 %v3686_v31, %v2993_v10  ;;  %2197 = vmatprep.mubr.bf16.mxu0 %v10060_v62  ;;  %v1537_v10 = vpop.f32.mrf.mxu0  ;;  %v7591_v54 = vpop.f32.mrf.mxu1 }
 0x24b   : > { %v3741_v49 = vmin.f32 %v3706_v58, %v3727_v2  ;;  %10096 = vst [vmem:[#allocation81_spill] sm:$0xff] %v7581_v63  ;;  %v3748_v40 = vmax.f32 %v3720_v33, %v2999_v59  ;;  %v3755_v42 = vmin.f32 %v3720_v33, %v2999_v59  ;;  %v3000_v38 = vadd.f32 %v7272_v30, %v1535_v51  ;;  %v7593_v2 = vpop.permute.xlu0 %2907 }
 0x24c   : > { %10094 = vst [vmem:[#allocation79_spill] sm:$0xff] %v7574_v27  ;;  %10095 = vst [vmem:[#allocation80_spill] sm:$0xff] %v7578_v56  ;;  %v7586_v48 = vadd.f32 %v7568_v5, %v7518_v7  ;;  %v7589_v14 = vadd.f32 %v7568_v5, %v1735_v6  ;;  %v3728_v17 = vmax.f32 %v3700_v46, %v3714_v19 }
 0x24d   : > { %v3735_v31 = vmin.f32 %v3700_v46, %v3714_v19  ;;  %10099 = vst [vmem:[#allocation84_spill] sm:$0xff] %v7591_v54  ;;  %v3762_v44 = vmax.f32 %v3734_v53, %v3748_v40  ;;  %v3769_v58 = vmin.f32 %v3734_v53, %v3748_v40  ;;  %10100 = vst [vmem:[#allocation85_spill] sm:$0xff] %v7593_v2  ;;  %v1539_v46 = vpop.f32.mrf.mxu0  ;;  %v7602_v19 = vpop.f32.mrf.mxu1  ;;  %v10108_v54 = vld [vmem:[#allocation26_spill] sm:$0xff] }
 0x24e   : > { %10097 = vst [vmem:[#allocation82_spill] sm:$0xff] %v7586_v48  ;;  %10098 = vst [vmem:[#allocation83_spill] sm:$0xff] %v7589_v14  ;;  %v3749_v56 = vmax.f32 %v3721_v12, %v3000_v38  ;;  %v3756_v33 = vmin.f32 %v3721_v12, %v3000_v38  ;;  %v7596_v59 = vadd.f32 %v7581_v63, %v1737_v60 }
 0x24f   : > { %v3742_v7 = vmin.f32 %v3707_v50, %v3728_v17  ;;  %v7599_v51 = vadd.f32 %v7581_v63, %v1739_v45  ;;  %v3006_v6 = vadd.f32 %v7270_v29, %v1537_v10  ;;  %10103 = vst [vmem:[#allocation88_spill] sm:$0xff] %v7602_v19  ;;  %v3776_v5 = vmin.f32 %v3741_v49, %v3762_v44  ;;  %v1543_v41 = vpop.f32.mrf.mxu0  ;;  %v1786_v50 = vpop.f32.mrf.mxu1  ;;  %v6702_v17 = vld [vmem:[%s6976_s11 + $0xc0] sm:$0xff]   ;;  %v3309_v49 = vld [vmem:[#allocation4 + $0x18] sm:$0xff] }
 0x250   : > { %10101 = vst [vmem:[#allocation86_spill] sm:$0xff] %v7596_v59  ;;  %v3763_v14 = vmax.f32 %v3735_v31, %v3749_v56  ;;  %v3770_v53 = vmin.f32 %v3735_v31, %v3749_v56  ;;  %v3007_v40 = vadd.f32 %v7270_v29, %v1539_v46  ;;  %v7606_v12 = vadd.f32 %v7593_v2, %v1743_v20 }
 0x251   : > { %10102 = vst [vmem:[#allocation87_spill] sm:$0xff] %v7599_v51  ;;  %v3783_v38 = vmax.f32 %v3755_v42, %v3006_v6  ;;  %v3790_v60 = vmin.f32 %v3755_v42, %v3006_v6  ;;  %6351 = vmatmul.mubr.msk.bf16.gmra.mxu1 %vm1354_vm3, %v6702_v17  ;;  %6365 = vmatmul.mubr.msk.bf16.gmra.mxu0 %vm1354_vm3, %v7179_v57  ;;  %v1545_v46 = vpop.f32.mrf.mxu0  ;;  %v1788_v17 = vpop.f32.mrf.mxu1 }
 0x252   : > { %10104 = vst [vmem:[#allocation89_spill] sm:$0xff] %v7606_v12  ;;  %v3777_v45 = vmin.f32 %v3742_v7, %v3763_v14  ;;  %v3784_v10 = vmax.f32 %v3756_v33, %v3007_v40  ;;  %v3791_v44 = vmin.f32 %v3756_v33, %v3007_v40  ;;  %v3013_v56 = vadd.f32 %v7279_v34, %v1543_v41  ;;  %v3316_v40 = vld [vmem:[#allocation5 + $0x20] sm:$0xff] }
 0x253   : > { %2034 = vmatprep.mubr.bf16.mxu1 %v10060_v62  ;;  %v7615_v20 = vadd.f32 %v7593_v2, %v1745_v4  ;;  %v3797_v42 = vmax.f32 %v3769_v58, %v3783_v38  ;;  %v3804_v31 = vmin.f32 %v3769_v58, %v3783_v38  ;;  %v2917_v6 = vadd.f32 %v7230_v13, %v1786_v50  ;;  %v3310_v4 = vld [vmem:[#allocation4 + $0x10] sm:$0xff]  ;;  %v1547_v2 = vpop.f32.mrf.mxu0  ;;  %v3323_v12 = vld [vmem:[#allocation6 + $0x28] sm:$0xff] }
 0x254   : > { %2207 = vmatprep.mubr.bf16.mxu0 %v10060_v62  ;;  %v3798_v57 = vmax.f32 %v3770_v53, %v3784_v10  ;;  %v3805_v14 = vmin.f32 %v3770_v53, %v3784_v10  ;;  %v3818_v7 = vmax.f32 %v3790_v60, %v3013_v56  ;;  %v3825_v33 = vmin.f32 %v3790_v60, %v3013_v56  ;;  %v3317_v10 = vld [vmem:[#allocation5 + $0x18] sm:$0xff] }
 0x255   : > { %10105 = vst [vmem:[#allocation90_spill] sm:$0xff] %v7615_v20  ;;  %v3811_v41 = vmin.f32 %v3776_v5, %v3797_v42  ;;  %v3330_v63 = vmax.f32 %v3309_v49, %v2917_v6  ;;  %v3337_v51 = vmin.f32 %v3309_v49, %v2917_v6  ;;  %v3014_v19 = vadd.f32 %v7279_v34, %v1545_v46  ;;  %v1790_v20 = vpop.f32.mrf.mxu1  ;;  %v1549_v5 = vpop.f32.mrf.mxu0 }
 0x256   : > { %v3812_v58 = vmin.f32 %v3777_v45, %v3798_v57  ;;  %v3832_v38 = vmax.f32 %v3804_v31, %v3818_v7  ;;  %v3839_v50 = vmin.f32 %v3804_v31, %v3818_v7  ;;  %v2918_v59 = vadd.f32 %v7230_v13, %v1788_v17  ;;  %v3324_v31 = vld [vmem:[#allocation6 + $0x20] sm:$0xff] }
 0x257   : > { %v3344_v43 = vmax.f32 %v3316_v40, %v3330_v63  ;;  %v3351_v48 = vmin.f32 %v3316_v40, %v3330_v63  ;;  %v3819_v53 = vmax.f32 %v3791_v44, %v3014_v19  ;;  %v3826_v60 = vmin.f32 %v3791_v44, %v3014_v19  ;;  %v1792_v56 = vpop.f32.mrf.mxu1  ;;  %v1553_v17 = vpop.f32.mrf.mxu0  ;;  %v6703_v63 = vld [vmem:[%s6976_s11 + $0xc8] sm:$0xff]  }
 0x258   : > { %v3846_v49 = vmin.f32 %v3811_v41, %v3832_v38  ;;  %v3331_v42 = vmax.f32 %v3310_v4, %v2918_v59  ;;  %v3338_v6 = vmin.f32 %v3310_v4, %v2918_v59  ;;  %v3020_v46 = vadd.f32 %v7277_v32, %v1547_v2 }
 0x259   : > { %v3358_v15 = vmin.f32 %v3323_v12, %v3344_v43  ;;  %v3833_v45 = vmax.f32 %v3805_v14, %v3819_v53  ;;  %v3840_v57 = vmin.f32 %v3805_v14, %v3819_v53  ;;  %v2924_v7 = vadd.f32 %v7235_v16, %v1790_v20  ;;  %v1796_v13 = vpop.f32.mrf.mxu1  ;;  %6352 = vmatmul.mubr.msk.bf16.gmra.mxu1 %vm1354_vm3, %v6703_v63  ;;  %v1555_v14 = vpop.f32.mrf.mxu0 }
 0x25a   : > { %v3345_v19 = vmax.f32 %v3317_v10, %v3331_v42  ;;  %v3352_v44 = vmin.f32 %v3317_v10, %v3331_v42  ;;  %v3853_v40 = vmax.f32 %v3825_v33, %v3020_v46  ;;  %v3860_v27 = vmin.f32 %v3825_v33, %v3020_v46  ;;  %6366 = vmatmul.mubr.msk.bf16.gmra.mxu0 %vm1354_vm3, %v7191_v61 }
 0x25b   : > { %v3847_v59 = vmin.f32 %v3812_v58, %v3833_v45  ;;  %v3365_v2 = vmax.f32 %v3337_v51, %v2924_v7  ;;  %v3372_v43 = vmin.f32 %v3337_v51, %v2924_v7  ;;  %v3021_v12 = vadd.f32 %v7277_v32, %v1549_v5  ;;  %v1798_v41 = vpop.f32.mrf.mxu1  ;;  %2044 = vmatprep.mubr.bf16.mxu1 %v10060_v62  ;;  %v1557_v58 = vpop.f32.mrf.mxu0 }
 0x25c   : > { %v3359_v20 = vmin.f32 %v3324_v31, %v3345_v19  ;;  %v3867_v4 = vmax.f32 %v3839_v50, %v3853_v40  ;;  %v3874_v38 = vmin.f32 %v3839_v50, %v3853_v40  ;;  %v2925_v53 = vadd.f32 %v7235_v16, %v1792_v56  ;;  %2217 = vmatprep.mubr.bf16.mxu0 %v10060_v62 }
 0x25d   : > { %v3379_v33 = vmax.f32 %v3351_v48, %v3365_v2  ;;  %v3386_v10 = vmin.f32 %v3351_v48, %v3365_v2  ;;  %v3854_v42 = vmax.f32 %v3826_v60, %v3021_v12  ;;  %v3861_v61 = vmin.f32 %v3826_v60, %v3021_v12  ;;  %v1800_v46 = vpop.f32.mrf.mxu1  ;;  %v1559_v56 = vpop.f32.mrf.mxu0 }
 0x25e   : > { %v3881_v51 = vmin.f32 %v3846_v49, %v3867_v4  ;;  %v3366_v45 = vmax.f32 %v3338_v6, %v2925_v53  ;;  %v3373_v5 = vmin.f32 %v3338_v6, %v2925_v53  ;;  %v3027_v7 = vadd.f32 %v7289_v36, %v1553_v17  ;;  %v6704_v17 = vld [vmem:[%s6976_s11 + $0xd0] sm:$0xff]  }
 0x25f   : > { %v3393_v63 = vmin.f32 %v3358_v15, %v3379_v33  ;;  %v3868_v31 = vmax.f32 %v3840_v57, %v3854_v42  ;;  %v3875_v19 = vmin.f32 %v3840_v57, %v3854_v42  ;;  %v2931_v50 = vadd.f32 %v7228_v11, %v1796_v13  ;;  %v1802_v40 = vpop.f32.mrf.mxu1  ;;  %v1563_v6 = vpop.f32.mrf.mxu0 }
 0x260   : > { %v3380_v16 = vmax.f32 %v3352_v44, %v3366_v45  ;;  %v3387_v0 = vmin.f32 %v3352_v44, %v3366_v45  ;;  %v3888_v48 = vmax.f32 %v3860_v27, %v3027_v7  ;;  %v3895_v2 = vmin.f32 %v3860_v27, %v3027_v7 }
 0x261   : > { %v3882_v60 = vmin.f32 %v3847_v59, %v3868_v31  ;;  %v3400_v12 = vmax.f32 %v3372_v43, %v2931_v50  ;;  %v3407_v47 = vmin.f32 %v3372_v43, %v2931_v50  ;;  %v3028_v49 = vadd.f32 %v7289_v36, %v1555_v14  ;;  %v1806_v4 = vpop.f32.mrf.mxu1  ;;  %6353 = vmatmul.mubr.msk.bf16.gmra.mxu1 %vm1354_vm3, %v6704_v17  ;;  %v1565_v43 = vpop.f32.mrf.mxu0 }
 0x262   : > { %v3394_v15 = vmin.f32 %v3359_v20, %v3380_v16  ;;  %v3902_v57 = vmax.f32 %v3874_v38, %v3888_v48  ;;  %v3909_v53 = vmin.f32 %v3874_v38, %v3888_v48  ;;  %v2932_v13 = vadd.f32 %v7228_v11, %v1798_v41  ;;  %6367 = vmatmul.mubr.msk.bf16.gmra.mxu0 %vm1354_vm3, %v7204_v3  ;;  %v10106_v3 = vld [vmem:[#allocation10_spill] sm:$0xff] }
 0x263   : > { %v3414_v44 = vmax.f32 %v3386_v10, %v3400_v12  ;;  %v3421_v27 = vmin.f32 %v3386_v10, %v3400_v12  ;;  %v3889_v59 = vmax.f32 %v3861_v61, %v3028_v49  ;;  %v3896_v33 = vmin.f32 %v3861_v61, %v3028_v49  ;;  %v7639_v42 = vpop.f32.mrf.mxu1  ;;  %2054 = vmatprep.mubr.bf16.mxu1 %v10060_v62  ;;  %v1567_v10 = vpop.f32.mrf.mxu0 }
 0x264   : > { %v3916_v14 = vmin.f32 %v3881_v51, %v3902_v57  ;;  %v3401_v45 = vmax.f32 %v3373_v5, %v2932_v13  ;;  %v3408_v7 = vmin.f32 %v3373_v5, %v2932_v13  ;;  %v3034_v16 = vadd.f32 %v7287_v35, %v1557_v58  ;;  %2227 = vmatprep.mubr.bf16.mxu0 %v10060_v62 }
 0x265   : > { %v3428_v41 = vmin.f32 %v3393_v63, %v3414_v44  ;;  %v3903_v20 = vmax.f32 %v3875_v19, %v3889_v59  ;;  %v3910_v38 = vmin.f32 %v3875_v19, %v3889_v59  ;;  %v2938_v31 = vadd.f32 %v10106_v3, %v1800_v46  ;;  %v7645_v50 = vpop.f32.mrf.mxu1  ;;  %v7648_v57 = vpop.f32.mrf.mxu0 }
 0x266   : > { %v3415_v61 = vmax.f32 %v3387_v0, %v3401_v45  ;;  %v3422_v48 = vmin.f32 %v3387_v0, %v3401_v45  ;;  %v3923_v12 = vmax.f32 %v3895_v2, %v3034_v16  ;;  %v3930_v49 = vmin.f32 %v3895_v2, %v3034_v16 }
 0x267   : > { %v3917_v17 = vmin.f32 %v3882_v60, %v3903_v20  ;;  %v3435_v51 = vmax.f32 %v3407_v47, %v2938_v31  ;;  %v3442_v5 = vmin.f32 %v3407_v47, %v2938_v31  ;;  %v3035_v58 = vadd.f32 %v7287_v35, %v1559_v56  ;;  %v7650_v63 = vpop.f32.mrf.mxu1  ;;  %v7653_v60 = vpop.f32.mrf.mxu0  ;;  %v6705_v47 = vld [vmem:[%s6976_s11 + $0xd8] sm:$0xff]   ;;  %v10107_v31 = vld [vmem:[#allocation27_spill] sm:$0xff] }
 0x268   : > { %v3429_v19 = vmin.f32 %v3394_v15, %v3415_v61  ;;  %v3937_v46 = vmax.f32 %v3909_v53, %v3923_v12  ;;  %v3944_v13 = vmin.f32 %v3909_v53, %v3923_v12  ;;  %v2939_v44 = vadd.f32 %v10106_v3, %v1802_v40  ;;  %v7661_v53 = vld [vmem:[%s6976_s11 + $0x68] sm:$0xff]  }
 0x269   : > { %v3449_v59 = vmax.f32 %v3421_v27, %v3435_v51  ;;  %v3456_v0 = vmin.f32 %v3421_v27, %v3435_v51  ;;  %v3924_v45 = vmax.f32 %v3896_v33, %v3035_v58  ;;  %v3931_v2 = vmin.f32 %v3896_v33, %v3035_v58  ;;  %v7655_v16 = vpop.f32.mrf.mxu1  ;;  %6354 = vmatmul.mubr.msk.bf16.gmra.mxu1 %vm1354_vm3, %v6705_v47  ;;  %v7666_v51 = vpop.f32.mrf.mxu0 }
 0x26a   : > { %v3951_v56 = vmin.f32 %v3916_v14, %v3937_v46  ;;  %v3436_v20 = vmax.f32 %v3408_v7, %v2939_v44  ;;  %v3443_v15 = vmin.f32 %v3408_v7, %v2939_v44  ;;  %v3041_v61 = vadd.f32 %v10107_v31, %v1563_v6  ;;  %6368 = vmatmul.mubr.msk.bf16.gmra.mxu0 %vm1354_vm3, %v7661_v53  ;;  %v6707_v44 = vld [vmem:[%s6976_s11] sm:$0xff]  }
 0x26b   : > { %v3463_v40 = vmin.f32 %v3428_v41, %v3449_v59  ;;  %v3938_v27 = vmax.f32 %v3910_v38, %v3924_v45  ;;  %v3945_v33 = vmin.f32 %v3910_v38, %v3924_v45  ;;  %v2945_v12 = vadd.f32 %v7244_v18, %v1806_v4  ;;  %v7668_v58 = vpop.f32.mrf.mxu1  ;;  %2237 = vmatprep.mubr.bf16.mxu0 %v10060_v62  ;;  %v7674_v59 = vpop.f32.mrf.mxu0 }
 0x26c   : > { %v3450_v14 = vmax.f32 %v3422_v48, %v3436_v20  ;;  %v3457_v7 = vmin.f32 %v3422_v48, %v3436_v20  ;;  %v3958_v46 = vmax.f32 %v3930_v49, %v3041_v61  ;;  %v3965_v6 = vmin.f32 %v3930_v49, %v3041_v61  ;;  %6479 = vmatprep.mubr.msk.bf16.mxu1 %vm1354_vm3, %v6707_v44 }
 0x26d   : > { %v3952_v47 = vmin.f32 %v3917_v17, %v3938_v27  ;;  %v3470_v3 = vmax.f32 %v3442_v5, %v2945_v12  ;;  %v3477_v41 = vmin.f32 %v3442_v5, %v2945_v12  ;;  %v3042_v38 = vadd.f32 %v10107_v31, %v1565_v43  ;;  %v7676_v4 = vpop.f32.mrf.mxu1  ;;  %v7680_v17 = vpop.f32.mrf.mxu0 }
 0x26e   : > { %v3464_v45 = vmin.f32 %v3429_v19, %v3450_v14  ;;  %v3972_v11 = vmax.f32 %v3944_v13, %v3958_v46  ;;  %v3979_v25 = vmin.f32 %v3944_v13, %v3958_v46  ;;  %v2946_v48 = vadd.f32 %v7244_v18, %v7639_v42  ;;  %v10109_v42 = vld [vmem:[#allocation12_spill] sm:$0xff] }
 0x26f   : > { %v3484_v20 = vmax.f32 %v3456_v0, %v3470_v3  ;;  %v3491_v49 = vmin.f32 %v3456_v0, %v3470_v3  ;;  %v3959_v61 = vmax.f32 %v3931_v2, %v3042_v38  ;;  %v3966_v44 = vmin.f32 %v3931_v2, %v3042_v38  ;;  %v7682_v5 = vpop.f32.mrf.mxu1  ;;  %v7687_v55 = vpop.f32.mrf.mxu0  ;;  %v6708_v0 = vld [vmem:[%s6976_s11 + $0x8] sm:$0xff]   ;;  %v7694_v38 = vld [vmem:[%s6976_s11 + $0x70] sm:$0xff]  }
 0x270   : > { %v3986_v43 = vmin.f32 %v3951_v56, %v3972_v11  ;;  %v3471_v27 = vmax.f32 %v3443_v15, %v2946_v48  ;;  %v3478_v12 = vmin.f32 %v3443_v15, %v2946_v48  ;;  %v3048_v19 = vadd.f32 %v10108_v54, %v1567_v10 }
 0x271   : > { %v3498_v14 = vmin.f32 %v3463_v40, %v3484_v20  ;;  %v3973_v13 = vmax.f32 %v3945_v33, %v3959_v61  ;;  %v3980_v46 = vmin.f32 %v3945_v33, %v3959_v61  ;;  %v2952_v18 = vadd.f32 %v10109_v42, %v7645_v50  ;;  %v7689_v3 = vpop.f32.mrf.mxu1  ;;  %6480 = vmatmul.mubr.msk.bf16.vlgmr.msra.gmra.mxu1 %vm1354_vm3, %v6708_v0  ;;  %v7700_v48 = vpop.f32.mrf.mxu0 }
 0x272   : > { %v3485_v2 = vmax.f32 %v3457_v7, %v3471_v27  ;;  %v3492_v11 = vmin.f32 %v3457_v7, %v3471_v27  ;;  %v3993_v56 = vmax.f32 %v3965_v6, %v3048_v19  ;;  %v4000_v15 = vmin.f32 %v3965_v6, %v3048_v19  ;;  %6369 = vmatmul.mubr.msk.bf16.gmra.mxu0 %vm1354_vm3, %v7694_v38  ;;  %v6710_v19 = vld [vmem:[%s6976_s11 + $0x10] sm:$0xff]  }
 0x273   : > { %v3987_v10 = vmin.f32 %v3952_v47, %v3973_v13  ;;  %v3505_v40 = vmax.f32 %v3477_v41, %v2952_v18  ;;  %v3512_v50 = vmin.f32 %v3477_v41, %v2952_v18  ;;  %v3049_v33 = vadd.f32 %v10108_v54, %v7648_v57  ;;  %v7702_v20 = vpop.f32.mrf.mxu1  ;;  %2247 = vmatprep.mubr.bf16.mxu0 %v10060_v62  ;;  %v7709_v57 = vpop.f32.mrf.mxu0 }
 0x274   : > { %v3499_v7 = vmin.f32 %v3464_v45, %v3485_v2  ;;  %v4007_v61 = vmax.f32 %v3979_v25, %v3993_v56  ;;  %v4014_v6 = vmin.f32 %v3979_v25, %v3993_v56  ;;  %v2953_v27 = vadd.f32 %v10109_v42, %v7650_v63  ;;  %6483 = vmatprep.mubr.msk.bf16.mxu1 %vm1354_vm3, %v6710_v19  ;;  %v10110_v45 = vld [vmem:[#allocation29_spill] sm:$0xff] }
 0x275   : > { %v3519_v47 = vmax.f32 %v3491_v49, %v3505_v40  ;;  %v3526_v18 = vmin.f32 %v3491_v49, %v3505_v40  ;;  %v3994_v41 = vmax.f32 %v3966_v44, %v3049_v33  ;;  %v4001_v13 = vmin.f32 %v3966_v44, %v3049_v33  ;;  %v7711_v0 = vpop.f32.mrf.mxu1  ;;  %v7717_v49 = vpop.f32.mrf.mxu0 }
 0x276   : > { %v4021_v52 = vmin.f32 %v3986_v43, %v4007_v61  ;;  %v3506_v39 = vmax.f32 %v3478_v12, %v2953_v27  ;;  %v3513_v8 = vmin.f32 %v3478_v12, %v2953_v27  ;;  %v3055_v25 = vadd.f32 %v10110_v45, %v7653_v60 }
 0x277   : > { %v3533_v2 = vmin.f32 %v3498_v14, %v3519_v47  ;;  %v4008_v63 = vmax.f32 %v3980_v46, %v3994_v41  ;;  %v4015_v56 = vmin.f32 %v3980_v46, %v3994_v41  ;;  %v2959_v19 = vadd.f32 %v7249_v22, %v7655_v16  ;;  %v7719_v44 = vpop.f32.mrf.mxu1  ;;  %v7723_v14 = vpop.f32.mrf.mxu0  ;;  %v6711_v16 = vld [vmem:[%s6976_s11 + $0x18] sm:$0xff]  }
 0x278   : > { %v3520_v40 = vmax.f32 %v3492_v11, %v3506_v39  ;;  %v3527_v33 = vmin.f32 %v3492_v11, %v3506_v39  ;;  %v4028_v43 = vmax.f32 %v4000_v15, %v3055_v25  ;;  %v4035_v61 = vmin.f32 %v4000_v15, %v3055_v25  ;;  %v7732_v11 = vld [vmem:[%s6976_s11 + $0x78] sm:$0xff]  }
 0x279   : > { %v4022_v12 = vmin.f32 %v3987_v10, %v4008_v63  ;;  %v3540_v27 = vmax.f32 %v3512_v50, %v2959_v19  ;;  %v3547_v42 = vmin.f32 %v3512_v50, %v2959_v19  ;;  %v3056_v60 = vadd.f32 %v10110_v45, %v7666_v51  ;;  %v7725_v46 = vpop.f32.mrf.mxu1  ;;  %6484 = vmatmul.mubr.msk.bf16.gmra.mxu1 %vm1354_vm3, %v6711_v16  ;;  %v7736_v25 = vpop.f32.mrf.mxu0 }
 0x27a   : > { %v3534_v47 = vmin.f32 %v3499_v7, %v3520_v40  ;;  %v4042_v41 = vmax.f32 %v4014_v6, %v4028_v43  ;;  %v4049_v1 = vmin.f32 %v4014_v6, %v4028_v43  ;;  %v2960_v39 = vadd.f32 %v7249_v22, %v7668_v58  ;;  %6370 = vmatmul.mubr.msk.bf16.gmra.mxu0 %vm1354_vm3, %v7732_v11  ;;  %v10111_v58 = vld [vmem:[#allocation28_spill] sm:$0xff]  ;;  %v6713_v43 = vld [vmem:[%s6976_s11 + $0x20] sm:$0xff]  }
 0x27b   : > { %v3554_v51 = vmax.f32 %v3526_v18, %v3540_v27  ;;  %v3561_v15 = vmin.f32 %v3526_v18, %v3540_v27  ;;  %v4029_v10 = vmax.f32 %v4001_v13, %v3056_v60  ;;  %v4036_v50 = vmin.f32 %v4001_v13, %v3056_v60  ;;  %v7738_v63 = vpop.f32.mrf.mxu1  ;;  %2257 = vmatprep.mubr.bf16.mxu0 %v10060_v62  ;;  %v7747_v27 = vpop.f32.mrf.mxu0 }
 0x27c   : > { %v4056_v7 = vmin.f32 %v4021_v52, %v4042_v41  ;;  %v3541_v6 = vmax.f32 %v3513_v8, %v2960_v39  ;;  %v3548_v19 = vmin.f32 %v3513_v8, %v2960_v39  ;;  %v3062_v40 = vadd.f32 %v10111_v58, %v7674_v59  ;;  %6487 = vmatprep.mubr.msk.bf16.mxu1 %vm1354_vm3, %v6713_v43 }
 0x27d   : > { %v3568_v16 = vmin.f32 %v3533_v2, %v3554_v51  ;;  %v4043_v22 = vmax.f32 %v4015_v56, %v4029_v10  ;;  %v4050_v18 = vmin.f32 %v4015_v56, %v4029_v10  ;;  %v2966_v13 = vadd.f32 %v7247_v21, %v7676_v4  ;;  %v7749_v60 = vpop.f32.mrf.mxu1  ;;  %v7753_v51 = vpop.f32.mrf.mxu0 }
 0x27e   : > { %v3555_v9 = vmax.f32 %v3527_v33, %v3541_v6  ;;  %v3562_v52 = vmin.f32 %v3527_v33, %v3541_v6  ;;  %v4063_v41 = vmax.f32 %v4035_v61, %v3062_v40  ;;  %v4070_v8 = vmin.f32 %v4035_v61, %v3062_v40 }
 0x27f   : > { %v4057_v39 = vmin.f32 %v4022_v12, %v4043_v22  ;;  %v3575_v59 = vmax.f32 %v3547_v42, %v2966_v13  ;;  %v3582_v37 = vmin.f32 %v3547_v42, %v2966_v13  ;;  %v3063_v2 = vadd.f32 %v10111_v58, %v7680_v17  ;;  %v7755_v56 = vpop.f32.mrf.mxu1  ;;  %v7759_v40 = vpop.f32.mrf.mxu0  ;;  %v6714_v17 = vld [vmem:[%s6976_s11 + $0x28] sm:$0xff]  }
 0x280   : > { %v3569_v4 = vmin.f32 %v3534_v47, %v3555_v9  ;;  %v4077_v10 = vmax.f32 %v4049_v1, %v4063_v41  ;;  %v4084_v43 = vmin.f32 %v4049_v1, %v4063_v41  ;;  %v2967_v33 = vadd.f32 %v7247_v21, %v7682_v5  ;;  %v10112_v1 = vld [vmem:[#allocation31_spill] sm:$0xff]  ;;  %v7768_v41 = vld [vmem:[%s6976_s11 + $0x80] sm:$0xff]  }
 0x281   : > { %v3589_v6 = vmax.f32 %v3561_v15, %v3575_v59  ;;  %v3596_v61 = vmin.f32 %v3561_v15, %v3575_v59  ;;  %v4064_v22 = vmax.f32 %v4036_v50, %v3063_v2  ;;  %v4071_v12 = vmin.f32 %v4036_v50, %v3063_v2  ;;  %v7761_v42 = vpop.f32.mrf.mxu1  ;;  %6488 = vmatmul.mubr.msk.bf16.gmra.mxu1 %vm1354_vm3, %v6714_v17  ;;  %v7774_v2 = vpop.f32.mrf.mxu0  ;;  %v6716_v17 = vld [vmem:[%s6976_s11 + $0x30] sm:$0xff]  }
 0x282   : > { %v4091_v13 = vmin.f32 %v4056_v7, %v4077_v10  ;;  %v3576_v58 = vmax.f32 %v3548_v19, %v2967_v33  ;;  %v3583_v9 = vmin.f32 %v3548_v19, %v2967_v33  ;;  %v3069_v47 = vadd.f32 %v10112_v1, %v7687_v55  ;;  %6371 = vmatmul.mubr.msk.bf16.gmra.mxu0 %vm1354_vm3, %v7768_v41 }
 0x283   : > { %v3603_v5 = vmin.f32 %v3568_v16, %v3589_v6  ;;  %v4078_v15 = vmax.f32 %v4050_v18, %v4064_v22  ;;  %v4085_v50 = vmin.f32 %v4050_v18, %v4064_v22  ;;  %v2973_v59 = vadd.f32 %v7258_v24, %v7689_v3  ;;  %v7776_v7 = vpop.f32.mrf.mxu1  ;;  %2267 = vmatprep.mubr.bf16.mxu0 %v10060_v62  ;;  %v7783_v3 = vpop.f32.mrf.mxu0 }
 0x284   : > { %v3590_v19 = vmax.f32 %v3562_v52, %v3576_v58  ;;  %v3597_v10 = vmin.f32 %v3562_v52, %v3576_v58  ;;  %v4098_v55 = vmax.f32 %v4070_v8, %v3069_v47  ;;  %v4105_v33 = vmin.f32 %v4070_v8, %v3069_v47  ;;  %6491 = vmatprep.mubr.msk.bf16.mxu1 %vm1354_vm3, %v6716_v17 }
 0x285   : > { %v4092_v21 = vmin.f32 %v4057_v39, %v4078_v15  ;;  %v3610_v16 = vmax.f32 %v3582_v37, %v2973_v59  ;;  %v3617_v6 = vmin.f32 %v3582_v37, %v2973_v59  ;;  %v3070_v18 = vadd.f32 %v10112_v1, %v7700_v48  ;;  %v7785_v22 = vpop.f32.mrf.mxu1  ;;  %v7789_v15 = vpop.f32.mrf.mxu0 }
 0x286   : > { %v3604_v45 = vmin.f32 %v3569_v4, %v3590_v19  ;;  %v4112_v54 = vmax.f32 %v4084_v43, %v4098_v55  ;;  %v4119_v31 = vmin.f32 %v4084_v43, %v4098_v55  ;;  %v2974_v58 = vadd.f32 %v7258_v24, %v7702_v20  ;;  %v10113_v4 = vld [vmem:[#allocation30_spill] sm:$0xff] }
 0x287   : > { %v3624_v52 = vmax.f32 %v3596_v61, %v3610_v16  ;;  %v3631_v8 = vmin.f32 %v3596_v61, %v3610_v16  ;;  %v4099_v47 = vmax.f32 %v4071_v12, %v3070_v18  ;;  %v4106_v39 = vmin.f32 %v4071_v12, %v3070_v18  ;;  %v7791_v37 = vpop.f32.mrf.mxu1  ;;  %v7797_v61 = vpop.f32.mrf.mxu0  ;;  %v6717_v16 = vld [vmem:[%s6976_s11 + $0x38] sm:$0xff]  }
 0x288   : > { %v4126_v48 = vmin.f32 %v4091_v13, %v4112_v54  ;;  %v3611_v59 = vmax.f32 %v3583_v9, %v2974_v58  ;;  %v3618_v17 = vmin.f32 %v3583_v9, %v2974_v58  ;;  %v3076_v19 = vadd.f32 %v10113_v4, %v7709_v57  ;;  %v7804_v58 = vld [vmem:[%s6976_s11 + $0x88] sm:$0xff]  }
 0x289   : > { %v3638_v43 = vmin.f32 %v3603_v5, %v3624_v52  ;;  %v4113_v55 = vmax.f32 %v4085_v50, %v4099_v47  ;;  %v4120_v1 = vmin.f32 %v4085_v50, %v4099_v47  ;;  %v2980_v20 = vadd.f32 %v7256_v23, %v7711_v0  ;;  %v7799_v12 = vpop.f32.mrf.mxu1  ;;  %6492 = vmatmul.mubr.msk.bf16.gmra.mxu1 %vm1354_vm3, %v6717_v16  ;;  %v7810_v52 = vpop.f32.mrf.mxu0  ;;  %v6719_v16 = vld [vmem:[%s6976_s11 + $0x40] sm:$0xff]  }
 0x28a   : > { %v3625_v54 = vmax.f32 %v3597_v10, %v3611_v59  ;;  %v3632_v13 = vmin.f32 %v3597_v10, %v3611_v59  ;;  %v4133_v9 = vmax.f32 %v4105_v33, %v3076_v19  ;;  %v4140_v18 = vmin.f32 %v4105_v33, %v3076_v19  ;;  %10114 = vst [vmem:[#allocation91_spill] sm:$0xff] %v7804_v58 }
 0x28b   : > { %6372 = vmatmul.mubr.msk.bf16.gmra.mxu0 %vm1354_vm3, %v7804_v58  ;;  %v4127_v57 = vmin.f32 %v4092_v21, %v4113_v55  ;;  %v3645_v5 = vmax.f32 %v3617_v6, %v2980_v20  ;;  %v3652_v0 = vmin.f32 %v3617_v6, %v2980_v20  ;;  %v3077_v50 = vadd.f32 %v10113_v4, %v7717_v49  ;;  %v7812_v47 = vpop.f32.mrf.mxu1  ;;  %v7819_v49 = vpop.f32.mrf.mxu0 }
 0x28c   : > { %2277 = vmatprep.mubr.bf16.mxu0 %v10060_v62  ;;  %v3639_v10 = vmin.f32 %v3604_v45, %v3625_v54  ;;  %v4147_v59 = vmax.f32 %v4119_v31, %v4133_v9  ;;  %v4154_v33 = vmin.f32 %v4119_v31, %v4133_v9  ;;  %v2981_v19 = vadd.f32 %v7256_v23, %v7719_v44  ;;  %v10115_v45 = vld [vmem:[#allocation32_spill] sm:$0xff] }
 0x28d   : > { %6495 = vmatprep.mubr.msk.bf16.mxu1 %vm1354_vm3, %v6719_v16  ;;  %v3659_v21 = vmax.f32 %v3631_v8, %v3645_v5  ;;  %v3666_v6 = vmin.f32 %v3631_v8, %v3645_v5  ;;  %v4134_v55 = vmax.f32 %v4106_v39, %v3077_v50  ;;  %v4141_v20 = vmin.f32 %v4106_v39, %v3077_v50  ;;  %v7821_v24 = vpop.f32.mrf.mxu1  ;;  %v7827_v8 = vpop.f32.mrf.mxu0 }
 0x28e   : > { %v4161_v4 = vmin.f32 %v4126_v48, %v4147_v59  ;;  %v3646_v35 = vmax.f32 %v3618_v17, %v2981_v19  ;;  %v3653_v36 = vmin.f32 %v3618_v17, %v2981_v19  ;;  %v3083_v31 = vadd.f32 %v10115_v45, %v7723_v14 }
 0x28f   : > { %v3673_v54 = vmin.f32 %v3638_v43, %v3659_v21  ;;  %v4148_v44 = vmax.f32 %v4120_v1, %v4134_v55  ;;  %v4155_v9 = vmin.f32 %v4120_v1, %v4134_v55  ;;  %v2987_v16 = vadd.f32 %v7263_v28, %v7725_v46  ;;  %v7829_v39 = vpop.f32.mrf.mxu1  ;;  %v7833_v43 = vpop.f32.mrf.mxu0  ;;  %v6720_v46 = vld [vmem:[%s6976_s11 + $0x48] sm:$0xff]  }
 0x290   : > { %v3660_v5 = vmax.f32 %v3632_v13, %v3646_v35  ;;  %v3667_v50 = vmin.f32 %v3632_v13, %v3646_v35  ;;  %v4168_v48 = vmax.f32 %v4140_v18, %v3083_v31  ;;  %v4175_v59 = vmin.f32 %v4140_v18, %v3083_v31  ;;  %v7842_v13 = vld [vmem:[%s6976_s11 + $0x90] sm:$0xff]  }
 0x291   : > { %v4162_v17 = vmin.f32 %v4127_v57, %v4148_v44  ;;  %v3680_v19 = vmax.f32 %v3652_v0, %v2987_v16  ;;  %v3687_v23 = vmin.f32 %v3652_v0, %v2987_v16  ;;  %v3084_v14 = vadd.f32 %v10115_v45, %v7736_v25  ;;  %v7835_v1 = vpop.f32.mrf.mxu1  ;;  %6496 = vmatmul.mubr.msk.bf16.gmra.mxu1 %vm1354_vm3, %v6720_v46  ;;  %v7846_v31 = vpop.f32.mrf.mxu0 }
 0x292   : > { %v3674_v21 = vmin.f32 %v3639_v10, %v3660_v5  ;;  %v4182_v55 = vmax.f32 %v4154_v33, %v4168_v48  ;;  %v4189_v58 = vmin.f32 %v4154_v33, %v4168_v48  ;;  %v2988_v35 = vadd.f32 %v7263_v28, %v7738_v63  ;;  %v10117_v63 = vld [vmem:[#allocation33_spill] sm:$0xff]  ;;  %v6722_v48 = vld [vmem:[%s6976_s11 + $0x50] sm:$0xff]  }
 0x293   : > { %6373 = vmatmul.mubr.msk.bf16.gmra.mxu0 %vm1354_vm3, %v7842_v13  ;;  %v3694_v25 = vmax.f32 %v3666_v6, %v3680_v19  ;;  %v3701_v18 = vmin.f32 %v3666_v6, %v3680_v19  ;;  %v4169_v57 = vmax.f32 %v4141_v20, %v3084_v14  ;;  %v4176_v0 = vmin.f32 %v4141_v20, %v3084_v14  ;;  %v7848_v44 = vpop.f32.mrf.mxu1  ;;  %v7857_v19 = vpop.f32.mrf.mxu0 }
 0x294   : > { %10116 = vst [vmem:[#allocation92_spill] sm:$0xff] %v7848_v44  ;;  %2287 = vmatprep.mubr.bf16.mxu0 %v10060_v62  ;;  %v4196_v10 = vmin.f32 %v4161_v4, %v4182_v55  ;;  %v3681_v33 = vmax.f32 %v3653_v36, %v2988_v35  ;;  %v3688_v16 = vmin.f32 %v3653_v36, %v2988_v35 }
 0x295   : > { %v3090_v5 = vadd.f32 %v10117_v63, %v7747_v27  ;;  %6499 = vmatprep.mubr.msk.bf16.mxu1 %vm1354_vm3, %v6722_v48  ;;  %v3708_v46 = vmin.f32 %v3673_v54, %v3694_v25  ;;  %v4183_v28 = vmax.f32 %v4155_v9, %v4169_v57  ;;  %v4190_v6 = vmin.f32 %v4155_v9, %v4169_v57  ;;  %v7859_v14 = vpop.f32.mrf.mxu1  ;;  %v7863_v25 = vpop.f32.mrf.mxu0 }
 0x296   : > { %v2994_v20 = vadd.f32 %v7261_v26, %v7749_v60  ;;  %v3695_v45 = vmax.f32 %v3667_v50, %v3681_v33  ;;  %v3702_v4 = vmin.f32 %v3667_v50, %v3681_v33  ;;  %v3091_v54 = vadd.f32 %v10117_v63, %v7753_v51  ;;  %v6723_v51 = vld [vmem:[%s6976_s11 + $0x58] sm:$0xff]  }
 0x297   : > { %v4203_v55 = vmax.f32 %v4175_v59, %v3090_v5  ;;  %v4210_v36 = vmin.f32 %v4175_v59, %v3090_v5  ;;  %v4197_v35 = vmin.f32 %v4162_v17, %v4183_v28  ;;  %v7865_v9 = vpop.f32.mrf.mxu1  ;;  %v2995_v50 = vadd.f32 %v7261_v26, %v7755_v56  ;;  %v7869_v5 = vpop.f32.mrf.mxu0 }
 0x298   : > { %v3715_v27 = vmax.f32 %v3687_v23, %v2994_v20  ;;  %v3722_v44 = vmin.f32 %v3687_v23, %v2994_v20  ;;  %v3709_v60 = vmin.f32 %v3674_v21, %v3695_v45  ;;  %v4204_v28 = vmax.f32 %v4176_v0, %v3091_v54 }
 0x299   : > { %v4217_v57 = vmax.f32 %v4189_v58, %v4203_v55  ;;  %v4224_v48 = vmin.f32 %v4189_v58, %v4203_v55  ;;  %v4211_v17 = vmin.f32 %v4176_v0, %v3091_v54  ;;  %v7871_v23 = vpop.f32.mrf.mxu1  ;;  %6500 = vmatmul.mubr.msk.bf16.gmra.mxu1 %vm1354_vm3, %v6723_v51  ;;  %v3716_v63 = vmax.f32 %v3688_v16, %v2995_v50  ;;  %v10119_v58 = vld [vmem:[#allocation34_spill] sm:$0xff]  ;;  %v7878_v55 = vld [vmem:[%s6976_s11 + $0x98] sm:$0xff]   ;;  %v7884_v54 = vpop.f32.mrf.mxu0 }
 0x29a   : > { %v3729_v33 = vmax.f32 %v3701_v18, %v3715_v27  ;;  %v3736_v59 = vmin.f32 %v3701_v18, %v3715_v27  ;;  %10118 = vst [vmem:[#allocation93_spill] sm:$0xff] %v7871_v23  ;;  %v3723_v45 = vmin.f32 %v3688_v16, %v2995_v50  ;;  %v3097_v21 = vadd.f32 %v10119_v58, %v7759_v40  ;;  %v6725_v51 = vld [vmem:[%s6976_s11 + $0x60] sm:$0xff]  }
 0x29b   : > { %v4231_v20 = vmin.f32 %v4196_v10, %v4217_v57  ;;  %6374 = vmatmul.mubr.msk.bf16.gmra.mxu0 %vm1354_vm3, %v7878_v55  ;;  %v4218_v18 = vmax.f32 %v4190_v6, %v4204_v28  ;;  %v4225_v0 = vmin.f32 %v4190_v6, %v4204_v28  ;;  %v3001_v27 = vadd.f32 %v7272_v30, %v7761_v42  ;;  %v7886_v10 = vpop.f32.mrf.mxu1  ;;  %v7893_v42 = vpop.f32.mrf.mxu0 }
 0x29c   : > { %v3743_v56 = vmin.f32 %v3708_v46, %v3729_v33  ;;  %10120 = vst [vmem:[#allocation94_spill] sm:$0xff] %v7884_v54  ;;  %10121 = vst [vmem:[#allocation95_spill] sm:$0xff] %v7886_v10  ;;  %2297 = vmatprep.mubr.bf16.mxu0 %v10060_v62  ;;  %v3730_v16 = vmax.f32 %v3702_v4, %v3716_v63  ;;  %v3737_v57 = vmin.f32 %v3702_v4, %v3716_v63 }
 0x29d   : > { %v4238_v40 = vmax.f32 %v4210_v36, %v3097_v21  ;;  %v4245_v50 = vmin.f32 %v4210_v36, %v3097_v21  ;;  %6503 = vmatprep.mubr.msk.bf16.mxu1 %vm1354_vm3, %v6725_v51  ;;  %v4232_v26 = vmin.f32 %v4197_v35, %v4218_v18  ;;  %v3750_v46 = vmax.f32 %v3722_v44, %v3001_v27  ;;  %v7895_v28 = vpop.f32.mrf.mxu1  ;;  %v7899_v35 = vpop.f32.mrf.mxu0 }
 0x29e   : > { %v3757_v33 = vmin.f32 %v3722_v44, %v3001_v27  ;;  %v3098_v6 = vadd.f32 %v10119_v58, %v7774_v2  ;;  %v3744_v10 = vmin.f32 %v3709_v60, %v3730_v16  ;;  %v3002_v63 = vadd.f32 %v7272_v30, %v7776_v7  ;;  %v10122_v58 = vld [vmem:[#allocation35_spill] sm:$0xff] }
 0x29f   : > { %v4252_v54 = vmax.f32 %v4224_v48, %v4238_v40  ;;  %v4259_v23 = vmin.f32 %v4224_v48, %v4238_v40  ;;  %v3764_v4 = vmax.f32 %v3736_v59, %v3750_v46  ;;  %v3771_v36 = vmin.f32 %v3736_v59, %v3750_v46  ;;  %v7901_v44 = vpop.f32.mrf.mxu1  ;;  %v7907_v59 = vpop.f32.mrf.mxu0 }
 0x2a0   : > { %v4239_v21 = vmax.f32 %v4211_v17, %v3098_v6  ;;  %v4246_v51 = vmin.f32 %v4211_v17, %v3098_v6  ;;  %v3751_v18 = vmax.f32 %v3723_v45, %v3002_v63  ;;  %v3758_v27 = vmin.f32 %v3723_v45, %v3002_v63  ;;  %v7914_v6 = vld [vmem:[%s6976_s11 + $0xa0] sm:$0xff]  }
 0x2a1   : > { %v4266_v2 = vmin.f32 %v4231_v20, %v4252_v54  ;;  %v3104_v60 = vadd.f32 %v10122_v58, %v7783_v3  ;;  %v3778_v16 = vmin.f32 %v3743_v56, %v3764_v4  ;;  %v3008_v7 = vadd.f32 %v7270_v29, %v7785_v22  ;;  %v7909_v17 = vpop.f32.mrf.mxu1  ;;  %6504 = vmatmul.mubr.msk.bf16.gmra.mxu1 %vm1354_vm3, %v7661_v53  ;;  %v7920_v63 = vpop.f32.mrf.mxu0 }
 0x2a2   : > { %v4253_v48 = vmax.f32 %v4225_v0, %v4239_v21  ;;  %v4260_v40 = vmin.f32 %v4225_v0, %v4239_v21  ;;  %v3765_v46 = vmax.f32 %v3737_v57, %v3751_v18  ;;  %v3772_v20 = vmin.f32 %v3737_v57, %v3751_v18  ;;  %6507 = vmatprep.mubr.msk.bf16.mxu1 %vm1354_vm3, %v7694_v38 }
 0x2a3   : > { %v4273_v54 = vmax.f32 %v4245_v50, %v3104_v60  ;;  %v4280_v45 = vmin.f32 %v4245_v50, %v3104_v60  ;;  %6375 = vmatmul.mubr.msk.bf16.gmra.mxu0 %vm1354_vm3, %v7914_v6  ;;  %v3785_v56 = vmax.f32 %v3757_v33, %v3008_v7  ;;  %v3792_v0 = vmin.f32 %v3757_v33, %v3008_v7  ;;  %v7922_v4 = vpop.f32.mrf.mxu1 }
 0x2a4   : > { %v4267_v3 = vmin.f32 %v4232_v26, %v4253_v48  ;;  %v3105_v22 = vadd.f32 %v10122_v58, %v7789_v15  ;;  %2307 = vmatprep.mubr.bf16.mxu0 %v10060_v62  ;;  %v3779_v53 = vmin.f32 %v3744_v10, %v3765_v46  ;;  %v3009_v21 = vadd.f32 %v7270_v29, %v7791_v37  ;;  %v7929_v15 = vpop.f32.mrf.mxu0  ;;  %v10123_v10 = vld [vmem:[#allocation36_spill] sm:$0xff] }
 0x2a5   : > { %v4287_v57 = vmax.f32 %v4259_v23, %v4273_v54  ;;  %v4294_v50 = vmin.f32 %v4259_v23, %v4273_v54  ;;  %v3799_v26 = vmax.f32 %v3771_v36, %v3785_v56  ;;  %v3806_v33 = vmin.f32 %v3771_v36, %v3785_v56  ;;  %v7931_v48 = vpop.f32.mrf.mxu1 }
 0x2a6   : > { %v4274_v18 = vmax.f32 %v4246_v51, %v3105_v22  ;;  %v4281_v60 = vmin.f32 %v4246_v51, %v3105_v22  ;;  %v3786_v30 = vmax.f32 %v3758_v27, %v3009_v21  ;;  %v3793_v58 = vmin.f32 %v3758_v27, %v3009_v21  ;;  %v7937_v29 = vpop.f32.mrf.mxu0 }
 0x2a7   : > { %v4301_v7 = vmin.f32 %v4266_v2, %v4287_v57  ;;  %v3111_v23 = vadd.f32 %v10123_v10, %v7797_v61  ;;  %v3813_v46 = vmin.f32 %v3778_v16, %v3799_v26  ;;  %v3015_v38 = vadd.f32 %v7279_v34, %v7799_v12  ;;  %v7939_v36 = vpop.f32.mrf.mxu1 }
 0x2a8   : > { %v4288_v54 = vmax.f32 %v4260_v40, %v4274_v18  ;;  %v4295_v37 = vmin.f32 %v4260_v40, %v4274_v18  ;;  %v3800_v51 = vmax.f32 %v3772_v20, %v3786_v30  ;;  %v3807_v56 = vmin.f32 %v3772_v20, %v3786_v30  ;;  %v7943_v16 = vpop.f32.mrf.mxu0  ;;  %v7952_v20 = vld [vmem:[%s6976_s11 + $0xa8] sm:$0xff]  }
 0x2a9   : > { %v4308_v22 = vmax.f32 %v4280_v45, %v3111_v23  ;;  %v4315_v2 = vmin.f32 %v4280_v45, %v3111_v23  ;;  %v3820_v27 = vmax.f32 %v3792_v0, %v3015_v38  ;;  %v3827_v21 = vmin.f32 %v3792_v0, %v3015_v38  ;;  %v7945_v40 = vpop.f32.mrf.mxu1  ;;  %6508 = vmatmul.mubr.msk.bf16.gmra.mxu1 %vm1354_vm3, %v7732_v11 }
 0x2aa   : > { %v4302_v57 = vmin.f32 %v4267_v3, %v4288_v54  ;;  %v3112_v61 = vadd.f32 %v10123_v10, %v7810_v52  ;;  %v3814_v12 = vmin.f32 %v3779_v53, %v3800_v51  ;;  %v3016_v30 = vadd.f32 %v7279_v34, %v7812_v47  ;;  %v7956_v23 = vpop.f32.mrf.mxu0  ;;  %v10124_v47 = vld [vmem:[#allocation37_spill] sm:$0xff]  ;;  %6511 = vmatprep.mubr.msk.bf16.mxu1 %vm1354_vm3, %v7768_v41 }
 0x2ab   : > { %v4322_v26 = vmax.f32 %v4294_v50, %v4308_v22  ;;  %v4329_v18 = vmin.f32 %v4294_v50, %v4308_v22  ;;  %6376 = vmatmul.mubr.msk.bf16.gmra.mxu0 %vm1354_vm3, %v7952_v20  ;;  %v3834_v45 = vmax.f32 %v3806_v33, %v3820_v27  ;;  %v3841_v52 = vmin.f32 %v3806_v33, %v3820_v27  ;;  %v7958_v54 = vpop.f32.mrf.mxu1 }
 0x2ac   : > { %v4309_v3 = vmax.f32 %v4281_v60, %v3112_v61  ;;  %v4316_v0 = vmin.f32 %v4281_v60, %v3112_v61  ;;  %2317 = vmatprep.mubr.bf16.mxu0 %v10060_v62  ;;  %v3821_v53 = vmax.f32 %v3793_v58, %v3016_v30  ;;  %v3828_v50 = vmin.f32 %v3793_v58, %v3016_v30  ;;  %v7967_v27 = vpop.f32.mrf.mxu0 }
 0x2ad   : > { %v4336_v11 = vmin.f32 %v4301_v7, %v4322_v26  ;;  %v3118_v38 = vadd.f32 %v10124_v47, %v7819_v49  ;;  %v3848_v51 = vmin.f32 %v3813_v46, %v3834_v45  ;;  %v3022_v60 = vadd.f32 %v7277_v32, %v7821_v24  ;;  %v7969_v61 = vpop.f32.mrf.mxu1 }
 0x2ae   : > { %v4323_v22 = vmax.f32 %v4295_v37, %v4309_v3  ;;  %v4330_v33 = vmin.f32 %v4295_v37, %v4309_v3  ;;  %10125 = vst [vmem:[#allocation96_spill] sm:$0xff] %v7969_v61  ;;  %v3835_v34 = vmax.f32 %v3807_v56, %v3821_v53  ;;  %v3842_v7 = vmin.f32 %v3807_v56, %v3821_v53  ;;  %v7973_v46 = vpop.f32.mrf.mxu0 }
 0x2af   : > { %v4343_v26 = vmax.f32 %v4315_v2, %v3118_v38  ;;  %v4350_v58 = vmin.f32 %v4315_v2, %v3118_v38  ;;  %v3855_v10 = vmax.f32 %v3827_v21, %v3022_v60  ;;  %v3862_v49 = vmin.f32 %v3827_v21, %v3022_v60  ;;  %v7975_v37 = vpop.f32.mrf.mxu1 }
 0x2b0   : > { %v4337_v30 = vmin.f32 %v4302_v57, %v4323_v22  ;;  %v3119_v41 = vadd.f32 %v10124_v47, %v7827_v8  ;;  %v3849_v24 = vmin.f32 %v3814_v12, %v3835_v34  ;;  %v3023_v61 = vadd.f32 %v7277_v32, %v7829_v39  ;;  %v7979_v38 = vpop.f32.mrf.mxu0  ;;  %v10127_v8 = vld [vmem:[#allocation91_spill] sm:$0xff]  ;;  %v10128_v34 = vld [vmem:[#allocation38_spill] sm:$0xff] }
 0x2b1   : > { %v4357_v45 = vmax.f32 %v4329_v18, %v4343_v26  ;;  %v4364_v3 = vmin.f32 %v4329_v18, %v4343_v26  ;;  %v3869_v56 = vmax.f32 %v3841_v52, %v3855_v10  ;;  %v3876_v53 = vmin.f32 %v3841_v52, %v3855_v10  ;;  %v7981_v21 = vpop.f32.mrf.mxu1  ;;  %6512 = vmatmul.mubr.msk.bf16.gmra.mxu1 %vm1354_vm3, %v10127_v8  ;;  %v7988_v18 = vld [vmem:[%s6976_s11 + $0xb0] sm:$0xff]  }
 0x2b2   : > { %v4344_v2 = vmax.f32 %v4316_v0, %v3119_v41  ;;  %v4351_v57 = vmin.f32 %v4316_v0, %v3119_v41  ;;  %10126 = vst [vmem:[#allocation97_spill] sm:$0xff] %v7981_v21  ;;  %v3856_v60 = vmax.f32 %v3828_v50, %v3023_v61  ;;  %v3863_v47 = vmin.f32 %v3828_v50, %v3023_v61  ;;  %v10129_v0 = vld [vmem:[#allocation25_spill] sm:$0xff]  ;;  %v7994_v41 = vpop.f32.mrf.mxu0  ;;  %v10132_v21 = vld [vmem:[#allocation92_spill] sm:$0xff] }
 0x2b3   : > { %v4371_v22 = vmin.f32 %v4336_v11, %v4357_v45  ;;  %v3125_v12 = vadd.f32 %v10128_v34, %v7833_v43  ;;  %6377 = vmatmul.mubr.msk.bf16.gmra.mxu0 %vm1354_vm3, %v7988_v18  ;;  %v3883_v39 = vmin.f32 %v3848_v51, %v3869_v56  ;;  %v3029_v26 = vadd.f32 %v10129_v0, %v7835_v1  ;;  %v7996_v8 = vpop.f32.mrf.mxu1 }
 0x2b4   : > { %v4358_v10 = vmax.f32 %v4330_v33, %v4344_v2  ;;  %v4365_v52 = vmin.f32 %v4330_v33, %v4344_v2  ;;  %10130 = vst [vmem:[#allocation91_spill] sm:$0xff] %v7994_v41  ;;  %10131 = vst [vmem:[#allocation98_spill] sm:$0xff] %v7996_v8  ;;  %2327 = vmatprep.mubr.bf16.mxu0 %v10060_v62  ;;  %v3870_v11 = vmax.f32 %v3842_v7, %v3856_v60  ;;  %v8003_v1 = vpop.f32.mrf.mxu0 }
 0x2b5   : > { %v3877_v50 = vmin.f32 %v3842_v7, %v3856_v60  ;;  %v4378_v43 = vmax.f32 %v4350_v58, %v3125_v12  ;;  %v4385_v61 = vmin.f32 %v4350_v58, %v3125_v12  ;;  %6515 = vmatprep.mubr.msk.bf16.mxu1 %vm1354_vm3, %v7842_v13  ;;  %v3890_v51 = vmax.f32 %v3862_v49, %v3029_v26  ;;  %v8005_v2 = vpop.f32.mrf.mxu1 }
 0x2b6   : > { %v4372_v45 = vmin.f32 %v4337_v30, %v4358_v10  ;;  %v3897_v56 = vmin.f32 %v3862_v49, %v3029_v26  ;;  %v3126_v33 = vadd.f32 %v10128_v34, %v7846_v31  ;;  %v3884_v32 = vmin.f32 %v3849_v24, %v3870_v11  ;;  %v8009_v30 = vpop.f32.mrf.mxu0  ;;  %v10133_v34 = vld [vmem:[#allocation39_spill] sm:$0xff] }
 0x2b7   : > { %v4392_v8 = vmax.f32 %v4364_v3, %v4378_v43  ;;  %v4399_v41 = vmin.f32 %v4364_v3, %v4378_v43  ;;  %v3030_v7 = vadd.f32 %v10129_v0, %v10132_v21  ;;  %v3904_v58 = vmax.f32 %v3876_v53, %v3890_v51  ;;  %v8011_v49 = vpop.f32.mrf.mxu1  ;;  %v10134_v21 = vld [vmem:[#allocation24_spill] sm:$0xff] }
 0x2b8   : > { %v3911_v60 = vmin.f32 %v3876_v53, %v3890_v51  ;;  %v4379_v12 = vmax.f32 %v4351_v57, %v3126_v33  ;;  %v4386_v13 = vmin.f32 %v4351_v57, %v3126_v33  ;;  %v3132_v24 = vadd.f32 %v10133_v34, %v7857_v19  ;;  %v8017_v53 = vpop.f32.mrf.mxu0  ;;  %v8024_v33 = vld [vmem:[%s6976_s11 + $0xb8] sm:$0xff]  }
 0x2b9   : > { %v4406_v31 = vmin.f32 %v4371_v22, %v4392_v8  ;;  %v3891_v10 = vmax.f32 %v3863_v47, %v3030_v7  ;;  %v3898_v26 = vmin.f32 %v3863_v47, %v3030_v7  ;;  %v3918_v11 = vmin.f32 %v3883_v39, %v3904_v58  ;;  %v8019_v57 = vpop.f32.mrf.mxu1  ;;  %6516 = vmatmul.mubr.msk.bf16.gmra.mxu1 %vm1354_vm3, %v7878_v55 }
 0x2ba   : > { %v4393_v3 = vmax.f32 %v4365_v52, %v4379_v12  ;;  %v4400_v43 = vmin.f32 %v4365_v52, %v4379_v12  ;;  %v3036_v0 = vadd.f32 %v10134_v21, %v7859_v14  ;;  %10135 = vst [vmem:[#allocation92_spill] sm:$0xff] %v8019_v57  ;;  %v4413_v8 = vmax.f32 %v4385_v61, %v3132_v24  ;;  %v8030_v7 = vpop.f32.mrf.mxu0 }
 0x2bb   : > { %v3905_v51 = vmax.f32 %v3877_v50, %v3891_v10  ;;  %v3912_v22 = vmin.f32 %v3877_v50, %v3891_v10  ;;  %v4420_v47 = vmin.f32 %v4385_v61, %v3132_v24  ;;  %6378 = vmatmul.mubr.msk.bf16.gmra.mxu0 %vm1354_vm3, %v8024_v33  ;;  %v3133_v14 = vadd.f32 %v10133_v34, %v7863_v25  ;;  %v8032_v58 = vpop.f32.mrf.mxu1 }
 0x2bc   : > { %v4407_v19 = vmin.f32 %v4372_v45, %v4393_v3  ;;  %v3925_v39 = vmax.f32 %v3897_v56, %v3036_v0  ;;  %v3932_v52 = vmin.f32 %v3897_v56, %v3036_v0  ;;  %10136 = vst [vmem:[#allocation99_spill] sm:$0xff] %v8030_v7  ;;  %10137 = vst [vmem:[#allocation100_spill] sm:$0xff] %v8032_v58  ;;  %2337 = vmatprep.mubr.bf16.mxu0 %v10060_v62  ;;  %v8039_v25 = vpop.f32.mrf.mxu0  ;;  %v10141_v7 = vld [vmem:[#allocation27_spill] sm:$0xff] }
 0x2bd   : > { %v3919_v55 = vmin.f32 %v3884_v32, %v3905_v51  ;;  %v4427_v50 = vmax.f32 %v4399_v41, %v4413_v8  ;;  %v4434_v61 = vmin.f32 %v4399_v41, %v4413_v8  ;;  %v3037_v12 = vadd.f32 %v10134_v21, %v7865_v9  ;;  %6519 = vmatprep.mubr.msk.bf16.mxu1 %vm1354_vm3, %v7914_v6  ;;  %v8041_v24 = vpop.f32.mrf.mxu1  ;;  %v10139_v32 = vld [vmem:[#allocation40_spill] sm:$0xff]  ;;  %v10140_v21 = vld [vmem:[#allocation93_spill] sm:$0xff] }
 0x2be   : > { %v3939_v45 = vmax.f32 %v3911_v60, %v3925_v39  ;;  %v3946_v0 = vmin.f32 %v3911_v60, %v3925_v39  ;;  %v4414_v56 = vmax.f32 %v4386_v13, %v3133_v14  ;;  %v4421_v10 = vmin.f32 %v4386_v13, %v3133_v14  ;;  %10138 = vst [vmem:[#allocation101_spill] sm:$0xff] %v8041_v24  ;;  %v8047_v57 = vpop.f32.mrf.mxu0  ;;  %v10143_v24 = vld [vmem:[#allocation94_spill] sm:$0xff] }
 0x2bf   : > { %v4441_v3 = vmin.f32 %v4406_v31, %v4427_v50  ;;  %v3926_v34 = vmax.f32 %v3898_v26, %v3037_v12  ;;  %v3933_v58 = vmin.f32 %v3898_v26, %v3037_v12  ;;  %v3139_v41 = vadd.f32 %v10139_v32, %v7869_v5  ;;  %v8049_v60 = vpop.f32.mrf.mxu1 }
 0x2c0   : > { %v3953_v51 = vmin.f32 %v3918_v11, %v3939_v45  ;;  %v4428_v8 = vmax.f32 %v4400_v43, %v4414_v56  ;;  %v4435_v9 = vmin.f32 %v4400_v43, %v4414_v56  ;;  %v3043_v6 = vadd.f32 %v10141_v7, %v10140_v21  ;;  %10142 = vst [vmem:[#allocation93_spill] sm:$0xff] %v8049_v60  ;;  %v8055_v43 = vpop.f32.mrf.mxu0  ;;  %v10144_v60 = vld [vmem:[#allocation95_spill] sm:$0xff] }
 0x2c1   : > { %v3940_v13 = vmax.f32 %v3912_v22, %v3926_v34  ;;  %v3947_v39 = vmin.f32 %v3912_v22, %v3926_v34  ;;  %v4448_v14 = vmax.f32 %v4420_v47, %v3139_v41  ;;  %v4455_v31 = vmin.f32 %v4420_v47, %v3139_v41  ;;  %v8053_v11 = vpop.f32.mrf.mxu1  ;;  %6520 = vmatmul.mubr.msk.bf16.gmra.mxu1 %vm1354_vm3, %v7952_v20  ;;  %v6730_v22 = vld [vmem:[%s6976_s11 + $0xc0] sm:$0xff]  }
 0x2c2   : > { %v4442_v50 = vmin.f32 %v4407_v19, %v4428_v8  ;;  %v3960_v26 = vmax.f32 %v3932_v52, %v3043_v6  ;;  %v3967_v12 = vmin.f32 %v3932_v52, %v3043_v6  ;;  %v3140_v5 = vadd.f32 %v10139_v32, %v10143_v24  ;;  %v8065_v8 = vpop.f32.mrf.mxu0  ;;  %6523 = vmatprep.mubr.msk.bf16.mxu1 %vm1354_vm3, %v7988_v18 }
 0x2c3   : > { %v3954_v21 = vmin.f32 %v3919_v55, %v3940_v13  ;;  %v4462_v45 = vmax.f32 %v4434_v61, %v4448_v14  ;;  %v4469_v56 = vmin.f32 %v4434_v61, %v4448_v14  ;;  %v3044_v34 = vadd.f32 %v10141_v7, %v10144_v60  ;;  %6379 = vmatmul.mubr.msk.bf16.gmra.mxu0 %vm1354_vm3, %v6730_v22  ;;  %v8063_v41 = vpop.f32.mrf.mxu1  ;;  %v10146_v61 = vld [vmem:[#allocation41_spill] sm:$0xff] }
 0x2c4   : > { %v3974_v47 = vmax.f32 %v3946_v0, %v3960_v26  ;;  %v3981_v19 = vmin.f32 %v3946_v0, %v3960_v26  ;;  %v4449_v52 = vmax.f32 %v4421_v10, %v3140_v5  ;;  %v4456_v24 = vmin.f32 %v4421_v10, %v3140_v5  ;;  %10145 = vst [vmem:[#allocation94_spill] sm:$0xff] %v8065_v8  ;;  %v10147_v10 = vld [vmem:[#allocation26_spill] sm:$0xff]  ;;  %v8076_v7 = vpop.f32.mrf.mxu0 }
 0x2c5   : > { %2347 = vmatprep.mubr.bf16.mxu0 %v10060_v62  ;;  %v4476_v20 = vmin.f32 %v4441_v3, %v4462_v45  ;;  %v3961_v55 = vmax.f32 %v3933_v58, %v3044_v34  ;;  %v3968_v6 = vmin.f32 %v3933_v58, %v3044_v34  ;;  %v3146_v13 = vadd.f32 %v10146_v61, %v7893_v42  ;;  %v8074_v5 = vpop.f32.mrf.mxu1 }
 0x2c6   : > { %v3988_v60 = vmin.f32 %v3953_v51, %v3974_v47  ;;  %v4463_v14 = vmax.f32 %v4435_v9, %v4449_v52  ;;  %v4470_v0 = vmin.f32 %v4435_v9, %v4449_v52  ;;  %v3050_v26 = vadd.f32 %v10147_v10, %v7895_v28  ;;  %10148 = vst [vmem:[#allocation95_spill] sm:$0xff] %v8076_v7  ;;  %v8082_v9 = vpop.f32.mrf.mxu0 }
 0x2c7   : > { %v3975_v32 = vmax.f32 %v3947_v39, %v3961_v55  ;;  %v3982_v3 = vmin.f32 %v3947_v39, %v3961_v55  ;;  %v4483_v45 = vmax.f32 %v4455_v31, %v3146_v13  ;;  %v4490_v58 = vmin.f32 %v4455_v31, %v3146_v13  ;;  %v8080_v51 = vpop.f32.mrf.mxu1 }
 0x2c8   : > { %v4477_v34 = vmin.f32 %v4442_v50, %v4463_v14  ;;  %v3995_v8 = vmax.f32 %v3967_v12, %v3050_v26  ;;  %v4002_v42 = vmin.f32 %v3967_v12, %v3050_v26  ;;  %v3147_v18 = vadd.f32 %v10146_v61, %v7899_v35  ;;  %v8088_v12 = vpop.f32.mrf.mxu0 }
 0x2c9   : > { %v3989_v28 = vmin.f32 %v3954_v21, %v3975_v32  ;;  %v4497_v47 = vmax.f32 %v4469_v56, %v4483_v45  ;;  %v4504_v52 = vmin.f32 %v4469_v56, %v4483_v45  ;;  %v3051_v7 = vadd.f32 %v10147_v10, %v7901_v44  ;;  %v8086_v13 = vpop.f32.mrf.mxu1  ;;  %6524 = vmatmul.mubr.msk.bf16.gmra.mxu1 %vm1354_vm3, %v8024_v33  ;;  %v10149_v32 = vld [vmem:[#allocation42_spill] sm:$0xff] }
 0x2ca   : > { %v4009_v39 = vmax.f32 %v3981_v19, %v3995_v8  ;;  %v4016_v55 = vmin.f32 %v3981_v19, %v3995_v8  ;;  %v4484_v31 = vmax.f32 %v4456_v24, %v3147_v18  ;;  %v4491_v50 = vmin.f32 %v4456_v24, %v3147_v18  ;;  %v6731_v56 = vld [vmem:[%s6976_s11 + $0xc8] sm:$0xff]   ;;  %v10150_v24 = vld [vmem:[#allocation29_spill] sm:$0xff]  ;;  %v8100_v10 = vpop.f32.mrf.mxu0  ;;  %6527 = vmatprep.mubr.msk.bf16.mxu1 %vm1354_vm3, %v6730_v22 }
 0x2cb   : > { %v4511_v35 = vmin.f32 %v4476_v20, %v4497_v47  ;;  %v3996_v14 = vmax.f32 %v3968_v6, %v3051_v7  ;;  %v4003_v26 = vmin.f32 %v3968_v6, %v3051_v7  ;;  %v3153_v21 = vadd.f32 %v10149_v32, %v7907_v59  ;;  %6380 = vmatmul.mubr.msk.bf16.gmra.mxu0 %vm1354_vm3, %v6731_v56  ;;  %v8098_v18 = vpop.f32.mrf.mxu1 }
 0x2cc   : > { %v4023_v44 = vmin.f32 %v3988_v60, %v4009_v39  ;;  %v4498_v19 = vmax.f32 %v4470_v0, %v4484_v31  ;;  %v4505_v8 = vmin.f32 %v4470_v0, %v4484_v31  ;;  %v3057_v45 = vadd.f32 %v10150_v24, %v7909_v17  ;;  %10151 = vst [vmem:[#allocation102_spill] sm:$0xff] %v8100_v10  ;;  %v8108_v17 = vpop.f32.mrf.mxu0 }
 0x2cd   : > { %2357 = vmatprep.mubr.bf16.mxu0 %v10060_v62  ;;  %v4010_v33 = vmax.f32 %v3982_v3, %v3996_v14  ;;  %v4017_v7 = vmin.f32 %v3982_v3, %v3996_v14  ;;  %v4518_v20 = vmax.f32 %v4490_v58, %v3153_v21  ;;  %v4525_v6 = vmin.f32 %v4490_v58, %v3153_v21  ;;  %v8106_v39 = vpop.f32.mrf.mxu1 }
 0x2ce   : > { %v4512_v59 = vmin.f32 %v4477_v34, %v4498_v19  ;;  %v4030_v47 = vmax.f32 %v4002_v42, %v3057_v45  ;;  %v4037_v60 = vmin.f32 %v4002_v42, %v3057_v45  ;;  %v3154_v0 = vadd.f32 %v10149_v32, %v7920_v63  ;;  %v8114_v42 = vpop.f32.mrf.mxu0  ;;  %v10152_v32 = vld [vmem:[#allocation43_spill] sm:$0xff] }
 0x2cf   : > { %v4024_v31 = vmin.f32 %v3989_v28, %v4010_v33  ;;  %v4532_v61 = vmax.f32 %v4504_v52, %v4518_v20  ;;  %v4539_v10 = vmin.f32 %v4504_v52, %v4518_v20  ;;  %v3058_v3 = vadd.f32 %v10150_v24, %v7922_v4  ;;  %v8112_v34 = vpop.f32.mrf.mxu1  ;;  %v10153_v4 = vld [vmem:[#allocation28_spill] sm:$0xff] }
 0x2d0   : > { %v4044_v14 = vmax.f32 %v4016_v55, %v4030_v47  ;;  %v4051_v58 = vmin.f32 %v4016_v55, %v4030_v47  ;;  %v4519_v21 = vmax.f32 %v4491_v50, %v3154_v0  ;;  %v4526_v22 = vmin.f32 %v4491_v50, %v3154_v0  ;;  %v8122_v50 = vpop.f32.mrf.mxu0 }
 0x2d1   : > { %v4546_v63 = vmin.f32 %v4511_v35, %v4532_v61  ;;  %v4031_v19 = vmax.f32 %v4003_v26, %v3058_v3  ;;  %v4038_v45 = vmin.f32 %v4003_v26, %v3058_v3  ;;  %v3160_v28 = vadd.f32 %v10152_v32, %v7929_v15  ;;  %v8120_v55 = vpop.f32.mrf.mxu1  ;;  %6528 = vmatmul.mubr.msk.bf16.gmra.mxu1 %vm1354_vm3, %v6731_v56  ;;  %v6732_v26 = vld [vmem:[%s6976_s11 + $0xd0] sm:$0xff]  }
 0x2d2   : > { %v4058_v33 = vmin.f32 %v4023_v44, %v4044_v14  ;;  %v4533_v52 = vmax.f32 %v4505_v8, %v4519_v21  ;;  %v4540_v20 = vmin.f32 %v4505_v8, %v4519_v21  ;;  %v3064_v24 = vadd.f32 %v10153_v4, %v7931_v48  ;;  %v8131_v14 = vpop.f32.mrf.mxu0  ;;  %6531 = vmatprep.mubr.msk.bf16.mxu1 %vm1354_vm3, %v6732_v26 }
 0x2d3   : > { %v4045_v47 = vmax.f32 %v4017_v7, %v4031_v19  ;;  %v4052_v0 = vmin.f32 %v4017_v7, %v4031_v19  ;;  %v4553_v61 = vmax.f32 %v4525_v6, %v3160_v28  ;;  %v4560_v35 = vmin.f32 %v4525_v6, %v3160_v28  ;;  %6381 = vmatmul.mubr.msk.bf16.gmra.mxu0 %vm1354_vm3, %v6732_v26  ;;  %v8129_v48 = vpop.f32.mrf.mxu1 }
 0x2d4   : > { %v4547_v15 = vmin.f32 %v4512_v59, %v4533_v52  ;;  %v4065_v44 = vmax.f32 %v4037_v60, %v3064_v24  ;;  %v4072_v3 = vmin.f32 %v4037_v60, %v3064_v24  ;;  %v3161_v8 = vadd.f32 %v10152_v32, %v7937_v29  ;;  %10154 = vst [vmem:[#allocation103_spill] sm:$0xff] %v8131_v14  ;;  %v8139_v29 = vpop.f32.mrf.mxu0 }
 0x2d5   : > { %2367 = vmatprep.mubr.bf16.mxu0 %v10060_v62  ;;  %v4059_v56 = vmin.f32 %v4024_v31, %v4045_v47  ;;  %v4567_v21 = vmax.f32 %v4539_v10, %v4553_v61  ;;  %v4574_v7 = vmin.f32 %v4539_v10, %v4553_v61  ;;  %v3065_v6 = vadd.f32 %v10153_v4, %v7939_v36  ;;  %v8137_v28 = vpop.f32.mrf.mxu1  ;;  %v10155_v62 = vld [vmem:[#allocation44_spill] sm:$0xff]  ;;  %v10156_v61 = vld [vmem:[#allocation31_spill] sm:$0xff] }
 0x2d6   : > { %v4079_v59 = vmax.f32 %v4051_v58, %v4065_v44  ;;  %v4086_v19 = vmin.f32 %v4051_v58, %v4065_v44  ;;  %v4554_v24 = vmax.f32 %v4526_v22, %v3161_v8  ;;  %v4561_v60 = vmin.f32 %v4526_v22, %v3161_v8  ;;  %v8147_v22 = vpop.f32.mrf.mxu0 }
 0x2d7   : > { %v4581_v52 = vmin.f32 %v4546_v63, %v4567_v21  ;;  %v4066_v32 = vmax.f32 %v4038_v45, %v3065_v6  ;;  %v4073_v14 = vmin.f32 %v4038_v45, %v3065_v6  ;;  %v3167_v31 = vadd.f32 %v10155_v62, %v7943_v16  ;;  %v8145_v58 = vpop.f32.mrf.mxu1  ;;  %10158 = vst [vmem:[#allocation105_spill] sm:$0xff] %v8147_v22 }
 0x2d8   : > { %v4093_v10 = vmin.f32 %v4058_v33, %v4079_v59  ;;  %v4568_v47 = vmax.f32 %v4540_v20, %v4554_v24  ;;  %v4575_v36 = vmin.f32 %v4540_v20, %v4554_v24  ;;  %v3071_v26 = vadd.f32 %v10156_v61, %v7945_v40  ;;  %10157 = vst [vmem:[#allocation104_spill] sm:$0xff] %v8145_v58  ;;  %v8151_v33 = vpop.f32.mrf.mxu0  ;;  %v6733_v20 = vld [vmem:[%s6976_s11 + $0xd8] sm:$0xff]  }
 0x2d9   : > { %v4080_v44 = vmax.f32 %v4052_v0, %v4066_v32  ;;  %v4087_v8 = vmin.f32 %v4052_v0, %v4066_v32  ;;  %v4588_v4 = vmax.f32 %v4560_v35, %v3167_v31  ;;  %v4595_v63 = vmin.f32 %v4560_v35, %v3167_v31  ;;  %10159 = vst [vmem:[#allocation106_spill] sm:$0xff] %v8151_v33  ;;  %v8157_v32 = vpop.f32.mrf.mxu1 }
 0x2da   : > { %v4582_v21 = vmin.f32 %v4547_v15, %v4568_v47  ;;  %v4100_v45 = vmax.f32 %v4072_v3, %v3071_v26  ;;  %v4107_v6 = vmin.f32 %v4072_v3, %v3071_v26  ;;  %v3168_v16 = vadd.f32 %v10155_v62, %v7956_v23  ;;  %6532 = vmatmul.mubr.msk.bf16.gmra.mxu1 %vm1354_vm3, %v6733_v20  ;;  %v10161_v26 = vld [vmem:[#allocation45_spill] sm:$0xff] }
 0x2db   : > { %v4094_v40 = vmin.f32 %v4059_v56, %v4080_v44  ;;  %v4602_v59 = vmax.f32 %v4574_v7, %v4588_v4  ;;  %v4609_v24 = vmin.f32 %v4574_v7, %v4588_v4  ;;  %v3072_v22 = vadd.f32 %v10156_v61, %v7958_v54  ;;  %10160 = vst [vmem:[#allocation107_spill] sm:$0xff] %v8157_v32  ;;  %v8162_v56 = vpop.f32.mrf.mxu0  ;;  %v10162_v54 = vld [vmem:[#allocation96_spill] sm:$0xff]  ;;  %v10163_v61 = vld [vmem:[#allocation30_spill] sm:$0xff] }
 0x2dc   : > { %6382 = vmatmul.mubr.msk.bf16.gmra.mxu0 %vm1354_vm3, %v6733_v20  ;;  %v4114_v0 = vmax.f32 %v4086_v19, %v4100_v45  ;;  %v4121_v35 = vmin.f32 %v4086_v19, %v4100_v45  ;;  %v4589_v15 = vmax.f32 %v4561_v60, %v3168_v16  ;;  %v4596_v3 = vmin.f32 %v4561_v60, %v3168_v16  ;;  %v8166_v45 = vpop.f32.mrf.mxu1 }
 0x2dd   : > { %v4616_v23 = vmin.f32 %v4581_v52, %v4602_v59  ;;  %v4101_v31 = vmax.f32 %v4073_v14, %v3072_v22  ;;  %v4108_v47 = vmin.f32 %v4073_v14, %v3072_v22  ;;  %v3174_v62 = vadd.f32 %v10161_v26, %v7967_v27  ;;  %v8172_v59 = vpop.f32.mrf.mxu0 }
 0x2de   : > { %v4128_v4 = vmin.f32 %v4093_v10, %v4114_v0  ;;  %v4603_v7 = vmax.f32 %v4575_v36, %v4589_v15  ;;  %v4610_v44 = vmin.f32 %v4575_v36, %v4589_v15  ;;  %v3078_v33 = vadd.f32 %v10163_v61, %v10162_v54 }
 0x2df   : > { %v4115_v32 = vmax.f32 %v4087_v8, %v4101_v31  ;;  %v4122_v20 = vmin.f32 %v4087_v8, %v4101_v31  ;;  %v4623_v58 = vmax.f32 %v4595_v63, %v3174_v62  ;;  %v4630_v19 = vmin.f32 %v4595_v63, %v3174_v62 }
 0x2e0   : > { %v4617_v60 = vmin.f32 %v4582_v21, %v4603_v7  ;;  %v4135_v52 = vmax.f32 %v4107_v6, %v3078_v33  ;;  %v4142_v14 = vmin.f32 %v4107_v6, %v3078_v33  ;;  %v3175_v27 = vadd.f32 %v10161_v26, %v7973_v46  ;;  %v10164_v6 = vld [vmem:[#allocation46_spill] sm:$0xff]  ;;  %v8176_v7 = vpop.f32.mrf.mxu1 }
 0x2e1   : > { %v4129_v22 = vmin.f32 %v4094_v40, %v4115_v32  ;;  %v4637_v16 = vmax.f32 %v4609_v24, %v4623_v58  ;;  %v4644_v10 = vmin.f32 %v4609_v24, %v4623_v58  ;;  %v3079_v36 = vadd.f32 %v10163_v61, %v7975_v37  ;;  %v10165_v24 = vld [vmem:[#allocation97_spill] sm:$0xff]  ;;  %v10166_v32 = vld [vmem:[#allocation32_spill] sm:$0xff] }
 0x2e2   : > { %v4149_v0 = vmax.f32 %v4121_v35, %v4135_v52  ;;  %v4156_v8 = vmin.f32 %v4121_v35, %v4135_v52  ;;  %v4624_v15 = vmax.f32 %v4596_v3, %v3175_v27  ;;  %v4631_v62 = vmin.f32 %v4596_v3, %v3175_v27  ;;  %v8180_v52 = vpop.f32.mrf.mxu0  ;;  %v10168_v27 = vld [vmem:[#allocation91_spill] sm:$0xff] }
 0x2e3   : > { %v4651_v63 = vmin.f32 %v4616_v23, %v4637_v16  ;;  %v4136_v31 = vmax.f32 %v4108_v47, %v3079_v36  ;;  %v4143_v21 = vmin.f32 %v4108_v47, %v3079_v36  ;;  %v3181_v33 = vadd.f32 %v10164_v6, %v7979_v38  ;;  %10167 = vst [vmem:[#allocation96_spill] sm:$0xff] %v8180_v52 }
 0x2e4   : > { %v4163_v46 = vmin.f32 %v4128_v4, %v4149_v0  ;;  %v4638_v40 = vmax.f32 %v4610_v44, %v4624_v15  ;;  %v4645_v58 = vmin.f32 %v4610_v44, %v4624_v15  ;;  %v3085_v37 = vadd.f32 %v10166_v32, %v10165_v24  ;;  %v10169_v0 = vld [vmem:[#allocation98_spill] sm:$0xff]  ;;  %v8186_v15 = vpop.f32.mrf.mxu1 }
 0x2e5   : > { %v4150_v54 = vmax.f32 %v4122_v20, %v4136_v31  ;;  %v4157_v61 = vmin.f32 %v4122_v20, %v4136_v31  ;;  %v4658_v26 = vmax.f32 %v4630_v19, %v3181_v33  ;;  %v4665_v35 = vmin.f32 %v4630_v19, %v3181_v33 }
 0x2e6   : > { %v4652_v3 = vmin.f32 %v4617_v60, %v4638_v40  ;;  %v4170_v23 = vmax.f32 %v4142_v14, %v3085_v37  ;;  %v4177_v47 = vmin.f32 %v4142_v14, %v3085_v37  ;;  %v3182_v38 = vadd.f32 %v10164_v6, %v10168_v27  ;;  %v10170_v14 = vld [vmem:[#allocation47_spill] sm:$0xff]  ;;  %v8190_v37 = vpop.f32.mrf.mxu0 }
 0x2e7   : > { %v4164_v16 = vmin.f32 %v4129_v22, %v4150_v54  ;;  %v4672_v36 = vmax.f32 %v4644_v10, %v4658_v26  ;;  %v4679_v4 = vmin.f32 %v4644_v10, %v4658_v26  ;;  %v3086_v44 = vadd.f32 %v10166_v32, %v10169_v0  ;;  %v10171_v10 = vld [vmem:[#allocation33_spill] sm:$0xff] }
 0x2e8   : > { %v4184_v24 = vmax.f32 %v4156_v8, %v4170_v23  ;;  %v4191_v20 = vmin.f32 %v4156_v8, %v4170_v23  ;;  %v4659_v31 = vmax.f32 %v4631_v62, %v3182_v38  ;;  %v4666_v19 = vmin.f32 %v4631_v62, %v3182_v38  ;;  %v8194_v23 = vpop.f32.mrf.mxu1 }
 0x2e9   : > { %v4686_v33 = vmin.f32 %v4651_v63, %v4672_v36  ;;  %v4171_v52 = vmax.f32 %v4143_v21, %v3086_v44  ;;  %v4178_v60 = vmin.f32 %v4143_v21, %v3086_v44  ;;  %v3188_v40 = vadd.f32 %v10170_v14, %v8003_v1  ;;  %v8200_v44 = vpop.f32.mrf.mxu0 }
 0x2ea   : > { %v4198_v22 = vmin.f32 %v4163_v46, %v4184_v24  ;;  %v4673_v54 = vmax.f32 %v4645_v58, %v4659_v31  ;;  %v4680_v26 = vmin.f32 %v4645_v58, %v4659_v31  ;;  %v3092_v27 = vadd.f32 %v10171_v10, %v8005_v2  ;;  %10172 = vst [vmem:[#allocation97_spill] sm:$0xff] %v8200_v44 }
 0x2eb   : > { %v4185_v0 = vmax.f32 %v4157_v61, %v4171_v52  ;;  %v4192_v32 = vmin.f32 %v4157_v61, %v4171_v52  ;;  %v4693_v6 = vmax.f32 %v4665_v35, %v3188_v40  ;;  %v4700_v8 = vmin.f32 %v4665_v35, %v3188_v40 }
 0x2ec   : > { %v4687_v62 = vmin.f32 %v4652_v3, %v4673_v54  ;;  %v4205_v63 = vmax.f32 %v4177_v47, %v3092_v27  ;;  %v4212_v21 = vmin.f32 %v4177_v47, %v3092_v27  ;;  %v3189_v1 = vadd.f32 %v10170_v14, %v8009_v30  ;;  %v10173_v47 = vld [vmem:[#allocation48_spill] sm:$0xff]  ;;  %v8204_v54 = vpop.f32.mrf.mxu1  ;;  %v10176_v27 = vld [vmem:[#allocation34_spill] sm:$0xff] }
 0x2ed   : > { %v4199_v38 = vmin.f32 %v4164_v16, %v4185_v0  ;;  %v4707_v36 = vmax.f32 %v4679_v4, %v4693_v6  ;;  %v4714_v46 = vmin.f32 %v4679_v4, %v4693_v6  ;;  %v3093_v58 = vadd.f32 %v10171_v10, %v8011_v49  ;;  %10174 = vst [vmem:[#allocation91_spill] sm:$0xff] %v8204_v54  ;;  %v10175_v4 = vld [vmem:[#allocation92_spill] sm:$0xff] }
 0x2ee   : > { %v4219_v2 = vmax.f32 %v4191_v20, %v4205_v63  ;;  %v4226_v61 = vmin.f32 %v4191_v20, %v4205_v63  ;;  %v4694_v52 = vmax.f32 %v4666_v19, %v3189_v1  ;;  %v4701_v35 = vmin.f32 %v4666_v19, %v3189_v1  ;;  %v8208_v63 = vpop.f32.mrf.mxu0  ;;  %v10178_v1 = vld [vmem:[#allocation99_spill] sm:$0xff] }
 0x2ef   : > { %v4721_v24 = vmin.f32 %v4686_v33, %v4707_v36  ;;  %v4206_v31 = vmax.f32 %v4178_v60, %v3093_v58  ;;  %v4213_v3 = vmin.f32 %v4178_v60, %v3093_v58  ;;  %v3195_v40 = vadd.f32 %v10173_v47, %v8017_v53  ;;  %10177 = vst [vmem:[#allocation98_spill] sm:$0xff] %v8208_v63 }
 0x2f0   : > { %v4233_v30 = vmin.f32 %v4198_v22, %v4219_v2  ;;  %v4708_v16 = vmax.f32 %v4680_v26, %v4694_v52  ;;  %v4715_v6 = vmin.f32 %v4680_v26, %v4694_v52  ;;  %v3099_v49 = vadd.f32 %v10176_v27, %v10175_v4  ;;  %v10179_v2 = vld [vmem:[#allocation100_spill] sm:$0xff]  ;;  %v8214_v52 = vpop.f32.mrf.mxu1 }
 0x2f1   : > { %v4220_v0 = vmax.f32 %v4192_v32, %v4206_v31  ;;  %v4227_v10 = vmin.f32 %v4192_v32, %v4206_v31  ;;  %v4728_v14 = vmax.f32 %v4700_v8, %v3195_v40  ;;  %v4735_v20 = vmin.f32 %v4700_v8, %v3195_v40  ;;  %10180 = vst [vmem:[#allocation92_spill] sm:$0xff] %v8214_v52 }
 0x2f2   : > { %v4722_v19 = vmin.f32 %v4687_v62, %v4708_v16  ;;  %v4240_v33 = vmax.f32 %v4212_v21, %v3099_v49  ;;  %v4247_v60 = vmin.f32 %v4212_v21, %v3099_v49  ;;  %v3196_v53 = vadd.f32 %v10173_v47, %v10178_v1  ;;  %v10181_v21 = vld [vmem:[#allocation49_spill] sm:$0xff]  ;;  %v8220_v49 = vpop.f32.mrf.mxu0  ;;  %v10184_v1 = vld [vmem:[#allocation35_spill] sm:$0xff] }
 0x2f3   : > { %v4234_v36 = vmin.f32 %v4199_v38, %v4220_v0  ;;  %v4742_v58 = vmax.f32 %v4714_v46, %v4728_v14  ;;  %v4749_v22 = vmin.f32 %v4714_v46, %v4728_v14  ;;  %v3100_v26 = vadd.f32 %v10176_v27, %v10179_v2  ;;  %10182 = vst [vmem:[#allocation99_spill] sm:$0xff] %v8220_v49  ;;  %v10183_v0 = vld [vmem:[#allocation101_spill] sm:$0xff] }
 0x2f4   : > { %v4254_v4 = vmax.f32 %v4226_v61, %v4240_v33  ;;  %v4261_v32 = vmin.f32 %v4226_v61, %v4240_v33  ;;  %v4729_v31 = vmax.f32 %v4701_v35, %v3196_v53  ;;  %v4736_v8 = vmin.f32 %v4701_v35, %v3196_v53 }
 0x2f5   : > { %v4756_v40 = vmin.f32 %v4721_v24, %v4742_v58  ;;  %v4241_v63 = vmax.f32 %v4213_v3, %v3100_v26  ;;  %v8216_v62 = vmin.f32 %v4213_v3, %v3100_v26  ;;  %v3202_v16 = vadd.f32 %v10181_v21, %v8039_v25  ;;  %v8226_v24 = vpop.f32.mrf.mxu1  ;;  %v10186_v26 = vld [vmem:[#allocation52_spill] sm:$0xff] }
 0x2f6   : > { %v4268_v38 = vmin.f32 %v4233_v30, %v4254_v4  ;;  %v4743_v14 = vmax.f32 %v4715_v6, %v4729_v31  ;;  %v4750_v46 = vmin.f32 %v4715_v6, %v4729_v31  ;;  %v3106_v2 = vadd.f32 %v10184_v1, %v10183_v0  ;;  %10185 = vst [vmem:[#allocation100_spill] sm:$0xff] %v8226_v24  ;;  %v8235_v31 = vpop.f32.mrf.mxu0 }
 0x2f7   : > { %v4255_v27 = vmax.f32 %v4227_v10, %v4241_v63  ;;  %v8224_v47 = vmin.f32 %v4227_v10, %v4241_v63  ;;  %v4763_v61 = vmax.f32 %v4735_v20, %v3202_v16  ;;  %v4770_v35 = vmin.f32 %v4735_v20, %v3202_v16  ;;  %10187 = vst [vmem:[#allocation101_spill] sm:$0xff] %v8235_v31 }
 0x2f8   : > { %v4757_v3 = vmin.f32 %v4722_v19, %v4743_v14  ;;  %v4275_v33 = vmax.f32 %v4247_v60, %v3106_v2  ;;  %v8228_v53 = vmin.f32 %v4247_v60, %v3106_v2  ;;  %v3203_v25 = vadd.f32 %v10181_v21, %v8047_v57  ;;  %v8240_v2 = vpop.f32.mrf.mxu1  ;;  %v10189_v57 = vld [vmem:[#allocation54_spill] sm:$0xff] }
 0x2f9   : > { %v8232_v30 = vmin.f32 %v4234_v36, %v4255_v27  ;;  %v4777_v6 = vmax.f32 %v4749_v22, %v4763_v61  ;;  %v4784_v58 = vmin.f32 %v4749_v22, %v4763_v61  ;;  %v4798_v4 = vmax.f32 %v4770_v35, %v10186_v26  ;;  %10188 = vst [vmem:[#allocation52_spill] sm:$0xff] %v8240_v2 }
 0x2fa   : > { %v4805_v10 = vmin.f32 %v4770_v35, %v10186_v26  ;;  %v4289_v20 = vmax.f32 %v4261_v32, %v4275_v33  ;;  %v8238_v63 = vmin.f32 %v4261_v32, %v4275_v33  ;;  %v4764_v19 = vmax.f32 %v4736_v8, %v3203_v25  ;;  %v10190_v35 = vld [vmem:[#allocation55_spill] sm:$0xff]  ;;  %v8248_v33 = vpop.f32.mrf.mxu0 }
 0x2fb   : > { %v4791_v16 = vmin.f32 %v4756_v40, %v4777_v6  ;;  %v4812_v60 = vmax.f32 %v4784_v58, %v4798_v4  ;;  %v4819_v14 = vmin.f32 %v4784_v58, %v4798_v4  ;;  %v4771_v0 = vmin.f32 %v4736_v8, %v3203_v25  ;;  %10191 = vst [vmem:[#allocation54_spill] sm:$0xff] %v8248_v33  ;;  %v10192_v8 = vld [vmem:[#allocation57_spill] sm:$0xff] }
 0x2fc   : > { %v4833_v27 = vmax.f32 %v4805_v10, %v10189_v57  ;;  %v4840_v36 = vmin.f32 %v4805_v10, %v10189_v57  ;;  %v8244_v22 = vmin.f32 %v4268_v38, %v4289_v20  ;;  %v4778_v61 = vmax.f32 %v4750_v46, %v4764_v19  ;;  %v10193_v38 = vld [vmem:[#allocation59_spill] sm:$0xff]  ;;  %v8253_v57 = vpop.f32.mrf.mxu1 }
 0x2fd   : > { %v4826_v21 = vmin.f32 %v4791_v16, %v4812_v60  ;;  %v4785_v31 = vmin.f32 %v4750_v46, %v4764_v19  ;;  %v4799_v26 = vmax.f32 %v4771_v0, %v10190_v35  ;;  %v4806_v32 = vmin.f32 %v4771_v0, %v10190_v35  ;;  %10194 = vst [vmem:[#allocation55_spill] sm:$0xff] %v8253_v57  ;;  %v10195_v60 = vld [vmem:[#allocation58_spill] sm:$0xff]  ;;  %v8256_v35 = vpop.permute.xlu1 %2912  ;;  %v10198_v57 = vld [vmem:[#allocation65_spill] sm:$0xff] }
 0x2fe   : > { %v4847_v40 = vmax.f32 %v4819_v14, %v4833_v27  ;;  %v4854_v6 = vmin.f32 %v4819_v14, %v4833_v27  ;;  %v4868_v25 = vmax.f32 %v4840_v36, %v10192_v8  ;;  %v4875_v58 = vmin.f32 %v4840_v36, %v10192_v8  ;;  %10196 = vst [vmem:[#allocation57_spill] sm:$0xff] %v8256_v35  ;;  %v8265_v24 = vpop.f32.mrf.mxu1 }
 0x2ff   : > { %v4792_v4 = vmin.f32 %v4757_v3, %v4778_v61  ;;  %v4813_v2 = vmax.f32 %v4785_v31, %v4799_v26  ;;  %v4820_v10 = vmin.f32 %v4785_v31, %v4799_v26  ;;  %v4834_v20 = vmax.f32 %v4806_v32, %v10193_v38  ;;  %v8260_v3 = vpop.f32.mrf.mxu0  ;;  %10200 = vst [vmem:[#allocation58_spill] sm:$0xff] %v8265_v24 }
 0x300   : > { %v4861_v46 = vmin.f32 %v4826_v21, %v4847_v40  ;;  %v4882_v19 = vmax.f32 %v4854_v6, %v4868_v25  ;;  %v4889_v16 = vmin.f32 %v4854_v6, %v4868_v25  ;;  %v4903_v0 = vmax.f32 %v4875_v58, %v10195_v60  ;;  %10197 = vst [vmem:[#allocation59_spill] sm:$0xff] %v8260_v3  ;;  %v10199_v25 = vld [vmem:[#allocation62_spill] sm:$0xff] }
 0x301   : > { %v4910_v14 = vmin.f32 %v4875_v58, %v10195_v60  ;;  %v4827_v27 = vmin.f32 %v4792_v4, %v4813_v2  ;;  %v4841_v33 = vmin.f32 %v4806_v32, %v10193_v38  ;;  %v4848_v36 = vmax.f32 %v4820_v10, %v4834_v20  ;;  %v10201_v58 = vld [vmem:[#allocation84_spill] sm:$0xff]  ;;  %v10202_v38 = vld [vmem:[#allocation93_spill] sm:$0xff]  ;;  %v8278_v60 = vpop.f32.mrf.mxu0 }
 0x302   : > { %v4896_v31 = vmin.f32 %v4861_v46, %v4882_v19  ;;  %v4917_v61 = vmax.f32 %v4889_v16, %v4903_v0  ;;  %v4924_v26 = vmin.f32 %v4889_v16, %v4903_v0  ;;  %v4855_v8 = vmin.f32 %v4820_v10, %v4834_v20  ;;  %v10203_v19 = vld [vmem:[#allocation67_spill] sm:$0xff]  ;;  %10204 = vst [vmem:[#allocation65_spill] sm:$0xff] %v8278_v60 }
 0x303   : > { %v4938_v21 = vmax.f32 %v4910_v14, %v10198_v57  ;;  %v4945_v40 = vmin.f32 %v4910_v14, %v10198_v57  ;;  %v4862_v6 = vmin.f32 %v4827_v27, %v4848_v36  ;;  %v4869_v49 = vmax.f32 %v4841_v33, %v10199_v25  ;;  %v10205_v27 = vld [vmem:[#allocation61_spill] sm:$0xff]  ;;  %v8287_v52 = vpop.f32.mrf.mxu0 }
 0x304   : > { %v8269_v2 = vadd.f32 %v8256_v35, %v10201_v58  ;;  %v4931_v32 = vmin.f32 %v4896_v31, %v4917_v61  ;;  %v4876_v4 = vmin.f32 %v4841_v33, %v10199_v25  ;;  %v8274_v46 = vadd.f32 %v10184_v1, %v10202_v38  ;;  %v10206_v58 = vld [vmem:[#allocation70_spill] sm:$0xff]  ;;  %v8283_v1 = vpop.f32.mrf.mxu1  ;;  %10209 = vst [vmem:[#allocation84_spill] sm:$0xff] %v8287_v52 }
 0x305   : > { %v4952_v10 = vmax.f32 %v4924_v26, %v4938_v21  ;;  %v4959_v20 = vmin.f32 %v4924_v26, %v4938_v21  ;;  %v4973_v57 = vmax.f32 %v4945_v40, %v10203_v19  ;;  %v4980_v16 = vmin.f32 %v4945_v40, %v10203_v19  ;;  %10207 = vst [vmem:[#allocation62_spill] sm:$0xff] %v8283_v1 }
 0x306   : > { %v4883_v0 = vmax.f32 %v4855_v8, %v4869_v49  ;;  %v4890_v14 = vmin.f32 %v4855_v8, %v4869_v49  ;;  %v4904_v36 = vmax.f32 %v4876_v4, %v10205_v27  ;;  %v4911_v31 = vmin.f32 %v4876_v4, %v10205_v27  ;;  %v10208_v49 = vld [vmem:[#allocation64_spill] sm:$0xff]  ;;  %v10210_v4 = vld [vmem:[#allocation73_spill] sm:$0xff] }
 0x307   : > { %v4966_v61 = vmin.f32 %v4931_v32, %v4952_v10  ;;  %v4987_v33 = vmax.f32 %v4959_v20, %v4973_v57  ;;  %v4994_v25 = vmin.f32 %v4959_v20, %v4973_v57  ;;  %v5008_v38 = vmax.f32 %v4980_v16, %v10206_v58 }
 0x308   : > { %v5015_v26 = vmin.f32 %v4980_v16, %v10206_v58  ;;  %v4897_v21 = vmin.f32 %v4862_v6, %v4883_v0  ;;  %v4918_v3 = vmax.f32 %v4890_v14, %v4904_v36  ;;  %v4925_v40 = vmin.f32 %v4890_v14, %v4904_v36  ;;  %v10211_v6 = vld [vmem:[#allocation36_spill] sm:$0xff]  ;;  %v8296_v14 = vpop.f32.mrf.mxu1 }
 0x309   : > { %v5001_v19 = vmin.f32 %v4966_v61, %v4987_v33  ;;  %v5022_v60 = vmax.f32 %v4994_v25, %v5008_v38  ;;  %v5029_v24 = vmin.f32 %v4994_v25, %v5008_v38  ;;  %v4939_v8 = vmax.f32 %v4911_v31, %v10208_v49  ;;  %10212 = vst [vmem:[#allocation93_spill] sm:$0xff] %v8296_v14  ;;  %v10213_v33 = vld [vmem:[#allocation75_spill] sm:$0xff]  ;;  %v10219_v14 = vld [vmem:[#allocation82_spill] sm:$0xff] }
 0x30a   : > { %v5043_v32 = vmax.f32 %v5015_v26, %v10210_v4  ;;  %v5050_v10 = vmin.f32 %v5015_v26, %v10210_v4  ;;  %v4932_v20 = vmin.f32 %v4897_v21, %v4918_v3  ;;  %v4946_v57 = vmin.f32 %v4911_v31, %v10208_v49  ;;  %v10214_v26 = vld [vmem:[#allocation69_spill] sm:$0xff]  ;;  %v8306_v21 = vpop.f32.mrf.mxu0  ;;  %v10216_v49 = vld [vmem:[#allocation79_spill] sm:$0xff] }
 0x30b   : > { %v5036_v27 = vmin.f32 %v5001_v19, %v5022_v60  ;;  %v4953_v1 = vmax.f32 %v4925_v40, %v4939_v8  ;;  %v4960_v16 = vmin.f32 %v4925_v40, %v4939_v8  ;;  %v8294_v0 = vadd.f32 %v10211_v6, %v8053_v11  ;;  %10215 = vst [vmem:[#allocation67_spill] sm:$0xff] %v8306_v21 }
 0x30c   : > { %v5057_v36 = vmax.f32 %v5029_v24, %v5043_v32  ;;  %v5064_v61 = vmin.f32 %v5029_v24, %v5043_v32  ;;  %v5078_v25 = vmax.f32 %v5050_v10, %v10213_v33  ;;  %v5085_v58 = vmin.f32 %v5050_v10, %v10213_v33 }
 0x30d   : > { %v4967_v38 = vmin.f32 %v4932_v20, %v4953_v1  ;;  %v4974_v3 = vmax.f32 %v4946_v57, %v10214_v26  ;;  %v4981_v31 = vmin.f32 %v4946_v57, %v10214_v26  ;;  %v8304_v60 = vmax.f32 %v8216_v62, %v8274_v46  ;;  %v10217_v1 = vld [vmem:[#allocation72_spill] sm:$0xff]  ;;  %v8311_v20 = vpop.f32.mrf.mxu1 }
 0x30e   : > { %v5071_v11 = vmin.f32 %v5036_v27, %v5057_v36  ;;  %v5092_v40 = vmax.f32 %v5064_v61, %v5078_v25  ;;  %v5099_v19 = vmin.f32 %v5064_v61, %v5078_v25  ;;  %v5113_v24 = vmax.f32 %v5085_v58, %v10216_v49  ;;  %10218 = vst [vmem:[#allocation61_spill] sm:$0xff] %v8311_v20  ;;  %v8316_v25 = vpop.f32.mrf.mxu0 }
 0x30f   : > { %v5120_v8 = vmin.f32 %v5085_v58, %v10216_v49  ;;  %v4988_v4 = vmax.f32 %v4960_v16, %v4974_v3  ;;  %v4995_v32 = vmin.f32 %v4960_v16, %v4974_v3  ;;  %v5009_v10 = vmax.f32 %v4981_v31, %v10217_v1  ;;  %10220 = vst [vmem:[#allocation70_spill] sm:$0xff] %v8316_v25  ;;  %v10221_v16 = vld [vmem:[#allocation74_spill] sm:$0xff] }
 0x310   : > { %v5106_v57 = vmin.f32 %v5071_v11, %v5092_v40  ;;  %v5127_v33 = vmax.f32 %v5099_v19, %v5113_v24  ;;  %v5134_v26 = vmin.f32 %v5099_v19, %v5113_v24  ;;  %v5016_v52 = vmin.f32 %v4981_v31, %v10217_v1  ;;  %v10222_v40 = vld [vmem:[#allocation86_spill] sm:$0xff]  ;;  %v8322_v24 = vpop.f32.mrf.mxu1  ;;  %v8326_v54 = vpop.f32.mrf.mxu0 }
 0x311   : > { %v5148_v21 = vmax.f32 %v5120_v8, %v10219_v14  ;;  %v5155_v27 = vmin.f32 %v5120_v8, %v10219_v14  ;;  %v5002_v36 = vmin.f32 %v4967_v38, %v4988_v4  ;;  %v5023_v61 = vmax.f32 %v4995_v32, %v5009_v10  ;;  %v10223_v8 = vld [vmem:[#allocation77_spill] sm:$0xff]  ;;  %10225 = vst [vmem:[#allocation64_spill] sm:$0xff] %v8326_v54 }
 0x312   : > { %v5141_v58 = vmin.f32 %v5106_v57, %v5127_v33  ;;  %v5030_v49 = vmin.f32 %v4995_v32, %v5009_v10  ;;  %v5044_v3 = vmax.f32 %v5016_v52, %v10221_v16  ;;  %v5051_v44 = vmin.f32 %v5016_v52, %v10221_v16  ;;  %v10224_v10 = vld [vmem:[#allocation89_spill] sm:$0xff] }
 0x313   : > { %v5162_v20 = vmax.f32 %v5134_v26, %v5148_v21  ;;  %v5169_v11 = vmin.f32 %v5134_v26, %v5148_v21  ;;  %v5183_v19 = vmax.f32 %v5155_v27, %v10222_v40  ;;  %v5190_v31 = vmin.f32 %v5155_v27, %v10222_v40 }
 0x314   : > { %v5037_v1 = vmin.f32 %v5002_v36, %v5023_v61  ;;  %v5058_v14 = vmax.f32 %v5030_v49, %v5044_v3  ;;  %v5065_v38 = vmin.f32 %v5030_v49, %v5044_v3  ;;  %v5079_v4 = vmax.f32 %v5051_v44, %v10223_v8  ;;  %v8330_v49 = vpop.f32.mrf.mxu1 }
 0x315   : > { %v5176_v25 = vmin.f32 %v5141_v58, %v5162_v20  ;;  %v5197_v57 = vmax.f32 %v5169_v11, %v5183_v19  ;;  %v5204_v32 = vmin.f32 %v5169_v11, %v5183_v19  ;;  %v5218_v33 = vmax.f32 %v5190_v31, %v10224_v10  ;;  %v10226_v11 = vld [vmem:[#allocation80_spill] sm:$0xff] }
 0x316   : > { %v5225_v52 = vmin.f32 %v5190_v31, %v10224_v10  ;;  %v5072_v21 = vmin.f32 %v5037_v1, %v5058_v14  ;;  %v5086_v26 = vmin.f32 %v5051_v44, %v10223_v8  ;;  %v5093_v27 = vmax.f32 %v5065_v38, %v5079_v4  ;;  %v8342_v1 = vpop.f32.mrf.mxu0 }
 0x317   : > { %v5211_v16 = vmin.f32 %v5176_v25, %v5197_v57  ;;  %v5232_v40 = vmax.f32 %v5204_v32, %v5218_v33  ;;  %v5239_v36 = vmin.f32 %v5204_v32, %v5218_v33  ;;  %v5100_v61 = vmin.f32 %v5065_v38, %v5079_v4  ;;  %v10227_v4 = vld [vmem:[#allocation83_spill] sm:$0xff] }
 0x318   : > { %v5253_v20 = vmax.f32 %v5225_v52, %v8269_v2  ;;  %v5260_v58 = vmin.f32 %v5225_v52, %v8269_v2  ;;  %v5107_v3 = vmin.f32 %v5072_v21, %v5093_v27  ;;  %v5114_v19 = vmax.f32 %v5086_v26, %v10226_v11  ;;  %v3311_v52 = vld [vmem:[#allocation4 + $0x8] sm:$0xff]  ;;  %v8349_v21 = vpop.f32.mrf.mxu1 }
 0x319   : > { %v5246_v54 = vmin.f32 %v5211_v16, %v5232_v40  ;;  %v5121_v31 = vmin.f32 %v5086_v26, %v10226_v11  ;;  %v4290_v44 = vmax.f32 %v8224_v47, %v8304_v60  ;;  %v8340_v25 = vmin.f32 %v8224_v47, %v8304_v60  ;;  %v10228_v47 = vld [vmem:[#allocation88_spill] sm:$0xff]  ;;  %v10229_v16 = vld [vmem:[#allocation9_spill] sm:$0xff] }
 0x31a   : > { %v5267_v14 = vmax.f32 %v5239_v36, %v5253_v20  ;;  %v5274_v38 = vmin.f32 %v5239_v36, %v5253_v20  ;;  %5288 = vst [vmem:[#allocation4 + $0x30] sm:$0xff] %v5260_v58  ;;  %v5128_v8 = vmax.f32 %v5100_v61, %v5114_v19  ;;  %v5135_v2 = vmin.f32 %v5100_v61, %v5114_v19  ;;  %v10230_v20 = vld [vmem:[#allocation87_spill] sm:$0xff]  ;;  %v3318_v11 = vld [vmem:[#allocation5 + $0x28] sm:$0xff]  ;;  %v8357_v19 = vpop.f32.mrf.mxu0 }
 0x31b   : > { %v5149_v57 = vmax.f32 %v5121_v31, %v10227_v4  ;;  %v5156_v32 = vmin.f32 %v5121_v31, %v10227_v4  ;;  %v4304_v10 = vmin.f32 %v8232_v30, %v4290_v44  ;;  %v4310_v33 = vmax.f32 %v8228_v53, %v8294_v0  ;;  %10231 = vst [vmem:[#allocation73_spill] sm:$0xff] %v8357_v19  ;;  %v8364_v4 = vpop.f32.mrf.mxu1 }
 0x31c   : > { %v3301_v60 = vadd.f32 %v8256_v35, %v10228_v47  ;;  %v5281_v26 = vmin.f32 %v5246_v54, %v5267_v14  ;;  %5295 = vst [vmem:[#allocation5] sm:$0xff] %v5274_v38  ;;  %v5142_v27 = vmin.f32 %v5107_v3, %v5128_v8  ;;  %v2919_v40 = vadd.f32 %v10229_v16, %v8055_v43  ;;  %v10232_v8 = vld [vmem:[#allocation90_spill] sm:$0xff] }
 0x31d   : > { %v5163_v36 = vmax.f32 %v5135_v2, %v5149_v57  ;;  %v5170_v61 = vmin.f32 %v5135_v2, %v5149_v57  ;;  %v5184_v58 = vmax.f32 %v5156_v32, %v10230_v20  ;;  %v5191_v30 = vmin.f32 %v5156_v32, %v10230_v20 }
 0x31e   : > { %5302 = vst [vmem:[#allocation6] sm:$0xff] %v5281_v26  ;;  %v4283_v31 = vmin.f32 %v8216_v62, %v8274_v46  ;;  %v4324_v54 = vmax.f32 %v8238_v63, %v4310_v33  ;;  %v4331_v3 = vmin.f32 %v8238_v63, %v4310_v33  ;;  %v3332_v44 = vmax.f32 %v3311_v52, %v2919_v40  ;;  %v3325_v63 = vld [vmem:[#allocation6 + $0x18] sm:$0xff] }
 0x31f   : > { %v5177_v14 = vmin.f32 %v5142_v27, %v5163_v36  ;;  %v5198_v43 = vmax.f32 %v5170_v61, %v5184_v58  ;;  %v5205_v38 = vmin.f32 %v5170_v61, %v5184_v58  ;;  %v5219_v2 = vmax.f32 %v5191_v30, %v10232_v8  ;;  %v3312_v27 = vld [vmem:[#allocation4 + $0x20] sm:$0xff]  ;;  %v8372_v36 = vpop.f32.mrf.mxu0 }
 0x320   : > { %v5226_v57 = vmin.f32 %v5191_v30, %v10232_v8  ;;  %v4317_v32 = vmin.f32 %v8228_v53, %v8294_v0  ;;  %v4338_v47 = vmin.f32 %v8244_v22, %v4324_v54  ;;  %v3346_v62 = vmax.f32 %v3318_v11, %v3332_v44  ;;  %10233 = vst [vmem:[#allocation75_spill] sm:$0xff] %v8372_v36  ;;  %v10234_v30 = vld [vmem:[#allocation94_spill] sm:$0xff]  ;;  %v3319_v54 = vld [vmem:[#allocation5 + $0x30] sm:$0xff] }
 0x321   : > { %v5212_v46 = vmin.f32 %v5177_v14, %v5198_v43  ;;  %v5233_v26 = vmax.f32 %v5205_v38, %v5219_v2  ;;  %v5240_v20 = vmin.f32 %v5205_v38, %v5219_v2  ;;  %v3114_v33 = vadd.f32 %v10211_v6, %v8063_v41  ;;  %v10235_v14 = vld [vmem:[#allocation37_spill] sm:$0xff]  ;;  %v8378_v38 = vpop.f32.mrf.mxu1 }
 0x322   : > { %v5254_v61 = vmax.f32 %v5226_v57, %v3301_v60  ;;  %v5261_v58 = vmin.f32 %v5226_v57, %v3301_v60  ;;  %v3339_v35 = vmin.f32 %v3311_v52, %v2919_v40  ;;  %v2920_v8 = vadd.f32 %v10229_v16, %v10234_v30  ;;  %v8382_v57 = vpop.f32.mrf.mxu0  ;;  %v10237_v30 = vld [vmem:[#allocation11_spill] sm:$0xff] }
 0x323   : > { %v5247_v53 = vmin.f32 %v5212_v46, %v5233_v26  ;;  %v3353_v0 = vmin.f32 %v3318_v11, %v3332_v44  ;;  %v4311_v22 = vmax.f32 %v4283_v31, %v3114_v33  ;;  %v3120_v43 = vadd.f32 %v10235_v14, %v8074_v5  ;;  %v3326_v44 = vld [vmem:[#allocation6 + $0x10] sm:$0xff]  ;;  %v10236_v26 = vld [vmem:[#allocation95_spill] sm:$0xff] }
 0x324   : > { %v5268_v2 = vmax.f32 %v5240_v20, %v5254_v61  ;;  %v5275_v41 = vmin.f32 %v5240_v20, %v5254_v61  ;;  %5289 = vst [vmem:[#allocation4] sm:$0xff] %v5261_v58  ;;  %v3360_v6 = vmin.f32 %v3325_v63, %v3346_v62  ;;  %v3333_v36 = vmax.f32 %v3312_v27, %v2920_v8  ;;  %v8388_v63 = vpop.f32.mrf.mxu1 }
 0x325   : > { %v4318_v19 = vmin.f32 %v4283_v31, %v3114_v33  ;;  %v4325_v52 = vmax.f32 %v8340_v25, %v4311_v22  ;;  %v4332_v60 = vmin.f32 %v8340_v25, %v4311_v22  ;;  %v4345_v40 = vmax.f32 %v4317_v32, %v3120_v43 }
 0x326   : > { %v5282_v11 = vmin.f32 %v5247_v53, %v5268_v2  ;;  %5296 = vst [vmem:[#allocation5 + $0x8] sm:$0xff] %v5275_v41  ;;  %v3340_v46 = vmin.f32 %v3312_v27, %v2920_v8  ;;  %v3347_v5 = vmax.f32 %v3319_v54, %v3333_v36  ;;  %v2926_v16 = vadd.f32 %v10237_v30, %v10236_v26  ;;  %v10238_v2 = vld [vmem:[#allocation38_spill] sm:$0xff]  ;;  %v8394_v41 = vpop.f32.mrf.mxu0 }
 0x327   : > { %v4339_v20 = vmin.f32 %v4304_v10, %v4325_v52  ;;  %v4359_v61 = vmax.f32 %v4331_v3, %v4345_v40  ;;  %v4366_v62 = vmin.f32 %v4331_v3, %v4345_v40  ;;  %v3121_v31 = vadd.f32 %v10235_v14, %v8080_v51 }
 0x328   : > { %5303 = vst [vmem:[#allocation6 + $0x8] sm:$0xff] %v5282_v11  ;;  %v3354_v25 = vmin.f32 %v3319_v54, %v3333_v36  ;;  %v4352_v33 = vmin.f32 %v4317_v32, %v3120_v43  ;;  %v3367_v58 = vmax.f32 %v3339_v35, %v2926_v16  ;;  %v2927_v53 = vadd.f32 %v10237_v30, %v8082_v9  ;;  %v8396_v54 = vpop.f32.mrf.mxu1 }
 0x329   : > { %v3361_v27 = vmin.f32 %v3326_v44, %v3347_v5  ;;  %v4373_v8 = vmin.f32 %v4338_v47, %v4359_v61  ;;  %v4346_v22 = vmax.f32 %v4318_v19, %v3121_v31  ;;  %v3127_v10 = vadd.f32 %v10238_v2, %v8086_v13  ;;  %v10239_v47 = vld [vmem:[#allocation8_spill] sm:$0xff] }
 0x32a   : > { %v3374_v3 = vmin.f32 %v3339_v35, %v2926_v16  ;;  %v3381_v52 = vmax.f32 %v3353_v0, %v3367_v58  ;;  %v4353_v51 = vmin.f32 %v4318_v19, %v3121_v31  ;;  %v3368_v40 = vmax.f32 %v3340_v46, %v2927_v53  ;;  %v8402_v16 = vpop.f32.mrf.mxu0  ;;  %v10240_v31 = vld [vmem:[#allocation102_spill] sm:$0xff] }
 0x32b   : > { %v3388_v26 = vmin.f32 %v3353_v0, %v3367_v58  ;;  %v4360_v11 = vmax.f32 %v4332_v60, %v4346_v22  ;;  %v4367_v36 = vmin.f32 %v4332_v60, %v4346_v22  ;;  %v4380_v32 = vmax.f32 %v4352_v33, %v3127_v10  ;;  %v10241_v22 = vld [vmem:[#allocation39_spill] sm:$0xff] }
 0x32c   : > { %v3375_v43 = vmin.f32 %v3340_v46, %v2927_v53  ;;  %v3382_v9 = vmax.f32 %v3354_v25, %v3368_v40  ;;  %v4387_v44 = vmin.f32 %v4352_v33, %v3127_v10  ;;  %v2933_v5 = vadd.f32 %v10239_v47, %v8088_v12 }
 0x32d   : > { %v4374_v61 = vmin.f32 %v4339_v20, %v4360_v11  ;;  %v4394_v13 = vmax.f32 %v4366_v62, %v4380_v32  ;;  %v4401_v30 = vmin.f32 %v4366_v62, %v4380_v32  ;;  %v3128_v35 = vadd.f32 %v10238_v2, %v8098_v18  ;;  %v8408_v20 = vpop.f32.mrf.mxu1 }
 0x32e   : > { %v3395_v19 = vmin.f32 %v3360_v6, %v3381_v52  ;;  %v3389_v0 = vmin.f32 %v3354_v25, %v3368_v40  ;;  %v3402_v60 = vmax.f32 %v3374_v3, %v2933_v5  ;;  %v2934_v58 = vadd.f32 %v10239_v47, %v10240_v31  ;;  %v8410_v52 = vpop.f32.mrf.mxu0 }
 0x32f   : > { %v3396_v46 = vmin.f32 %v3361_v27, %v3382_v9  ;;  %v4408_v53 = vmin.f32 %v4373_v8, %v4394_v13  ;;  %v4381_v33 = vmax.f32 %v4353_v51, %v3128_v35  ;;  %v3134_v12 = vadd.f32 %v10241_v22, %v8106_v39  ;;  %v10242_v8 = vld [vmem:[#allocation10_spill] sm:$0xff] }
 0x330   : > { %v3409_v62 = vmin.f32 %v3374_v3, %v2933_v5  ;;  %v3416_v10 = vmax.f32 %v3388_v26, %v3402_v60  ;;  %v4388_v11 = vmin.f32 %v4353_v51, %v3128_v35  ;;  %v3403_v18 = vmax.f32 %v3375_v43, %v2934_v58  ;;  %v8416_v51 = vpop.f32.mrf.mxu1 }
 0x331   : > { %v3423_v32 = vmin.f32 %v3388_v26, %v3402_v60  ;;  %v4395_v2 = vmax.f32 %v4367_v36, %v4381_v33  ;;  %v4402_v6 = vmin.f32 %v4367_v36, %v4381_v33  ;;  %v4415_v25 = vmax.f32 %v4387_v44, %v3134_v12 }
 0x332   : > { %v3410_v40 = vmin.f32 %v3375_v43, %v2934_v58  ;;  %v3417_v31 = vmax.f32 %v3389_v0, %v3403_v18  ;;  %v4422_v27 = vmin.f32 %v4387_v44, %v3134_v12  ;;  %v2940_v9 = vadd.f32 %v10242_v8, %v8108_v17  ;;  %v10243_v58 = vld [vmem:[#allocation40_spill] sm:$0xff] }
 0x333   : > { %v4409_v13 = vmin.f32 %v4374_v61, %v4395_v2  ;;  %v4429_v39 = vmax.f32 %v4401_v30, %v4415_v25  ;;  %v4436_v14 = vmin.f32 %v4401_v30, %v4415_v25  ;;  %v3135_v3 = vadd.f32 %v10241_v22, %v8112_v34  ;;  %v8422_v2 = vpop.f32.mrf.mxu0 }
 0x334   : > { %v3430_v26 = vmin.f32 %v3395_v19, %v3416_v10  ;;  %v3424_v5 = vmin.f32 %v3389_v0, %v3403_v18  ;;  %v3437_v36 = vmax.f32 %v3409_v62, %v2940_v9  ;;  %v2941_v35 = vadd.f32 %v10242_v8, %v8114_v42  ;;  %v8424_v10 = vpop.f32.mrf.mxu1  ;;  %v10249_v8 = vld [vmem:[#allocation104_spill] sm:$0xff] }
 0x335   : > { %v3431_v43 = vmin.f32 %v3396_v46, %v3417_v31  ;;  %v4443_v60 = vmin.f32 %v4408_v53, %v4429_v39  ;;  %v4416_v44 = vmax.f32 %v4388_v11, %v3135_v3  ;;  %v3141_v17 = vadd.f32 %v10243_v58, %v8120_v55  ;;  %v10244_v53 = vld [vmem:[#allocation13_spill] sm:$0xff] }
 0x336   : > { %v3444_v30 = vmin.f32 %v3409_v62, %v2940_v9  ;;  %v3451_v61 = vmax.f32 %v3423_v32, %v3437_v36  ;;  %v4423_v33 = vmin.f32 %v4388_v11, %v3135_v3  ;;  %v3438_v34 = vmax.f32 %v3410_v40, %v2941_v35  ;;  %v8430_v11 = vpop.f32.mrf.mxu0  ;;  %v10245_v3 = vld [vmem:[#allocation103_spill] sm:$0xff] }
 0x337   : > { %v3458_v12 = vmin.f32 %v3423_v32, %v3437_v36  ;;  %v4430_v25 = vmax.f32 %v4402_v6, %v4416_v44  ;;  %v4437_v19 = vmin.f32 %v4402_v6, %v4416_v44  ;;  %v4450_v0 = vmax.f32 %v4422_v27, %v3141_v17  ;;  %v10246_v44 = vld [vmem:[#allocation41_spill] sm:$0xff] }
 0x338   : > { %v3445_v18 = vmin.f32 %v3410_v40, %v2941_v35  ;;  %v3452_v42 = vmax.f32 %v3424_v5, %v3438_v34  ;;  %v4457_v46 = vmin.f32 %v4422_v27, %v3141_v17  ;;  %v2947_v31 = vadd.f32 %v10244_v53, %v8122_v50 }
 0x339   : > { %v4444_v39 = vmin.f32 %v4409_v13, %v4430_v25  ;;  %v4464_v55 = vmax.f32 %v4436_v14, %v4450_v0  ;;  %v4471_v22 = vmin.f32 %v4436_v14, %v4450_v0  ;;  %v3142_v62 = vadd.f32 %v10243_v58, %v8129_v48  ;;  %v8436_v13 = vpop.f32.mrf.mxu1 }
 0x33a   : > { %v3465_v32 = vmin.f32 %v3430_v26, %v3451_v61  ;;  %v3459_v9 = vmin.f32 %v3424_v5, %v3438_v34  ;;  %v3472_v6 = vmax.f32 %v3444_v30, %v2947_v31  ;;  %v2948_v36 = vadd.f32 %v10244_v53, %v10245_v3  ;;  %v8438_v61 = vpop.f32.mrf.mxu0 }
 0x33b   : > { %v3466_v40 = vmin.f32 %v3431_v43, %v3452_v42  ;;  %v4478_v35 = vmin.f32 %v4443_v60, %v4464_v55  ;;  %v4451_v27 = vmax.f32 %v4423_v33, %v3142_v62  ;;  %v3148_v50 = vadd.f32 %v10246_v44, %v8137_v28  ;;  %10247 = vst [vmem:[#allocation69_spill] sm:$0xff] %v8438_v61  ;;  %v10248_v60 = vld [vmem:[#allocation12_spill] sm:$0xff] }
 0x33c   : > { %v3479_v14 = vmin.f32 %v3444_v30, %v2947_v31  ;;  %v3486_v17 = vmax.f32 %v3458_v12, %v3472_v6  ;;  %v4458_v25 = vmin.f32 %v4423_v33, %v3142_v62  ;;  %v3473_v48 = vmax.f32 %v3445_v18, %v2948_v36  ;;  %v8444_v33 = vpop.f32.mrf.mxu1  ;;  %v10250_v62 = vld [vmem:[#allocation105_spill] sm:$0xff] }
 0x33d   : > { %v3493_v0 = vmin.f32 %v3458_v12, %v3472_v6  ;;  %v4465_v58 = vmax.f32 %v4437_v19, %v4451_v27  ;;  %v4472_v26 = vmin.f32 %v4437_v19, %v4451_v27  ;;  %v4485_v5 = vmax.f32 %v4457_v46, %v3148_v50  ;;  %v10251_v27 = vld [vmem:[#allocation107_spill] sm:$0xff] }
 0x33e   : > { %v3480_v34 = vmin.f32 %v3445_v18, %v2948_v36  ;;  %v3487_v3 = vmax.f32 %v3459_v9, %v3473_v48  ;;  %v4492_v43 = vmin.f32 %v4457_v46, %v3148_v50  ;;  %v2954_v42 = vadd.f32 %v10248_v60, %v8139_v29  ;;  %v10252_v50 = vld [vmem:[#allocation42_spill] sm:$0xff] }
 0x33f   : > { %v4479_v55 = vmin.f32 %v4444_v39, %v4465_v58  ;;  %v4499_v28 = vmax.f32 %v4471_v22, %v4485_v5  ;;  %v4506_v53 = vmin.f32 %v4471_v22, %v4485_v5  ;;  %v3149_v30 = vadd.f32 %v10246_v44, %v10249_v8  ;;  %v8450_v58 = vpop.f32.mrf.mxu0 }
 0x340   : > { %v3500_v12 = vmin.f32 %v3465_v32, %v3486_v17  ;;  %v3494_v31 = vmin.f32 %v3459_v9, %v3473_v48  ;;  %v3507_v19 = vmax.f32 %v3479_v14, %v2954_v42  ;;  %v2955_v6 = vadd.f32 %v10248_v60, %v10250_v62  ;;  %v8452_v17 = vpop.f32.mrf.mxu1 }
 0x341   : > { %v3501_v18 = vmin.f32 %v3466_v40, %v3487_v3  ;;  %v4513_v36 = vmin.f32 %v4478_v35, %v4499_v28  ;;  %v4486_v46 = vmax.f32 %v4458_v25, %v3149_v30  ;;  %v3155_v29 = vadd.f32 %v10252_v50, %v10251_v27  ;;  %v10253_v35 = vld [vmem:[#allocation106_spill] sm:$0xff]  ;;  %v10254_v3 = vld [vmem:[#allocation15_spill] sm:$0xff] }
 0x342   : > { %v3514_v22 = vmin.f32 %v3479_v14, %v2954_v42  ;;  %v3521_v39 = vmax.f32 %v3493_v0, %v3507_v19  ;;  %v4493_v5 = vmin.f32 %v4458_v25, %v3149_v30  ;;  %v3508_v8 = vmax.f32 %v3480_v34, %v2955_v6  ;;  %v8458_v25 = vpop.f32.mrf.mxu0 }
 0x343   : > { %v3528_v44 = vmin.f32 %v3493_v0, %v3507_v19  ;;  %v4500_v47 = vmax.f32 %v4472_v26, %v4486_v46  ;;  %v4507_v32 = vmin.f32 %v4472_v26, %v4486_v46  ;;  %v4520_v9 = vmax.f32 %v4492_v43, %v3155_v29 }
 0x344   : > { %v3515_v48 = vmin.f32 %v3480_v34, %v2955_v6  ;;  %v3522_v62 = vmax.f32 %v3494_v31, %v3508_v8  ;;  %v4527_v40 = vmin.f32 %v4492_v43, %v3155_v29  ;;  %v2961_v28 = vadd.f32 %v10254_v3, %v10253_v35  ;;  %v10255_v6 = vld [vmem:[#allocation43_spill] sm:$0xff] }
 0x345   : > { %v4514_v60 = vmin.f32 %v4479_v55, %v4500_v47  ;;  %v4534_v27 = vmax.f32 %v4506_v53, %v4520_v9  ;;  %v4541_v61 = vmin.f32 %v4506_v53, %v4520_v9  ;;  %v3156_v14 = vadd.f32 %v10252_v50, %v8166_v45  ;;  %v8464_v47 = vpop.f32.mrf.mxu1 }
 0x346   : > { %v3535_v0 = vmin.f32 %v3500_v12, %v3521_v39  ;;  %v3529_v42 = vmin.f32 %v3494_v31, %v3508_v8  ;;  %v3542_v26 = vmax.f32 %v3514_v22, %v2961_v28  ;;  %v2962_v30 = vadd.f32 %v10254_v3, %v8162_v56  ;;  %v8466_v39 = vpop.f32.mrf.mxu0  ;;  %v10261_v3 = vld [vmem:[#allocation91_spill] sm:$0xff] }
 0x347   : > { %v3536_v34 = vmin.f32 %v3501_v18, %v3522_v62  ;;  %v4548_v19 = vmin.f32 %v4513_v36, %v4534_v27  ;;  %v4521_v43 = vmax.f32 %v4493_v5, %v3156_v14  ;;  %v3162_v46 = vadd.f32 %v10255_v6, %v8176_v7  ;;  %v10256_v36 = vld [vmem:[#allocation14_spill] sm:$0xff] }
 0x348   : > { %v3549_v53 = vmin.f32 %v3514_v22, %v2961_v28  ;;  %v3556_v55 = vmax.f32 %v3528_v44, %v3542_v26  ;;  %v4528_v29 = vmin.f32 %v4493_v5, %v3156_v14  ;;  %v3543_v45 = vmax.f32 %v3515_v48, %v2962_v30  ;;  %v8472_v5 = vpop.f32.mrf.mxu1  ;;  %v10257_v14 = vld [vmem:[#allocation96_spill] sm:$0xff] }
 0x349   : > { %v3563_v9 = vmin.f32 %v3528_v44, %v3542_v26  ;;  %v4535_v35 = vmax.f32 %v4507_v32, %v4521_v43  ;;  %v4542_v12 = vmin.f32 %v4507_v32, %v4521_v43  ;;  %v4555_v31 = vmax.f32 %v4527_v40, %v3162_v46  ;;  %v10258_v43 = vld [vmem:[#allocation44_spill] sm:$0xff] }
 0x34a   : > { %v3550_v8 = vmin.f32 %v3515_v48, %v2962_v30  ;;  %v3557_v56 = vmax.f32 %v3529_v42, %v3543_v45  ;;  %v4562_v18 = vmin.f32 %v4527_v40, %v3162_v46  ;;  %v2968_v62 = vadd.f32 %v10256_v36, %v8172_v59 }
 0x34b   : > { %v4549_v27 = vmin.f32 %v4514_v60, %v4535_v35  ;;  %v4569_v7 = vmax.f32 %v4541_v61, %v4555_v31  ;;  %v4576_v50 = vmin.f32 %v4541_v61, %v4555_v31  ;;  %v3163_v22 = vadd.f32 %v10255_v6, %v8186_v15  ;;  %v8478_v60 = vpop.f32.mrf.mxu0 }
 0x34c   : > { %v3570_v44 = vmin.f32 %v3535_v0, %v3556_v55  ;;  %v3564_v28 = vmin.f32 %v3529_v42, %v3543_v45  ;;  %v3577_v32 = vmax.f32 %v3549_v53, %v2968_v62  ;;  %v2969_v26 = vadd.f32 %v10256_v36, %v10257_v14  ;;  %10259 = vst [vmem:[#allocation79_spill] sm:$0xff] %v8478_v60  ;;  %v8480_v55 = vpop.f32.mrf.mxu1 }
 0x34d   : > { %v3571_v48 = vmin.f32 %v3536_v34, %v3557_v56  ;;  %v4583_v30 = vmin.f32 %v4548_v19, %v4569_v7  ;;  %v4556_v40 = vmax.f32 %v4528_v29, %v3163_v22  ;;  %v3169_v59 = vadd.f32 %v10258_v43, %v8194_v23  ;;  %v10260_v19 = vld [vmem:[#allocation17_spill] sm:$0xff] }
 0x34e   : > { %v3584_v61 = vmin.f32 %v3549_v53, %v2968_v62  ;;  %v3591_v46 = vmax.f32 %v3563_v9, %v3577_v32  ;;  %v4563_v35 = vmin.f32 %v4528_v29, %v3163_v22  ;;  %v3578_v15 = vmax.f32 %v3550_v8, %v2969_v26  ;;  %v8486_v29 = vpop.f32.mrf.mxu0  ;;  %v10263_v22 = vld [vmem:[#allocation97_spill] sm:$0xff] }
 0x34f   : > { %v3598_v31 = vmin.f32 %v3563_v9, %v3577_v32  ;;  %v4570_v6 = vmax.f32 %v4542_v12, %v4556_v40  ;;  %v4577_v0 = vmin.f32 %v4542_v12, %v4556_v40  ;;  %v4590_v42 = vmax.f32 %v4562_v18, %v3169_v59  ;;  %10262 = vst [vmem:[#allocation72_spill] sm:$0xff] %v8486_v29  ;;  %v10264_v40 = vld [vmem:[#allocation92_spill] sm:$0xff] }
 0x350   : > { %v3585_v45 = vmin.f32 %v3550_v8, %v2969_v26  ;;  %v3592_v14 = vmax.f32 %v3564_v28, %v3578_v15  ;;  %v4597_v34 = vmin.f32 %v4562_v18, %v3169_v59  ;;  %v2975_v56 = vadd.f32 %v10260_v19, %v8190_v37  ;;  %v10265_v59 = vld [vmem:[#allocation45_spill] sm:$0xff] }
 0x351   : > { %v4584_v7 = vmin.f32 %v4549_v27, %v4570_v6  ;;  %v4604_v23 = vmax.f32 %v4576_v50, %v4590_v42  ;;  %v4611_v36 = vmin.f32 %v4576_v50, %v4590_v42  ;;  %v3170_v53 = vadd.f32 %v10258_v43, %v10261_v3  ;;  %v8492_v6 = vpop.f32.mrf.mxu1 }
 0x352   : > { %v3605_v9 = vmin.f32 %v3570_v44, %v3591_v46  ;;  %v3599_v62 = vmin.f32 %v3564_v28, %v3578_v15  ;;  %v3612_v12 = vmax.f32 %v3584_v61, %v2975_v56  ;;  %v2976_v32 = vadd.f32 %v10260_v19, %v10263_v22  ;;  %10266 = vst [vmem:[#allocation82_spill] sm:$0xff] %v8492_v6  ;;  %v8494_v46 = vpop.f32.mrf.mxu0  ;;  %v10270_v6 = vld [vmem:[#allocation100_spill] sm:$0xff] }
 0x353   : > { %v3606_v8 = vmin.f32 %v3571_v48, %v3592_v14  ;;  %v4618_v26 = vmin.f32 %v4583_v30, %v4604_v23  ;;  %v4591_v18 = vmax.f32 %v4563_v35, %v3170_v53  ;;  %v3176_v37 = vadd.f32 %v10265_v59, %v10264_v40  ;;  %10267 = vst [vmem:[#allocation74_spill] sm:$0xff] %v8494_v46  ;;  %v10268_v30 = vld [vmem:[#allocation98_spill] sm:$0xff]  ;;  %v10269_v14 = vld [vmem:[#allocation16_spill] sm:$0xff] }
 0x354   : > { %v3619_v50 = vmin.f32 %v3584_v61, %v2975_v56  ;;  %v3626_v27 = vmax.f32 %v3598_v31, %v3612_v12  ;;  %v4598_v42 = vmin.f32 %v4563_v35, %v3170_v53  ;;  %v3613_v3 = vmax.f32 %v3585_v45, %v2976_v32  ;;  %v8500_v35 = vpop.f32.mrf.mxu1  ;;  %v10272_v53 = vld [vmem:[#allocation99_spill] sm:$0xff] }
 0x355   : > { %v3633_v43 = vmin.f32 %v3598_v31, %v3612_v12  ;;  %v4605_v29 = vmax.f32 %v4577_v0, %v4591_v18  ;;  %v4612_v44 = vmin.f32 %v4577_v0, %v4591_v18  ;;  %v4625_v28 = vmax.f32 %v4597_v34, %v3176_v37  ;;  %10271 = vst [vmem:[#allocation86_spill] sm:$0xff] %v8500_v35  ;;  %v10273_v18 = vld [vmem:[#allocation52_spill] sm:$0xff] }
 0x356   : > { %v3620_v15 = vmin.f32 %v3585_v45, %v2976_v32  ;;  %v3627_v22 = vmax.f32 %v3599_v62, %v3613_v3  ;;  %v4632_v48 = vmin.f32 %v4597_v34, %v3176_v37  ;;  %v2982_v23 = vadd.f32 %v10269_v14, %v10268_v30  ;;  %v10274_v37 = vld [vmem:[#allocation46_spill] sm:$0xff] }
 0x357   : > { %v4619_v19 = vmin.f32 %v4584_v7, %v4605_v29  ;;  %v4639_v40 = vmax.f32 %v4611_v36, %v4625_v28  ;;  %v4646_v60 = vmin.f32 %v4611_v36, %v4625_v28  ;;  %v3177_v61 = vadd.f32 %v10265_v59, %v10270_v6  ;;  %v8506_v7 = vpop.f32.mrf.mxu0 }
 0x358   : > { %v3640_v31 = vmin.f32 %v3605_v9, %v3626_v27  ;;  %v3634_v56 = vmin.f32 %v3599_v62, %v3613_v3  ;;  %v3647_v0 = vmax.f32 %v3619_v50, %v2982_v23  ;;  %v2983_v12 = vadd.f32 %v10269_v14, %v10272_v53  ;;  %10275 = vst [vmem:[#allocation77_spill] sm:$0xff] %v8506_v7  ;;  %v8508_v27 = vpop.f32.mrf.mxu1  ;;  %v10279_v7 = vld [vmem:[#allocation55_spill] sm:$0xff] }
 0x359   : > { %v3641_v45 = vmin.f32 %v3606_v8, %v3627_v22  ;;  %v4653_v32 = vmin.f32 %v4618_v26, %v4639_v40  ;;  %v4626_v34 = vmax.f32 %v4598_v42, %v3177_v61  ;;  %v3183_v30 = vadd.f32 %v10274_v37, %v10273_v18  ;;  %10276 = vst [vmem:[#allocation89_spill] sm:$0xff] %v8508_v27  ;;  %v10277_v26 = vld [vmem:[#allocation101_spill] sm:$0xff]  ;;  %v10278_v22 = vld [vmem:[#allocation19_spill] sm:$0xff] }
 0x35a   : > { %v3654_v36 = vmin.f32 %v3619_v50, %v2982_v23  ;;  %v3661_v29 = vmax.f32 %v3633_v43, %v3647_v0  ;;  %v4633_v28 = vmin.f32 %v4598_v42, %v3177_v61  ;;  %v3648_v6 = vmax.f32 %v3620_v15, %v2983_v12  ;;  %v8514_v42 = vpop.f32.mrf.mxu0  ;;  %v10281_v61 = vld [vmem:[#allocation54_spill] sm:$0xff] }
 0x35b   : > { %v3668_v59 = vmin.f32 %v3633_v43, %v3647_v0  ;;  %v4640_v46 = vmax.f32 %v4612_v44, %v4626_v34  ;;  %v4647_v9 = vmin.f32 %v4612_v44, %v4626_v34  ;;  %v4660_v62 = vmax.f32 %v4632_v48, %v3183_v30  ;;  %10280 = vst [vmem:[#allocation80_spill] sm:$0xff] %v8514_v42  ;;  %v10282_v34 = vld [vmem:[#allocation58_spill] sm:$0xff] }
 0x35c   : > { %v3655_v3 = vmin.f32 %v3620_v15, %v2983_v12  ;;  %v3662_v53 = vmax.f32 %v3634_v56, %v3648_v6  ;;  %v4667_v8 = vmin.f32 %v4632_v48, %v3183_v30  ;;  %v2989_v40 = vadd.f32 %v10278_v22, %v10277_v26  ;;  %v10283_v30 = vld [vmem:[#allocation47_spill] sm:$0xff] }
 0x35d   : > { %v4654_v14 = vmin.f32 %v4619_v19, %v4640_v46  ;;  %v4674_v18 = vmax.f32 %v4646_v60, %v4660_v62  ;;  %v4681_v35 = vmin.f32 %v4646_v60, %v4660_v62  ;;  %v3184_v50 = vadd.f32 %v10274_v37, %v10279_v7  ;;  %v8520_v19 = vpop.f32.mrf.mxu1 }
 0x35e   : > { %v3675_v43 = vmin.f32 %v3640_v31, %v3661_v29  ;;  %v3669_v23 = vmin.f32 %v3634_v56, %v3648_v6  ;;  %v3682_v44 = vmax.f32 %v3654_v36, %v2989_v40  ;;  %v2990_v0 = vadd.f32 %v10278_v22, %v10281_v61  ;;  %10284 = vst [vmem:[#allocation83_spill] sm:$0xff] %v8520_v19  ;;  %v8522_v29 = vpop.f32.mrf.mxu0  ;;  %v10288_v19 = vld [vmem:[#allocation62_spill] sm:$0xff] }
 0x35f   : > { %v3676_v15 = vmin.f32 %v3641_v45, %v3662_v53  ;;  %v4688_v12 = vmin.f32 %v4653_v32, %v4674_v18  ;;  %v4661_v48 = vmax.f32 %v4633_v28, %v3184_v50  ;;  %v3190_v26 = vadd.f32 %v10283_v30, %v10282_v34  ;;  %10285 = vst [vmem:[#allocation88_spill] sm:$0xff] %v8522_v29  ;;  %v10286_v32 = vld [vmem:[#allocation59_spill] sm:$0xff]  ;;  %v10287_v53 = vld [vmem:[#allocation18_spill] sm:$0xff] }
 0x360   : > { %v3689_v60 = vmin.f32 %v3654_v36, %v2989_v40  ;;  %v3696_v46 = vmax.f32 %v3668_v59, %v3682_v44  ;;  %v4668_v62 = vmin.f32 %v4633_v28, %v3184_v50  ;;  %v3683_v7 = vmax.f32 %v3655_v3, %v2990_v0  ;;  %v8528_v28 = vpop.f32.mrf.mxu1  ;;  %v10290_v50 = vld [vmem:[#allocation65_spill] sm:$0xff] }
 0x361   : > { %v3703_v37 = vmin.f32 %v3668_v59, %v3682_v44  ;;  %v4675_v42 = vmax.f32 %v4647_v9, %v4661_v48  ;;  %v4682_v31 = vmin.f32 %v4647_v9, %v4661_v48  ;;  %v4695_v56 = vmax.f32 %v4667_v8, %v3190_v26  ;;  %10289 = vst [vmem:[#allocation87_spill] sm:$0xff] %v8528_v28  ;;  %v10291_v48 = vld [vmem:[#allocation93_spill] sm:$0xff] }
 0x362   : > { %v3690_v6 = vmin.f32 %v3655_v3, %v2990_v0  ;;  %v3697_v61 = vmax.f32 %v3669_v23, %v3683_v7  ;;  %v4702_v45 = vmin.f32 %v4667_v8, %v3190_v26  ;;  %v2996_v18 = vadd.f32 %v10287_v53, %v10286_v32  ;;  %v10292_v26 = vld [vmem:[#allocation48_spill] sm:$0xff] }
 0x363   : > { %v4689_v22 = vmin.f32 %v4654_v14, %v4675_v42  ;;  %v4709_v34 = vmax.f32 %v4681_v35, %v4695_v56  ;;  %v4716_v27 = vmin.f32 %v4681_v35, %v4695_v56  ;;  %v3191_v36 = vadd.f32 %v10283_v30, %v10288_v19  ;;  %v8534_v14 = vpop.f32.mrf.mxu0 }
 0x364   : > { %v3710_v59 = vmin.f32 %v3675_v43, %v3696_v46  ;;  %v3704_v40 = vmin.f32 %v3669_v23, %v3683_v7  ;;  %v3717_v9 = vmax.f32 %v3689_v60, %v2996_v18  ;;  %v2997_v44 = vadd.f32 %v10287_v53, %v10290_v50  ;;  %10293 = vst [vmem:[#allocation90_spill] sm:$0xff] %v8534_v14  ;;  %v8536_v46 = vpop.f32.mrf.mxu1  ;;  %v10296_v14 = vld [vmem:[#allocation61_spill] sm:$0xff] }
 0x365   : > { %v3711_v3 = vmin.f32 %v3676_v15, %v3697_v61  ;;  %v4723_v0 = vmin.f32 %v4688_v12, %v4709_v34  ;;  %v4696_v8 = vmax.f32 %v4668_v62, %v3191_v36  ;;  %v3197_v32 = vadd.f32 %v10292_v26, %v10291_v48  ;;  %v10294_v12 = vld [vmem:[#allocation84_spill] sm:$0xff]  ;;  %v10295_v61 = vld [vmem:[#allocation21_spill] sm:$0xff] }
 0x366   : > { %v3724_v35 = vmin.f32 %v3689_v60, %v2996_v18  ;;  %v3731_v42 = vmax.f32 %v3703_v37, %v3717_v9  ;;  %v4703_v56 = vmin.f32 %v4668_v62, %v3191_v36  ;;  %v3718_v19 = vmax.f32 %v3690_v6, %v2997_v44  ;;  %v8542_v62 = vpop.f32.mrf.mxu0  ;;  %v10298_v36 = vld [vmem:[#allocation67_spill] sm:$0xff] }
 0x367   : > { %v3738_v30 = vmin.f32 %v3703_v37, %v3717_v9  ;;  %v4710_v29 = vmax.f32 %v4682_v31, %v4696_v8  ;;  %v4717_v43 = vmin.f32 %v4682_v31, %v4696_v8  ;;  %v4730_v23 = vmax.f32 %v4702_v45, %v3197_v32  ;;  %10297 = vst [vmem:[#allocation94_spill] sm:$0xff] %v8542_v62  ;;  %v10299_v8 = vld [vmem:[#allocation49_spill] sm:$0xff] }
 0x368   : > { %v3725_v7 = vmin.f32 %v3690_v6, %v2997_v44  ;;  %v3732_v50 = vmax.f32 %v3704_v40, %v3718_v19  ;;  %v4737_v15 = vmin.f32 %v4702_v45, %v3197_v32  ;;  %v3003_v34 = vadd.f32 %v10295_v61, %v10294_v12 }
 0x369   : > { %v4724_v53 = vmin.f32 %v4689_v22, %v4710_v29  ;;  %v4744_v48 = vmax.f32 %v4716_v27, %v4730_v23  ;;  %v4751_v28 = vmin.f32 %v4716_v27, %v4730_v23  ;;  %v3198_v60 = vadd.f32 %v10292_v26, %v10296_v14  ;;  %v8548_v22 = vpop.f32.mrf.mxu1 }
 0x36a   : > { %v3745_v37 = vmin.f32 %v3710_v59, %v3731_v42  ;;  %v3739_v18 = vmin.f32 %v3704_v40, %v3718_v19  ;;  %v3752_v31 = vmax.f32 %v3724_v35, %v3003_v34  ;;  %v3004_v9 = vadd.f32 %v10295_v61, %v10298_v36  ;;  %v8550_v42 = vpop.f32.mrf.mxu0 }
 0x36b   : > { %v3746_v6 = vmin.f32 %v3711_v3, %v3732_v50  ;;  %v4758_v44 = vmin.f32 %v4723_v0, %v4744_v48  ;;  %v4731_v45 = vmax.f32 %v4703_v56, %v3198_v60  ;;  %v3204_v32 = vadd.f32 %v10299_v8, %v8322_v24  ;;  %v10300_v0 = vld [vmem:[#allocation70_spill] sm:$0xff]  ;;  %v10301_v50 = vld [vmem:[#allocation20_spill] sm:$0xff] }
 0x36c   : > { %v3759_v27 = vmin.f32 %v3724_v35, %v3003_v34  ;;  %v3766_v29 = vmax.f32 %v3738_v30, %v3752_v31  ;;  %v4738_v23 = vmin.f32 %v4703_v56, %v3198_v60  ;;  %v3753_v14 = vmax.f32 %v3725_v7, %v3004_v9  ;;  %v8556_v56 = vpop.f32.mrf.mxu1  ;;  %v10302_v60 = vld [vmem:[#allocation64_spill] sm:$0xff] }
 0x36d   : > { %v3773_v12 = vmin.f32 %v3738_v30, %v3752_v31  ;;  %v4745_v26 = vmax.f32 %v4717_v43, %v4731_v45  ;;  %v4752_v59 = vmin.f32 %v4717_v43, %v4731_v45  ;;  %v4765_v40 = vmax.f32 %v4737_v15, %v3204_v32  ;;  %v10303_v45 = vld [vmem:[#allocation50_spill] sm:$0xff] }
 0x36e   : > { %v3760_v19 = vmin.f32 %v3725_v7, %v3004_v9  ;;  %v3767_v36 = vmax.f32 %v3739_v18, %v3753_v14  ;;  %v4772_v3 = vmin.f32 %v4737_v15, %v3204_v32  ;;  %v3010_v48 = vadd.f32 %v10301_v50, %v10300_v0 }
 0x36f   : > { %v4759_v61 = vmin.f32 %v4724_v53, %v4745_v26  ;;  %v4779_v24 = vmax.f32 %v4751_v28, %v4765_v40  ;;  %v4786_v62 = vmin.f32 %v4751_v28, %v4765_v40  ;;  %v3205_v35 = vadd.f32 %v10299_v8, %v8330_v49  ;;  %v8562_v53 = vpop.f32.mrf.mxu0 }
 0x370   : > { %v3780_v30 = vmin.f32 %v3745_v37, %v3766_v29  ;;  %v3774_v34 = vmin.f32 %v3739_v18, %v3753_v14  ;;  %v3787_v43 = vmax.f32 %v3759_v27, %v3010_v48  ;;  %v3011_v31 = vadd.f32 %v10301_v50, %v10302_v60  ;;  %v8564_v29 = vpop.f32.mrf.mxu1 }
 0x371   : > { %v3781_v7 = vmin.f32 %v3746_v6, %v3767_v36  ;;  %v4793_v9 = vmin.f32 %v4758_v44, %v4779_v24  ;;  %v4766_v15 = vmax.f32 %v4738_v23, %v3205_v35  ;;  %v3211_v32 = vadd.f32 %v10303_v45, %v8349_v21  ;;  %v10304_v44 = vld [vmem:[#allocation23_spill] sm:$0xff] }
 0x372   : > { %v3794_v28 = vmin.f32 %v3759_v27, %v3010_v48  ;;  %v3801_v26 = vmax.f32 %v3773_v12, %v3787_v43  ;;  %v4773_v40 = vmin.f32 %v4738_v23, %v3205_v35  ;;  %v3788_v49 = vmax.f32 %v3760_v19, %v3011_v31  ;;  %v8570_v23 = vpop.f32.mrf.mxu0  ;;  %v10306_v35 = vld [vmem:[#allocation73_spill] sm:$0xff] }
 0x373   : > { %v3808_v0 = vmin.f32 %v3773_v12, %v3787_v43  ;;  %v4780_v8 = vmax.f32 %v4752_v59, %v4766_v15  ;;  %v4787_v37 = vmin.f32 %v4752_v59, %v4766_v15  ;;  %v4800_v18 = vmax.f32 %v4772_v3, %v3211_v32  ;;  %10305 = vst [vmem:[#allocation95_spill] sm:$0xff] %v8570_v23  ;;  %v10307_v15 = vld [vmem:[#allocation51_spill] sm:$0xff] }
 0x374   : > { %v3795_v14 = vmin.f32 %v3760_v19, %v3011_v31  ;;  %v3802_v60 = vmax.f32 %v3774_v34, %v3788_v49  ;;  %v4807_v6 = vmin.f32 %v4772_v3, %v3211_v32  ;;  %v3017_v36 = vadd.f32 %v10304_v44, %v8342_v1 }
 0x375   : > { %v4794_v24 = vmin.f32 %v4759_v61, %v4780_v8  ;;  %v4814_v21 = vmax.f32 %v4786_v62, %v4800_v18  ;;  %v4821_v50 = vmin.f32 %v4786_v62, %v4800_v18  ;;  %v3212_v27 = vadd.f32 %v10303_v45, %v8364_v4  ;;  %v8576_v61 = vpop.f32.mrf.mxu1 }
 0x376   : > { %v3815_v12 = vmin.f32 %v3780_v30, %v3801_v26  ;;  %v3809_v48 = vmin.f32 %v3774_v34, %v3788_v49  ;;  %v3822_v59 = vmax.f32 %v3794_v28, %v3017_v36  ;;  %v3018_v43 = vadd.f32 %v10304_v44, %v10306_v35  ;;  %v8578_v26 = vpop.f32.mrf.mxu0 }
 0x377   : > { %v3816_v19 = vmin.f32 %v3781_v7, %v3802_v60  ;;  %v4828_v31 = vmin.f32 %v4793_v9, %v4814_v21  ;;  %v4801_v3 = vmax.f32 %v4773_v40, %v3212_v27  ;;  %v3218_v1 = vadd.f32 %v10307_v15, %v8378_v38  ;;  %v10308_v9 = vld [vmem:[#allocation75_spill] sm:$0xff]  ;;  %v10309_v60 = vld [vmem:[#allocation22_spill] sm:$0xff] }
 0x378   : > { %v3829_v62 = vmin.f32 %v3794_v28, %v3017_v36  ;;  %v3836_v8 = vmax.f32 %v3808_v0, %v3822_v59  ;;  %v4808_v32 = vmin.f32 %v4773_v40, %v3212_v27  ;;  %v3823_v4 = vmax.f32 %v3795_v14, %v3018_v43  ;;  %v8584_v40 = vpop.f32.mrf.mxu1 }
 0x379   : > { %v3843_v18 = vmin.f32 %v3808_v0, %v3822_v59  ;;  %v4815_v45 = vmax.f32 %v4787_v37, %v4801_v3  ;;  %v4822_v30 = vmin.f32 %v4787_v37, %v4801_v3  ;;  %v4835_v34 = vmax.f32 %v4807_v6, %v3218_v1 }
 0x37a   : > { %v3830_v49 = vmin.f32 %v3795_v14, %v3018_v43  ;;  %v3837_v35 = vmax.f32 %v3809_v48, %v3823_v4  ;;  %v4842_v7 = vmin.f32 %v4807_v6, %v3218_v1  ;;  %v3024_v21 = vadd.f32 %v10309_v60, %v10308_v9  ;;  %v10310_v43 = vld [vmem:[#allocation53_spill] sm:$0xff] }
 0x37b   : > { %v4829_v44 = vmin.f32 %v4794_v24, %v4815_v45  ;;  %v4849_v38 = vmax.f32 %v4821_v50, %v4835_v34  ;;  %v4856_v23 = vmin.f32 %v4821_v50, %v4835_v34  ;;  %v3219_v28 = vadd.f32 %v10307_v15, %v8388_v63  ;;  %v8590_v45 = vpop.f32.mrf.mxu0 }
 0x37c   : > { %v3850_v0 = vmin.f32 %v3815_v12, %v3836_v8  ;;  %v3844_v36 = vmin.f32 %v3809_v48, %v3823_v4  ;;  %v3857_v37 = vmax.f32 %v3829_v62, %v3024_v21  ;;  %v3025_v27 = vadd.f32 %v10309_v60, %v8382_v57  ;;  %v8592_v8 = vpop.f32.mrf.mxu1 }
 0x37d   : > { %v3851_v14 = vmin.f32 %v3816_v19, %v3837_v35  ;;  %v4863_v59 = vmin.f32 %v4828_v31, %v4849_v38  ;;  %v4836_v6 = vmax.f32 %v4808_v32, %v3219_v28  ;;  %v3225_v3 = vadd.f32 %v10310_v43, %v8396_v54  ;;  %v10311_v31 = vld [vmem:[#allocation25_spill] sm:$0xff] }
 0x37e   : > { %v3864_v50 = vmin.f32 %v3829_v62, %v3024_v21  ;;  %v3871_v24 = vmax.f32 %v3843_v18, %v3857_v37  ;;  %v4843_v1 = vmin.f32 %v4808_v32, %v3219_v28  ;;  %v3858_v63 = vmax.f32 %v3830_v49, %v3025_v27  ;;  %v8598_v32 = vpop.f32.mrf.mxu0 }
 0x37f   : > { %v3878_v34 = vmin.f32 %v3843_v18, %v3857_v37  ;;  %v4850_v9 = vmax.f32 %v4822_v30, %v4836_v6  ;;  %v4857_v12 = vmin.f32 %v4822_v30, %v4836_v6  ;;  %v4870_v48 = vmax.f32 %v4842_v7, %v3225_v3 }
 0x380   : > { %v3865_v4 = vmin.f32 %v3830_v49, %v3025_v27  ;;  %v3872_v57 = vmax.f32 %v3844_v36, %v3858_v63  ;;  %v4877_v19 = vmin.f32 %v4842_v7, %v3225_v3  ;;  %v3031_v35 = vadd.f32 %v10311_v31, %v8394_v41  ;;  %v10312_v27 = vld [vmem:[#allocation56_spill] sm:$0xff] }
 0x381   : > { %v4864_v38 = vmin.f32 %v4829_v44, %v4850_v9  ;;  %v4884_v54 = vmax.f32 %v4856_v23, %v4870_v48  ;;  %v4891_v15 = vmin.f32 %v4856_v23, %v4870_v48  ;;  %v3226_v62 = vadd.f32 %v10310_v43, %v8408_v20  ;;  %v8604_v44 = vpop.f32.mrf.mxu1 }
 0x382   : > { %v3885_v18 = vmin.f32 %v3850_v0, %v3871_v24  ;;  %v3879_v21 = vmin.f32 %v3844_v36, %v3858_v63  ;;  %v3892_v30 = vmax.f32 %v3864_v50, %v3031_v35  ;;  %v3032_v28 = vadd.f32 %v10311_v31, %v8402_v16  ;;  %v8606_v24 = vpop.f32.mrf.mxu0  ;;  %v10326_v31 = vld [vmem:[#allocation86_spill] sm:$0xff] }
 0x383   : > { %v3886_v49 = vmin.f32 %v3851_v14, %v3872_v57  ;;  %v4898_v37 = vmin.f32 %v4863_v59, %v4884_v54  ;;  %v4871_v7 = vmax.f32 %v4843_v1, %v3226_v62  ;;  %v3232_v41 = vadd.f32 %v10312_v27, %v8416_v51  ;;  %v10313_v59 = vld [vmem:[#allocation24_spill] sm:$0xff] }
 0x384   : > { %v3899_v23 = vmin.f32 %v3864_v50, %v3031_v35  ;;  %v3906_v6 = vmax.f32 %v3878_v34, %v3892_v30  ;;  %v4878_v3 = vmin.f32 %v4843_v1, %v3226_v62  ;;  %v3893_v20 = vmax.f32 %v3865_v4, %v3032_v28  ;;  %v8612_v1 = vpop.f32.mrf.mxu1 }
 0x385   : > { %v3913_v9 = vmin.f32 %v3878_v34, %v3892_v30  ;;  %v4885_v48 = vmax.f32 %v4857_v12, %v4871_v7  ;;  %v4892_v0 = vmin.f32 %v4857_v12, %v4871_v7  ;;  %v4905_v36 = vmax.f32 %v4877_v19, %v3232_v41 }
 0x386   : > { %v3900_v63 = vmin.f32 %v3865_v4, %v3032_v28  ;;  %v3907_v16 = vmax.f32 %v3879_v21, %v3893_v20  ;;  %v4912_v14 = vmin.f32 %v4877_v19, %v3232_v41  ;;  %v3038_v57 = vadd.f32 %v10313_v59, %v8410_v52  ;;  %v10314_v28 = vld [vmem:[#allocation60_spill] sm:$0xff] }
 0x387   : > { %v4899_v54 = vmin.f32 %v4864_v38, %v4885_v48  ;;  %v4919_v51 = vmax.f32 %v4891_v15, %v4905_v36  ;;  %v4926_v43 = vmin.f32 %v4891_v15, %v4905_v36  ;;  %v3233_v50 = vadd.f32 %v10312_v27, %v8424_v10  ;;  %v8618_v38 = vpop.f32.mrf.mxu0 }
 0x388   : > { %v3920_v34 = vmin.f32 %v3885_v18, %v3906_v6  ;;  %v3914_v35 = vmin.f32 %v3879_v21, %v3893_v20  ;;  %v3927_v12 = vmax.f32 %v3899_v23, %v3038_v57  ;;  %v3039_v62 = vadd.f32 %v10313_v59, %v8422_v2  ;;  %v8620_v6 = vpop.f32.mrf.mxu1 }
 0x389   : > { %v3921_v4 = vmin.f32 %v3886_v49, %v3907_v16  ;;  %v4933_v30 = vmin.f32 %v4898_v37, %v4919_v51  ;;  %v4906_v19 = vmax.f32 %v4878_v3, %v3233_v50  ;;  %v3239_v52 = vadd.f32 %v10314_v28, %v8436_v13  ;;  %v10315_v37 = vld [vmem:[#allocation27_spill] sm:$0xff] }
 0x38a   : > { %v3934_v15 = vmin.f32 %v3899_v23, %v3038_v57  ;;  %v3941_v7 = vmax.f32 %v3913_v9, %v3927_v12  ;;  %v4913_v41 = vmin.f32 %v4878_v3, %v3233_v50  ;;  %v3928_v10 = vmax.f32 %v3900_v63, %v3039_v62  ;;  %v8626_v3 = vpop.f32.mrf.mxu0  ;;  %v10316_v50 = vld [vmem:[#allocation69_spill] sm:$0xff] }
 0x38b   : > { %v3948_v48 = vmin.f32 %v3913_v9, %v3927_v12  ;;  %v4920_v36 = vmax.f32 %v4892_v0, %v4906_v19  ;;  %v4927_v18 = vmin.f32 %v4892_v0, %v4906_v19  ;;  %v4940_v21 = vmax.f32 %v4912_v14, %v3239_v52  ;;  %v10317_v19 = vld [vmem:[#allocation63_spill] sm:$0xff] }
 0x38c   : > { %v3935_v20 = vmin.f32 %v3900_v63, %v3039_v62  ;;  %v3942_v2 = vmax.f32 %v3914_v35, %v3928_v10  ;;  %v4947_v49 = vmin.f32 %v4912_v14, %v3239_v52  ;;  %v3045_v16 = vadd.f32 %v10315_v37, %v8430_v11 }
 0x38d   : > { %v4934_v51 = vmin.f32 %v4899_v54, %v4920_v36  ;;  %v4954_v13 = vmax.f32 %v4926_v43, %v4940_v21  ;;  %v4961_v27 = vmin.f32 %v4926_v43, %v4940_v21  ;;  %v3240_v23 = vadd.f32 %v10314_v28, %v8444_v33  ;;  %v8632_v54 = vpop.f32.mrf.mxu1 }
 0x38e   : > { %v3955_v9 = vmin.f32 %v3920_v34, %v3941_v7  ;;  %v3949_v57 = vmin.f32 %v3914_v35, %v3928_v10  ;;  %v3962_v0 = vmax.f32 %v3934_v15, %v3045_v16  ;;  %v3046_v12 = vadd.f32 %v10315_v37, %v10316_v50  ;;  %v8634_v7 = vpop.f32.mrf.mxu0 }
 0x38f   : > { %v3956_v63 = vmin.f32 %v3921_v4, %v3942_v2  ;;  %v4968_v62 = vmin.f32 %v4933_v30, %v4954_v13  ;;  %v4941_v14 = vmax.f32 %v4913_v41, %v3240_v23  ;;  %v3246_v11 = vadd.f32 %v10317_v19, %v8452_v17  ;;  %v10318_v30 = vld [vmem:[#allocation26_spill] sm:$0xff] }
 0x390   : > { %v3969_v43 = vmin.f32 %v3934_v15, %v3045_v16  ;;  %v3976_v52 = vmax.f32 %v3948_v48, %v3962_v0  ;;  %v4948_v36 = vmin.f32 %v4913_v41, %v3240_v23  ;;  %v3963_v33 = vmax.f32 %v3935_v20, %v3046_v12  ;;  %v8640_v41 = vpop.f32.mrf.mxu1 }
 0x391   : > { %v3983_v21 = vmin.f32 %v3948_v48, %v3962_v0  ;;  %v4955_v28 = vmax.f32 %v4927_v18, %v4941_v14  ;;  %v4962_v34 = vmin.f32 %v4927_v18, %v4941_v14  ;;  %v4975_v35 = vmax.f32 %v4947_v49, %v3246_v11 }
 0x392   : > { %v3970_v10 = vmin.f32 %v3935_v20, %v3046_v12  ;;  %v3977_v50 = vmax.f32 %v3949_v57, %v3963_v33  ;;  %v4982_v4 = vmin.f32 %v4947_v49, %v3246_v11  ;;  %v3052_v2 = vadd.f32 %v10318_v30, %v8450_v58  ;;  %v10319_v12 = vld [vmem:[#allocation66_spill] sm:$0xff] }
 0x393   : > { %v4969_v13 = vmin.f32 %v4934_v51, %v4955_v28  ;;  %v4989_v17 = vmax.f32 %v4961_v27, %v4975_v35  ;;  %v4996_v59 = vmin.f32 %v4961_v27, %v4975_v35  ;;  %v3247_v15 = vadd.f32 %v10317_v19, %v8464_v47  ;;  %v8646_v28 = vpop.f32.mrf.mxu0 }
 0x394   : > { %v3990_v48 = vmin.f32 %v3955_v9, %v3976_v52  ;;  %v3984_v16 = vmin.f32 %v3949_v57, %v3963_v33  ;;  %v3997_v18 = vmax.f32 %v3969_v43, %v3052_v2  ;;  %v3053_v23 = vadd.f32 %v10318_v30, %v8458_v25  ;;  %v8648_v52 = vpop.f32.mrf.mxu1 }
 0x395   : > { %v3991_v20 = vmin.f32 %v3956_v63, %v3977_v50  ;;  %v5003_v0 = vmin.f32 %v4968_v62, %v4989_v17  ;;  %v4976_v49 = vmax.f32 %v4948_v36, %v3247_v15  ;;  %v3253_v58 = vadd.f32 %v10319_v12, %v8472_v5  ;;  %v10320_v62 = vld [vmem:[#allocation29_spill] sm:$0xff] }
 0x396   : > { %v4004_v27 = vmin.f32 %v3969_v43, %v3052_v2  ;;  %v4011_v51 = vmax.f32 %v3983_v21, %v3997_v18  ;;  %v4983_v14 = vmin.f32 %v4948_v36, %v3247_v15  ;;  %v3998_v47 = vmax.f32 %v3970_v10, %v3053_v23  ;;  %v8654_v36 = vpop.f32.mrf.mxu0  ;;  %v10321_v15 = vld [vmem:[#allocation79_spill] sm:$0xff] }
 0x397   : > { %v4018_v11 = vmin.f32 %v3983_v21, %v3997_v18  ;;  %v4990_v35 = vmax.f32 %v4962_v34, %v4976_v49  ;;  %v4997_v9 = vmin.f32 %v4962_v34, %v4976_v49  ;;  %v5010_v57 = vmax.f32 %v4982_v4, %v3253_v58  ;;  %v10322_v49 = vld [vmem:[#allocation82_spill] sm:$0xff] }
 0x398   : > { %v4005_v33 = vmin.f32 %v3970_v10, %v3053_v23  ;;  %v4012_v25 = vmax.f32 %v3984_v16, %v3998_v47  ;;  %v5017_v63 = vmin.f32 %v4982_v4, %v3253_v58  ;;  %v3059_v50 = vadd.f32 %v10320_v62, %v8466_v39  ;;  %v10323_v58 = vld [vmem:[#allocation68_spill] sm:$0xff] }
 0x399   : > { %v5004_v17 = vmin.f32 %v4969_v13, %v4990_v35  ;;  %v5024_v5 = vmax.f32 %v4996_v59, %v5010_v57  ;;  %v5031_v19 = vmin.f32 %v4996_v59, %v5010_v57  ;;  %v3254_v43 = vadd.f32 %v10319_v12, %v8480_v55  ;;  %v8660_v13 = vpop.f32.mrf.mxu1 }
 0x39a   : > { %v4025_v21 = vmin.f32 %v3990_v48, %v4011_v51  ;;  %v4019_v2 = vmin.f32 %v3984_v16, %v3998_v47  ;;  %v4032_v34 = vmax.f32 %v4004_v27, %v3059_v50  ;;  %v3060_v18 = vadd.f32 %v10320_v62, %v10321_v15  ;;  %v8662_v51 = vpop.f32.mrf.mxu0 }
 0x39b   : > { %v4026_v10 = vmin.f32 %v3991_v20, %v4012_v25  ;;  %v5038_v23 = vmin.f32 %v5003_v0, %v5024_v5  ;;  %v5011_v4 = vmax.f32 %v4983_v14, %v3254_v43  ;;  %v3260_v39 = vadd.f32 %v10323_v58, %v10322_v49  ;;  %v10324_v0 = vld [vmem:[#allocation72_spill] sm:$0xff] }
 0x39c   : > { %v4039_v59 = vmin.f32 %v4004_v27, %v3059_v50  ;;  %v4046_v35 = vmax.f32 %v4018_v11, %v4032_v34  ;;  %v5018_v57 = vmin.f32 %v4983_v14, %v3254_v43  ;;  %v4033_v55 = vmax.f32 %v4005_v33, %v3060_v18  ;;  %v10325_v25 = vld [vmem:[#allocation28_spill] sm:$0xff]  ;;  %v8668_v14 = vpop.f32.mrf.mxu1  ;;  %v10328_v43 = vld [vmem:[#allocation74_spill] sm:$0xff] }
 0x39d   : > { %v4053_v12 = vmin.f32 %v4018_v11, %v4032_v34  ;;  %v5025_v30 = vmax.f32 %v4997_v9, %v5011_v4  ;;  %v5032_v48 = vmin.f32 %v4997_v9, %v5011_v4  ;;  %v5045_v16 = vmax.f32 %v5017_v63, %v3260_v39  ;;  %10327 = vst [vmem:[#allocation102_spill] sm:$0xff] %v8668_v14  ;;  %v10329_v4 = vld [vmem:[#allocation89_spill] sm:$0xff] }
 0x39e   : > { %v4040_v47 = vmin.f32 %v4005_v33, %v3060_v18  ;;  %v4047_v15 = vmax.f32 %v4019_v2, %v4033_v55  ;;  %v5052_v20 = vmin.f32 %v5017_v63, %v3260_v39  ;;  %v3066_v5 = vadd.f32 %v10325_v25, %v10324_v0  ;;  %v10330_v39 = vld [vmem:[#allocation71_spill] sm:$0xff] }
 0x39f   : > { %v5039_v62 = vmin.f32 %v5004_v17, %v5025_v30  ;;  %v5059_v49 = vmax.f32 %v5031_v19, %v5045_v16  ;;  %v5066_v37 = vmin.f32 %v5031_v19, %v5045_v16  ;;  %v3261_v27 = vadd.f32 %v10323_v58, %v10326_v31  ;;  %v8674_v30 = vpop.f32.mrf.mxu0 }
 0x3a0   : > { %v4060_v11 = vmin.f32 %v4025_v21, %v4046_v35  ;;  %v4054_v50 = vmin.f32 %v4019_v2, %v4033_v55  ;;  %v4067_v9 = vmax.f32 %v4039_v59, %v3066_v5  ;;  %v3067_v34 = vadd.f32 %v10325_v25, %v10328_v43  ;;  %10331 = vst [vmem:[#allocation103_spill] sm:$0xff] %v8674_v30  ;;  %v8676_v35 = vpop.f32.mrf.mxu1  ;;  %v10335_v30 = vld [vmem:[#allocation83_spill] sm:$0xff] }
 0x3a1   : > { %v4061_v33 = vmin.f32 %v4026_v10, %v4047_v15  ;;  %v5073_v18 = vmin.f32 %v5038_v23, %v5059_v49  ;;  %v5046_v63 = vmax.f32 %v5018_v57, %v3261_v27  ;;  %v3267_v0 = vadd.f32 %v10330_v39, %v10329_v4  ;;  %10332 = vst [vmem:[#allocation104_spill] sm:$0xff] %v8676_v35  ;;  %v10333_v23 = vld [vmem:[#allocation77_spill] sm:$0xff]  ;;  %v10334_v15 = vld [vmem:[#allocation31_spill] sm:$0xff] }
 0x3a2   : > { %v4074_v19 = vmin.f32 %v4039_v59, %v3066_v5  ;;  %v4081_v17 = vmax.f32 %v4053_v12, %v4067_v9  ;;  %v5053_v16 = vmin.f32 %v5018_v57, %v3261_v27  ;;  %v4068_v31 = vmax.f32 %v4040_v47, %v3067_v34  ;;  %v8682_v57 = vpop.f32.mrf.mxu0  ;;  %v10337_v27 = vld [vmem:[#allocation80_spill] sm:$0xff] }
 0x3a3   : > { %v4088_v58 = vmin.f32 %v4053_v12, %v4067_v9  ;;  %v5060_v60 = vmax.f32 %v5032_v48, %v5046_v63  ;;  %v5067_v21 = vmin.f32 %v5032_v48, %v5046_v63  ;;  %v5080_v2 = vmax.f32 %v5052_v20, %v3267_v0  ;;  %10336 = vst [vmem:[#allocation105_spill] sm:$0xff] %v8682_v57  ;;  %v10338_v63 = vld [vmem:[#allocation87_spill] sm:$0xff] }
 0x3a4   : > { %v4075_v55 = vmin.f32 %v4040_v47, %v3067_v34  ;;  %v4082_v43 = vmax.f32 %v4054_v50, %v4068_v31  ;;  %v5087_v10 = vmin.f32 %v5052_v20, %v3267_v0  ;;  %v3073_v49 = vadd.f32 %v10334_v15, %v10333_v23  ;;  %v10339_v0 = vld [vmem:[#allocation76_spill] sm:$0xff] }
 0x3a5   : > { %v5074_v25 = vmin.f32 %v5039_v62, %v5060_v60  ;;  %v5094_v4 = vmax.f32 %v5066_v37, %v5080_v2  ;;  %v5101_v14 = vmin.f32 %v5066_v37, %v5080_v2  ;;  %v3268_v59 = vadd.f32 %v10330_v39, %v10335_v30  ;;  %v8688_v60 = vpop.f32.mrf.mxu1 }
 0x3a6   : > { %v4095_v12 = vmin.f32 %v4060_v11, %v4081_v17  ;;  %v4089_v5 = vmin.f32 %v4054_v50, %v4068_v31  ;;  %v4102_v48 = vmax.f32 %v4074_v19, %v3073_v49  ;;  %v3074_v9 = vadd.f32 %v10334_v15, %v10337_v27  ;;  %v8690_v17 = vpop.f32.mrf.mxu0 }
 0x3a7   : > { %v4096_v47 = vmin.f32 %v4061_v33, %v4082_v43  ;;  %v5108_v34 = vmin.f32 %v5073_v18, %v5094_v4  ;;  %v5081_v20 = vmax.f32 %v5053_v16, %v3268_v59  ;;  %v3274_v23 = vadd.f32 %v10339_v0, %v10338_v63  ;;  %v10340_v18 = vld [vmem:[#allocation88_spill] sm:$0xff]  ;;  %v10341_v43 = vld [vmem:[#allocation30_spill] sm:$0xff] }
 0x3a8   : > { %v4109_v37 = vmin.f32 %v4074_v19, %v3073_v49  ;;  %v4116_v62 = vmax.f32 %v4088_v58, %v4102_v48  ;;  %v5088_v2 = vmin.f32 %v5053_v16, %v3268_v59  ;;  %v4103_v30 = vmax.f32 %v4075_v55, %v3074_v9  ;;  %v8696_v16 = vpop.f32.mrf.mxu1  ;;  %v10343_v59 = vld [vmem:[#allocation90_spill] sm:$0xff] }
 0x3a9   : > { %v4123_v39 = vmin.f32 %v4088_v58, %v4102_v48  ;;  %v5095_v35 = vmax.f32 %v5067_v21, %v5081_v20  ;;  %v5102_v11 = vmin.f32 %v5067_v21, %v5081_v20  ;;  %v5115_v50 = vmax.f32 %v5087_v10, %v3274_v23  ;;  %10342 = vst [vmem:[#allocation107_spill] sm:$0xff] %v8696_v16  ;;  %v10344_v20 = vld [vmem:[#allocation78_spill] sm:$0xff] }
 0x3aa   : > { %v4110_v31 = vmin.f32 %v4075_v55, %v3074_v9  ;;  %v4117_v27 = vmax.f32 %v4089_v5, %v4103_v30  ;;  %v5122_v33 = vmin.f32 %v5087_v10, %v3274_v23  ;;  %v3080_v4 = vadd.f32 %v10341_v43, %v10340_v18 }
 0x3ab   : > { %v5109_v15 = vmin.f32 %v5074_v25, %v5095_v35  ;;  %v5129_v63 = vmax.f32 %v5101_v14, %v5115_v50  ;;  %v5136_v57 = vmin.f32 %v5101_v14, %v5115_v50  ;;  %v3275_v19 = vadd.f32 %v10339_v0, %v8536_v46  ;;  %v8702_v25 = vpop.f32.mrf.mxu0 }
 0x3ac   : > { %v4130_v58 = vmin.f32 %v4095_v12, %v4116_v62  ;;  %v4124_v49 = vmin.f32 %v4089_v5, %v4103_v30  ;;  %v4137_v21 = vmax.f32 %v4109_v37, %v3080_v4  ;;  %v3081_v48 = vadd.f32 %v10341_v43, %v10343_v59  ;;  %v8704_v62 = vpop.f32.mrf.mxu1 }
 0x3ad   : > { %v4131_v55 = vmin.f32 %v4096_v47, %v4117_v27  ;;  %v5143_v9 = vmin.f32 %v5108_v34, %v5129_v63  ;;  %v5116_v10 = vmax.f32 %v5088_v2, %v3275_v19  ;;  %v3281_v23 = vadd.f32 %v10344_v20, %v8548_v22  ;;  %v10345_v34 = vld [vmem:[#allocation94_spill] sm:$0xff]  ;;  %v10346_v27 = vld [vmem:[#allocation32_spill] sm:$0xff] }
 0x3ae   : > { %v4144_v14 = vmin.f32 %v4109_v37, %v3080_v4  ;;  %v4151_v35 = vmax.f32 %v4123_v39, %v4137_v21  ;;  %v5123_v50 = vmin.f32 %v5088_v2, %v3275_v19  ;;  %v4138_v46 = vmax.f32 %v4110_v31, %v3081_v48  ;;  %v8710_v2 = vpop.f32.mrf.mxu0 }
 0x3af   : > { %v4158_v18 = vmin.f32 %v4123_v39, %v4137_v21  ;;  %v5130_v0 = vmax.f32 %v5102_v11, %v5116_v10  ;;  %v5137_v12 = vmin.f32 %v5102_v11, %v5116_v10  ;;  %v5150_v5 = vmax.f32 %v5122_v33, %v3281_v23 }
 0x3b0   : > { %v4145_v30 = vmin.f32 %v4110_v31, %v3081_v48  ;;  %v4152_v59 = vmax.f32 %v4124_v49, %v4138_v46  ;;  %v5157_v47 = vmin.f32 %v5122_v33, %v3281_v23  ;;  %v3087_v63 = vadd.f32 %v10346_v27, %v10345_v34  ;;  %v10347_v48 = vld [vmem:[#allocation81_spill] sm:$0xff] }
 0x3b1   : > { %v5144_v43 = vmin.f32 %v5109_v15, %v5130_v0  ;;  %v5164_v22 = vmax.f32 %v5136_v57, %v5150_v5  ;;  %v5171_v16 = vmin.f32 %v5136_v57, %v5150_v5  ;;  %v3282_v37 = vadd.f32 %v10344_v20, %v8556_v56  ;;  %v8716_v15 = vpop.f32.mrf.mxu1 }
 0x3b2   : > { %v4165_v39 = vmin.f32 %v4130_v58, %v4151_v35  ;;  %v4159_v4 = vmin.f32 %v4124_v49, %v4138_v46  ;;  %v4172_v11 = vmax.f32 %v4144_v14, %v3087_v63  ;;  %v3088_v19 = vadd.f32 %v10346_v27, %v8550_v42  ;;  %v8718_v35 = vpop.f32.mrf.mxu0 }
 0x3b3   : > { %v4166_v31 = vmin.f32 %v4131_v55, %v4152_v59  ;;  %v5178_v21 = vmin.f32 %v5143_v9, %v5164_v22  ;;  %v5151_v33 = vmax.f32 %v5123_v50, %v3282_v37  ;;  %v3288_v10 = vadd.f32 %v10347_v48, %v8564_v29  ;;  %v10348_v9 = vld [vmem:[#allocation33_spill] sm:$0xff] }
 0x3b4   : > { %v4179_v57 = vmin.f32 %v4144_v14, %v3087_v63  ;;  %v4186_v0 = vmax.f32 %v4158_v18, %v4172_v11  ;;  %v5158_v23 = vmin.f32 %v5123_v50, %v3282_v37  ;;  %v4173_v56 = vmax.f32 %v4145_v30, %v3088_v19  ;;  %v8724_v50 = vpop.f32.mrf.mxu1  ;;  %v10349_v37 = vld [vmem:[#allocation95_spill] sm:$0xff] }
 0x3b5   : > { %v4193_v5 = vmin.f32 %v4158_v18, %v4172_v11  ;;  %v5165_v34 = vmax.f32 %v5137_v12, %v5151_v33  ;;  %v5172_v58 = vmin.f32 %v5137_v12, %v5151_v33  ;;  %v5185_v49 = vmax.f32 %v5157_v47, %v3288_v10  ;;  %v10350_v33 = vld [vmem:[#allocation85_spill] sm:$0xff] }
 0x3b6   : > { %v4180_v46 = vmin.f32 %v4145_v30, %v3088_v19  ;;  %v4187_v42 = vmax.f32 %v4159_v4, %v4173_v56  ;;  %v5192_v55 = vmin.f32 %v5157_v47, %v3288_v10  ;;  %v3094_v59 = vadd.f32 %v10348_v9, %v8562_v53 }
 0x3b7   : > { %v5179_v22 = vmin.f32 %v5144_v43, %v5165_v34  ;;  %v5199_v29 = vmax.f32 %v5171_v16, %v5185_v49  ;;  %v5206_v20 = vmin.f32 %v5171_v16, %v5185_v49  ;;  %v3289_v14 = vadd.f32 %v10347_v48, %v8576_v61  ;;  %v8730_v43 = vpop.f32.mrf.mxu0 }
 0x3b8   : > { %v4200_v18 = vmin.f32 %v4165_v39, %v4186_v0  ;;  %v4194_v63 = vmin.f32 %v4159_v4, %v4173_v56  ;;  %v4207_v12 = vmax.f32 %v4179_v57, %v3094_v59  ;;  %v3095_v11 = vadd.f32 %v10348_v9, %v10349_v37  ;;  %v8732_v0 = vpop.f32.mrf.mxu1 }
 0x3b9   : > { %v4201_v30 = vmin.f32 %v4166_v31, %v4187_v42  ;;  %v5213_v19 = vmin.f32 %v5178_v21, %v5199_v29  ;;  %v5186_v47 = vmax.f32 %v5158_v23, %v3289_v14  ;;  %v3295_v53 = vadd.f32 %v10350_v33, %v8584_v40  ;;  %v10351_v21 = vld [vmem:[#allocation34_spill] sm:$0xff] }
 0x3ba   : > { %v4214_v16 = vmin.f32 %v4179_v57, %v3094_v59  ;;  %v4221_v10 = vmax.f32 %v4193_v5, %v4207_v12  ;;  %v5193_v34 = vmin.f32 %v5158_v23, %v3289_v14  ;;  %v4208_v61 = vmax.f32 %v4180_v46, %v3095_v11  ;;  %v8738_v23 = vpop.f32.mrf.mxu0 }
 0x3bb   : > { %v4228_v49 = vmin.f32 %v4193_v5, %v4207_v12  ;;  %v5200_v48 = vmax.f32 %v5172_v58, %v5186_v47  ;;  %v5207_v39 = vmin.f32 %v5172_v58, %v5186_v47  ;;  %v5220_v4 = vmax.f32 %v5192_v55, %v3295_v53 }
 0x3bc   : > { %v4215_v56 = vmin.f32 %v4180_v46, %v3095_v11  ;;  %v4222_v37 = vmax.f32 %v4194_v63, %v4208_v61  ;;  %v5227_v31 = vmin.f32 %v5192_v55, %v3295_v53  ;;  %v3101_v42 = vadd.f32 %v10351_v21, %v8578_v26  ;;  %v10352_v11 = vld [vmem:[#allocation57_spill] sm:$0xff] }
 0x3bd   : > { %v5214_v29 = vmin.f32 %v5179_v22, %v5200_v48  ;;  %v5234_v40 = vmax.f32 %v5206_v20, %v5220_v4  ;;  %v5241_v9 = vmin.f32 %v5206_v20, %v5220_v4  ;;  %v3296_v57 = vadd.f32 %v10350_v33, %v8592_v8  ;;  %v8744_v48 = vpop.f32.mrf.mxu1 }
 0x3be   : > { %v4235_v5 = vmin.f32 %v4200_v18, %v4221_v10  ;;  %v4229_v59 = vmin.f32 %v4194_v63, %v4208_v61  ;;  %v4242_v58 = vmax.f32 %v4214_v16, %v3101_v42  ;;  %v3102_v14 = vadd.f32 %v10351_v21, %v8590_v45  ;;  %v8746_v10 = vpop.f32.mrf.mxu0 }
 0x3bf   : > { %v4236_v46 = vmin.f32 %v4201_v30, %v4222_v37  ;;  %v5248_v12 = vmin.f32 %v5213_v19, %v5234_v40  ;;  %v5221_v55 = vmax.f32 %v5193_v34, %v3296_v57  ;;  %v3302_v26 = vadd.f32 %v10352_v11, %v8604_v44  ;;  %v10353_v19 = vld [vmem:[#allocation35_spill] sm:$0xff] }
 0x3c0   : > { %v4249_v20 = vmin.f32 %v4214_v16, %v3101_v42  ;;  %v4256_v22 = vmax.f32 %v4228_v49, %v4242_v58  ;;  %v5228_v47 = vmin.f32 %v5193_v34, %v3296_v57  ;;  %v4243_v8 = vmax.f32 %v4215_v56, %v3102_v14  ;;  %v8752_v34 = vpop.f32.mrf.mxu1 }
 0x3c1   : > { %v5235_v53 = vmax.f32 %v5207_v39, %v5221_v55  ;;  %v5242_v4 = vmin.f32 %v5207_v39, %v5221_v55  ;;  %v5255_v18 = vmax.f32 %v5227_v31, %v3302_v26  ;;  %v5262_v63 = vmin.f32 %v5227_v31, %v3302_v26 }
 0x3c2   : > { %v4263_v61 = vmin.f32 %v4228_v49, %v4242_v58  ;;  %v4250_v45 = vmin.f32 %v4215_v56, %v3102_v14  ;;  %v4257_v30 = vmax.f32 %v4229_v59, %v4243_v8  ;;  %v3108_v37 = vadd.f32 %v10353_v19, %v8598_v32  ;;  %v10354_v32 = vld [vmem:[#allocation36_spill] sm:$0xff] }
 0x3c3   : > { %v5249_v40 = vmin.f32 %v5214_v29, %v5235_v53  ;;  %v5269_v44 = vmax.f32 %v5241_v9, %v5255_v18  ;;  %v5276_v33 = vmin.f32 %v5241_v9, %v5255_v18  ;;  %5290 = vst [vmem:[#allocation4 + $0x18] sm:$0xff] %v5262_v63  ;;  %v3303_v16 = vadd.f32 %v10352_v11, %v8612_v1  ;;  %v8758_v9 = vpop.f32.mrf.mxu0 }
 0x3c4   : > { %v4270_v39 = vmin.f32 %v4235_v5, %v4256_v22  ;;  %v4277_v42 = vmax.f32 %v4249_v20, %v3108_v37  ;;  %v4284_v31 = vmin.f32 %v4249_v20, %v3108_v37  ;;  %v3109_v49 = vadd.f32 %v10353_v19, %v8606_v24  ;;  %v8760_v24 = vpop.f32.mrf.mxu1 }
 0x3c5   : > { %v5283_v56 = vmin.f32 %v5248_v12, %v5269_v44  ;;  %5297 = vst [vmem:[#allocation5 + $0x20] sm:$0xff] %v5276_v33  ;;  %v5256_v57 = vmax.f32 %v5228_v47, %v3303_v16  ;;  %v5263_v58 = vmin.f32 %v5228_v47, %v3303_v16  ;;  %v3115_v29 = vadd.f32 %v10354_v32, %v8618_v38  ;;  %v10356_v44 = vld [vmem:[#allocation9_spill] sm:$0xff] }
 0x3c6   : > { %v4264_v14 = vmin.f32 %v4229_v59, %v4243_v8  ;;  %v4271_v55 = vmin.f32 %v4236_v46, %v4257_v30  ;;  %v4291_v1 = vmax.f32 %v4263_v61, %v4277_v42  ;;  %v4278_v26 = vmax.f32 %v4250_v45, %v3109_v49  ;;  %v3313_v46 = vld [vmem:[#allocation4 + $0x28] sm:$0xff]  ;;  %v8764_v8 = vpop.f32.mrf.mxu0 }
 0x3c7   : > { %5304 = vst [vmem:[#allocation6 + $0x28] sm:$0xff] %v5283_v56  ;;  %v4298_v5 = vmin.f32 %v4263_v61, %v4277_v42  ;;  %v5270_v22 = vmax.f32 %v5242_v4, %v5256_v57  ;;  %v5277_v20 = vmin.f32 %v5242_v4, %v5256_v57  ;;  %5291 = vst [vmem:[#allocation4 + $0x10] sm:$0xff] %v5263_v58  ;;  %v10355_v4 = vld [vmem:[#allocation8_spill] sm:$0xff]  ;;  %v8774_v56 = vpop.f32.mrf.mxu1 }
 0x3c8   : > { %v4312_v53 = vmax.f32 %v4284_v31, %v3115_v29  ;;  %v4305_v33 = vmin.f32 %v4270_v39, %v4291_v1  ;;  %v4285_v12 = vmin.f32 %v4250_v45, %v3109_v49  ;;  %v4292_v47 = vmax.f32 %v4264_v14, %v4278_v26  ;;  %v10357_v45 = vld [vmem:[#allocation37_spill] sm:$0xff] }
 0x3c9   : > { %v4319_v18 = vmin.f32 %v4284_v31, %v3115_v29  ;;  %v5284_v63 = vmin.f32 %v5249_v40, %v5270_v22  ;;  %5298 = vst [vmem:[#allocation5 + $0x18] sm:$0xff] %v5277_v20  ;;  %v4299_v38 = vmin.f32 %v4264_v14, %v4278_v26  ;;  %v3116_v59 = vadd.f32 %v10354_v32, %v8626_v3  ;;  %v3320_v49 = vld [vmem:[#allocation5 + $0x10] sm:$0xff]  ;;  %v3327_v26 = vld [vmem:[#allocation6 + $0x30] sm:$0xff] }
 0x3ca   : > { %v4326_v37 = vmax.f32 %v4298_v5, %v4312_v53  ;;  %v4333_v61 = vmin.f32 %v4298_v5, %v4312_v53  ;;  %v2935_v30 = vadd.f32 %v8620_v6, %v10355_v4  ;;  %v2921_v16 = vadd.f32 %v10356_v44, %v8632_v54  ;;  %v10358_v6 = vld [vmem:[#allocation10_spill] sm:$0xff] }
 0x3cb   : > { %v3122_v39 = vadd.f32 %v10357_v45, %v8634_v7  ;;  %5305 = vst [vmem:[#allocation6 + $0x20] sm:$0xff] %v5284_v63  ;;  %v4306_v40 = vmin.f32 %v4271_v55, %v4292_v47  ;;  %v4313_v42 = vmax.f32 %v4285_v12, %v3116_v59  ;;  %v4320_v31 = vmin.f32 %v4285_v12, %v3116_v59  ;;  %v8778_v55 = vpop.f32.mrf.mxu0  ;;  %v8782_v59 = vpop.f32.mrf.mxu1 }
 0x3cc   : > { %v3123_v3 = vadd.f32 %v10357_v45, %v8646_v28  ;;  %v4340_v57 = vmin.f32 %v4305_v33, %v4326_v37  ;;  %v3334_v58 = vmax.f32 %v3313_v46, %v2921_v16  ;;  %v2942_v14 = vadd.f32 %v8640_v41, %v10358_v6  ;;  %v10359_v33 = vld [vmem:[#allocation11_spill] sm:$0xff] }
 0x3cd   : > { %v4347_v29 = vmax.f32 %v4319_v18, %v3122_v39  ;;  %v4327_v54 = vmax.f32 %v4299_v38, %v4313_v42  ;;  %v4334_v1 = vmin.f32 %v4299_v38, %v4313_v42  ;;  %v3341_v7 = vmin.f32 %v3313_v46, %v2921_v16  ;;  %v10360_v46 = vld [vmem:[#allocation38_spill] sm:$0xff] }
 0x3ce   : > { %v4348_v5 = vmax.f32 %v4320_v31, %v3123_v3  ;;  %v3348_v22 = vmax.f32 %v3320_v49, %v3334_v58  ;;  %v4354_v20 = vmin.f32 %v4319_v18, %v3122_v39  ;;  %v4355_v12 = vmin.f32 %v4320_v31, %v3123_v3  ;;  %v8788_v39 = vpop.f32.mrf.mxu0  ;;  %v10362_v3 = vld [vmem:[#allocation103_spill] sm:$0xff] }
 0x3cf   : > { %v4361_v53 = vmax.f32 %v4333_v61, %v4347_v29  ;;  %v3355_v28 = vmin.f32 %v3320_v49, %v3334_v58  ;;  %v4368_v47 = vmin.f32 %v4333_v61, %v4347_v29  ;;  %v2928_v37 = vadd.f32 %v10359_v33, %v8648_v52  ;;  %v10361_v49 = vld [vmem:[#allocation15_spill] sm:$0xff] }
 0x3d0   : > { %v4362_v63 = vmax.f32 %v4334_v1, %v4348_v5  ;;  %v4341_v41 = vmin.f32 %v4306_v40, %v4327_v54  ;;  %v3362_v4 = vmin.f32 %v3327_v26, %v3348_v22  ;;  %v4369_v38 = vmin.f32 %v4334_v1, %v4348_v5  ;;  %v10363_v40 = vld [vmem:[#allocation39_spill] sm:$0xff]  ;;  %v10365_v22 = vld [vmem:[#allocation13_spill] sm:$0xff] }
 0x3d1   : > { %v3129_v44 = vadd.f32 %v10360_v46, %v8654_v36  ;;  %v4375_v16 = vmin.f32 %v4340_v57, %v4361_v53  ;;  %v3369_v42 = vmax.f32 %v3341_v7, %v2928_v37  ;;  %v3376_v6 = vmin.f32 %v3341_v7, %v2928_v37  ;;  %v8794_v57 = vpop.f32.mrf.mxu1 }
 0x3d2   : > { %v3130_v18 = vadd.f32 %v10360_v46, %v8662_v51  ;;  %v4376_v61 = vmin.f32 %v4341_v41, %v4362_v63  ;;  %v2963_v52 = vadd.f32 %v8660_v13, %v10361_v49  ;;  %v3136_v58 = vadd.f32 %v10363_v40, %v10362_v3  ;;  %v10364_v51 = vld [vmem:[#allocation102_spill] sm:$0xff]  ;;  %v8798_v13 = vpop.f32.mrf.mxu0 }
 0x3d3   : > { %v4382_v31 = vmax.f32 %v4354_v20, %v3129_v44  ;;  %v3383_v29 = vmax.f32 %v3355_v28, %v3369_v42  ;;  %v3390_v54 = vmin.f32 %v3355_v28, %v3369_v42  ;;  %v3404_v1 = vmax.f32 %v3376_v6, %v2935_v30 }
 0x3d4   : > { %v3411_v36 = vmin.f32 %v3376_v6, %v2935_v30  ;;  %v4389_v26 = vmin.f32 %v4354_v20, %v3129_v44  ;;  %v4383_v5 = vmax.f32 %v4355_v12, %v3130_v18  ;;  %v2949_v53 = vadd.f32 %v10365_v22, %v10364_v51  ;;  %v8800_v20 = vpop.f32.mrf.mxu1  ;;  %v8802_v22 = vpop.f32.mrf.mxu0 }
 0x3d5   : > { %v4396_v7 = vmax.f32 %v4368_v47, %v4382_v31  ;;  %v3397_v63 = vmin.f32 %v3362_v4, %v3383_v29  ;;  %v3418_v33 = vmax.f32 %v3390_v54, %v3404_v1  ;;  %v3425_v37 = vmin.f32 %v3390_v54, %v3404_v1 }
 0x3d6   : > { %v3439_v41 = vmax.f32 %v3411_v36, %v2942_v14  ;;  %v4403_v49 = vmin.f32 %v4368_v47, %v4382_v31  ;;  %v4390_v3 = vmin.f32 %v4355_v12, %v3130_v18  ;;  %v4397_v11 = vmax.f32 %v4369_v38, %v4383_v5  ;;  %v10366_v18 = vld [vmem:[#allocation105_spill] sm:$0xff]  ;;  %v10367_v31 = vld [vmem:[#allocation12_spill] sm:$0xff] }
 0x3d7   : > { %v3446_v28 = vmin.f32 %v3411_v36, %v2942_v14  ;;  %v3432_v42 = vmin.f32 %v3397_v63, %v3418_v33  ;;  %v4417_v45 = vmax.f32 %v4389_v26, %v3136_v58  ;;  %v4410_v44 = vmin.f32 %v4375_v16, %v4396_v7  ;;  %v10368_v16 = vld [vmem:[#allocation14_spill] sm:$0xff] }
 0x3d8   : > { %v3453_v30 = vmax.f32 %v3425_v37, %v3439_v41  ;;  %v3460_v6 = vmin.f32 %v3425_v37, %v3439_v41  ;;  %v4404_v46 = vmin.f32 %v4369_v38, %v4383_v5  ;;  %v4411_v4 = vmin.f32 %v4376_v61, %v4397_v11  ;;  %v10369_v38 = vld [vmem:[#allocation104_spill] sm:$0xff] }
 0x3d9   : > { %v3474_v32 = vmax.f32 %v3446_v28, %v2949_v53  ;;  %v3481_v51 = vmin.f32 %v3446_v28, %v2949_v53  ;;  %v4424_v54 = vmin.f32 %v4389_v26, %v3136_v58  ;;  %v4431_v1 = vmax.f32 %v4403_v49, %v4417_v45  ;;  %v10370_v11 = vld [vmem:[#allocation40_spill] sm:$0xff]  ;;  %v8812_v58 = vpop.f32.mrf.mxu1 }
 0x3da   : > { %v3467_v29 = vmin.f32 %v3432_v42, %v3453_v30  ;;  %v3137_v14 = vadd.f32 %v10363_v40, %v10366_v18  ;;  %v2956_v36 = vadd.f32 %v10367_v31, %v8688_v60  ;;  %v4438_v63 = vmin.f32 %v4403_v49, %v4417_v45  ;;  %v10371_v60 = vld [vmem:[#allocation19_spill] sm:$0xff]  ;;  %v8818_v42 = vpop.f32.mrf.mxu0 }
 0x3db   : > { %v3488_v47 = vmax.f32 %v3460_v6, %v3474_v32  ;;  %v3495_v12 = vmin.f32 %v3460_v6, %v3474_v32  ;;  %v4445_v33 = vmin.f32 %v4410_v44, %v4431_v1  ;;  %v2970_v7 = vadd.f32 %v10369_v38, %v10368_v16  ;;  %v10372_v45 = vld [vmem:[#allocation107_spill] sm:$0xff]  ;;  %v8822_v16 = vpop.f32.mrf.mxu1 }
 0x3dc   : > { %v3143_v61 = vadd.f32 %v10370_v11, %v8690_v17  ;;  %v4418_v5 = vmax.f32 %v4390_v3, %v3137_v14  ;;  %v3509_v53 = vmax.f32 %v3481_v51, %v2956_v36  ;;  %v3144_v32 = vadd.f32 %v10370_v11, %v8702_v25  ;;  %v8824_v11 = vpop.f32.mrf.mxu0 }
 0x3dd   : > { %v3502_v26 = vmin.f32 %v3467_v29, %v3488_v47  ;;  %v4425_v37 = vmin.f32 %v4390_v3, %v3137_v14  ;;  %v3516_v41 = vmin.f32 %v3481_v51, %v2956_v36  ;;  %v2991_v49 = vadd.f32 %v10372_v45, %v10371_v60  ;;  %v10373_v47 = vld [vmem:[#allocation17_spill] sm:$0xff] }
 0x3de   : > { %v4452_v28 = vmax.f32 %v4424_v54, %v3143_v61  ;;  %v4432_v30 = vmax.f32 %v4404_v46, %v4418_v5  ;;  %v3523_v6 = vmax.f32 %v3495_v12, %v3509_v53  ;;  %v3530_v44 = vmin.f32 %v3495_v12, %v3509_v53 }
 0x3df   : > { %v4459_v17 = vmin.f32 %v4424_v54, %v3143_v61  ;;  %v3544_v1 = vmax.f32 %v3516_v41, %v2963_v52  ;;  %v3551_v18 = vmin.f32 %v3516_v41, %v2963_v52  ;;  %v2977_v31 = vadd.f32 %v10373_v47, %v8704_v62  ;;  %v10374_v52 = vld [vmem:[#allocation41_spill] sm:$0xff] }
 0x3e0   : > { %v4466_v29 = vmax.f32 %v4438_v63, %v4452_v28  ;;  %v4439_v25 = vmin.f32 %v4404_v46, %v4418_v5  ;;  %v3537_v3 = vmin.f32 %v3502_v26, %v3523_v6  ;;  %v4473_v51 = vmin.f32 %v4438_v63, %v4452_v28  ;;  %v8828_v46 = vpop.f32.mrf.mxu1 }
 0x3e1   : > { %v4453_v14 = vmax.f32 %v4425_v37, %v3144_v32  ;;  %v4446_v36 = vmin.f32 %v4411_v4, %v4432_v30  ;;  %v3558_v38 = vmax.f32 %v3530_v44, %v3544_v1  ;;  %v3565_v60 = vmin.f32 %v3530_v44, %v3544_v1  ;;  %v10375_v30 = vld [vmem:[#allocation18_spill] sm:$0xff] }
 0x3e2   : > { %v3579_v45 = vmax.f32 %v3551_v18, %v2970_v7  ;;  %v4460_v12 = vmin.f32 %v4425_v37, %v3144_v32  ;;  %v3586_v61 = vmin.f32 %v3551_v18, %v2970_v7  ;;  %v3150_v53 = vadd.f32 %v10374_v52, %v8710_v2  ;;  %v10376_v32 = vld [vmem:[#allocation16_spill] sm:$0xff]  ;;  %v8836_v37 = vpop.f32.mrf.mxu0 }
 0x3e3   : > { %v4467_v54 = vmax.f32 %v4439_v25, %v4453_v14  ;;  %v3572_v41 = vmin.f32 %v3537_v3, %v3558_v38  ;;  %v4480_v47 = vmin.f32 %v4445_v33, %v4466_v29  ;;  %v4474_v63 = vmin.f32 %v4439_v25, %v4453_v14  ;;  %v8838_v14 = vpop.f32.mrf.mxu1 }
 0x3e4   : > { %v3593_v62 = vmax.f32 %v3565_v60, %v3579_v45  ;;  %v3600_v40 = vmin.f32 %v3565_v60, %v3579_v45  ;;  %v3614_v26 = vmax.f32 %v3586_v61, %v2977_v31  ;;  %v3621_v4 = vmin.f32 %v3586_v61, %v2977_v31 }
 0x3e5   : > { %v4487_v5 = vmax.f32 %v4459_v17, %v3150_v53  ;;  %v2998_v6 = vadd.f32 %v8716_v15, %v10375_v30  ;;  %v3151_v7 = vadd.f32 %v10374_v52, %v8718_v35  ;;  %v2984_v2 = vadd.f32 %v10376_v32, %v8724_v50  ;;  %v10377_v35 = vld [vmem:[#allocation42_spill] sm:$0xff] }
 0x3e6   : > { %v3607_v28 = vmin.f32 %v3572_v41, %v3593_v62  ;;  %v4481_v33 = vmin.f32 %v4446_v36, %v4467_v54  ;;  %v3628_v44 = vmax.f32 %v3600_v40, %v3614_v26  ;;  %v3635_v1 = vmin.f32 %v3600_v40, %v3614_v26  ;;  %v8842_v36 = vpop.f32.mrf.mxu0 }
 0x3e7   : > { %v4501_v18 = vmax.f32 %v4473_v51, %v4487_v5  ;;  %v4494_v29 = vmin.f32 %v4459_v17, %v3150_v53  ;;  %v4488_v25 = vmax.f32 %v4460_v12, %v3151_v7  ;;  %v3649_v31 = vmax.f32 %v3621_v4, %v2984_v2  ;;  %v10378_v53 = vld [vmem:[#allocation23_spill] sm:$0xff] }
 0x3e8   : > { %v3656_v3 = vmin.f32 %v3621_v4, %v2984_v2  ;;  %v3642_v38 = vmin.f32 %v3607_v28, %v3628_v44  ;;  %v4508_v15 = vmin.f32 %v4473_v51, %v4487_v5  ;;  %v4495_v60 = vmin.f32 %v4460_v12, %v3151_v7  ;;  %v8848_v12 = vpop.f32.mrf.mxu1 }
 0x3e9   : > { %v3157_v45 = vadd.f32 %v10377_v35, %v8730_v43  ;;  %v4515_v61 = vmin.f32 %v4480_v47, %v4501_v18  ;;  %v4502_v50 = vmax.f32 %v4474_v63, %v4488_v25  ;;  %v3663_v41 = vmax.f32 %v3635_v1, %v3649_v31  ;;  %v8852_v18 = vpop.f32.mrf.mxu0 }
 0x3ea   : > { %v3670_v62 = vmin.f32 %v3635_v1, %v3649_v31  ;;  %v3684_v40 = vmax.f32 %v3656_v3, %v2991_v49  ;;  %v3691_v54 = vmin.f32 %v3656_v3, %v2991_v49  ;;  %v3019_v26 = vadd.f32 %v8732_v0, %v10378_v53  ;;  %v10379_v49 = vld [vmem:[#allocation21_spill] sm:$0xff] }
 0x3eb   : > { %v4522_v17 = vmax.f32 %v4494_v29, %v3157_v45  ;;  %v4509_v4 = vmin.f32 %v4474_v63, %v4488_v25  ;;  %v3677_v30 = vmin.f32 %v3642_v38, %v3663_v41  ;;  %v4529_v28 = vmin.f32 %v4494_v29, %v3157_v45  ;;  %v8854_v45 = vpop.f32.mrf.mxu1 }
 0x3ec   : > { %v3158_v51 = vadd.f32 %v10377_v35, %v8738_v23  ;;  %v3698_v43 = vmax.f32 %v3670_v62, %v3684_v40  ;;  %v3705_v47 = vmin.f32 %v3670_v62, %v3684_v40  ;;  %v3719_v5 = vmax.f32 %v3691_v54, %v2998_v6 }
 0x3ed   : > { %v4536_v7 = vmax.f32 %v4508_v15, %v4522_v17  ;;  %v4516_v32 = vmin.f32 %v4481_v33, %v4502_v50  ;;  %v3005_v44 = vadd.f32 %v10379_v49, %v8744_v48  ;;  %v3726_v1 = vmin.f32 %v3691_v54, %v2998_v6  ;;  %v10380_v33 = vld [vmem:[#allocation43_spill] sm:$0xff] }
 0x3ee   : > { %v4523_v2 = vmax.f32 %v4495_v60, %v3158_v51  ;;  %v3712_v0 = vmin.f32 %v3677_v30, %v3698_v43  ;;  %v3733_v63 = vmax.f32 %v3705_v47, %v3719_v5  ;;  %v4543_v29 = vmin.f32 %v4508_v15, %v4522_v17  ;;  %v10381_v15 = vld [vmem:[#allocation20_spill] sm:$0xff] }
 0x3ef   : > { %v3740_v25 = vmin.f32 %v3705_v47, %v3719_v5  ;;  %v4530_v31 = vmin.f32 %v4495_v60, %v3158_v51  ;;  %v3754_v3 = vmax.f32 %v3726_v1, %v3005_v44  ;;  %v3761_v38 = vmin.f32 %v3726_v1, %v3005_v44  ;;  %v8862_v60 = vpop.f32.mrf.mxu0  ;;  %v10382_v51 = vld [vmem:[#allocation22_spill] sm:$0xff] }
 0x3f0   : > { %v4537_v23 = vmax.f32 %v4509_v4, %v4523_v2  ;;  %v4550_v41 = vmin.f32 %v4515_v61, %v4536_v7  ;;  %v3747_v62 = vmin.f32 %v3712_v0, %v3733_v63  ;;  %v3164_v50 = vadd.f32 %v10380_v33, %v8746_v10  ;;  %v10383_v7 = vld [vmem:[#allocation44_spill] sm:$0xff] }
 0x3f1   : > { %v3165_v48 = vadd.f32 %v10380_v33, %v8758_v9  ;;  %v4544_v6 = vmin.f32 %v4509_v4, %v4523_v2  ;;  %v3768_v40 = vmax.f32 %v3740_v25, %v3754_v3  ;;  %v3775_v54 = vmin.f32 %v3740_v25, %v3754_v3  ;;  %v8868_v4 = vpop.f32.mrf.mxu1  ;;  %v8870_v25 = vpop.f32.mrf.mxu0 }
 0x3f2   : > { %v3012_v17 = vadd.f32 %v10381_v15, %v8760_v24  ;;  %v4551_v53 = vmin.f32 %v4516_v32, %v4537_v23  ;;  %v4557_v30 = vmax.f32 %v4529_v28, %v3164_v50  ;;  %v3026_v61 = vadd.f32 %v8752_v34, %v10382_v51  ;;  %v10384_v51 = vld [vmem:[#allocation25_spill] sm:$0xff] }
 0x3f3   : > { %v4558_v43 = vmax.f32 %v4530_v31, %v3165_v48  ;;  %v3782_v47 = vmin.f32 %v3747_v62, %v3768_v40  ;;  %v3171_v9 = vadd.f32 %v10383_v7, %v8764_v8  ;;  %v4564_v2 = vmin.f32 %v4529_v28, %v3164_v50 }
 0x3f4   : > { %v3789_v5 = vmax.f32 %v3761_v38, %v3012_v17  ;;  %v3796_v10 = vmin.f32 %v3761_v38, %v3012_v17  ;;  %v4571_v49 = vmax.f32 %v4543_v29, %v4557_v30  ;;  %v4565_v44 = vmin.f32 %v4530_v31, %v3165_v48  ;;  %v8872_v17 = vpop.f32.mrf.mxu1 }
 0x3f5   : > { %v4572_v24 = vmax.f32 %v4544_v6, %v4558_v43  ;;  %v4578_v34 = vmin.f32 %v4543_v29, %v4557_v30  ;;  %v4579_v3 = vmin.f32 %v4544_v6, %v4558_v43  ;;  %v4592_v62 = vmax.f32 %v4564_v2, %v3171_v9  ;;  %v8878_v6 = vpop.f32.mrf.mxu0  ;;  %v10385_v43 = vld [vmem:[#allocation27_spill] sm:$0xff] }
 0x3f6   : > { %v3803_v1 = vmax.f32 %v3775_v54, %v3789_v5  ;;  %v3810_v0 = vmin.f32 %v3775_v54, %v3789_v5  ;;  %v3824_v32 = vmax.f32 %v3796_v10, %v3019_v26  ;;  %v3831_v63 = vmin.f32 %v3796_v10, %v3019_v26 }
 0x3f7   : > { %v4585_v23 = vmin.f32 %v4550_v41, %v4571_v49  ;;  %v4586_v28 = vmin.f32 %v4551_v53, %v4572_v24  ;;  %v4599_v50 = vmin.f32 %v4564_v2, %v3171_v9  ;;  %v4606_v31 = vmax.f32 %v4578_v34, %v4592_v62  ;;  %v10386_v49 = vld [vmem:[#allocation45_spill] sm:$0xff]  ;;  %v8884_v24 = vpop.f32.mrf.mxu1 }
 0x3f8   : > { %v3817_v38 = vmin.f32 %v3782_v47, %v3803_v1  ;;  %v3838_v40 = vmax.f32 %v3810_v0, %v3824_v32  ;;  %v3845_v15 = vmin.f32 %v3810_v0, %v3824_v32  ;;  %v3859_v8 = vmax.f32 %v3831_v63, %v3026_v61 }
 0x3f9   : > { %v3172_v48 = vadd.f32 %v10383_v7, %v8778_v55  ;;  %v3033_v29 = vadd.f32 %v10384_v51, %v8782_v59  ;;  %v3866_v41 = vmin.f32 %v3831_v63, %v3026_v61  ;;  %v4613_v30 = vmin.f32 %v4578_v34, %v4592_v62 }
 0x3fa   : > { %v3852_v54 = vmin.f32 %v3817_v38, %v3838_v40  ;;  %v3873_v26 = vmax.f32 %v3845_v15, %v3859_v8  ;;  %v3047_v47 = vadd.f32 %v8774_v56, %v10385_v43  ;;  %v3880_v10 = vmin.f32 %v3845_v15, %v3859_v8  ;;  %v10387_v56 = vld [vmem:[#allocation26_spill] sm:$0xff] }
 0x3fb   : > { %v4593_v5 = vmax.f32 %v4565_v44, %v3172_v48  ;;  %v4620_v53 = vmin.f32 %v4585_v23, %v4606_v31  ;;  %v4600_v9 = vmin.f32 %v4565_v44, %v3172_v48  ;;  %v3894_v2 = vmax.f32 %v3866_v41, %v3033_v29  ;;  %v8890_v23 = vpop.f32.mrf.mxu0 }
 0x3fc   : > { %v3178_v55 = vadd.f32 %v10386_v49, %v8788_v39  ;;  %v3887_v0 = vmin.f32 %v3852_v54, %v3873_v26  ;;  %v3901_v59 = vmin.f32 %v3866_v41, %v3033_v29  ;;  %v3179_v61 = vadd.f32 %v10386_v49, %v8798_v13  ;;  %v10388_v39 = vld [vmem:[#allocation24_spill] sm:$0xff]  ;;  %v10389_v54 = vld [vmem:[#allocation46_spill] sm:$0xff] }
 0x3fd   : > { %v4607_v1 = vmax.f32 %v4579_v3, %v4593_v5  ;;  %v4614_v32 = vmin.f32 %v4579_v3, %v4593_v5  ;;  %v3908_v63 = vmax.f32 %v3880_v10, %v3894_v2  ;;  %v3054_v62 = vadd.f32 %v8794_v57, %v10387_v56  ;;  %v8896_v3 = vpop.f32.mrf.mxu1 }
 0x3fe   : > { %v4627_v34 = vmax.f32 %v4599_v50, %v3178_v55  ;;  %v3915_v44 = vmin.f32 %v3880_v10, %v3894_v2  ;;  %v4634_v38 = vmin.f32 %v4599_v50, %v3178_v55  ;;  %v4628_v40 = vmax.f32 %v4600_v9, %v3179_v61  ;;  %v8898_v10 = vpop.f32.mrf.mxu0 }
 0x3ff   : > { %v3040_v15 = vadd.f32 %v10388_v39, %v8800_v20  ;;  %v4621_v8 = vmin.f32 %v4586_v28, %v4607_v1  ;;  %v4635_v48 = vmin.f32 %v4600_v9, %v3179_v61  ;;  %v3185_v13 = vadd.f32 %v10389_v54, %v8802_v22  ;;  %v10390_v61 = vld [vmem:[#allocation31_spill] sm:$0xff] }
 0x400   : > { %v4641_v31 = vmax.f32 %v4613_v30, %v4627_v34  ;;  %v3922_v26 = vmin.f32 %v3887_v0, %v3908_v63  ;;  %v4642_v51 = vmax.f32 %v4614_v32, %v4628_v40  ;;  %v4648_v41 = vmin.f32 %v4613_v30, %v4627_v34  ;;  %v8904_v63 = vpop.f32.mrf.mxu1 }
 0x401   : > { %v3929_v29 = vmax.f32 %v3901_v59, %v3040_v15  ;;  %v3936_v57 = vmin.f32 %v3901_v59, %v3040_v15  ;;  %v4649_v5 = vmin.f32 %v4614_v32, %v4628_v40  ;;  %v4662_v50 = vmax.f32 %v4634_v38, %v3185_v13 }
 0x402   : > { %v4655_v43 = vmin.f32 %v4620_v53, %v4641_v31  ;;  %v4669_v55 = vmin.f32 %v4634_v38, %v3185_v13  ;;  %v3075_v22 = vadd.f32 %v8812_v58, %v10390_v61  ;;  %v3186_v0 = vadd.f32 %v10389_v54, %v8818_v42  ;;  %v10392_v31 = vld [vmem:[#allocation47_spill] sm:$0xff] }
 0x403   : > { %v3943_v2 = vmax.f32 %v3915_v44, %v3929_v29  ;;  %v3950_v20 = vmin.f32 %v3915_v44, %v3929_v29  ;;  %v3964_v28 = vmax.f32 %v3936_v57, %v3047_v47  ;;  %v3971_v9 = vmin.f32 %v3936_v57, %v3047_v47  ;;  %v10391_v44 = vld [vmem:[#allocation29_spill] sm:$0xff]  ;;  %v8908_v47 = vpop.f32.mrf.mxu0 }
 0x404   : > { %v4676_v1 = vmax.f32 %v4648_v41, %v4662_v50  ;;  %v4656_v30 = vmin.f32 %v4621_v8, %v4642_v51  ;;  %v4683_v56 = vmin.f32 %v4648_v41, %v4662_v50  ;;  %v4663_v40 = vmax.f32 %v4635_v48, %v3186_v0  ;;  %v8912_v51 = vpop.f32.mrf.mxu1 }
 0x405   : > { %v3957_v53 = vmin.f32 %v3922_v26, %v3943_v2  ;;  %v3978_v59 = vmax.f32 %v3950_v20, %v3964_v28  ;;  %v3985_v32 = vmin.f32 %v3950_v20, %v3964_v28  ;;  %v3999_v34 = vmax.f32 %v3971_v9, %v3054_v62  ;;  %v10393_v2 = vld [vmem:[#allocation30_spill] sm:$0xff] }
 0x406   : > { %v3061_v38 = vadd.f32 %v10391_v44, %v8822_v16  ;;  %v4690_v15 = vmin.f32 %v4655_v43, %v4676_v1  ;;  %v4006_v58 = vmin.f32 %v3971_v9, %v3054_v62  ;;  %v3192_v42 = vadd.f32 %v10392_v31, %v8824_v11  ;;  %v10394_v43 = vld [vmem:[#allocation28_spill] sm:$0xff]  ;;  %v8920_v9 = vpop.f32.mrf.mxu0  ;;  %v8922_v44 = vpop.f32.mrf.mxu1 }
 0x407   : > { %v3992_v39 = vmin.f32 %v3957_v53, %v3978_v59  ;;  %v4013_v13 = vmax.f32 %v3985_v32, %v3999_v34  ;;  %v4670_v29 = vmin.f32 %v4635_v48, %v3186_v0  ;;  %v4677_v8 = vmax.f32 %v4649_v5, %v4663_v40 }
 0x408   : > { %v4020_v26 = vmin.f32 %v3985_v32, %v3999_v34  ;;  %v4034_v57 = vmax.f32 %v4006_v58, %v3061_v38  ;;  %v4041_v41 = vmin.f32 %v4006_v58, %v3061_v38  ;;  %v4697_v50 = vmax.f32 %v4669_v55, %v3192_v42 }
 0x409   : > { %v3082_v16 = vadd.f32 %v8828_v46, %v10393_v2  ;;  %v4684_v20 = vmin.f32 %v4649_v5, %v4663_v40  ;;  %v4027_v28 = vmin.f32 %v3992_v39, %v4013_v13  ;;  %v3193_v62 = vadd.f32 %v10392_v31, %v8836_v37  ;;  %v10395_v37 = vld [vmem:[#allocation48_spill] sm:$0xff]  ;;  %v8926_v2 = vpop.f32.mrf.mxu0 }
 0x40a   : > { %v3068_v11 = vadd.f32 %v10394_v43, %v8838_v14  ;;  %v4048_v48 = vmax.f32 %v4020_v26, %v4034_v57  ;;  %v4055_v1 = vmin.f32 %v4020_v26, %v4034_v57  ;;  %v4704_v61 = vmin.f32 %v4669_v55, %v3192_v42 }
 0x40b   : > { %v4711_v0 = vmax.f32 %v4683_v56, %v4697_v50  ;;  %v4691_v53 = vmin.f32 %v4656_v30, %v4677_v8  ;;  %v4698_v59 = vmax.f32 %v4670_v29, %v3193_v62  ;;  %v4718_v5 = vmin.f32 %v4683_v56, %v4697_v50 }
 0x40c   : > { %v4069_v32 = vmax.f32 %v4041_v41, %v3068_v11  ;;  %v4076_v34 = vmin.f32 %v4041_v41, %v3068_v11  ;;  %v4062_v46 = vmin.f32 %v4027_v28, %v4048_v48  ;;  %v4705_v40 = vmin.f32 %v4670_v29, %v3193_v62  ;;  %v8932_v29 = vpop.f32.mrf.mxu1  ;;  %v8936_v48 = vpop.f32.mrf.mxu0 }
 0x40d   : > { %v3199_v38 = vadd.f32 %v10395_v37, %v8842_v36  ;;  %v4725_v39 = vmin.f32 %v4690_v15, %v4711_v0  ;;  %v4712_v14 = vmax.f32 %v4684_v20, %v4698_v59  ;;  %v3103_v8 = vadd.f32 %v8848_v12, %v10351_v21 }
 0x40e   : > { %v4083_v58 = vmax.f32 %v4055_v1, %v4069_v32  ;;  %v4090_v13 = vmin.f32 %v4055_v1, %v4069_v32  ;;  %v4104_v55 = vmax.f32 %v4076_v34, %v3075_v22  ;;  %v4111_v42 = vmin.f32 %v4076_v34, %v3075_v22  ;;  %v8938_v32 = vpop.f32.mrf.mxu1 }
 0x40f   : > { %v4732_v30 = vmax.f32 %v4704_v61, %v3199_v38  ;;  %v4719_v26 = vmin.f32 %v4684_v20, %v4698_v59  ;;  %v4739_v41 = vmin.f32 %v4704_v61, %v3199_v38  ;;  %v3200_v56 = vadd.f32 %v10395_v37, %v8852_v18 }
 0x410   : > { %v4097_v57 = vmin.f32 %v4062_v46, %v4083_v58  ;;  %v4118_v36 = vmax.f32 %v4090_v13, %v4104_v55  ;;  %v4125_v15 = vmin.f32 %v4090_v13, %v4104_v55  ;;  %v4139_v50 = vmax.f32 %v4111_v42, %v3082_v16 }
 0x411   : > { %v4746_v28 = vmax.f32 %v4718_v5, %v4732_v30  ;;  %v4726_v62 = vmin.f32 %v4691_v53, %v4712_v14  ;;  %v4733_v43 = vmax.f32 %v4705_v40, %v3200_v56  ;;  %v3089_v22 = vadd.f32 %v10346_v27, %v8854_v45  ;;  %v10396_v53 = vld [vmem:[#allocation49_spill] sm:$0xff] }
 0x412   : > { %v4146_v11 = vmin.f32 %v4111_v42, %v3082_v16  ;;  %v4132_v21 = vmin.f32 %v4097_v57, %v4118_v36  ;;  %v4153_v12 = vmax.f32 %v4125_v15, %v4139_v50  ;;  %v4753_v20 = vmin.f32 %v4718_v5, %v4732_v30  ;;  %v10397_v5 = vld [vmem:[#allocation33_spill] sm:$0xff] }
 0x413   : > { %v4160_v1 = vmin.f32 %v4125_v15, %v4139_v50  ;;  %v4740_v61 = vmin.f32 %v4705_v40, %v3200_v56  ;;  %v4747_v18 = vmax.f32 %v4719_v26, %v4733_v43  ;;  %v4760_v34 = vmin.f32 %v4725_v39, %v4746_v28  ;;  %v8946_v40 = vpop.f32.mrf.mxu0  ;;  %v10398_v56 = vld [vmem:[#allocation50_spill] sm:$0xff] }
 0x414   : > { %v4174_v0 = vmax.f32 %v4146_v11, %v3089_v22  ;;  %v4181_v59 = vmin.f32 %v4146_v11, %v3089_v22  ;;  %v4167_v46 = vmin.f32 %v4132_v21, %v4153_v12  ;;  %v3206_v38 = vadd.f32 %v10396_v53, %v8862_v60 }
 0x415   : > { %v3207_v27 = vadd.f32 %v10396_v53, %v8870_v25  ;;  %v4754_v45 = vmin.f32 %v4719_v26, %v4733_v43  ;;  %v3096_v58 = vadd.f32 %v10397_v5, %v8872_v17  ;;  %v4761_v13 = vmin.f32 %v4726_v62, %v4747_v18  ;;  %v8952_v26 = vpop.f32.mrf.mxu1  ;;  %v8954_v11 = vpop.f32.mrf.mxu0  ;;  %v10400_v5 = vld [vmem:[#allocation38_spill] sm:$0xff] }
 0x416   : > { %v4188_v16 = vmax.f32 %v4160_v1, %v4174_v0  ;;  %v4195_v14 = vmin.f32 %v4160_v1, %v4174_v0  ;;  %v4767_v55 = vmax.f32 %v4739_v41, %v3206_v38  ;;  %v3110_v39 = vadd.f32 %v8868_v4, %v10353_v19 }
 0x417   : > { %v4768_v42 = vmax.f32 %v4740_v61, %v3207_v27  ;;  %v4209_v57 = vmax.f32 %v4181_v59, %v3096_v58  ;;  %v4216_v60 = vmin.f32 %v4181_v59, %v3096_v58  ;;  %v3213_v25 = vadd.f32 %v10398_v56, %v8878_v6  ;;  %v8956_v59 = vpop.f32.mrf.mxu1 }
 0x418   : > { %v4202_v30 = vmin.f32 %v4167_v46, %v4188_v16  ;;  %v4774_v36 = vmin.f32 %v4739_v41, %v3206_v38  ;;  %v4781_v15 = vmax.f32 %v4753_v20, %v4767_v55  ;;  %v4775_v50 = vmin.f32 %v4740_v61, %v3207_v27  ;;  %v10399_v16 = vld [vmem:[#allocation36_spill] sm:$0xff] }
 0x419   : > { %v4782_v17 = vmax.f32 %v4754_v45, %v4768_v42  ;;  %v4223_v28 = vmax.f32 %v4195_v14, %v4209_v57  ;;  %v4230_v43 = vmin.f32 %v4195_v14, %v4209_v57  ;;  %v4244_v62 = vmax.f32 %v4216_v60, %v3103_v8 }
 0x41a   : > { %v4251_v22 = vmin.f32 %v4216_v60, %v3103_v8  ;;  %v4788_v19 = vmin.f32 %v4753_v20, %v4767_v55  ;;  %v4795_v4 = vmin.f32 %v4760_v34, %v4781_v15  ;;  %v4789_v21 = vmin.f32 %v4754_v45, %v4768_v42  ;;  %v8962_v45 = vpop.f32.mrf.mxu0  ;;  %v10401_v60 = vld [vmem:[#allocation51_spill] sm:$0xff] }
 0x41b   : > { %v4802_v12 = vmax.f32 %v4774_v36, %v3213_v25  ;;  %v4237_v1 = vmin.f32 %v4202_v30, %v4223_v28  ;;  %v4258_v18 = vmax.f32 %v4230_v43, %v4244_v62  ;;  %v4265_v0 = vmin.f32 %v4230_v43, %v4244_v62 }
 0x41c   : > { %v4279_v6 = vmax.f32 %v4251_v22, %v3110_v39  ;;  %v4796_v41 = vmin.f32 %v4761_v13, %v4782_v17  ;;  %v4809_v46 = vmin.f32 %v4774_v36, %v3213_v25  ;;  %v3214_v38 = vadd.f32 %v10398_v56, %v8890_v23  ;;  %v8968_v25 = vpop.f32.mrf.mxu1 }
 0x41d   : > { %v4816_v61 = vmax.f32 %v4788_v19, %v4802_v12  ;;  %v4272_v27 = vmin.f32 %v4237_v1, %v4258_v18  ;;  %v3117_v20 = vadd.f32 %v10399_v16, %v8896_v3  ;;  %v4286_v34 = vmin.f32 %v4251_v22, %v3110_v39  ;;  %v8974_v22 = vpop.f32.mrf.mxu0 }
 0x41e   : > { %v4293_v8 = vmax.f32 %v4265_v0, %v4279_v6  ;;  %v4823_v14 = vmin.f32 %v4788_v19, %v4802_v12  ;;  %v3131_v58 = vadd.f32 %v8884_v24, %v10400_v5  ;;  %v4803_v55 = vmax.f32 %v4775_v50, %v3214_v38  ;;  %v10402_v24 = vld [vmem:[#allocation39_spill] sm:$0xff] }
 0x41f   : > { %v4300_v42 = vmin.f32 %v4265_v0, %v4279_v6  ;;  %v4830_v13 = vmin.f32 %v4795_v4, %v4816_v61  ;;  %v4810_v30 = vmin.f32 %v4775_v50, %v3214_v38  ;;  %v4314_v57 = vmax.f32 %v4286_v34, %v3117_v20  ;;  %v10404_v6 = vld [vmem:[#allocation53_spill] sm:$0xff] }
 0x420   : > { %v3220_v23 = vadd.f32 %v10401_v60, %v8898_v10  ;;  %v4817_v36 = vmax.f32 %v4789_v21, %v4803_v55  ;;  %v4307_v15 = vmin.f32 %v4272_v27, %v4293_v8  ;;  %v4321_v3 = vmin.f32 %v4286_v34, %v3117_v20  ;;  %v10403_v10 = vld [vmem:[#allocation37_spill] sm:$0xff]  ;;  %v8982_v34 = vpop.f32.mrf.mxu0 }
 0x421   : > { %v3221_v39 = vadd.f32 %v10401_v60, %v8908_v47  ;;  %v4824_v17 = vmin.f32 %v4789_v21, %v4803_v55  ;;  %v4328_v28 = vmax.f32 %v4300_v42, %v4314_v57  ;;  %v3138_v62 = vadd.f32 %v8904_v63, %v10402_v24  ;;  %v8980_v21 = vpop.f32.mrf.mxu1 }
 0x422   : > { %v4837_v43 = vmax.f32 %v4809_v46, %v3220_v23  ;;  %v4335_v50 = vmin.f32 %v4300_v42, %v4314_v57  ;;  %v4844_v19 = vmin.f32 %v4809_v46, %v3220_v23  ;;  %v3124_v12 = vadd.f32 %v10403_v10, %v8912_v51 }
 0x423   : > { %v4838_v4 = vmax.f32 %v4810_v30, %v3221_v39  ;;  %v4831_v1 = vmin.f32 %v4796_v41, %v4817_v36  ;;  %v4845_v0 = vmin.f32 %v4810_v30, %v3221_v39  ;;  %v3227_v47 = vadd.f32 %v10404_v6, %v8920_v9  ;;  %v8988_v23 = vpop.f32.mrf.mxu1 }
 0x424   : > { %v4851_v18 = vmax.f32 %v4823_v14, %v4837_v43  ;;  %v4342_v61 = vmin.f32 %v4307_v15, %v4328_v28  ;;  %v4349_v27 = vmax.f32 %v4321_v3, %v3124_v12  ;;  %v4356_v63 = vmin.f32 %v4321_v3, %v3124_v12  ;;  %v10405_v28 = vld [vmem:[#allocation40_spill] sm:$0xff] }
 0x425   : > { %v4852_v38 = vmax.f32 %v4824_v17, %v4838_v4  ;;  %v4858_v8 = vmin.f32 %v4823_v14, %v4837_v43  ;;  %v4859_v20 = vmin.f32 %v4824_v17, %v4838_v4  ;;  %v4872_v46 = vmax.f32 %v4844_v19, %v3227_v47 }
 0x426   : > { %v4865_v16 = vmin.f32 %v4830_v13, %v4851_v18  ;;  %v4363_v5 = vmax.f32 %v4335_v50, %v4349_v27  ;;  %v4370_v51 = vmin.f32 %v4335_v50, %v4349_v27  ;;  %v4384_v41 = vmax.f32 %v4356_v63, %v3131_v58 }
 0x427   : > { %v4879_v55 = vmin.f32 %v4844_v19, %v3227_v47  ;;  %v4391_v42 = vmin.f32 %v4356_v63, %v3131_v58  ;;  %v4886_v30 = vmax.f32 %v4858_v8, %v4872_v46  ;;  %v3159_v9 = vadd.f32 %v8922_v44, %v10377_v35  ;;  %v8992_v58 = vpop.f32.mrf.mxu0  ;;  %v10406_v44 = vld [vmem:[#allocation56_spill] sm:$0xff] }
 0x428   : > { %v3228_v57 = vadd.f32 %v10404_v6, %v8926_v2  ;;  %v4866_v14 = vmin.f32 %v4831_v1, %v4852_v38  ;;  %v4377_v13 = vmin.f32 %v4342_v61, %v4363_v5  ;;  %v4398_v36 = vmax.f32 %v4370_v51, %v4384_v41  ;;  %v8996_v1 = vpop.f32.mrf.mxu1 }
 0x429   : > { %v4405_v15 = vmin.f32 %v4370_v51, %v4384_v41  ;;  %v4419_v3 = vmax.f32 %v4391_v42, %v3138_v62  ;;  %v4893_v39 = vmin.f32 %v4858_v8, %v4872_v46  ;;  %v3145_v43 = vadd.f32 %v10405_v28, %v8932_v29  ;;  %v9004_v63 = vpop.f32.mrf.mxu0 }
 0x42a   : > { %v4873_v17 = vmax.f32 %v4845_v0, %v3228_v57  ;;  %v4412_v24 = vmin.f32 %v4377_v13, %v4398_v36  ;;  %v4900_v50 = vmin.f32 %v4865_v16, %v4886_v30  ;;  %v4426_v35 = vmin.f32 %v4391_v42, %v3138_v62  ;;  %v9006_v30 = vpop.f32.mrf.mxu1 }
 0x42b   : > { %v3234_v2 = vadd.f32 %v10406_v44, %v8936_v48  ;;  %v4433_v19 = vmax.f32 %v4405_v15, %v4419_v3  ;;  %v4880_v4 = vmin.f32 %v4845_v0, %v3228_v57  ;;  %v4440_v12 = vmin.f32 %v4405_v15, %v4419_v3  ;;  %v9010_v15 = vpop.f32.mrf.mxu0 }
 0x42c   : > { %v4887_v10 = vmax.f32 %v4859_v20, %v4873_v17  ;;  %v4454_v18 = vmax.f32 %v4426_v35, %v3145_v43  ;;  %v4461_v47 = vmin.f32 %v4426_v35, %v3145_v43  ;;  %v3166_v29 = vadd.f32 %v8938_v32, %v10380_v33  ;;  %v9016_v35 = vpop.f32.mrf.mxu1 }
 0x42d   : > { %v4907_v61 = vmax.f32 %v4879_v55, %v3234_v2  ;;  %v4894_v38 = vmin.f32 %v4859_v20, %v4873_v17  ;;  %v4447_v27 = vmin.f32 %v4412_v24, %v4433_v19  ;;  %v3235_v62 = vadd.f32 %v10406_v44, %v8946_v40  ;;  %v10407_v40 = vld [vmem:[#allocation60_spill] sm:$0xff] }
 0x42e   : > { %v3152_v48 = vadd.f32 %v10374_v52, %v8952_v26  ;;  %v4468_v0 = vmax.f32 %v4440_v12, %v4454_v18  ;;  %v4475_v8 = vmin.f32 %v4440_v12, %v4454_v18  ;;  %v4914_v16 = vmin.f32 %v4879_v55, %v3234_v2  ;;  %v9020_v18 = vpop.f32.mrf.mxu0 }
 0x42f   : > { %v4921_v46 = vmax.f32 %v4893_v39, %v4907_v61  ;;  %v4901_v5 = vmin.f32 %v4866_v14, %v4887_v10  ;;  %v4908_v51 = vmax.f32 %v4880_v4, %v3235_v62  ;;  %v4928_v32 = vmin.f32 %v4893_v39, %v4907_v61 }
 0x430   : > { %v4489_v41 = vmax.f32 %v4461_v47, %v3152_v48  ;;  %v4496_v42 = vmin.f32 %v4461_v47, %v3152_v48  ;;  %v4482_v33 = vmin.f32 %v4447_v27, %v4468_v0  ;;  %v4915_v20 = vmin.f32 %v4880_v4, %v3235_v62  ;;  %v9022_v48 = vpop.f32.mrf.mxu1 }
 0x431   : > { %v3241_v57 = vadd.f32 %v10407_v40, %v8954_v11  ;;  %v4935_v13 = vmin.f32 %v4900_v50, %v4921_v46  ;;  %v4922_v52 = vmax.f32 %v4894_v38, %v4908_v51  ;;  %v3187_v17 = vadd.f32 %v8956_v59, %v10389_v54 }
 0x432   : > { %v4503_v26 = vmax.f32 %v4475_v8, %v4489_v41  ;;  %v4510_v36 = vmin.f32 %v4475_v8, %v4489_v41  ;;  %v4524_v55 = vmax.f32 %v4496_v42, %v3159_v9  ;;  %v4531_v3 = vmin.f32 %v4496_v42, %v3159_v9  ;;  %v2349_v41 = vpop.f32.mrf.mxu0 }
 0x433   : > { %v4942_v14 = vmax.f32 %v4914_v16, %v3241_v57  ;;  %v4929_v28 = vmin.f32 %v4894_v38, %v4908_v51  ;;  %v4949_v24 = vmin.f32 %v4914_v16, %v3241_v57  ;;  %v3242_v39 = vadd.f32 %v10407_v40, %v8962_v45  ;;  %v10408_v16 = vld [vmem:[#allocation63_spill] sm:$0xff] }
 0x434   : > { %v4517_v43 = vmin.f32 %v4482_v33, %v4503_v26  ;;  %v4538_v11 = vmax.f32 %v4510_v36, %v4524_v55  ;;  %v4545_v50 = vmin.f32 %v4510_v36, %v4524_v55  ;;  %v4559_v2 = vmax.f32 %v4531_v3, %v3166_v29 }
 0x435   : > { %v4956_v19 = vmax.f32 %v4928_v32, %v4942_v14  ;;  %v4936_v4 = vmin.f32 %v4901_v5, %v4922_v52  ;;  %v4943_v10 = vmax.f32 %v4915_v20, %v3242_v39  ;;  %v3173_v9 = vadd.f32 %v10383_v7, %v8968_v25 }
 0x436   : > { %v4566_v12 = vmin.f32 %v4531_v3, %v3166_v29  ;;  %v4552_v54 = vmin.f32 %v4517_v43, %v4538_v11  ;;  %v4573_v59 = vmax.f32 %v4545_v50, %v4559_v2  ;;  %v4963_v47 = vmin.f32 %v4928_v32, %v4942_v14 }
 0x437   : > { %v4580_v61 = vmin.f32 %v4545_v50, %v4559_v2  ;;  %v4950_v38 = vmin.f32 %v4915_v20, %v3242_v39  ;;  %v4957_v45 = vmax.f32 %v4929_v28, %v4943_v10  ;;  %v4970_v0 = vmin.f32 %v4935_v13, %v4956_v19  ;;  %v2351_v39 = vpop.f32.mrf.mxu0 }
 0x438   : > { %v4594_v27 = vmax.f32 %v4566_v12, %v3173_v9  ;;  %v4601_v62 = vmin.f32 %v4566_v12, %v3173_v9  ;;  %v4587_v8 = vmin.f32 %v4552_v54, %v4573_v59  ;;  %v3248_v46 = vadd.f32 %v10408_v16, %v8974_v22  ;;  %v10409_v22 = vld [vmem:[#allocation66_spill] sm:$0xff] }
 0x439   : > { %v3249_v7 = vadd.f32 %v10408_v16, %v8982_v34  ;;  %v4964_v25 = vmin.f32 %v4929_v28, %v4943_v10  ;;  %v3180_v51 = vadd.f32 %v10386_v49, %v8988_v23  ;;  %v4971_v42 = vmin.f32 %v4936_v4, %v4957_v45  ;;  %v9034_v34 = vpop.f32.mrf.mxu1 }
 0x43a   : > { %v4608_v29 = vmax.f32 %v4580_v61, %v4594_v27  ;;  %v4615_v5 = vmin.f32 %v4580_v61, %v4594_v27  ;;  %v4977_v33 = vmax.f32 %v4949_v24, %v3248_v46  ;;  %v3194_v32 = vadd.f32 %v8980_v21, %v10392_v31 }
 0x43b   : > { %v4978_v20 = vmax.f32 %v4950_v38, %v3249_v7  ;;  %v4629_v13 = vmax.f32 %v4601_v62, %v3180_v51  ;;  %v4636_v52 = vmin.f32 %v4601_v62, %v3180_v51  ;;  %v3255_v26 = vadd.f32 %v10409_v22, %v8992_v58  ;;  %v2588_v58 = vpop.f32.mrf.mxu1 }
 0x43c   : > { %v4622_v57 = vmin.f32 %v4587_v8, %v4608_v29  ;;  %v4984_v36 = vmin.f32 %v4949_v24, %v3248_v46  ;;  %v4991_v55 = vmax.f32 %v4963_v47, %v4977_v33  ;;  %v4985_v3 = vmin.f32 %v4950_v38, %v3249_v7  ;;  %v2353_v38 = vpop.f32.mrf.mxu0 }
 0x43d   : > { %v4992_v14 = vmax.f32 %v4964_v25, %v4978_v20  ;;  %v4643_v49 = vmax.f32 %v4615_v5, %v4629_v13  ;;  %v4650_v23 = vmin.f32 %v4615_v5, %v4629_v13  ;;  %v4664_v28 = vmax.f32 %v4636_v52, %v3187_v17 }
 0x43e   : > { %v4671_v43 = vmin.f32 %v4636_v52, %v3187_v17  ;;  %v4998_v11 = vmin.f32 %v4963_v47, %v4977_v33  ;;  %v5005_v31 = vmin.f32 %v4970_v0, %v4991_v55  ;;  %v4999_v21 = vmin.f32 %v4964_v25, %v4978_v20  ;;  %v10410_v25 = vld [vmem:[#allocation68_spill] sm:$0xff]  ;;  %v10411_v55 = vld [vmem:[#allocation71_spill] sm:$0xff] }
 0x43f   : > { %v5012_v50 = vmax.f32 %v4984_v36, %v3255_v26  ;;  %v4657_v2 = vmin.f32 %v4622_v57, %v4643_v49  ;;  %v4678_v19 = vmax.f32 %v4650_v23, %v4664_v28  ;;  %v4685_v4 = vmin.f32 %v4650_v23, %v4664_v28 }
 0x440   : > { %v4699_v10 = vmax.f32 %v4671_v43, %v3194_v32  ;;  %v5006_v9 = vmin.f32 %v4971_v42, %v4992_v14  ;;  %v5019_v12 = vmin.f32 %v4984_v36, %v3255_v26  ;;  %v3256_v54 = vadd.f32 %v10409_v22, %v9004_v63  ;;  %v6526_v63 = vpop.f32.mrf.mxu1 }
 0x441   : > { %v5026_v24 = vmax.f32 %v4998_v11, %v5012_v50  ;;  %v4692_v59 = vmin.f32 %v4657_v2, %v4678_v19  ;;  %v3201_v17 = vadd.f32 %v10395_v37, %v9006_v30  ;;  %v4706_v47 = vmin.f32 %v4671_v43, %v3194_v32 }
 0x442   : > { %v4713_v61 = vmax.f32 %v4685_v4, %v4699_v10  ;;  %v5033_v45 = vmin.f32 %v4998_v11, %v5012_v50  ;;  %v3215_v27 = vadd.f32 %v8996_v1, %v10398_v56  ;;  %v5013_v62 = vmax.f32 %v4985_v3, %v3256_v54  ;;  %v2355_v1 = vpop.f32.mrf.mxu0  ;;  %v2591_v14 = vpop.f32.mrf.mxu1 }
 0x443   : > { %v4720_v0 = vmin.f32 %v4685_v4, %v4699_v10  ;;  %v5040_v8 = vmin.f32 %v5005_v31, %v5026_v24  ;;  %v5020_v46 = vmin.f32 %v4985_v3, %v3256_v54  ;;  %v4734_v7 = vmax.f32 %v4706_v47, %v3201_v17 }
 0x444   : > { %v3262_v29 = vadd.f32 %v10410_v25, %v9010_v15  ;;  %v5027_v5 = vmax.f32 %v4999_v21, %v5013_v62  ;;  %v4727_v51 = vmin.f32 %v4692_v59, %v4713_v61  ;;  %v4741_v42 = vmin.f32 %v4706_v47, %v3201_v17  ;;  %v2359_v31 = vpop.f32.mrf.mxu0  ;;  %v6529_v10 = vpop.f32.mrf.mxu1 }
 0x445   : > { %v3263_v37 = vadd.f32 %v10410_v25, %v9020_v18  ;;  %v5034_v30 = vmin.f32 %v4999_v21, %v5013_v62  ;;  %v4748_v33 = vmax.f32 %v4720_v0, %v4734_v7  ;;  %v3222_v56 = vadd.f32 %v9016_v35, %v10401_v60 }
 0x446   : > { %v5047_v32 = vmax.f32 %v5019_v12, %v3262_v29  ;;  %v4755_v20 = vmin.f32 %v4720_v0, %v4734_v7  ;;  %v5054_v57 = vmin.f32 %v5019_v12, %v3262_v29  ;;  %v3208_v15 = vadd.f32 %v10396_v53, %v9022_v48  ;;  %v2604_v29 = vpop.f32.mrf.mxu1 }
 0x447   : > { %v5048_v13 = vmax.f32 %v5020_v46, %v3263_v37  ;;  %v5041_v52 = vmin.f32 %v5006_v9, %v5027_v5  ;;  %v5055_v36 = vmin.f32 %v5020_v46, %v3263_v37  ;;  %v3269_v3 = vadd.f32 %v10411_v55, %v2349_v41 }
 0x448   : > { %v5061_v26 = vmax.f32 %v5033_v45, %v5047_v32  ;;  %v4762_v18 = vmin.f32 %v4727_v51, %v4748_v33  ;;  %v4769_v23 = vmax.f32 %v4741_v42, %v3208_v15  ;;  %v4776_v28 = vmin.f32 %v4741_v42, %v3208_v15 }
 0x449   : > { %v5062_v49 = vmax.f32 %v5034_v30, %v5048_v13  ;;  %v5068_v43 = vmin.f32 %v5033_v45, %v5047_v32  ;;  %v5069_v60 = vmin.f32 %v5034_v30, %v5048_v13  ;;  %v5082_v35 = vmax.f32 %v5054_v57, %v3269_v3  ;;  %v2361_v45 = vpop.f32.mrf.mxu0 }
 0x44a   : > { %v5075_v11 = vmin.f32 %v5040_v8, %v5061_v26  ;;  %v4783_v21 = vmax.f32 %v4755_v20, %v4769_v23  ;;  %v4790_v50 = vmin.f32 %v4755_v20, %v4769_v23  ;;  %v4804_v2 = vmax.f32 %v4776_v28, %v3215_v27  ;;  %v10412_v8 = vld [vmem:[#allocation76_spill] sm:$0xff] }
 0x44b   : > { %v5089_v19 = vmin.f32 %v5054_v57, %v3269_v3  ;;  %v4811_v53 = vmin.f32 %v4776_v28, %v3215_v27  ;;  %v5096_v48 = vmax.f32 %v5068_v43, %v5082_v35  ;;  %v3243_v4 = vadd.f32 %v9034_v34, %v10407_v40  ;;  %v2363_v32 = vpop.f32.mrf.mxu0 }
 0x44c   : > { %v3270_v41 = vadd.f32 %v10411_v55, %v2351_v39  ;;  %v5076_v9 = vmin.f32 %v5041_v52, %v5062_v49  ;;  %v4797_v12 = vmin.f32 %v4762_v18, %v4783_v21  ;;  %v4818_v24 = vmax.f32 %v4790_v50, %v4804_v2 }
 0x44d   : > { %v4825_v54 = vmin.f32 %v4790_v50, %v4804_v2  ;;  %v4839_v59 = vmax.f32 %v4811_v53, %v3222_v56  ;;  %v5103_v61 = vmin.f32 %v5068_v43, %v5082_v35  ;;  %v3229_v47 = vadd.f32 %v10404_v6, %v2588_v58 }
 0x44e   : > { %v5083_v17 = vmax.f32 %v5055_v36, %v3270_v41  ;;  %v4832_v62 = vmin.f32 %v4797_v12, %v4818_v24  ;;  %v5110_v0 = vmin.f32 %v5075_v11, %v5096_v48  ;;  %v4846_v27 = vmin.f32 %v4811_v53, %v3222_v56 }
 0x44f   : > { %v3276_v46 = vadd.f32 %v10412_v8, %v2353_v38  ;;  %v4853_v7 = vmax.f32 %v4825_v54, %v4839_v59  ;;  %v5090_v40 = vmin.f32 %v5055_v36, %v3270_v41  ;;  %v4860_v39 = vmin.f32 %v4825_v54, %v4839_v59  ;;  %v6530_v36 = vpop.f32.mrf.mxu1 }
 0x450   : > { %v5097_v34 = vmax.f32 %v5069_v60, %v5083_v17  ;;  %v4874_v5 = vmax.f32 %v4846_v27, %v3229_v47  ;;  %v4881_v51 = vmin.f32 %v4846_v27, %v3229_v47  ;;  %v3250_v37 = vadd.f32 %v6526_v63, %v10408_v16  ;;  %v10413_v16 = vld [vmem:[#allocation78_spill] sm:$0xff] }
 0x451   : > { %v5117_v42 = vmax.f32 %v5089_v19, %v3276_v46  ;;  %v5104_v30 = vmin.f32 %v5069_v60, %v5083_v17  ;;  %v4867_v33 = vmin.f32 %v4832_v62, %v4853_v7  ;;  %v3277_v6 = vadd.f32 %v10412_v8, %v2355_v1  ;;  %v2607_v53 = vpop.f32.mrf.mxu1 }
 0x452   : > { %v3236_v58 = vadd.f32 %v10406_v44, %v2591_v14  ;;  %v4888_v56 = vmax.f32 %v4860_v39, %v4874_v5  ;;  %v4895_v20 = vmin.f32 %v4860_v39, %v4874_v5  ;;  %v5124_v38 = vmin.f32 %v5089_v19, %v3276_v46  ;;  %v2365_v44 = vpop.f32.mrf.mxu0 }
 0x453   : > { %v5131_v57 = vmax.f32 %v5103_v61, %v5117_v42  ;;  %v5111_v13 = vmin.f32 %v5076_v9, %v5097_v34  ;;  %v5118_v15 = vmax.f32 %v5090_v40, %v3277_v6  ;;  %v5138_v18 = vmin.f32 %v5103_v61, %v5117_v42 }
 0x454   : > { %v4909_v52 = vmax.f32 %v4881_v51, %v3236_v58  ;;  %v4916_v26 = vmin.f32 %v4881_v51, %v3236_v58  ;;  %v4902_v3 = vmin.f32 %v4867_v33, %v4888_v56  ;;  %v5125_v49 = vmin.f32 %v5090_v40, %v3277_v6  ;;  %v2369_v61 = vpop.f32.mrf.mxu0  ;;  %v10414_v40 = vld [vmem:[#allocation81_spill] sm:$0xff] }
 0x455   : > { %v3283_v63 = vadd.f32 %v10413_v16, %v2359_v31  ;;  %v5145_v23 = vmin.f32 %v5110_v0, %v5131_v57  ;;  %v5132_v28 = vmax.f32 %v5104_v30, %v5118_v15  ;;  %v3271_v35 = vadd.f32 %v6529_v10, %v10411_v55 }
 0x456   : > { %v4923_v1 = vmax.f32 %v4895_v20, %v4909_v52  ;;  %v4930_v43 = vmin.f32 %v4895_v20, %v4909_v52  ;;  %v4944_v14 = vmax.f32 %v4916_v26, %v3243_v4  ;;  %v4951_v11 = vmin.f32 %v4916_v26, %v3243_v4  ;;  %v2371_v42 = vpop.f32.mrf.mxu0 }
 0x457   : > { %v5152_v60 = vmax.f32 %v5124_v38, %v3283_v63  ;;  %v5139_v21 = vmin.f32 %v5104_v30, %v5118_v15  ;;  %v5159_v2 = vmin.f32 %v5124_v38, %v3283_v63  ;;  %v3284_v19 = vadd.f32 %v10413_v16, %v2361_v45  ;;  %v6533_v45 = vpop.f32.mrf.mxu1  ;;  %v10415_v38 = vld [vmem:[#allocation85_spill] sm:$0xff] }
 0x458   : > { %v4937_v50 = vmin.f32 %v4902_v3, %v4923_v1  ;;  %v4958_v48 = vmax.f32 %v4930_v43, %v4944_v14  ;;  %v4965_v41 = vmin.f32 %v4930_v43, %v4944_v14  ;;  %v4979_v9 = vmax.f32 %v4951_v11, %v3250_v37  ;;  %v2373_v63 = vpop.f32.mrf.mxu0 }
 0x459   : > { %v5166_v31 = vmax.f32 %v5138_v18, %v5152_v60  ;;  %v5146_v12 = vmin.f32 %v5111_v13, %v5132_v28  ;;  %v5153_v24 = vmax.f32 %v5125_v49, %v3284_v19  ;;  %v3257_v54 = vadd.f32 %v10409_v22, %v2604_v29  ;;  %v2620_v13 = vpop.f32.mrf.mxu1 }
 0x45a   : > { %v4986_v59 = vmin.f32 %v4951_v11, %v3250_v37  ;;  %v4972_v4 = vmin.f32 %v4937_v50, %v4958_v48  ;;  %v4993_v17 = vmax.f32 %v4965_v41, %v4979_v9  ;;  %v5173_v47 = vmin.f32 %v5138_v18, %v5152_v60 }
 0x45b   : > { %v5000_v55 = vmin.f32 %v4965_v41, %v4979_v9  ;;  %v5160_v10 = vmin.f32 %v5125_v49, %v3284_v19  ;;  %v5167_v62 = vmax.f32 %v5139_v21, %v5153_v24  ;;  %v5180_v46 = vmin.f32 %v5145_v23, %v5166_v31  ;;  %v6534_v11 = vpop.f32.mrf.mxu1  ;;  %v2375_v41 = vpop.f32.mrf.mxu0 }
 0x45c   : > { %v5014_v0 = vmax.f32 %v4986_v59, %v3257_v54  ;;  %v5021_v27 = vmin.f32 %v4986_v59, %v3257_v54  ;;  %v5007_v7 = vmin.f32 %v4972_v4, %v4993_v17  ;;  %v3290_v34 = vadd.f32 %v10414_v40, %v2363_v32  ;;  %v10416_v4 = vld [vmem:[#allocation57_spill] sm:$0xff] }
 0x45d   : > { %v3291_v39 = vadd.f32 %v10414_v40, %v2365_v44  ;;  %v5174_v5 = vmin.f32 %v5139_v21, %v5153_v24  ;;  %v3264_v29 = vadd.f32 %v10410_v25, %v2607_v53  ;;  %v5181_v37 = vmin.f32 %v5146_v12, %v5167_v62 }
 0x45e   : > { %v5028_v51 = vmax.f32 %v5000_v55, %v5014_v0  ;;  %v5035_v22 = vmin.f32 %v5000_v55, %v5014_v0  ;;  %v5187_v30 = vmax.f32 %v5159_v2, %v3290_v34  ;;  %v3278_v33 = vadd.f32 %v6530_v36, %v10412_v8 }
 0x45f   : > { %v5188_v6 = vmax.f32 %v5160_v10, %v3291_v39  ;;  %v5049_v56 = vmax.f32 %v5021_v27, %v3264_v29  ;;  %v5056_v20 = vmin.f32 %v5021_v27, %v3264_v29  ;;  %v3297_v57 = vadd.f32 %v10415_v38, %v2369_v61 }
 0x460   : > { %v5042_v58 = vmin.f32 %v5007_v7, %v5028_v51  ;;  %v5194_v32 = vmin.f32 %v5159_v2, %v3290_v34  ;;  %v5201_v15 = vmax.f32 %v5173_v47, %v5187_v30  ;;  %v5195_v52 = vmin.f32 %v5160_v10, %v3291_v39 }
 0x461   : > { %v5202_v26 = vmax.f32 %v5174_v5, %v5188_v6  ;;  %v5063_v3 = vmax.f32 %v5035_v22, %v5049_v56  ;;  %v5070_v18 = vmin.f32 %v5035_v22, %v5049_v56  ;;  %v5084_v49 = vmax.f32 %v5056_v20, %v3271_v35 }
 0x462   : > { %v5091_v25 = vmin.f32 %v5056_v20, %v3271_v35  ;;  %v5208_v23 = vmin.f32 %v5173_v47, %v5187_v30  ;;  %v5215_v28 = vmin.f32 %v5180_v46, %v5201_v15  ;;  %v5209_v1 = vmin.f32 %v5174_v5, %v5188_v6  ;;  %v2623_v47 = vpop.f32.mrf.mxu1 }
 0x463   : > { %v5222_v8 = vmax.f32 %v5194_v32, %v3297_v57  ;;  %v5077_v36 = vmin.f32 %v5042_v58, %v5063_v3  ;;  %v5098_v43 = vmax.f32 %v5070_v18, %v5084_v49  ;;  %v5105_v44 = vmin.f32 %v5070_v18, %v5084_v49 }
 0x464   : > { %v5119_v14 = vmax.f32 %v5091_v25, %v3278_v33  ;;  %v5216_v60 = vmin.f32 %v5181_v37, %v5202_v26  ;;  %v5229_v21 = vmin.f32 %v5194_v32, %v3297_v57  ;;  %v3298_v2 = vadd.f32 %v10415_v38, %v2371_v42 }
 0x465   : > { %v5236_v50 = vmax.f32 %v5208_v23, %v5222_v8  ;;  %v5112_v19 = vmin.f32 %v5077_v36, %v5098_v43  ;;  %v3285_v48 = vadd.f32 %v10413_v16, %v2620_v13  ;;  %v5126_v35 = vmin.f32 %v5091_v25, %v3278_v33 }
 0x466   : > { %v5133_v53 = vmax.f32 %v5105_v44, %v5119_v14  ;;  %v5243_v9 = vmin.f32 %v5208_v23, %v5222_v8  ;;  %v3299_v31 = vadd.f32 %v6533_v45, %v10415_v38  ;;  %v5223_v12 = vmax.f32 %v5195_v52, %v3298_v2 }
 0x467   : > { %v5140_v24 = vmin.f32 %v5105_v44, %v5119_v14  ;;  %v5250_v54 = vmin.f32 %v5215_v28, %v5236_v50  ;;  %v5154_v61 = vmax.f32 %v5126_v35, %v3285_v48  ;;  %v3304_v17 = vadd.f32 %v10416_v4, %v2373_v63 }
 0x468   : > { %v5147_v59 = vmin.f32 %v5112_v19, %v5133_v53  ;;  %v5230_v55 = vmin.f32 %v5195_v52, %v3298_v2  ;;  %v5237_v10 = vmax.f32 %v5209_v1, %v5223_v12  ;;  %v5161_v62 = vmin.f32 %v5126_v35, %v3285_v48 }
 0x469   : > { %v3305_v0 = vadd.f32 %v10416_v4, %v2375_v41  ;;  %v5244_v27 = vmin.f32 %v5209_v1, %v5223_v12  ;;  %v5168_v16 = vmax.f32 %v5140_v24, %v5154_v61  ;;  %v5257_v46 = vmax.f32 %v5229_v21, %v3304_v17 }
 0x46a   : > { %v5264_v7 = vmin.f32 %v5229_v21, %v3304_v17  ;;  %v5175_v34 = vmin.f32 %v5140_v24, %v5154_v61  ;;  %v3292_v5 = vadd.f32 %v10414_v40, %v2623_v47  ;;  %v5251_v51 = vmin.f32 %v5216_v60, %v5237_v10 }
 0x46b   : > { %v5258_v39 = vmax.f32 %v5230_v55, %v3305_v0  ;;  %v5265_v45 = vmin.f32 %v5230_v55, %v3305_v0  ;;  %v5182_v22 = vmin.f32 %v5147_v59, %v5168_v16  ;;  %v5271_v29 = vmax.f32 %v5243_v9, %v5257_v46 }
 0x46c   : > { %v5278_v42 = vmin.f32 %v5243_v9, %v5257_v46  ;;  %5292 = vst [vmem:[#allocation4 + $0x8] sm:$0xff] %v5264_v7  ;;  %v5189_v33 = vmax.f32 %v5161_v62, %v3292_v5  ;;  %v5196_v6 = vmin.f32 %v5161_v62, %v3292_v5  ;;  %v3306_v40 = vadd.f32 %v6534_v11, %v10416_v4 }
 0x46d   : > { %v5272_v37 = vmax.f32 %v5244_v27, %v5258_v39  ;;  %v5279_v30 = vmin.f32 %v5244_v27, %v5258_v39  ;;  %5293 = vst [vmem:[#allocation4 + $0x20] sm:$0xff] %v5265_v45  ;;  %v5285_v58 = vmin.f32 %v5250_v54, %v5271_v29 }
 0x46e   : > { %5299 = vst [vmem:[#allocation5 + $0x28] sm:$0xff] %v5278_v42  ;;  %v5203_v20 = vmax.f32 %v5175_v34, %v5189_v33  ;;  %v5210_v38 = vmin.f32 %v5175_v34, %v5189_v33  ;;  %v5224_v57 = vmax.f32 %v5196_v6, %v3299_v31  ;;  %v5231_v13 = vmin.f32 %v5196_v6, %v3299_v31 }
 0x46f   : > { %v5286_v56 = vmin.f32 %v5251_v51, %v5272_v37  ;;  %5300 = vst [vmem:[#allocation5 + $0x30] sm:$0xff] %v5279_v30  ;;  %5306 = vst [vmem:[#allocation6 + $0x18] sm:$0xff] %v5285_v58 }
 0x470   : > { %v5217_v32 = vmin.f32 %v5182_v22, %v5203_v20  ;;  %v5238_v15 = vmax.f32 %v5210_v38, %v5224_v57  ;;  %v5245_v52 = vmin.f32 %v5210_v38, %v5224_v57  ;;  %v5259_v26 = vmax.f32 %v5231_v13, %v3306_v40 }
 0x471   : > { %5307 = vst [vmem:[#allocation6 + $0x10] sm:$0xff] %v5286_v56  ;;  %v5266_v3 = vmin.f32 %v5231_v13, %v3306_v40 }
 0x472   : > { %v5252_v18 = vmin.f32 %v5217_v32, %v5238_v15  ;;  %v5273_v49 = vmax.f32 %v5245_v52, %v5259_v26  ;;  %v5280_v25 = vmin.f32 %v5245_v52, %v5259_v26  ;;  %5312 = sbr.rel (%p6411_p1) target bundleno = 1353 (0x549), region = 70 }
 0x473   : > { %5294 = vst [vmem:[#allocation4 + $0x28] sm:$0xff] %v5266_v3 }
 0x474   : > { %v5287_v63 = vmin.f32 %v5252_v18, %v5273_v49  ;;  %5301 = vst [vmem:[#allocation5 + $0x10] sm:$0xff] %v5280_v25 }
 0x476   : > { %5308 = vst [vmem:[#allocation6 + $0x30] sm:$0xff] %v5287_v63 }
 0x477   : > { %v9076_v23 = vld [vmem:[#allocation4 + $0x30] sm:$0xff]  ;;  %v9078_v28 = vld [vmem:[#allocation4] sm:$0xff]  ;;  %v9080_v1 = vld [vmem:[#allocation4 + $0x18] sm:$0xff]  ;;  %v10012_v41 = vlaneseq  ;;  %v6822_v58 = vmov 1966171168  }
 0x478   : > { %v9082_v8 = vld [vmem:[#allocation4 + $0x10] sm:$0xff]  ;;  %v9084_v36 = vld [vmem:[#allocation4 + $0x8] sm:$0xff]  ;;  %v9086_v43 = vld [vmem:[#allocation4 + $0x20] sm:$0xff]  ;;  %v5868_v56 = vunpack.c.l.s4 %v6822_v58 }
 0x479   : > { %v9090_v14 = vld [vmem:[#allocation5] sm:$0xff]  ;;  %v9092_v11 = vld [vmem:[#allocation5 + $0x8] sm:$0xff]  ;;  %v9096_v21 = vld [vmem:[#allocation5 + $0x18] sm:$0xff]  ;;  %v9140_v39 = vshrl.u32 %v10012_v41, 7 }
 0x47a   : > { %v9088_v44 = vld [vmem:[#allocation4 + $0x28] sm:$0xff]  ;;  %v9094_v60 = vld [vmem:[#allocation5 + $0x20] sm:$0xff]  ;;  %v9098_v50 = vld [vmem:[#allocation5 + $0x28] sm:$0xff]  ;;  %v5338_v2 = vmin.f32 %v9076_v23, %v9090_v14  ;;  %v5346_v19 = vmin.f32 %v9078_v28, %v9092_v11  ;;  %v5362_v31 = vmin.f32 %v9082_v8, %v9096_v21 }
 0x47b   : > { %v9104_v53 = vld [vmem:[#allocation5 + $0x30] sm:$0xff]  ;;  %v9108_v35 = vld [vmem:[#allocation6] sm:$0xff]  ;;  %v5354_v9 = vmin.f32 %v9080_v1, %v9094_v60  ;;  %v9114_v12 = vld [vmem:[#allocation6 + $0x8] sm:$0xff]  ;;  %v5370_v61 = vmin.f32 %v9084_v36, %v9098_v50  ;;  %v9143_v13 = vadd.s32 8, %v9140_v39 }
 0x47c   : > { %v9106_v48 = vld [vmem:[#allocation5 + $0x10] sm:$0xff]  ;;  %v9116_v24 = vld [vmem:[#allocation6 + $0x28] sm:$0xff]  ;;  %v9118_v54 = vld [vmem:[#allocation6 + $0x20] sm:$0xff]  ;;  %v5339_v59 = vmin.f32 %v5338_v2, %v9108_v35  ;;  %v5378_v4 = vmin.f32 %v9086_v43, %v9104_v53  ;;  %v5347_v62 = vmin.f32 %v5346_v19, %v9114_v12  ;;  %v5869_v19 = vunpack.c.0.s8 %v5868_v56 }
 0x47d   : > { %v5386_v17 = vmin.f32 %v9088_v44, %v9106_v48  ;;  %v9127_v47 = vld [vmem:[#allocation6 + $0x18] sm:$0xff]  ;;  %v9129_v55 = vld [vmem:[#allocation6 + $0x10] sm:$0xff]  ;;  %v5355_v0 = vmin.f32 %v5354_v9, %v9116_v24  ;;  %v5363_v27 = vmin.f32 %v5362_v31, %v9118_v54 }
 0x47e   : > { %v9131_v10 = vld [vmem:[#allocation6 + $0x30] sm:$0xff]  ;;  %v5340_v16 = vrot.slane %v5339_v59, 4  ;;  %v5371_v46 = vmin.f32 %v5370_v61, %v9127_v47  ;;  %v5379_v7 = vmin.f32 %v5378_v4, %v9129_v55  ;;  %v5348_v45 = vrot.slane %v5347_v62, 4 }
 0x47f   : > { %v5387_v34 = vmin.f32 %v5386_v17, %v9131_v10  ;;  %v5356_v5 = vrot.slane %v5355_v0, 4  ;;  %v5364_v51 = vrot.slane %v5363_v27, 4  ;;  %v9146_v4 = vadd.s32 16, %v9140_v39 }
 0x480   : > { %v5341_v22 = vmin.f32 %v5339_v59, %v5340_v16  ;;  %v5372_v29 = vrot.slane %v5371_v46, 4  ;;  %v5380_v42 = vrot.slane %v5379_v7, 4  ;;  %v5349_v30 = vmin.f32 %v5347_v62, %v5348_v45 }
 0x481   : > { %v5388_v37 = vrot.slane %v5387_v34, 4  ;;  %v5357_v33 = vmin.f32 %v5355_v0, %v5356_v5  ;;  %v5365_v6 = vmin.f32 %v5363_v27, %v5364_v51  ;;  %v9157_v51 = vsub.s32 %v5869_v19, %v9140_v39 }
 0x482   : > { %v5342_v20 = vrot.slane %v5341_v22, 2  ;;  %v5373_v38 = vmin.f32 %v5371_v46, %v5372_v29  ;;  %v5381_v57 = vmin.f32 %v5379_v7, %v5380_v42  ;;  %v5350_v32 = vrot.slane %v5349_v30, 2 }
 0x483   : > { %v5389_v40 = vmin.f32 %v5387_v34, %v5388_v37  ;;  %v5358_v15 = vrot.slane %v5357_v33, 2  ;;  %v5366_v52 = vrot.slane %v5365_v6, 2 }
 0x484   : > { %v5343_v26 = vmin.f32 %v5341_v22, %v5342_v20  ;;  %v5374_v3 = vrot.slane %v5373_v38, 2  ;;  %v5382_v18 = vrot.slane %v5381_v57, 2  ;;  %v5351_v25 = vmin.f32 %v5349_v30, %v5350_v32 }
 0x485   : > { %v5390_v49 = vrot.slane %v5389_v40, 2  ;;  %v5359_v63 = vmin.f32 %v5357_v33, %v5358_v15  ;;  %v5367_v2 = vmin.f32 %v5365_v6, %v5366_v52 }
 0x486   : > { %v5344_v9 = vrot.slane %v5343_v26, 1  ;;  %v5375_v31 = vmin.f32 %v5373_v38, %v5374_v3  ;;  %v5383_v59 = vmin.f32 %v5381_v57, %v5382_v18  ;;  %v5352_v17 = vrot.slane %v5351_v25, 1 }
 0x487   : > { %v5391_v61 = vmin.f32 %v5389_v40, %v5390_v49  ;;  %v5360_v62 = vrot.slane %v5359_v63, 1  ;;  %v5368_v0 = vrot.slane %v5367_v2, 1 }
 0x488   : > { %v9148_v27 = vmin.f32 %v5343_v26, %v5344_v9  ;;  %v5376_v16 = vrot.slane %v5375_v31, 1  ;;  %v5384_v46 = vrot.slane %v5383_v59, 1  ;;  %v9150_v34 = vmin.f32 %v5351_v25, %v5352_v17 }
 0x489   : > { %v5392_v7 = vrot.slane %v5391_v61, 1  ;;  %v9152_v45 = vmin.f32 %v5359_v63, %v5360_v62  ;;  %v9154_v5 = vmin.f32 %v5367_v2, %v5368_v0 }
 0x48a   : > { %v9159_v22 = vmin.f32 %v5375_v31, %v5376_v16  ;;  %v9161_v29 = vmin.f32 %v5383_v59, %v5384_v46  ;;  %vm5394_vm4 = vcmp.eq.f32.partialorder %v9076_v23, %v9148_v27  ;;  %vm5395_vm5 = vcmp.eq.f32.partialorder %v9078_v28, %v9150_v34 }
 0x48b   : > { %v9163_v42 = vmin.f32 %v5391_v61, %v5392_v7  ;;  %vm5396_vm6 = vcmp.eq.f32.partialorder %v9080_v1, %v9152_v45  ;;  %vm5397_vm7 = vcmp.eq.f32.partialorder %v9082_v8, %v9154_v5  ;;  %vm5401_vm8 = vcmp.eq.f32.partialorder %v9090_v14, %v9148_v27 }
 0x48c   : > { %vm5398_vm9 = vcmp.eq.f32.partialorder %v9084_v36, %v9159_v22  ;;  %vm5399_vm10 = vcmp.eq.f32.partialorder %v9086_v43, %v9161_v29  ;;  %vm5402_vm12 = vcmp.eq.f32.partialorder %v9092_v11, %v9150_v34  ;;  %vm5408_vm2 = vcmp.eq.f32.partialorder %v9108_v35, %v9148_v27 }
 0x48d   : > { %10417 = vst [vmem:[#allocation108_spill] sm:$0xff] %v9163_v42  ;;  %vm5400_vm11 = vcmp.eq.f32.partialorder %v9088_v44, %v9163_v42  ;;  %vm5409_vm3 = vcmp.eq.f32.partialorder %v9114_v12, %v9150_v34  ;;  %vm5410_vm13 = vcmp.eq.f32.partialorder %v9116_v24, %v9152_v45  ;;  %vm5411_vm14 = vcmp.eq.f32.partialorder %v9118_v54, %v9154_v5 }
 0x48e   : > { %vm5412_vm15 = vcmp.eq.f32.partialorder %v9127_v47, %v9159_v22  ;;  %vm5413_vm0 = vcmp.eq.f32.partialorder %v9129_v55, %v9161_v29  ;;  %vm5414_vm1 = vcmp.eq.f32.partialorder %v9131_v10, %v9163_v42  ;;  %v5415_v37 = vsel %vm5394_vm4, %v9140_v39, 24 }
 0x48f   : > { %v5416_v30 = vsel %vm5395_vm5, %v9140_v39, 24  ;;  %v5417_v33 = vsel %vm5396_vm6, %v9140_v39, 24  ;;  %v5418_v6 = vsel %vm5397_vm7, %v9140_v39, 24  ;;  %v5419_v58 = vsel %vm5398_vm9, %v9140_v39, 24 }
 0x490   : > { %v5420_v56 = vsel %vm5399_vm10, %v9140_v39, 24  ;;  %v5421_v20 = vsel %vm5400_vm11, %v9140_v39, 24  ;;  %v5422_v38 = vsel %vm5401_vm8, %v9143_v13, 24  ;;  %v5423_v57 = vsel %vm5402_vm12, %v9143_v13, 24 }
 0x491   : > { %vm10418_vm4 = vcmp.eq.f32.partialorder %v9094_v60, %v9152_v45  ;;  %vm10419_vm5 = vcmp.eq.f32.partialorder %v9096_v21, %v9154_v5  ;;  %vm10420_vm6 = vcmp.eq.f32.partialorder %v9098_v50, %v9159_v22  ;;  %vm10421_vm7 = vcmp.eq.f32.partialorder %v9104_v53, %v9161_v29 }
 0x492   : > { %v5424_v40 = vsel %vm10418_vm4, %v9143_v13, 24  ;;  %v5425_v32 = vsel %vm10419_vm5, %v9143_v13, 24  ;;  %v5426_v15 = vsel %vm10420_vm6, %v9143_v13, 24  ;;  %v5427_v52 = vsel %vm10421_vm7, %v9143_v13, 24 }
 0x493   : > { %vm10422_vm8 = vcmp.eq.f32.partialorder %v9106_v48, %v9163_v42  ;;  %v5429_v3 = vsel %vm5408_vm2, %v9146_v4, 24  ;;  %v5430_v18 = vsel %vm5409_vm3, %v9146_v4, 24  ;;  %v5431_v49 = vsel %vm5410_vm13, %v9146_v4, 24 }
 0x494   : > { %v5428_v26 = vsel %vm10422_vm8, %v9143_v13, 24  ;;  %v5432_v25 = vsel %vm5411_vm14, %v9146_v4, 24  ;;  %v5433_v63 = vsel %vm5412_vm15, %v9146_v4, 24  ;;  %v5434_v2 = vsel %vm5413_vm0, %v9146_v4, 24 }
 0x495   : > { %v9291_v19 = vsel %vm5414_vm1, %v9146_v4, 24  ;;  %vm5436_vm9 = vcmp.lt.s32.totalorder %v5415_v37, %v5422_v38  ;;  %vm5449_vm10 = vcmp.lt.s32.totalorder %v5416_v30, %v5423_v57  ;;  %vm5462_vm11 = vcmp.lt.s32.totalorder %v5417_v33, %v5424_v40 }
 0x496   : > { %v5437_v9 = vsel %vm5436_vm9, %v5415_v37, %v5422_v38  ;;  %v5450_v31 = vsel %vm5449_vm10, %v5416_v30, %v5423_v57  ;;  %v5463_v59 = vsel %vm5462_vm11, %v5417_v33, %v5424_v40  ;;  %vm5475_vm12 = vcmp.lt.s32.totalorder %v5418_v6, %v5425_v32 }
 0x497   : > { %vm5438_vm13 = vcmp.lt.s32.totalorder %v5437_v9, %v5429_v3  ;;  %vm5451_vm14 = vcmp.lt.s32.totalorder %v5450_v31, %v5430_v18  ;;  %vm5464_vm15 = vcmp.lt.s32.totalorder %v5463_v59, %v5431_v49  ;;  %v5476_v61 = vsel %vm5475_vm12, %v5418_v6, %v5425_v32 }
 0x498   : > { %v5439_v17 = vsel %vm5438_vm13, %v5437_v9, %v5429_v3  ;;  %v5452_v62 = vsel %vm5451_vm14, %v5450_v31, %v5430_v18  ;;  %v5465_v0 = vsel %vm5464_vm15, %v5463_v59, %v5431_v49  ;;  %vm5477_vm0 = vcmp.lt.s32.totalorder %v5476_v61, %v5432_v25 }
 0x499   : > { %v5440_v16 = vrot.slane %v5439_v17, 4  ;;  %v5453_v46 = vrot.slane %v5452_v62, 4  ;;  %v5466_v7 = vrot.slane %v5465_v0, 4  ;;  %v5478_v41 = vsel %vm5477_vm0, %v5476_v61, %v5432_v25 }
 0x49a   : > { %v5479_v42 = vrot.slane %v5478_v41, 4  ;;  %vm5488_vm1 = vcmp.lt.s32.totalorder %v5419_v58, %v5426_v15  ;;  %vm5501_vm2 = vcmp.lt.s32.totalorder %v5420_v56, %v5427_v52  ;;  %vm5514_vm3 = vcmp.lt.s32.totalorder %v5421_v20, %v5428_v26 }
 0x49b   : > { %vm5441_vm4 = vcmp.lt.s32.totalorder %v5439_v17, %v5440_v16  ;;  %vm5454_vm5 = vcmp.lt.s32.totalorder %v5452_v62, %v5453_v46  ;;  %vm5467_vm6 = vcmp.lt.s32.totalorder %v5465_v0, %v5466_v7  ;;  %v5489_v37 = vsel %vm5488_vm1, %v5419_v58, %v5426_v15 }
 0x49c   : > { %v5442_v30 = vsel %vm5441_vm4, %v5439_v17, %v5440_v16  ;;  %v5455_v33 = vsel %vm5454_vm5, %v5452_v62, %v5453_v46  ;;  %v5468_v38 = vsel %vm5467_vm6, %v5465_v0, %v5466_v7  ;;  %vm5480_vm7 = vcmp.lt.s32.totalorder %v5478_v41, %v5479_v42 }
 0x49d   : > { %v5443_v6 = vrot.slane %v5442_v30, 2  ;;  %v5456_v57 = vrot.slane %v5455_v33, 2  ;;  %v5469_v40 = vrot.slane %v5468_v38, 2  ;;  %v5481_v32 = vsel %vm5480_vm7, %v5478_v41, %v5479_v42 }
 0x49e   : > { %v5482_v3 = vrot.slane %v5481_v32, 2  ;;  %vm5490_vm8 = vcmp.lt.s32.totalorder %v5489_v37, %v5433_v63  ;;  %v5502_v18 = vsel %vm5501_vm2, %v5420_v56, %v5427_v52  ;;  %v5515_v49 = vsel %vm5514_vm3, %v5421_v20, %v5428_v26 }
 0x49f   : > { %vm5444_vm9 = vcmp.lt.s32.totalorder %v5442_v30, %v5443_v6  ;;  %vm5457_vm10 = vcmp.lt.s32.totalorder %v5455_v33, %v5456_v57  ;;  %vm5470_vm11 = vcmp.lt.s32.totalorder %v5468_v38, %v5469_v40  ;;  %v5491_v25 = vsel %vm5490_vm8, %v5489_v37, %v5433_v63 }
 0x4a0   : > { %v5445_v9 = vsel %vm5444_vm9, %v5442_v30, %v5443_v6  ;;  %v5458_v58 = vsel %vm5457_vm10, %v5455_v33, %v5456_v57  ;;  %v5471_v15 = vsel %vm5470_vm11, %v5468_v38, %v5469_v40  ;;  %vm5483_vm12 = vcmp.lt.s32.totalorder %v5481_v32, %v5482_v3 }
 0x4a1   : > { %v5446_v31 = vrot.slane %v5445_v9, 1  ;;  %v5459_v59 = vrot.slane %v5458_v58, 1  ;;  %v5472_v61 = vrot.slane %v5471_v15, 1  ;;  %v5484_v17 = vsel %vm5483_vm12, %v5481_v32, %v5482_v3 }
 0x4a2   : > { %v5485_v62 = vrot.slane %v5484_v17, 1  ;;  %v5492_v41 = vrot.slane %v5491_v25, 4  ;;  %vm5503_vm13 = vcmp.lt.s32.totalorder %v5502_v18, %v5434_v2  ;;  %vm5516_vm14 = vcmp.lt.s32.totalorder %v5515_v49, %v9291_v19 }
 0x4a3   : > { %vm5447_vm15 = vcmp.lt.s32.totalorder %v5445_v9, %v5446_v31  ;;  %vm5460_vm0 = vcmp.lt.s32.totalorder %v5458_v58, %v5459_v59  ;;  %vm5473_vm1 = vcmp.lt.s32.totalorder %v5471_v15, %v5472_v61  ;;  %v5504_v42 = vsel %vm5503_vm13, %v5502_v18, %v5434_v2 }
 0x4a4   : > { %v9296_v56 = vsel %vm5447_vm15, %v5445_v9, %v5446_v31  ;;  %v9298_v20 = vsel %vm5460_vm0, %v5458_v58, %v5459_v59  ;;  %v9300_v52 = vsel %vm5473_vm1, %v5471_v15, %v5472_v61  ;;  %vm5486_vm2 = vcmp.lt.s32.totalorder %v5484_v17, %v5485_v62 }
 0x4a5   : > { %v9302_v26 = vsel %vm5486_vm2, %v5484_v17, %v5485_v62  ;;  %vm5493_vm3 = vcmp.lt.s32.totalorder %v5491_v25, %v5492_v41  ;;  %v5505_v63 = vrot.slane %v5504_v42, 4  ;;  %v5517_v0 = vsel %vm5516_vm14, %v5515_v49, %v9291_v19 }
 0x4a6   : > { %v5494_v16 = vsel %vm5493_vm3, %v5491_v25, %v5492_v41  ;;  %v5518_v46 = vrot.slane %v5517_v0, 4  ;;  %vm5527_vm4 = vcmp.eq.s32.totalorder %v9140_v39, %v9296_v56  ;;  %vm5528_vm5 = vcmp.eq.s32.totalorder %v9140_v39, %v9298_v20 }
 0x4a7   : > { %v5495_v2 = vrot.slane %v5494_v16, 2  ;;  %vm5506_vm6 = vcmp.lt.s32.totalorder %v5504_v42, %v5505_v63  ;;  %vm5529_vm7 = vcmp.eq.s32.totalorder %v9140_v39, %v9300_v52  ;;  %vm5530_vm8 = vcmp.eq.s32.totalorder %v9140_v39, %v9302_v26 }
 0x4a8   : > { %v5507_v7 = vsel %vm5506_vm6, %v5504_v42, %v5505_v63  ;;  %vm5519_vm9 = vcmp.lt.s32.totalorder %v5517_v0, %v5518_v46  ;;  %vm5534_vm10 = vcmp.eq.s32.totalorder %v9143_v13, %v9296_v56  ;;  %vm5535_vm11 = vcmp.eq.s32.totalorder %v9143_v13, %v9298_v20 }
 0x4a9   : > { %vm5496_vm12 = vcmp.lt.s32.totalorder %v5494_v16, %v5495_v2  ;;  %v5508_v19 = vrot.slane %v5507_v7, 2  ;;  %v5520_v37 = vsel %vm5519_vm9, %v5517_v0, %v5518_v46  ;;  %vm5536_vm13 = vcmp.eq.s32.totalorder %v9143_v13, %v9300_v52 }
 0x4aa   : > { %v5497_v30 = vsel %vm5496_vm12, %v5494_v16, %v5495_v2  ;;  %v5521_v33 = vrot.slane %v5520_v37, 2  ;;  %vm5537_vm14 = vcmp.eq.s32.totalorder %v9143_v13, %v9302_v26  ;;  %vm5541_vm15 = vcmp.eq.s32.totalorder %v9146_v4, %v9296_v56 }
 0x4ab   : > { %v5498_v38 = vrot.slane %v5497_v30, 1  ;;  %vm5509_vm0 = vcmp.lt.s32.totalorder %v5507_v7, %v5508_v19  ;;  %vm5542_vm1 = vcmp.eq.s32.totalorder %v9146_v4, %v9298_v20  ;;  %vm5543_vm2 = vcmp.eq.s32.totalorder %v9146_v4, %v9300_v52 }
 0x4ac   : > { %v5510_v6 = vsel %vm5509_vm0, %v5507_v7, %v5508_v19  ;;  %vm5522_vm3 = vcmp.lt.s32.totalorder %v5520_v37, %v5521_v33  ;;  %vm5544_vm6 = vcmp.eq.s32.totalorder %v9146_v4, %v9302_v26  ;;  %v9333_v57 = vsel %vm5527_vm4, inf, %v9076_v23 }
 0x4ad   : > { %vm5499_vm9 = vcmp.lt.s32.totalorder %v5497_v30, %v5498_v38  ;;  %v5511_v40 = vrot.slane %v5510_v6, 1  ;;  %v5523_v32 = vsel %vm5522_vm3, %v5520_v37, %v5521_v33  ;;  %v9339_v3 = vsel %vm5528_vm5, inf, %v9078_v28 }
 0x4ae   : > { %v5500_v18 = vsel %vm5499_vm9, %v5497_v30, %v5498_v38  ;;  %v5524_v49 = vrot.slane %v5523_v32, 1  ;;  %v9345_v25 = vsel %vm5529_vm7, inf, %v9080_v1  ;;  %v9351_v23 = vsel %vm5530_vm8, inf, %v9082_v8 }
 0x4af   : > { %vm5512_vm4 = vcmp.lt.s32.totalorder %v5510_v6, %v5511_v40  ;;  %vm5531_vm12 = vcmp.eq.s32.totalorder %v9140_v39, %v5500_v18  ;;  %vm5538_vm5 = vcmp.eq.s32.totalorder %v9143_v13, %v5500_v18  ;;  %v9363_v1 = vsel %vm5534_vm10, inf, %v9090_v14 }
 0x4b0   : > { %v5513_v28 = vsel %vm5512_vm4, %v5510_v6, %v5511_v40  ;;  %vm5525_vm3 = vcmp.lt.s32.totalorder %v5523_v32, %v5524_v49  ;;  %v9357_v9 = vsel %vm5531_vm12, inf, %v9084_v36  ;;  %v9381_v14 = vsel %vm5535_vm11, inf, %v9092_v11 }
 0x4b1   : > { %v5526_v8 = vsel %vm5525_vm3, %v5523_v32, %v5524_v49  ;;  %vm5532_vm7 = vcmp.eq.s32.totalorder %v9140_v39, %v5513_v28  ;;  %vm5539_vm8 = vcmp.eq.s32.totalorder %v9143_v13, %v5513_v28  ;;  %vm5546_vm9 = vcmp.eq.s32.totalorder %v9146_v4, %v5513_v28 }
 0x4b2   : > { %vm5533_vm0 = vcmp.eq.s32.totalorder %v9140_v39, %v5526_v8  ;;  %vm5540_vm4 = vcmp.eq.s32.totalorder %v9143_v13, %v5526_v8  ;;  %vm5547_vm12 = vcmp.eq.s32.totalorder %v9146_v4, %v5526_v8  ;;  %v9372_v36 = vsel %vm5532_vm7, inf, %v9086_v43 }
 0x4b3   : > { %v9375_v58 = vsel %vm5533_vm0, inf, %v9088_v44  ;;  %v9387_v15 = vsel %vm5536_vm13, inf, %v9094_v60  ;;  %v9393_v43 = vsel %vm5537_vm14, inf, %v9096_v21  ;;  %v9398_v44 = vsel %vm5538_vm5, inf, %v9098_v50 }
 0x4b4   : > { %v9401_v11 = vsel %vm5539_vm8, inf, %v9104_v53  ;;  %v9404_v31 = vsel %vm5540_vm4, inf, %v9106_v48  ;;  %v9410_v60 = vsel %vm5541_vm15, inf, %v9108_v35  ;;  %v9416_v21 = vsel %vm5542_vm1, inf, %v9114_v12 }
 0x4b5   : > { %v9422_v50 = vsel %vm5543_vm2, inf, %v9116_v24  ;;  %v9428_v53 = vsel %vm5544_vm6, inf, %v9118_v54  ;;  %vm10423_vm10 = vcmp.eq.s32.totalorder %v9146_v4, %v5500_v18  ;;  %v9438_v35 = vsel %vm5546_vm9, inf, %v9129_v55 }
 0x4b6   : > { %v9433_v48 = vsel %vm10423_vm10, inf, %v9127_v47  ;;  %v9441_v12 = vsel %vm5547_vm12, inf, %v9131_v10  ;;  %v5569_v24 = vmin.f32 %v9333_v57, %v9363_v1  ;;  %v5577_v54 = vmin.f32 %v9339_v3, %v9381_v14 }
 0x4b7   : > { %v5585_v59 = vmin.f32 %v9345_v25, %v9387_v15  ;;  %v5593_v47 = vmin.f32 %v9351_v23, %v9393_v43  ;;  %v5601_v61 = vmin.f32 %v9357_v9, %v9398_v44  ;;  %v5609_v55 = vmin.f32 %v9372_v36, %v9401_v11 }
 0x4b8   : > { %v5570_v10 = vmin.f32 %v5569_v24, %v9410_v60  ;;  %v5578_v17 = vmin.f32 %v5577_v54, %v9416_v21  ;;  %v5617_v62 = vmin.f32 %v9375_v58, %v9404_v31  ;;  %v5864_v41 = vcombine.low %v9148_v27, %v9150_v34 }
 0x4b9   : > { %v5586_v42 = vmin.f32 %v5585_v59, %v9422_v50  ;;  %v5594_v56 = vmin.f32 %v5593_v47, %v9428_v53  ;;  %v5602_v20 = vmin.f32 %v5601_v61, %v9433_v48  ;;  %v5610_v52 = vmin.f32 %v5609_v55, %v9438_v35 }
 0x4ba   : > { %v5571_v26 = vrot.slane %v5570_v10, 4  ;;  %v5579_v63 = vrot.slane %v5578_v17, 4  ;;  %v5618_v0 = vmin.f32 %v5617_v62, %v9441_v12  ;;  %v5865_v16 = vcombine.low %v9152_v45, %v9154_v5 }
 0x4bb   : > { %v5587_v46 = vrot.slane %v5586_v42, 4  ;;  %v5595_v2 = vrot.slane %v5594_v56, 4  ;;  %v5603_v7 = vrot.slane %v5602_v20, 4  ;;  %v5611_v19 = vrot.slane %v5610_v52, 4 }
 0x4bc   : > { %v5572_v27 = vmin.f32 %v5570_v10, %v5571_v26  ;;  %v5580_v34 = vmin.f32 %v5578_v17, %v5579_v63  ;;  %v5619_v37 = vrot.slane %v5618_v0, 4  ;;  %v5866_v30 = vcombine.low %v9159_v22, %v9161_v29 }
 0x4bd   : > { %v5588_v33 = vmin.f32 %v5586_v42, %v5587_v46  ;;  %v5596_v38 = vmin.f32 %v5594_v56, %v5595_v2  ;;  %v5604_v6 = vmin.f32 %v5602_v20, %v5603_v7  ;;  %v5612_v40 = vmin.f32 %v5610_v52, %v5611_v19  ;;  %v10424_v46 = vld [vmem:[#allocation108_spill] sm:$0xff] }
 0x4be   : > { %v5573_v32 = vrot.slane %v5572_v27, 2  ;;  %v5581_v18 = vrot.slane %v5580_v34, 2  ;;  %v5620_v49 = vmin.f32 %v5618_v0, %v5619_v37  ;;  %v9471_v28 = vrot.slane %v5864_v41, %v9157_v51 }
 0x4bf   : > { %v5589_v45 = vrot.slane %v5588_v33, 2  ;;  %v5597_v5 = vrot.slane %v5596_v38, 2  ;;  %v5605_v8 = vrot.slane %v5604_v6, 2  ;;  %v5613_v24 = vrot.slane %v5612_v40, 2 }
 0x4c0   : > { %v5574_v54 = vmin.f32 %v5572_v27, %v5573_v32  ;;  %v5582_v59 = vmin.f32 %v5580_v34, %v5581_v18  ;;  %v5621_v47 = vrot.slane %v5620_v49, 2  ;;  %v9474_v61 = vrot.slane %v5865_v16, %v9157_v51 }
 0x4c1   : > { %v5590_v22 = vmin.f32 %v5588_v33, %v5589_v45  ;;  %v5598_v29 = vmin.f32 %v5596_v38, %v5597_v5  ;;  %v5606_v55 = vmin.f32 %v5604_v6, %v5605_v8  ;;  %v5614_v10 = vmin.f32 %v5612_v40, %v5613_v24 }
 0x4c2   : > { %v5575_v17 = vrot.slane %v5574_v54, 1  ;;  %v5583_v62 = vrot.slane %v5582_v59, 1  ;;  %v5622_v42 = vmin.f32 %v5620_v49, %v5621_v47  ;;  %v9477_v41 = vrot.slane %v5866_v30, %v9157_v51 }
 0x4c3   : > { %v5591_v56 = vrot.slane %v5590_v22, 1  ;;  %v5599_v20 = vrot.slane %v5598_v29, 1  ;;  %v5607_v52 = vrot.slane %v5606_v55, 1  ;;  %v5615_v26 = vrot.slane %v5614_v10, 1 }
 0x4c4   : > { %v9479_v63 = vmin.f32 %v5574_v54, %v5575_v17  ;;  %v9481_v0 = vmin.f32 %v5582_v59, %v5583_v62  ;;  %v5623_v16 = vrot.slane %v5622_v42, 1 }
 0x4c5   : > { %v9485_v7 = vmin.f32 %v5590_v22, %v5591_v56  ;;  %v9487_v19 = vmin.f32 %v5598_v29, %v5599_v20  ;;  %v9489_v27 = vmin.f32 %v5606_v55, %v5607_v52  ;;  %v9491_v34 = vmin.f32 %v5614_v10, %v5615_v26 }
 0x4c6   : > { %v9493_v37 = vmin.f32 %v5622_v42, %v5623_v16  ;;  %vm5625_vm11 = vcmp.eq.f32.partialorder %v9333_v57, %v9479_v63  ;;  %vm5626_vm13 = vcmp.eq.f32.partialorder %v9339_v3, %v9481_v0  ;;  %vm5632_vm14 = vcmp.eq.f32.partialorder %v9363_v1, %v9479_v63 }
 0x4c7   : > { %10425 = vst [vmem:[#allocation108_spill] sm:$0xff] %v9485_v7  ;;  %10426 = vst [vmem:[#allocation109_spill] sm:$0xff] %v9487_v19  ;;  %vm5627_vm15 = vcmp.eq.f32.partialorder %v9345_v25, %v9485_v7  ;;  %vm5628_vm1 = vcmp.eq.f32.partialorder %v9351_v23, %v9487_v19  ;;  %vm5629_vm2 = vcmp.eq.f32.partialorder %v9357_v9, %v9489_v27  ;;  %v5646_v30 = vsel %vm5625_vm11, %v9140_v39, 24 }
 0x4c8   : > { %10427 = vst [vmem:[#allocation110_spill] sm:$0xff] %v9489_v27  ;;  %10428 = vst [vmem:[#allocation111_spill] sm:$0xff] %v9491_v34  ;;  %vm5630_vm6 = vcmp.eq.f32.partialorder %v9372_v36, %v9491_v34  ;;  %vm5631_vm5 = vcmp.eq.f32.partialorder %v9375_v58, %v9493_v37  ;;  %vm5633_vm0 = vcmp.eq.f32.partialorder %v9381_v14, %v9481_v0  ;;  %v5647_v33 = vsel %vm5626_vm13, %v9140_v39, 24 }
 0x4c9   : > { %10429 = vst [vmem:[#allocation112_spill] sm:$0xff] %v9493_v37  ;;  %vm5639_vm12 = vcmp.eq.f32.partialorder %v9410_v60, %v9479_v63  ;;  %vm5640_vm10 = vcmp.eq.f32.partialorder %v9416_v21, %v9481_v0  ;;  %vm5641_vm3 = vcmp.eq.f32.partialorder %v9422_v50, %v9485_v7  ;;  %vm5642_vm7 = vcmp.eq.f32.partialorder %v9428_v53, %v9487_v19 }
 0x4ca   : > { %vm5643_vm8 = vcmp.eq.f32.partialorder %v9433_v48, %v9489_v27  ;;  %vm5644_vm9 = vcmp.eq.f32.partialorder %v9438_v35, %v9491_v34  ;;  %vm5645_vm4 = vcmp.eq.f32.partialorder %v9441_v12, %v9493_v37  ;;  %v5648_v38 = vsel %vm5627_vm15, %v9140_v39, 24 }
 0x4cb   : > { %v5649_v6 = vsel %vm5628_vm1, %v9140_v39, 24  ;;  %v5650_v40 = vsel %vm5629_vm2, %v9140_v39, 24  ;;  %v5651_v32 = vsel %vm5630_vm6, %v9140_v39, 24  ;;  %v5652_v18 = vsel %vm5631_vm5, %v9140_v39, 24 }
 0x4cc   : > { %v5653_v49 = vsel %vm5632_vm14, %v9143_v13, 24  ;;  %v5654_v45 = vsel %vm5633_vm0, %v9143_v13, 24  ;;  %vm10430_vm11 = vcmp.eq.f32.partialorder %v9387_v15, %v9485_v7  ;;  %vm10431_vm13 = vcmp.eq.f32.partialorder %v9393_v43, %v9487_v19 }
 0x4cd   : > { %v5655_v5 = vsel %vm10430_vm11, %v9143_v13, 24  ;;  %v5656_v8 = vsel %vm10431_vm13, %v9143_v13, 24  ;;  %vm10432_vm15 = vcmp.eq.f32.partialorder %v9398_v44, %v9489_v27  ;;  %vm10433_vm14 = vcmp.eq.f32.partialorder %v9401_v11, %v9491_v34 }
 0x4ce   : > { %v5657_v24 = vsel %vm10432_vm15, %v9143_v13, 24  ;;  %v5658_v54 = vsel %vm10433_vm14, %v9143_v13, 24  ;;  %vm10434_vm1 = vcmp.eq.f32.partialorder %v9404_v31, %v9493_v37  ;;  %v5660_v47 = vsel %vm5639_vm12, %v9146_v4, 24 }
 0x4cf   : > { %v5659_v59 = vsel %vm10434_vm1, %v9143_v13, 24  ;;  %v5661_v22 = vsel %vm5640_vm10, %v9146_v4, 24  ;;  %v5662_v29 = vsel %vm5641_vm3, %v9146_v4, 24  ;;  %v5663_v55 = vsel %vm5642_vm7, %v9146_v4, 24 }
 0x4d0   : > { %v5664_v10 = vsel %vm5643_vm8, %v9146_v4, 24  ;;  %v9617_v17 = vsel %vm5644_vm9, %v9146_v4, 24  ;;  %v9623_v62 = vsel %vm5645_vm4, %v9146_v4, 24  ;;  %vm5667_vm2 = vcmp.lt.s32.totalorder %v5646_v30, %v5653_v49 }
 0x4d1   : > { %v5668_v42 = vsel %vm5667_vm2, %v5646_v30, %v5653_v49  ;;  %vm5680_vm6 = vcmp.lt.s32.totalorder %v5647_v33, %v5654_v45  ;;  %vm5693_vm5 = vcmp.lt.s32.totalorder %v5648_v38, %v5655_v5  ;;  %vm5706_vm0 = vcmp.lt.s32.totalorder %v5649_v6, %v5656_v8 }
 0x4d2   : > { %vm5669_vm3 = vcmp.lt.s32.totalorder %v5668_v42, %v5660_v47  ;;  %v5681_v56 = vsel %vm5680_vm6, %v5647_v33, %v5654_v45  ;;  %v5694_v20 = vsel %vm5693_vm5, %v5648_v38, %v5655_v5  ;;  %v5707_v52 = vsel %vm5706_vm0, %v5649_v6, %v5656_v8 }
 0x4d3   : > { %v5670_v26 = vsel %vm5669_vm3, %v5668_v42, %v5660_v47  ;;  %vm5682_vm7 = vcmp.lt.s32.totalorder %v5681_v56, %v5661_v22  ;;  %vm5695_vm8 = vcmp.lt.s32.totalorder %v5694_v20, %v5662_v29  ;;  %vm5708_vm9 = vcmp.lt.s32.totalorder %v5707_v52, %v5663_v55 }
 0x4d4   : > { %v5671_v16 = vrot.slane %v5670_v26, 4  ;;  %v5683_v2 = vsel %vm5682_vm7, %v5681_v56, %v5661_v22  ;;  %v5696_v27 = vsel %vm5695_vm8, %v5694_v20, %v5662_v29  ;;  %v5709_v34 = vsel %vm5708_vm9, %v5707_v52, %v5663_v55 }
 0x4d5   : > { %v5684_v37 = vrot.slane %v5683_v2, 4  ;;  %v5697_v7 = vrot.slane %v5696_v27, 4  ;;  %v5710_v19 = vrot.slane %v5709_v34, 4  ;;  %vm5719_vm4 = vcmp.lt.s32.totalorder %v5650_v40, %v5657_v24 }
 0x4d6   : > { %vm5672_vm12 = vcmp.lt.s32.totalorder %v5670_v26, %v5671_v16  ;;  %v5720_v30 = vsel %vm5719_vm4, %v5650_v40, %v5657_v24  ;;  %vm5732_vm10 = vcmp.lt.s32.totalorder %v5651_v32, %v5658_v54  ;;  %vm5745_vm11 = vcmp.lt.s32.totalorder %v5652_v18, %v5659_v59 }
 0x4d7   : > { %v5673_v49 = vsel %vm5672_vm12, %v5670_v26, %v5671_v16  ;;  %vm5685_vm13 = vcmp.lt.s32.totalorder %v5683_v2, %v5684_v37  ;;  %vm5698_vm15 = vcmp.lt.s32.totalorder %v5696_v27, %v5697_v7  ;;  %vm5711_vm14 = vcmp.lt.s32.totalorder %v5709_v34, %v5710_v19 }
 0x4d8   : > { %v5674_v33 = vrot.slane %v5673_v49, 2  ;;  %v5686_v38 = vsel %vm5685_vm13, %v5683_v2, %v5684_v37  ;;  %v5699_v6 = vsel %vm5698_vm15, %v5696_v27, %v5697_v7  ;;  %v5712_v45 = vsel %vm5711_vm14, %v5709_v34, %v5710_v19 }
 0x4d9   : > { %v5687_v5 = vrot.slane %v5686_v38, 2  ;;  %v5700_v8 = vrot.slane %v5699_v6, 2  ;;  %v5713_v47 = vrot.slane %v5712_v45, 2  ;;  %vm5721_vm1 = vcmp.lt.s32.totalorder %v5720_v30, %v5664_v10 }
 0x4da   : > { %vm5675_vm2 = vcmp.lt.s32.totalorder %v5673_v49, %v5674_v33  ;;  %v5722_v22 = vsel %vm5721_vm1, %v5720_v30, %v5664_v10  ;;  %v5733_v29 = vsel %vm5732_vm10, %v5651_v32, %v5658_v54  ;;  %v5746_v40 = vsel %vm5745_vm11, %v5652_v18, %v5659_v59 }
 0x4db   : > { %v5676_v24 = vsel %vm5675_vm2, %v5673_v49, %v5674_v33  ;;  %vm5688_vm6 = vcmp.lt.s32.totalorder %v5686_v38, %v5687_v5  ;;  %vm5701_vm5 = vcmp.lt.s32.totalorder %v5699_v6, %v5700_v8  ;;  %vm5714_vm0 = vcmp.lt.s32.totalorder %v5712_v45, %v5713_v47 }
 0x4dc   : > { %v5677_v55 = vrot.slane %v5676_v24, 1  ;;  %v5689_v42 = vsel %vm5688_vm6, %v5686_v38, %v5687_v5  ;;  %v5702_v56 = vsel %vm5701_vm5, %v5699_v6, %v5700_v8  ;;  %v5715_v2 = vsel %vm5714_vm0, %v5712_v45, %v5713_v47 }
 0x4dd   : > { %v5690_v7 = vrot.slane %v5689_v42, 1  ;;  %v5703_v19 = vrot.slane %v5702_v56, 1  ;;  %v5716_v27 = vrot.slane %v5715_v2, 1  ;;  %v5723_v34 = vrot.slane %v5722_v22, 4 }
 0x4de   : > { %vm5678_vm3 = vcmp.lt.s32.totalorder %v5676_v24, %v5677_v55  ;;  %vm5734_vm7 = vcmp.lt.s32.totalorder %v5733_v29, %v9617_v17  ;;  %vm5747_vm8 = vcmp.lt.s32.totalorder %v5746_v40, %v9623_v62  ;;  %v5895_v37 = vcombine.low %v9471_v28, %v9474_v61 }
 0x4df   : > { %v9631_v32 = vsel %vm5678_vm3, %v5676_v24, %v5677_v55  ;;  %vm5691_vm9 = vcmp.lt.s32.totalorder %v5689_v42, %v5690_v7  ;;  %vm5704_vm4 = vcmp.lt.s32.totalorder %v5702_v56, %v5703_v19  ;;  %vm5717_vm12 = vcmp.lt.s32.totalorder %v5715_v2, %v5716_v27 }
 0x4e0   : > { %v9633_v18 = vsel %vm5691_vm9, %v5689_v42, %v5690_v7  ;;  %v9635_v54 = vsel %vm5704_vm4, %v5702_v56, %v5703_v19  ;;  %v9637_v59 = vsel %vm5717_vm12, %v5715_v2, %v5716_v27  ;;  %vm5724_vm10 = vcmp.lt.s32.totalorder %v5722_v22, %v5723_v34 }
 0x4e1   : > { %v5725_v10 = vsel %vm5724_vm10, %v5722_v22, %v5723_v34  ;;  %v5735_v20 = vsel %vm5734_vm7, %v5733_v29, %v9617_v17  ;;  %v5748_v52 = vsel %vm5747_vm8, %v5746_v40, %v9623_v62  ;;  %vm5758_vm11 = vcmp.eq.s32.totalorder %v9140_v39, %v9631_v32 }
 0x4e2   : > { %v5726_v26 = vrot.slane %v5725_v10, 2  ;;  %v5736_v16 = vrot.slane %v5735_v20, 4  ;;  %v5749_v30 = vrot.slane %v5748_v52, 4  ;;  %vm5759_vm13 = vcmp.eq.s32.totalorder %v9140_v39, %v9633_v18 }
 0x4e3   : > { %vm5760_vm15 = vcmp.eq.s32.totalorder %v9140_v39, %v9635_v54  ;;  %vm5761_vm14 = vcmp.eq.s32.totalorder %v9140_v39, %v9637_v59  ;;  %vm5765_vm1 = vcmp.eq.s32.totalorder %v9143_v13, %v9631_v32  ;;  %vm5766_vm2 = vcmp.eq.s32.totalorder %v9143_v13, %v9633_v18 }
 0x4e4   : > { %vm5727_vm6 = vcmp.lt.s32.totalorder %v5725_v10, %v5726_v26  ;;  %vm5737_vm5 = vcmp.lt.s32.totalorder %v5735_v20, %v5736_v16  ;;  %vm5750_vm0 = vcmp.lt.s32.totalorder %v5748_v52, %v5749_v30  ;;  %vm5767_vm3 = vcmp.eq.s32.totalorder %v9143_v13, %v9635_v54 }
 0x4e5   : > { %v5728_v17 = vsel %vm5727_vm6, %v5725_v10, %v5726_v26  ;;  %v5738_v62 = vsel %vm5737_vm5, %v5735_v20, %v5736_v16  ;;  %v5751_v49 = vsel %vm5750_vm0, %v5748_v52, %v5749_v30  ;;  %vm5768_vm7 = vcmp.eq.s32.totalorder %v9143_v13, %v9637_v59 }
 0x4e6   : > { %v5729_v33 = vrot.slane %v5728_v17, 1  ;;  %v5739_v38 = vrot.slane %v5738_v62, 2  ;;  %v5752_v6 = vrot.slane %v5751_v49, 2  ;;  %vm5772_vm8 = vcmp.eq.s32.totalorder %v9146_v4, %v9631_v32 }
 0x4e7   : > { %vm5773_vm9 = vcmp.eq.s32.totalorder %v9146_v4, %v9633_v18  ;;  %vm5774_vm4 = vcmp.eq.s32.totalorder %v9146_v4, %v9635_v54  ;;  %v5779_v45 = vsel %vm5758_vm11, inf, %v9333_v57  ;;  %v5780_v5 = vsel %vm5759_vm13, inf, %v9339_v3 }
 0x4e8   : > { %vm5730_vm10 = vcmp.lt.s32.totalorder %v5728_v17, %v5729_v33  ;;  %vm5740_vm6 = vcmp.lt.s32.totalorder %v5738_v62, %v5739_v38  ;;  %vm5753_vm5 = vcmp.lt.s32.totalorder %v5751_v49, %v5752_v6  ;;  %v5781_v29 = vsel %vm5760_vm15, inf, %v9345_v25 }
 0x4e9   : > { %v5731_v8 = vsel %vm5730_vm10, %v5728_v17, %v5729_v33  ;;  %v5741_v47 = vsel %vm5740_vm6, %v5738_v62, %v5739_v38  ;;  %v5754_v22 = vsel %vm5753_vm5, %v5751_v49, %v5752_v6  ;;  %v5782_v57 = vsel %vm5761_vm14, inf, %v9351_v23 }
 0x4ea   : > { %v5742_v40 = vrot.slane %v5741_v47, 1  ;;  %v5755_v24 = vrot.slane %v5754_v22, 1  ;;  %vm5762_vm11 = vcmp.eq.s32.totalorder %v9140_v39, %v5731_v8  ;;  %vm5769_vm0 = vcmp.eq.s32.totalorder %v9143_v13, %v5731_v8 }
 0x4eb   : > { %vm5776_vm12 = vcmp.eq.s32.totalorder %v9146_v4, %v5731_v8  ;;  %v5783_v3 = vsel %vm5762_vm11, inf, %v9357_v9  ;;  %v5786_v25 = vsel %vm5765_vm1, inf, %v9363_v1  ;;  %v5787_v55 = vsel %vm5766_vm2, inf, %v9381_v14 }
 0x4ec   : > { %vm5743_vm13 = vcmp.lt.s32.totalorder %v5741_v47, %v5742_v40  ;;  %vm5756_vm15 = vcmp.lt.s32.totalorder %v5754_v22, %v5755_v24  ;;  %v5788_v42 = vsel %vm5767_vm3, inf, %v9387_v15  ;;  %v5789_v9 = vsel %vm5768_vm7, inf, %v9393_v43 }
 0x4ed   : > { %v5744_v23 = vsel %vm5743_vm13, %v5741_v47, %v5742_v40  ;;  %v5757_v56 = vsel %vm5756_vm15, %v5754_v22, %v5755_v24  ;;  %v5790_v1 = vsel %vm5769_vm0, inf, %v9398_v44  ;;  %vm10435_vm7 = vcmp.eq.s32.totalorder %v9146_v4, %v9637_v59 }
 0x4ee   : > { %vm5763_vm14 = vcmp.eq.s32.totalorder %v9140_v39, %v5744_v23  ;;  %vm5764_vm1 = vcmp.eq.s32.totalorder %v9140_v39, %v5757_v56  ;;  %vm5770_vm2 = vcmp.eq.s32.totalorder %v9143_v13, %v5744_v23  ;;  %vm5771_vm10 = vcmp.eq.s32.totalorder %v9143_v13, %v5757_v56 }
 0x4ef   : > { %vm5777_vm6 = vcmp.eq.s32.totalorder %v9146_v4, %v5744_v23  ;;  %vm5778_vm3 = vcmp.eq.s32.totalorder %v9146_v4, %v5757_v56  ;;  %v5784_v14 = vsel %vm5763_vm14, inf, %v9372_v36  ;;  %v5785_v15 = vsel %vm5764_vm1, inf, %v9375_v58  ;;  %v5856_v56 = vld [vmem:[#allocation3] sm:$0xff] }
 0x4f0   : > { %v5791_v43 = vsel %vm5770_vm2, inf, %v9401_v11  ;;  %v5792_v44 = vsel %vm5771_vm10, inf, %v9404_v31  ;;  %v5793_v39 = vsel %vm5772_vm8, inf, %v9410_v60  ;;  %v5794_v13 = vsel %vm5773_vm9, inf, %v9416_v21 }
 0x4f1   : > { %v5795_v36 = vsel %vm5774_vm4, inf, %v9422_v50  ;;  %v5796_v58 = vsel %vm10435_vm7, inf, %v9428_v53  ;;  %v5797_v11 = vsel %vm5776_vm12, inf, %v9433_v48  ;;  %v5798_v31 = vsel %vm5777_vm6, inf, %v9438_v35 }
 0x4f2   : > { %v5799_v60 = vsel %vm5778_vm3, inf, %v9441_v12  ;;  %v5800_v2 = vmin.f32 %v5779_v45, %v5786_v25  ;;  %v5808_v21 = vmin.f32 %v5780_v5, %v5787_v55  ;;  %v5816_v7 = vmin.f32 %v5781_v29, %v5788_v42 }
 0x4f3   : > { %v5824_v19 = vmin.f32 %v5782_v57, %v5789_v9  ;;  %v5832_v27 = vmin.f32 %v5783_v3, %v5790_v1  ;;  %v5840_v34 = vmin.f32 %v5784_v14, %v5791_v43  ;;  %v5848_v50 = vmin.f32 %v5785_v15, %v5792_v44 }
 0x4f4   : > { %v5801_v32 = vmin.f32 %v5800_v2, %v5793_v39  ;;  %v5809_v18 = vmin.f32 %v5808_v21, %v5794_v13  ;;  %v5817_v54 = vmin.f32 %v5816_v7, %v5795_v36  ;;  %v10436_v53 = vrot.slane %v10424_v46, %v9157_v51 }
 0x4f5   : > { %v5825_v48 = vmin.f32 %v5824_v19, %v5796_v58  ;;  %v5833_v59 = vmin.f32 %v5832_v27, %v5797_v11  ;;  %v5841_v35 = vmin.f32 %v5840_v34, %v5798_v31  ;;  %v5849_v10 = vmin.f32 %v5848_v50, %v5799_v60  ;;  %v10437_v19 = vld [vmem:[#allocation109_spill] sm:$0xff]  ;;  %v10438_v27 = vld [vmem:[#allocation108_spill] sm:$0xff]  ;;  %v10439_v50 = vld [vmem:[#allocation111_spill] sm:$0xff] }
 0x4f6   : > { %v5896_v4 = vcombine.low %v9477_v41, %v10436_v53  ;;  %v5802_v12 = vrot.slane %v5801_v32, 4  ;;  %v5810_v20 = vrot.slane %v5809_v18, 4  ;;  %v5818_v52 = vrot.slane %v5817_v54, 4 }
 0x4f7   : > { %v5903_v26 = vrot.slane %v5895_v37, %v9157_v51  ;;  %v5826_v16 = vrot.slane %v5825_v48, 4  ;;  %v5834_v30 = vrot.slane %v5833_v59, 4  ;;  %v5842_v17 = vrot.slane %v5841_v35, 4 }
 0x4f8   : > { %v5850_v62 = vrot.slane %v5849_v10, 4  ;;  %v5803_v49 = vmin.f32 %v5801_v32, %v5802_v12  ;;  %v5811_v46 = vmin.f32 %v5809_v18, %v5810_v20  ;;  %v5819_v33 = vmin.f32 %v5817_v54, %v5818_v52  ;;  %v10440_v32 = vld [vmem:[#allocation110_spill] sm:$0xff]  ;;  %v10441_v54 = vld [vmem:[#allocation112_spill] sm:$0xff] }
 0x4f9   : > { %v5910_v41 = vrot.slane %v5896_v4, %v9157_v51  ;;  %v5827_v38 = vmin.f32 %v5825_v48, %v5826_v16  ;;  %v5835_v6 = vmin.f32 %v5833_v59, %v5834_v30  ;;  %v5843_v45 = vmin.f32 %v5841_v35, %v5842_v17 }
 0x4fa   : > { %v5851_v5 = vmin.f32 %v5849_v10, %v5850_v62  ;;  %v5804_v8 = vrot.slane %v5803_v49, 2  ;;  %v5812_v47 = vrot.slane %v5811_v46, 2  ;;  %v5820_v22 = vrot.slane %v5819_v33, 2 }
 0x4fb   : > { %v5911_v29 = vcombine.low %v5903_v26, %v5910_v41  ;;  %v5828_v40 = vrot.slane %v5827_v38, 2  ;;  %v5836_v28 = vrot.slane %v5835_v6, 2  ;;  %v5844_v61 = vrot.slane %v5843_v45, 2 }
 0x4fc   : > { %v5852_v37 = vrot.slane %v5851_v5, 2  ;;  %v5805_v24 = vmin.f32 %v5803_v49, %v5804_v8  ;;  %v5813_v57 = vmin.f32 %v5811_v46, %v5812_v47  ;;  %v5821_v3 = vmin.f32 %v5819_v33, %v5820_v22 }
 0x4fd   : > { %v5829_v25 = vmin.f32 %v5827_v38, %v5828_v40  ;;  %v5837_v55 = vmin.f32 %v5835_v6, %v5836_v28  ;;  %v5845_v42 = vmin.f32 %v5843_v45, %v5844_v61  ;;  %v5913_v11 = vadd.f32 %v5911_v29, %v5856_v56 }
 0x4fe   : > { %v5853_v23 = vmin.f32 %v5851_v5, %v5852_v37  ;;  %v5806_v9 = vrot.slane %v5805_v24, 1  ;;  %v5814_v1 = vrot.slane %v5813_v57, 1  ;;  %v5822_v14 = vrot.slane %v5821_v3, 1 }
 0x4ff   : > { %v5830_v15 = vrot.slane %v5829_v25, 1  ;;  %v5838_v43 = vrot.slane %v5837_v55, 1  ;;  %v5846_v44 = vrot.slane %v5845_v42, 1  ;;  %v5929_v7 = vcombine.low %v9479_v63, %v9481_v0 }
 0x500   : > { %v5854_v39 = vrot.slane %v5853_v23, 1  ;;  %v5807_v13 = vmin.f32 %v5805_v24, %v5806_v9  ;;  %v5815_v36 = vmin.f32 %v5813_v57, %v5814_v1  ;;  %v5823_v58 = vmin.f32 %v5821_v3, %v5822_v14 }
 0x501   : > { %v5831_v31 = vmin.f32 %v5829_v25, %v5830_v15  ;;  %v5839_v60 = vmin.f32 %v5837_v55, %v5838_v43  ;;  %v5847_v2 = vmin.f32 %v5845_v42, %v5846_v44  ;;  %v5930_v34 = vcombine.low %v10438_v27, %v10437_v19 }
 0x502   : > { %v5855_v21 = vmin.f32 %v5853_v23, %v5854_v39  ;;  %v5931_v18 = vcombine.low %v10440_v32, %v10439_v50  ;;  %v5959_v53 = vrot.slane %v10441_v54, %v9157_v51  ;;  %v5994_v4 = vcombine.low %v5807_v13, %v5815_v36 }
 0x503   : > { %v5938_v48 = vrot.slane %v5929_v7, %v9157_v51  ;;  %v5995_v59 = vcombine.low %v5823_v58, %v5831_v31  ;;  %v5996_v35 = vcombine.low %v5839_v60, %v5847_v2  ;;  %v5914_v12 = vmax.f32 %v5913_v11, 0.0 }
 0x504   : > { %v6024_v10 = vrot.slane %v5855_v21, %v9157_v51  ;;  %v5945_v20 = vrot.slane %v5930_v34, %v9157_v51  ;;  %v5952_v63 = vrot.slane %v5931_v18, %v9157_v51  ;;  %v6003_v0 = vrot.slane %v5994_v4, %v9157_v51 }
 0x505   : > { %v6010_v52 = vrot.slane %v5995_v59, %v9157_v51  ;;  %v6017_v26 = vrot.slane %v5996_v35, %v9157_v51  ;;  %6734 = vrsqrt.f32 %v5914_v12  ;;  %vm5917_vm8 = vcmp.eq.f32.partialorder %v5914_v12, inf }
 0x506   : > { %v5960_v16 = vcombine.low %v5938_v48, %v5945_v20  ;;  %v5961_v30 = vcombine.low %v5952_v63, %v5959_v53  ;;  %v5920_v40 = vand.u32 2147483648, %v5914_v12  ;;  %vm5919_vm9 = vcmp.eq.f32.partialorder %v5914_v12, 0.0 }
 0x507   : > { %v6025_v17 = vcombine.low %v6003_v0, %v6010_v52  ;;  %v6026_v62 = vcombine.low %v6017_v26, %v6024_v10  ;;  %v10442_v58 = vlaneseq }
 0x508   : > { %v5968_v49 = vrot.slane %v5960_v16, %v9157_v51  ;;  %v5975_v46 = vrot.slane %v5961_v30, %v9157_v51 }
 0x509   : > { %v6033_v33 = vrot.slane %v6025_v17, %v9157_v51  ;;  %v6040_v41 = vrot.slane %v6026_v62, %v9157_v51  ;;  %vm6064_vm0 = vcmp.lt.s32.totalorder %v10442_v58, 896 }
 0x50a   : > { %v5976_v38 = vcombine.low %v5968_v49, %v5975_v46 }
 0x50b   : > { %v6041_v6 = vcombine.low %v6033_v33, %v6040_v41 }
 0x50c   : > { %v5978_v45 = vadd.f32 %v5976_v38, %v5856_v56 }
 0x50d   : > { %v6043_v5 = vadd.f32 %v6041_v6, %v5856_v56 }
 0x50e   : > { %v5979_v8 = vmax.f32 %v5978_v45, 0.0 }
 0x50f   : > { %v6044_v47 = vmax.f32 %v6043_v5, 0.0 }
 0x510   : > { %6736 = vrsqrt.f32 %v5979_v8  ;;  %vm5982_vm4 = vcmp.eq.f32.partialorder %v5979_v8, inf  ;;  %v5985_v37 = vand.u32 2147483648, %v5979_v8  ;;  %vm5984_vm12 = vcmp.eq.f32.partialorder %v5979_v8, 0.0 }
 0x511   : > { %6738 = vrsqrt.f32 %v6044_v47  ;;  %vm6047_vm5 = vcmp.eq.f32.partialorder %v6044_v47, inf  ;;  %v6050_v51 = vand.u32 2147483648, %v6044_v47  ;;  %vm6049_vm11 = vcmp.eq.f32.partialorder %v6044_v47, 0.0 }
 0x512   : > { %v6735_v22 = vpop.eup %6734 }
 0x513   : > { %v5916_v29 = vmul.f32 %v6735_v22, %v5914_v12 }
 0x515   : > { %v5918_v28 = vsel %vm5917_vm8, %v5914_v12, %v5916_v29 }
 0x516   : > { %v5921_v3 = vsel %vm5919_vm9, %v5920_v40, %v5918_v28 }
 0x51d   : > { %v6737_v61 = vpop.eup %6736 }
 0x51e   : > { %v6739_v24 = vpop.eup %6738  ;;  %v5981_v57 = vmul.f32 %v6737_v61, %v5979_v8 }
 0x51f   : > { %v6046_v25 = vmul.f32 %v6739_v24, %v6044_v47 }
 0x520   : > { %v5983_v55 = vsel %vm5982_vm4, %v5979_v8, %v5981_v57 }
 0x521   : > { %v5986_v42 = vsel %vm5984_vm12, %v5985_v37, %v5983_v55  ;;  %v6048_v23 = vsel %vm6047_vm5, %v6044_v47, %v6046_v25 }
 0x522   : > { %v6051_v56 = vsel %vm6049_vm11, %v6050_v51, %v6048_v23  ;;  %v6052_v9 = vsub.f32 %v5921_v3, %v5986_v42 }
 0x523   : > { %v6056_v1 = vsub.f32 %v5921_v3, %v6051_v56 }
 0x524   : > { %v6053_v14 = vmul.f32 1.442695, %v6052_v9 }
 0x525   : > { %v6057_v15 = vmul.f32 1.442695, %v6056_v1 }
 0x526   : > { %6740 = vpow2.f32 %v6053_v14 }
 0x527   : > { %6742 = vpow2.f32 %v6057_v15 }
 0x533   : > { %v6741_v43 = vpop.eup %6740 }
 0x534   : > { %v6743_v44 = vpop.eup %6742  ;;  %v6055_v39 = vadd.f32 1.0, %v6741_v43 }
 0x536   : > { %v6059_v13 = vadd.f32 %v6743_v44, %v6055_v39 }
 0x538   : > { %6744 = vrcp.f32 %v6059_v13 }
 0x545   : > { %v6745_v36 = vpop.eup %6744 }
 0x546   : > { %v6061_v11 = vmul.f32 %v6745_v36, %v5921_v3 }
 0x548   : > { %6066 = vst.msk [vmem:[%s341_s29] sm:$0x7f] %vm6064_vm0, %v6061_v11 }
 0x549 PF: > { %s14_s23 = sadd.s32 1, %s6816_s23   ;;  %s10443_s15 = smov %s6788_s16 }
 0x54a   : > { %p11_p2 = scmp.ge.s32.totalorder %s14_s23, 18   ;;  %s10444_s16 = smov %s6913_s5 }
 0x54b   : > { %s10445_s17 = smov %s6804_s20  ;;  %s10446_s18 = smov %s6808_s21 }
 0x54c   : > { %s10447_s19 = smov %s6812_s22  ;;  %s10448_s20 = smov %s10452_s24 }
 0x54d   : > { %s10449_s21 = smov %s10456_s25  ;;  %s10450_s22 = smov %s10460_s26 }
 0x54e   :  { %13 = sbr.rel (!%p11_p2) target bundleno = 7 (0x7), region = 117 }

</bundles_post_ra>
